<compile_context>
chip_gen: v6e
topology: v6e:2x2x1
jax: 0.10.0
libtpu: 0.0.40
codegen_flags: <defaults>
</compile_context>

<pallas_src>
import functools

import numpy as np

import jax
import jax.numpy as jnp
from jax.experimental import pallas as pl
from jax.experimental.pallas import tpu as pltpu

EPS = 1e-5
CP = 128          # lane-padded channel width for all activations / weights
K_STEM = 256      # padded im2col contraction dim for the 7x7 stem (3*49=147)
NUM_CLASSES = 10


# ------------------------------ kernel helpers ------------------------------

def _mm(x, w):
    """MXU matmul: bf16 operands, f32 accumulation."""
    return jnp.dot(x.astype(jnp.bfloat16), w.astype(jnp.bfloat16),
                   preferred_element_type=jnp.float32)


def _bn_relu(y, gamma, beta):
    """Training-mode BatchNorm over rows (biased var) + ReLU, all f32.

    Padded channel columns have gamma = beta = 0 and y = 0, so they map to
    exactly 0 and never pollute real channels.
    """
    mu = jnp.mean(y, axis=0, keepdims=True)
    var = jnp.mean(jnp.square(y - mu), axis=0, keepdims=True)
    scale = gamma * jax.lax.rsqrt(var + EPS)          # EUP rsqrt (free slot)
    shift = beta - mu * scale
    return jnp.maximum(y * scale + shift, 0.0)


# ------------------------------ Pallas kernels -------------------------------

def _stem_kernel(x_ref, w_ref, g_ref, b_ref, o_ref):
    """K1: fused im2col-matmul + BatchNorm + ReLU; bf16 output (one HBM write)."""
    y = _bn_relu(_mm(x_ref[...], w_ref[...]), g_ref[...], b_ref[...])
    o_ref[...] = y.astype(o_ref.dtype)


def _body_kernel(xq_ref, cw_ref, cg_ref, cb_ref, p3_ref, p4_ref, pg_ref,
                 fcw_ref, fcb_ref, fcg_ref, fcbt_ref, clsw_ref, clsb_ref,
                 o_ref, x2_ref, *, n, h2, w2):
    """K2: maxpool + all 1x1 conv/BN/ReLU units + avgpools + GAP + head.

    xq_ref is the parity-split stem activation:
        xq[2*ph + pw, n, i, j, :] = stem_padded[n, 2*i + ph, 2*j + pw, :]
    (zero spatial padding; post-ReLU activations are >= 0, so 0-padding is
    equivalent to the -inf padding of nn.MaxPool2d.)
    """
    # --- maxpool 3x3, stride 2, padding 1 ------------------------------------
    # tap (di, dj) of output (oh, ow) = stem_padded[:, 2*oh + di, 2*ow + dj]
    taps = [xq_ref[2 * (di % 2) + (dj % 2), :,
                   di // 2:di // 2 + h2,
                   dj // 2:dj // 2 + w2, :].astype(jnp.float32)
            for di in range(3) for dj in range(3)]
    pooled = functools.reduce(jnp.maximum, taps)          # (n, h2, w2, CP) f32

    # Flatten to the (M, C) slab via the VMEM scratch (robust: only static,
    # tile-aligned (w2, CP) stores; no minor-dim reshapes inside the kernel).
    for b in range(n):
        for i in range(h2):
            r = (b * h2 + i) * w2
            x2_ref[r:r + w2, :] = pooled[b, i]
    x = x2_ref[...]                                       # (n*h2*w2, CP) f32

    def unit(x, k):
        """1x1 conv + BN + ReLU (Conv1x1 / block unit k)."""
        return _bn_relu(_mm(x, cw_ref[k]), cg_ref[k], cb_ref[k])

    def pool_mm(p, x):
        """Average pooling expressed as a (rows_out, rows_in) pooling matmul."""
        return jnp.dot(p, x.astype(jnp.bfloat16),
                       preferred_element_type=jnp.float32)

    x = unit(x, 0)                          # conv2a
    x = unit(x, 1)                          # conv2b
    x = pool_mm(p3_ref[...], x)             # AvgPool2d(2, 2)
    x = unit(x, 2)                          # conv3a
    x = unit(x, 3)                          # conv3b
    x = pool_mm(p4_ref[...], x)             # AvgPool2d(2, 2)
    x = unit(x, 4)                          # conv4a
    x = unit(x, 5)                          # conv5

    v = pool_mm(pg_ref[...], x)             # global average pool -> (n, CP)
    v = _mm(v, fcw_ref[...]) + fcb_ref[...]           # fc Linear
    v = _bn_relu(v, fcg_ref[...], fcbt_ref[...])      # BatchNorm1d + ReLU
    o_ref[...] = _mm(v, clsw_ref[...]) + clsb_ref[...]   # classifier logits


# ------------------------------ call wrappers --------------------------------

def _full_spec(shape):
    zeros = (0,) * len(shape)
    return pl.BlockSpec(shape, lambda *_: zeros)


_CPARAMS = pltpu.CompilerParams(dimension_semantics=("arbitrary",),
                                vmem_limit_bytes=32 * 1024 * 1024)


def stem_conv_bn_relu(pat, w, gamma, beta):
    M, K = pat.shape
    C = w.shape[1]
    return pl.pallas_call(
        _stem_kernel,
        out_shape=jax.ShapeDtypeStruct((M, C), jnp.bfloat16),
        grid=(1,),
        in_specs=[_full_spec((M, K)), _full_spec((K, C)),
                  _full_spec((1, C)), _full_spec((1, C))],
        out_specs=_full_spec((M, C)),
        compiler_params=_CPARAMS,
    )(pat, w, gamma, beta)


def fused_body(xq, cw, cg, cb, p3, p4, pg,
               fcw, fcb, fcg, fcbt, clsw, clsb, *, n, h2, w2):
    m2 = n * h2 * w2
    kern = functools.partial(_body_kernel, n=n, h2=h2, w2=w2)
    return pl.pallas_call(
        kern,
        out_shape=jax.ShapeDtypeStruct((n, CP), jnp.float32),
        grid=(1,),
        in_specs=[_full_spec(xq.shape), _full_spec(cw.shape),
                  _full_spec(cg.shape), _full_spec(cb.shape),
                  _full_spec(p3.shape), _full_spec(p4.shape),
                  _full_spec(pg.shape),
                  _full_spec(fcw.shape), _full_spec(fcb.shape),
                  _full_spec(fcg.shape), _full_spec(fcbt.shape),
                  _full_spec(clsw.shape), _full_spec(clsb.shape)],
        out_specs=_full_spec((n, CP)),
        scratch_shapes=[pltpu.VMEM((m2, CP), jnp.float32)],
        compiler_params=_CPARAMS,
    )(xq, cw, cg, cb, p3, p4, pg, fcw, fcb, fcg, fcbt, clsw, clsb)


# --------------------------- parameter construction --------------------------

def init_params(key, channels=(8, 16, 24, 32), feature_dim=32,
                num_classes=NUM_CLASSES):
    keys = iter(jax.random.split(key, 16))

    def conv_w(shape):
        cout, _, kh, kw = shape
        std = (2.0 / (cout * kh * kw)) ** 0.5        # kaiming_normal fan_out relu
        return std * jax.random.normal(next(keys), shape, jnp.float32)

    def bn(c):
        return (jnp.ones((c,), jnp.float32), jnp.zeros((c,), jnp.float32))

    c0, c1, c2, c3 = channels
    p = {}
    p["conv1_w"] = conv_w((c0, 3, 7, 7));    p["conv1_bn"] = bn(c0)
    p["conv2a_w"] = conv_w((c1, c0, 1, 1));  p["conv2a_bn"] = bn(c1)
    p["conv2b_w"] = conv_w((c1, c1, 1, 1));  p["conv2b_bn"] = bn(c1)
    p["conv3a_w"] = conv_w((c2, c1, 1, 1));  p["conv3a_bn"] = bn(c2)
    p["conv3b_w"] = conv_w((c2, c2, 1, 1));  p["conv3b_bn"] = bn(c2)
    p["conv4a_w"] = conv_w((c3, c2, 1, 1));  p["conv4a_bn"] = bn(c3)
    p["conv5_w"] = conv_w((c3, c3, 1, 1));   p["conv5_bn"] = bn(c3)
    p["fc_w"] = 0.01 * jax.random.normal(next(keys), (feature_dim, c3),
                                         jnp.float32)
    p["fc_b"] = jnp.zeros((feature_dim,), jnp.float32)
    p["fc_bn"] = bn(feature_dim)
    p["cls_w"] = 0.01 * jax.random.normal(next(keys), (num_classes, feature_dim),
                                          jnp.float32)
    p["cls_b"] = jnp.zeros((num_classes,), jnp.float32)
    return p


def _pad2(a, rows, cols):
    return jnp.pad(a, ((0, rows - a.shape[0]), (0, cols - a.shape[1])))


def _pad_row(v, n):
    return jnp.pad(v, (0, n - v.shape[0])).reshape(1, n)


def prepare_params(raw):
    """Transpose weights to (Cin, Cout) matmul layout, zero-pad all channel
    dims to CP=128 (lane-dense), cast matmul operands to bf16.  Zero padding
    keeps padded columns exactly zero through conv/BN/ReLU."""
    p = {}

    # stem: rows in tap-major order (i, j, cin) to match the im2col concat
    w = raw["conv1_w"]                                   # (c0, 3, 7, 7)
    w = jnp.transpose(w, (2, 3, 1, 0)).reshape(7 * 7 * 3, w.shape[0])
    p["conv1_w"] = _pad2(w, K_STEM, CP).astype(jnp.bfloat16)
    g, b = raw["conv1_bn"]
    p["conv1_g"] = _pad_row(g, CP)
    p["conv1_b"] = _pad_row(b, CP)

    # stacked 1x1 conv units, order: conv2a, conv2b, conv3a, conv3b, conv4a, conv5
    names = ("conv2a", "conv2b", "conv3a", "conv3b", "conv4a", "conv5")
    cws, cgs, cbs = [], [], []
    for nm in names:
        w = raw[nm + "_w"]                               # (co, ci, 1, 1)
        co, ci = w.shape[0], w.shape[1]
        cws.append(_pad2(w.reshape(co, ci).T, CP, CP).astype(jnp.bfloat16))
        g, b = raw[nm + "_bn"]
        cgs.append(_pad_row(g, CP))
        cbs.append(_pad_row(b, CP))
    p["conv_w"] = jnp.stack(cws, axis=0)                 # (6, CP, CP) bf16
    p["conv_g"] = jnp.stack(cgs, axis=0)                 # (6, 1, CP) f32
    p["conv_b"] = jnp.stack(cbs, axis=0)                 # (6, 1, CP) f32

    p["fc_w"] = _pad2(raw["fc_w"].T, CP, CP).astype(jnp.bfloat16)   # (c3, fdim)
    p["fc_b"] = _pad_row(raw["fc_b"], CP)
    g, b = raw["fc_bn"]
    p["fc_g"] = _pad_row(g, CP)
    p["fc_beta"] = _pad_row(b, CP)
    p["cls_w"] = _pad2(raw["cls_w"].T, CP, CP).astype(jnp.bfloat16) # (fdim, ncls)
    p["cls_b"] = _pad_row(raw["cls_b"], CP)
    return p


# --------------------------- pooling matrices (glue) --------------------------

def _avgpool_matrix(n, h, w):
    """(n*h/2*w/2, n*h*w) matrix performing 2x2/s2 average pooling over rows
    laid out in (n, h, w) row-major order.  Built at trace time (tiny)."""
    ho, wo = h // 2, w // 2
    P = np.zeros((n * ho * wo, n * h * w), np.float32)
    for b in range(n):
        for i in range(ho):
            for j in range(wo):
                r = (b * ho + i) * wo + j
                for di in range(2):
                    for dj in range(2):
                        P[r, (b * h + 2 * i + di) * w + 2 * j + dj] = 0.25
    return jnp.asarray(P, jnp.bfloat16)                  # 0.25 exact in bf16


def _gap_matrix(n, hw):
    """(n, n*hw) matrix performing the global average pool over rows."""
    P = np.zeros((n, n * hw), np.float32)
    for b in range(n):
        P[b, b * hw:(b + 1) * hw] = 1.0 / hw
    return jnp.asarray(P, jnp.bfloat16)                  # 1/8 exact in bf16


# ----------------------------------- forward ---------------------------------

def osnet_forward(params, x_nchw):
    """OSNet(num_classes=10, layers=[1,1,1], channels=[8,16,24,32],
    feature_dim=32, loss='softmax'), training-mode forward -> logits y."""
    x = jnp.transpose(x_nchw, (0, 2, 3, 1)).astype(jnp.float32)   # NCHW -> NHWC
    N, H, W, Cin = x.shape

    # --- K1: conv1 = ConvLayer(3, c0, 7, stride=2, padding=3) + BN + ReLU ----
    # Lightweight im2col: 49 strided slices concatenated along the channel axis
    # (tap-major column order, matching the permuted conv1_w rows).
    Ho, Wo = (H + 6 - 7) // 2 + 1, (W + 6 - 7) // 2 + 1
    xp = jnp.pad(x, ((0, 0), (3, 3), (3, 3), (0, 0)))
    cols = [xp[:, i:i + 2 * Ho:2, j:j + 2 * Wo:2, :]
            for i in range(7) for j in range(7)]
    pat = jnp.concatenate(cols, axis=-1).reshape(N * Ho * Wo, Cin * 49)
    pat = jnp.pad(pat, ((0, 0), (0, K_STEM - Cin * 49))).astype(jnp.bfloat16)
    y1 = stem_conv_bn_relu(pat, params["conv1_w"],
                           params["conv1_g"], params["conv1_b"])   # bf16

    # --- glue: zero-pad + parity-split the stem activation for the maxpool ---
    # (zero padding == -inf padding after ReLU; parity split is a 1x-traffic
    # rearrangement, no 9x window materialization)
    y1 = y1.reshape(N, Ho, Wo, CP)
    y1p = jnp.pad(y1, ((0, 0), (1, 1), (1, 1), (0, 0)))
    xq = jnp.stack([y1p[:, ph::2, pw::2, :]
                    for ph in range(2) for pw in range(2)], axis=0)
    # xq: (4, N, Ho//2 + 1, Wo//2 + 1, CP) bf16

    H2, W2 = Ho // 2, Wo // 2          # after maxpool(3, 2, 1)
    H3, W3 = H2 // 2, W2 // 2          # after avgpool(2, 2)
    H4, W4 = H3 // 2, W3 // 2          # after avgpool(2, 2)

    p3 = _avgpool_matrix(N, H2, W2)
    p4 = _avgpool_matrix(N, H3, W3)
    pg = _gap_matrix(N, H4 * W4)

    # --- K2: maxpool + conv2..conv5 + GAP + fc + classifier (single kernel) ---
    logits = fused_body(xq, params["conv_w"], params["conv_g"], params["conv_b"],
                        p3, p4, pg,
                        params["fc_w"], params["fc_b"],
                        params["fc_g"], params["fc_beta"],
                        params["cls_w"], params["cls_b"],
                        n=N, h2=H2, w2=W2)
    return logits[:, :NUM_CLASSES]


# ------------------------------------- main -----------------------------------

if __name__ == "__main__":
    key = jax.random.PRNGKey(0)
    k_in, k_par = jax.random.split(key)
    x = jax.random.normal(k_in, (2, 3, 64, 32), jnp.float32)   # NCHW input
    raw = init_params(k_par)
    params = prepare_params(raw)

    fwd = jax.jit(osnet_forward)
    y = jax.block_until_ready(fwd(params, x))
    assert y.shape == (2, NUM_CLASSES) and y.dtype == jnp.float32
    assert bool(jnp.all(jnp.isfinite(y)))
    print("KERNEL_OK")
</pallas_src>

<mosaic_0001>
module attributes {stable_mosaic.version = 11 : i64} {
  func.func @_stem_kernel(%arg0: i32, %arg1: memref<1024x256xbf16, #tpu.memory_space<vmem>>, %arg2: memref<256x128xbf16, #tpu.memory_space<vmem>>, %arg3: memref<1x128xf32, #tpu.memory_space<vmem>>, %arg4: memref<1x128xf32, #tpu.memory_space<vmem>>, %arg5: memref<1024x128xbf16, #tpu.memory_space<vmem>>) attributes {dimension_semantics = [#tpu.dimension_semantics<arbitrary>], iteration_bounds = array<i64: 1>, scalar_prefetch = 0 : i64, scratch_operands = 0 : i64, tpu.core_type = #tpu.core_type<tc>, window_params = [{pipeline_mode = #tpu.pipeline_mode<synchronous>, transform_indices = @transform_0, window_bounds = array<i64: 1024, 256>}, {pipeline_mode = #tpu.pipeline_mode<synchronous>, transform_indices = @transform_1, window_bounds = array<i64: 256, 128>}, {pipeline_mode = #tpu.pipeline_mode<synchronous>, transform_indices = @transform_2, window_bounds = array<i64: 1, 128>}, {pipeline_mode = #tpu.pipeline_mode<synchronous>, transform_indices = @transform_3, window_bounds = array<i64: 1, 128>}, {pipeline_mode = #tpu.pipeline_mode<synchronous>, transform_indices = @transform_4, window_bounds = array<i64: 1024, 128>}]} {
    %c0 = arith.constant 0 : index
    %c0_0 = arith.constant 0 : index
    %0 = vector.load %arg1[%c0, %c0_0] : memref<1024x256xbf16, #tpu.memory_space<vmem>>, vector<1024x256xbf16>
    %c0_1 = arith.constant 0 : index
    %c0_2 = arith.constant 0 : index
    %1 = vector.load %arg2[%c0_1, %c0_2] : memref<256x128xbf16, #tpu.memory_space<vmem>>, vector<256x128xbf16>
    %cst = arith.constant dense<0.000000e+00> : vector<1024x128xf32>
    %2 = tpu.matmul %0, %1, %cst {dimension_numbers = #tpu.dot_dimension_numbers<[1], [0], [0], [1], [0, 0, 1, 1], [], []>} : vector<1024x256xbf16>, vector<256x128xbf16>, vector<1024x128xf32> -> vector<1024x128xf32>
    %c0_3 = arith.constant 0 : index
    %c0_4 = arith.constant 0 : index
    %3 = vector.load %arg3[%c0_3, %c0_4] : memref<1x128xf32, #tpu.memory_space<vmem>>, vector<1x128xf32>
    %c0_5 = arith.constant 0 : index
    %c0_6 = arith.constant 0 : index
    %4 = vector.load %arg4[%c0_5, %c0_6] : memref<1x128xf32, #tpu.memory_space<vmem>>, vector<1x128xf32>
    %cst_7 = arith.constant dense<0.000000e+00> : vector<128xf32>
    %5 = vector.multi_reduction <add>, %2, %cst_7 [0] : vector<1024x128xf32> to vector<128xf32>
    %6 = vector.shape_cast %5 : vector<128xf32> to vector<1x128xf32>
    %cst_8 = arith.constant 1.024000e+03 : f32
    %7 = vector.broadcast %cst_8 : f32 to vector<1x128xf32>
    %8 = arith.divf %6, %7 : vector<1x128xf32>
    %9 = vector.broadcast %8 : vector<1x128xf32> to vector<1024x128xf32>
    %10 = arith.subf %2, %9 : vector<1024x128xf32>
    %11 = arith.mulf %10, %10 : vector<1024x128xf32>
    %cst_9 = arith.constant dense<0.000000e+00> : vector<128xf32>
    %12 = vector.multi_reduction <add>, %11, %cst_9 [0] : vector<1024x128xf32> to vector<128xf32>
    %13 = vector.shape_cast %12 : vector<128xf32> to vector<1x128xf32>
    %cst_10 = arith.constant 1.024000e+03 : f32
    %14 = vector.broadcast %cst_10 : f32 to vector<1x128xf32>
    %15 = arith.divf %13, %14 : vector<1x128xf32>
    %cst_11 = arith.constant 9.99999974E-6 : f32
    %16 = vector.broadcast %cst_11 : f32 to vector<1x128xf32>
    %17 = arith.addf %15, %16 : vector<1x128xf32>
    %18 = math.rsqrt %17 : vector<1x128xf32>
    %19 = arith.mulf %3, %18 : vector<1x128xf32>
    %20 = arith.mulf %8, %19 : vector<1x128xf32>
    %21 = arith.subf %4, %20 : vector<1x128xf32>
    %22 = vector.broadcast %19 : vector<1x128xf32> to vector<1024x128xf32>
    %23 = arith.mulf %2, %22 : vector<1024x128xf32>
    %24 = vector.broadcast %21 : vector<1x128xf32> to vector<1024x128xf32>
    %25 = arith.addf %23, %24 : vector<1024x128xf32>
    %cst_12 = arith.constant 0.000000e+00 : f32
    %26 = vector.broadcast %cst_12 : f32 to vector<1024x128xf32>
    %27 = arith.maximumf %25, %26 : vector<1024x128xf32>
    %28 = arith.truncf %27 : vector<1024x128xf32> to vector<1024x128xbf16>
    %c0_13 = arith.constant 0 : index
    %c0_14 = arith.constant 0 : index
    %29 = vector.load %arg5[%c0_13, %c0_14] : memref<1024x128xbf16, #tpu.memory_space<vmem>>, vector<1024x128xbf16>
    tpu.vector_store %arg5[%c0_13, %c0_14], %28 {strides = array<i32>} : memref<1024x128xbf16, #tpu.memory_space<vmem>>, vector<1024x128xbf16>,
    return
  }
  func.func @transform_0(%arg0: i32) -> (i32, i32) {
    %c0_i32 = arith.constant 0 : i32
    %c0_i32_0 = arith.constant 0 : i32
    %c0_i32_1 = arith.constant 0 : i32
    return %c0_i32, %c0_i32_0 : i32, i32
  }
  func.func @transform_1(%arg0: i32) -> (i32, i32) {
    %c0_i32 = arith.constant 0 : i32
    %c0_i32_0 = arith.constant 0 : i32
    %c0_i32_1 = arith.constant 0 : i32
    return %c0_i32, %c0_i32_0 : i32, i32
  }
  func.func @transform_2(%arg0: i32) -> (i32, i32) {
    %c0_i32 = arith.constant 0 : i32
    %c0_i32_0 = arith.constant 0 : i32
    %c0_i32_1 = arith.constant 0 : i32
    return %c0_i32, %c0_i32_0 : i32, i32
  }
  func.func @transform_3(%arg0: i32) -> (i32, i32) {
    %c0_i32 = arith.constant 0 : i32
    %c0_i32_0 = arith.constant 0 : i32
    %c0_i32_1 = arith.constant 0 : i32
    return %c0_i32, %c0_i32_0 : i32, i32
  }
  func.func @transform_4(%arg0: i32) -> (i32, i32) {
    %c0_i32 = arith.constant 0 : i32
    %c0_i32_0 = arith.constant 0 : i32
    %c0_i32_1 = arith.constant 0 : i32
    return %c0_i32, %c0_i32_0 : i32, i32
  }
}

module attributes {stable_mosaic.version = 11 : i64} {
  func.func @_body_kernel(%arg0: i32, %arg1: memref<4x2x17x9x128xbf16, #tpu.memory_space<vmem>>, %arg2: memref<6x128x128xbf16, #tpu.memory_space<vmem>>, %arg3: memref<6x1x128xf32, #tpu.memory_space<vmem>>, %arg4: memref<6x1x128xf32, #tpu.memory_space<vmem>>, %arg5: memref<64x256xbf16, #tpu.memory_space<vmem>>, %arg6: memref<16x64xbf16, #tpu.memory_space<vmem>>, %arg7: memref<2x16xbf16, #tpu.memory_space<vmem>>, %arg8: memref<128x128xbf16, #tpu.memory_space<vmem>>, %arg9: memref<1x128xf32, #tpu.memory_space<vmem>>, %arg10: memref<1x128xf32, #tpu.memory_space<vmem>>, %arg11: memref<1x128xf32, #tpu.memory_space<vmem>>, %arg12: memref<128x128xbf16, #tpu.memory_space<vmem>>, %arg13: memref<1x128xf32, #tpu.memory_space<vmem>>, %arg14: memref<2x128xf32, #tpu.memory_space<vmem>>, %arg15: memref<256x128xf32, #tpu.memory_space<vmem>>) attributes {dimension_semantics = [#tpu.dimension_semantics<arbitrary>], iteration_bounds = array<i64: 1>, scalar_prefetch = 0 : i64, scratch_operands = 1 : i64, tpu.core_type = #tpu.core_type<tc>, window_params = [{pipeline_mode = #tpu.pipeline_mode<synchronous>, transform_indices = @transform_0, window_bounds = array<i64: 4, 2, 17, 9, 128>}, {pipeline_mode = #tpu.pipeline_mode<synchronous>, transform_indices = @transform_1, window_bounds = array<i64: 6, 128, 128>}, {pipeline_mode = #tpu.pipeline_mode<synchronous>, transform_indices = @transform_2, window_bounds = array<i64: 6, 1, 128>}, {pipeline_mode = #tpu.pipeline_mode<synchronous>, transform_indices = @transform_3, window_bounds = array<i64: 6, 1, 128>}, {pipeline_mode = #tpu.pipeline_mode<synchronous>, transform_indices = @transform_4, window_bounds = array<i64: 64, 256>}, {pipeline_mode = #tpu.pipeline_mode<synchronous>, transform_indices = @transform_5, window_bounds = array<i64: 16, 64>}, {pipeline_mode = #tpu.pipeline_mode<synchronous>, transform_indices = @transform_6, window_bounds = array<i64: 2, 16>}, {pipeline_mode = #tpu.pipeline_mode<synchronous>, transform_indices = @transform_7, window_bounds = array<i64: 128, 128>}, {pipeline_mode = #tpu.pipeline_mode<synchronous>, transform_indices = @transform_8, window_bounds = array<i64: 1, 128>}, {pipeline_mode = #tpu.pipeline_mode<synchronous>, transform_indices = @transform_9, window_bounds = array<i64: 1, 128>}, {pipeline_mode = #tpu.pipeline_mode<synchronous>, transform_indices = @transform_10, window_bounds = array<i64: 1, 128>}, {pipeline_mode = #tpu.pipeline_mode<synchronous>, transform_indices = @transform_11, window_bounds = array<i64: 128, 128>}, {pipeline_mode = #tpu.pipeline_mode<synchronous>, transform_indices = @transform_12, window_bounds = array<i64: 1, 128>}, {pipeline_mode = #tpu.pipeline_mode<synchronous>, transform_indices = @transform_13, window_bounds = array<i64: 2, 128>}]} {
    %c0 = arith.constant 0 : index
    %c0_0 = arith.constant 0 : index
    %c0_1 = arith.constant 0 : index
    %c0_2 = arith.constant 0 : index
    %c0_3 = arith.constant 0 : index
    %0 = vector.load %arg1[%c0, %c0_0, %c0_1, %c0_2, %c0_3] : memref<4x2x17x9x128xbf16, #tpu.memory_space<vmem>>, vector<1x2x16x8x128xbf16>
    %1 = vector.shape_cast %0 : vector<1x2x16x8x128xbf16> to vector<2x16x8x128xbf16>
    %2 = arith.extf %1 : vector<2x16x8x128xbf16> to vector<2x16x8x128xf32>
    %c1 = arith.constant 1 : index
    %c0_4 = arith.constant 0 : index
    %c0_5 = arith.constant 0 : index
    %c0_6 = arith.constant 0 : index
    %c0_7 = arith.constant 0 : index
    %3 = vector.load %arg1[%c1, %c0_4, %c0_5, %c0_6, %c0_7] : memref<4x2x17x9x128xbf16, #tpu.memory_space<vmem>>, vector<1x2x16x8x128xbf16>
    %4 = vector.shape_cast %3 : vector<1x2x16x8x128xbf16> to vector<2x16x8x128xbf16>
    %5 = arith.extf %4 : vector<2x16x8x128xbf16> to vector<2x16x8x128xf32>
    %c0_8 = arith.constant 0 : index
    %c0_9 = arith.constant 0 : index
    %c0_10 = arith.constant 0 : index
    %c1_11 = arith.constant 1 : index
    %c0_12 = arith.constant 0 : index
    %6 = vector.load %arg1[%c0_8, %c0_9, %c0_10, %c1_11, %c0_12] : memref<4x2x17x9x128xbf16, #tpu.memory_space<vmem>>, vector<1x2x16x8x128xbf16>
    %7 = vector.shape_cast %6 : vector<1x2x16x8x128xbf16> to vector<2x16x8x128xbf16>
    %8 = arith.extf %7 : vector<2x16x8x128xbf16> to vector<2x16x8x128xf32>
    %c2 = arith.constant 2 : index
    %c0_13 = arith.constant 0 : index
    %c0_14 = arith.constant 0 : index
    %c0_15 = arith.constant 0 : index
    %c0_16 = arith.constant 0 : index
    %9 = vector.load %arg1[%c2, %c0_13, %c0_14, %c0_15, %c0_16] : memref<4x2x17x9x128xbf16, #tpu.memory_space<vmem>>, vector<1x2x16x8x128xbf16>
    %10 = vector.shape_cast %9 : vector<1x2x16x8x128xbf16> to vector<2x16x8x128xbf16>
    %11 = arith.extf %10 : vector<2x16x8x128xbf16> to vector<2x16x8x128xf32>
    %c3 = arith.constant 3 : index
    %c0_17 = arith.constant 0 : index
    %c0_18 = arith.constant 0 : index
    %c0_19 = arith.constant 0 : index
    %c0_20 = arith.constant 0 : index
    %12 = vector.load %arg1[%c3, %c0_17, %c0_18, %c0_19, %c0_20] : memref<4x2x17x9x128xbf16, #tpu.memory_space<vmem>>, vector<1x2x16x8x128xbf16>
    %13 = vector.shape_cast %12 : vector<1x2x16x8x128xbf16> to vector<2x16x8x128xbf16>
    %14 = arith.extf %13 : vector<2x16x8x128xbf16> to vector<2x16x8x128xf32>
    %c2_21 = arith.constant 2 : index
    %c0_22 = arith.constant 0 : index
    %c0_23 = arith.constant 0 : index
    %c1_24 = arith.constant 1 : index
    %c0_25 = arith.constant 0 : index
    %15 = vector.load %arg1[%c2_21, %c0_22, %c0_23, %c1_24, %c0_25] : memref<4x2x17x9x128xbf16, #tpu.memory_space<vmem>>, vector<1x2x16x8x128xbf16>
    %16 = vector.shape_cast %15 : vector<1x2x16x8x128xbf16> to vector<2x16x8x128xbf16>
    %17 = arith.extf %16 : vector<2x16x8x128xbf16> to vector<2x16x8x128xf32>
    %c0_26 = arith.constant 0 : index
    %c0_27 = arith.constant 0 : index
    %c1_28 = arith.constant 1 : index
    %c0_29 = arith.constant 0 : index
    %c0_30 = arith.constant 0 : index
    %18 = vector.load %arg1[%c0_26, %c0_27, %c1_28, %c0_29, %c0_30] : memref<4x2x17x9x128xbf16, #tpu.memory_space<vmem>>, vector<1x2x16x8x128xbf16>
    %19 = vector.shape_cast %18 : vector<1x2x16x8x128xbf16> to vector<2x16x8x128xbf16>
    %20 = arith.extf %19 : vector<2x16x8x128xbf16> to vector<2x16x8x128xf32>
    %c1_31 = arith.constant 1 : index
    %c0_32 = arith.constant 0 : index
    %c1_33 = arith.constant 1 : index
    %c0_34 = arith.constant 0 : index
    %c0_35 = arith.constant 0 : index
    %21 = vector.load %arg1[%c1_31, %c0_32, %c1_33, %c0_34, %c0_35] : memref<4x2x17x9x128xbf16, #tpu.memory_space<vmem>>, vector<1x2x16x8x128xbf16>
    %22 = vector.shape_cast %21 : vector<1x2x16x8x128xbf16> to vector<2x16x8x128xbf16>
    %23 = arith.extf %22 : vector<2x16x8x128xbf16> to vector<2x16x8x128xf32>
    %c0_36 = arith.constant 0 : index
    %c0_37 = arith.constant 0 : index
    %c1_38 = arith.constant 1 : index
    %c1_39 = arith.constant 1 : index
    %c0_40 = arith.constant 0 : index
    %24 = vector.load %arg1[%c0_36, %c0_37, %c1_38, %c1_39, %c0_40] : memref<4x2x17x9x128xbf16, #tpu.memory_space<vmem>>, vector<1x2x16x8x128xbf16>
    %25 = vector.shape_cast %24 : vector<1x2x16x8x128xbf16> to vector<2x16x8x128xbf16>
    %26 = arith.extf %25 : vector<2x16x8x128xbf16> to vector<2x16x8x128xf32>
    %27 = arith.maximumf %2, %5 : vector<2x16x8x128xf32>
    %28 = arith.maximumf %27, %8 : vector<2x16x8x128xf32>
    %29 = arith.maximumf %28, %11 : vector<2x16x8x128xf32>
    %30 = arith.maximumf %29, %14 : vector<2x16x8x128xf32>
    %31 = arith.maximumf %30, %17 : vector<2x16x8x128xf32>
    %32 = arith.maximumf %31, %20 : vector<2x16x8x128xf32>
    %33 = arith.maximumf %32, %23 : vector<2x16x8x128xf32>
    %34 = arith.maximumf %33, %26 : vector<2x16x8x128xf32>
    %35 = vector.extract_strided_slice %34 {offsets = [0, 0, 0, 0], sizes = [1, 1, 8, 128], strides = [1, 1, 1, 1]} : vector<2x16x8x128xf32> to vector<1x1x8x128xf32>
    %36 = vector.shape_cast %35 : vector<1x1x8x128xf32> to vector<8x128xf32>
    %c0_41 = arith.constant 0 : index
    %c0_42 = arith.constant 0 : index
    %37 = vector.load %arg15[%c0_41, %c0_42] : memref<256x128xf32, #tpu.memory_space<vmem>>, vector<8x128xf32>
    tpu.vector_store %arg15[%c0_41, %c0_42], %36 {strides = array<i32>} : memref<256x128xf32, #tpu.memory_space<vmem>>, vector<8x128xf32>,
    %38 = vector.extract_strided_slice %34 {offsets = [0, 1, 0, 0], sizes = [1, 1, 8, 128], strides = [1, 1, 1, 1]} : vector<2x16x8x128xf32> to vector<1x1x8x128xf32>
    %39 = vector.shape_cast %38 : vector<1x1x8x128xf32> to vector<8x128xf32>
    %c8 = arith.constant 8 : index
    %c0_43 = arith.constant 0 : index
    %40 = vector.load %arg15[%c8, %c0_43] : memref<256x128xf32, #tpu.memory_space<vmem>>, vector<8x128xf32>
    tpu.vector_store %arg15[%c8, %c0_43], %39 {strides = array<i32>} : memref<256x128xf32, #tpu.memory_space<vmem>>, vector<8x128xf32>,
    %41 = vector.extract_strided_slice %34 {offsets = [0, 2, 0, 0], sizes = [1, 1, 8, 128], strides = [1, 1, 1, 1]} : vector<2x16x8x128xf32> to vector<1x1x8x128xf32>
    %42 = vector.shape_cast %41 : vector<1x1x8x128xf32> to vector<8x128xf32>
    %c16 = arith.constant 16 : index
    %c0_44 = arith.constant 0 : index
    %43 = vector.load %arg15[%c16, %c0_44] : memref<256x128xf32, #tpu.memory_space<vmem>>, vector<8x128xf32>
    tpu.vector_store %arg15[%c16, %c0_44], %42 {strides = array<i32>} : memref<256x128xf32, #tpu.memory_space<vmem>>, vector<8x128xf32>,
    %44 = vector.extract_strided_slice %34 {offsets = [0, 3, 0, 0], sizes = [1, 1, 8, 128], strides = [1, 1, 1, 1]} : vector<2x16x8x128xf32> to vector<1x1x8x128xf32>
    %45 = vector.shape_cast %44 : vector<1x1x8x128xf32> to vector<8x128xf32>
    %c24 = arith.constant 24 : index
    %c0_45 = arith.constant 0 : index
    %46 = vector.load %arg15[%c24, %c0_45] : memref<256x128xf32, #tpu.memory_space<vmem>>, vector<8x128xf32>
    tpu.vector_store %arg15[%c24, %c0_45], %45 {strides = array<i32>} : memref<256x128xf32, #tpu.memory_space<vmem>>, vector<8x128xf32>,
    %47 = vector.extract_strided_slice %34 {offsets = [0, 4, 0, 0], sizes = [1, 1, 8, 128], strides = [1, 1, 1, 1]} : vector<2x16x8x128xf32> to vector<1x1x8x128xf32>
    %48 = vector.shape_cast %47 : vector<1x1x8x128xf32> to vector<8x128xf32>
    %c32 = arith.constant 32 : index
    %c0_46 = arith.constant 0 : index
    %49 = vector.load %arg15[%c32, %c0_46] : memref<256x128xf32, #tpu.memory_space<vmem>>, vector<8x128xf32>
    tpu.vector_store %arg15[%c32, %c0_46], %48 {strides = array<i32>} : memref<256x128xf32, #tpu.memory_space<vmem>>, vector<8x128xf32>,
    %50 = vector.extract_strided_slice %34 {offsets = [0, 5, 0, 0], sizes = [1, 1, 8, 128], strides = [1, 1, 1, 1]} : vector<2x16x8x128xf32> to vector<1x1x8x128xf32>
    %51 = vector.shape_cast %50 : vector<1x1x8x128xf32> to vector<8x128xf32>
    %c40 = arith.constant 40 : index
    %c0_47 = arith.constant 0 : index
    %52 = vector.load %arg15[%c40, %c0_47] : memref<256x128xf32, #tpu.memory_space<vmem>>, vector<8x128xf32>
    tpu.vector_store %arg15[%c40, %c0_47], %51 {strides = array<i32>} : memref<256x128xf32, #tpu.memory_space<vmem>>, vector<8x128xf32>,
    %53 = vector.extract_strided_slice %34 {offsets = [0, 6, 0, 0], sizes = [1, 1, 8, 128], strides = [1, 1, 1, 1]} : vector<2x16x8x128xf32> to vector<1x1x8x128xf32>
    %54 = vector.shape_cast %53 : vector<1x1x8x128xf32> to vector<8x128xf32>
    %c48 = arith.constant 48 : index
    %c0_48 = arith.constant 0 : index
    %55 = vector.load %arg15[%c48, %c0_48] : memref<256x128xf32, #tpu.memory_space<vmem>>, vector<8x128xf32>
    tpu.vector_store %arg15[%c48, %c0_48], %54 {strides = array<i32>} : memref<256x128xf32, #tpu.memory_space<vmem>>, vector<8x128xf32>,
    %56 = vector.extract_strided_slice %34 {offsets = [0, 7, 0, 0], sizes = [1, 1, 8, 128], strides = [1, 1, 1, 1]} : vector<2x16x8x128xf32> to vector<1x1x8x128xf32>
    %57 = vector.shape_cast %56 : vector<1x1x8x128xf32> to vector<8x128xf32>
    %c56 = arith.constant 56 : index
    %c0_49 = arith.constant 0 : index
    %58 = vector.load %arg15[%c56, %c0_49] : memref<256x128xf32, #tpu.memory_space<vmem>>, vector<8x128xf32>
    tpu.vector_store %arg15[%c56, %c0_49], %57 {strides = array<i32>} : memref<256x128xf32, #tpu.memory_space<vmem>>, vector<8x128xf32>,
    %59 = vector.extract_strided_slice %34 {offsets = [0, 8, 0, 0], sizes = [1, 1, 8, 128], strides = [1, 1, 1, 1]} : vector<2x16x8x128xf32> to vector<1x1x8x128xf32>
    %60 = vector.shape_cast %59 : vector<1x1x8x128xf32> to vector<8x128xf32>
    %c64 = arith.constant 64 : index
    %c0_50 = arith.constant 0 : index
    %61 = vector.load %arg15[%c64, %c0_50] : memref<256x128xf32, #tpu.memory_space<vmem>>, vector<8x128xf32>
    tpu.vector_store %arg15[%c64, %c0_50], %60 {strides = array<i32>} : memref<256x128xf32, #tpu.memory_space<vmem>>, vector<8x128xf32>,
    %62 = vector.extract_strided_slice %34 {offsets = [0, 9, 0, 0], sizes = [1, 1, 8, 128], strides = [1, 1, 1, 1]} : vector<2x16x8x128xf32> to vector<1x1x8x128xf32>
    %63 = vector.shape_cast %62 : vector<1x1x8x128xf32> to vector<8x128xf32>
    %c72 = arith.constant 72 : index
    %c0_51 = arith.constant 0 : index
    %64 = vector.load %arg15[%c72, %c0_51] : memref<256x128xf32, #tpu.memory_space<vmem>>, vector<8x128xf32>
    tpu.vector_store %arg15[%c72, %c0_51], %63 {strides = array<i32>} : memref<256x128xf32, #tpu.memory_space<vmem>>, vector<8x128xf32>,
    %65 = vector.extract_strided_slice %34 {offsets = [0, 10, 0, 0], sizes = [1, 1, 8, 128], strides = [1, 1, 1, 1]} : vector<2x16x8x128xf32> to vector<1x1x8x128xf32>
    %66 = vector.shape_cast %65 : vector<1x1x8x128xf32> to vector<8x128xf32>
    %c80 = arith.constant 80 : index
    %c0_52 = arith.constant 0 : index
    %67 = vector.load %arg15[%c80, %c0_52] : memref<256x128xf32, #tpu.memory_space<vmem>>, vector<8x128xf32>
    tpu.vector_store %arg15[%c80, %c0_52], %66 {strides = array<i32>} : memref<256x128xf32, #tpu.memory_space<vmem>>, vector<8x128xf32>,
    %68 = vector.extract_strided_slice %34 {offsets = [0, 11, 0, 0], sizes = [1, 1, 8, 128], strides = [1, 1, 1, 1]} : vector<2x16x8x128xf32> to vector<1x1x8x128xf32>
    %69 = vector.shape_cast %68 : vector<1x1x8x128xf32> to vector<8x128xf32>
    %c88 = arith.constant 88 : index
    %c0_53 = arith.constant 0 : index
    %70 = vector.load %arg15[%c88, %c0_53] : memref<256x128xf32, #tpu.memory_space<vmem>>, vector<8x128xf32>
    tpu.vector_store %arg15[%c88, %c0_53], %69 {strides = array<i32>} : memref<256x128xf32, #tpu.memory_space<vmem>>, vector<8x128xf32>,
    %71 = vector.extract_strided_slice %34 {offsets = [0, 12, 0, 0], sizes = [1, 1, 8, 128], strides = [1, 1, 1, 1]} : vector<2x16x8x128xf32> to vector<1x1x8x128xf32>
    %72 = vector.shape_cast %71 : vector<1x1x8x128xf32> to vector<8x128xf32>
    %c96 = arith.constant 96 : index
    %c0_54 = arith.constant 0 : index
    %73 = vector.load %arg15[%c96, %c0_54] : memref<256x128xf32, #tpu.memory_space<vmem>>, vector<8x128xf32>
    tpu.vector_store %arg15[%c96, %c0_54], %72 {strides = array<i32>} : memref<256x128xf32, #tpu.memory_space<vmem>>, vector<8x128xf32>,
    %74 = vector.extract_strided_slice %34 {offsets = [0, 13, 0, 0], sizes = [1, 1, 8, 128], strides = [1, 1, 1, 1]} : vector<2x16x8x128xf32> to vector<1x1x8x128xf32>
    %75 = vector.shape_cast %74 : vector<1x1x8x128xf32> to vector<8x128xf32>
    %c104 = arith.constant 104 : index
    %c0_55 = arith.constant 0 : index
    %76 = vector.load %arg15[%c104, %c0_55] : memref<256x128xf32, #tpu.memory_space<vmem>>, vector<8x128xf32>
    tpu.vector_store %arg15[%c104, %c0_55], %75 {strides = array<i32>} : memref<256x128xf32, #tpu.memory_space<vmem>>, vector<8x128xf32>,
    %77 = vector.extract_strided_slice %34 {offsets = [0, 14, 0, 0], sizes = [1, 1, 8, 128], strides = [1, 1, 1, 1]} : vector<2x16x8x128xf32> to vector<1x1x8x128xf32>
    %78 = vector.shape_cast %77 : vector<1x1x8x128xf32> to vector<8x128xf32>
    %c112 = arith.constant 112 : index
    %c0_56 = arith.constant 0 : index
    %79 = vector.load %arg15[%c112, %c0_56] : memref<256x128xf32, #tpu.memory_space<vmem>>, vector<8x128xf32>
    tpu.vector_store %arg15[%c112, %c0_56], %78 {strides = array<i32>} : memref<256x128xf32, #tpu.memory_space<vmem>>, vector<8x128xf32>,
    %80 = vector.extract_strided_slice %34 {offsets = [0, 15, 0, 0], sizes = [1, 1, 8, 128], strides = [1, 1, 1, 1]} : vector<2x16x8x128xf32> to vector<1x1x8x128xf32>
    %81 = vector.shape_cast %80 : vector<1x1x8x128xf32> to vector<8x128xf32>
    %c120 = arith.constant 120 : index
    %c0_57 = arith.constant 0 : index
    %82 = vector.load %arg15[%c120, %c0_57] : memref<256x128xf32, #tpu.memory_space<vmem>>, vector<8x128xf32>
    tpu.vector_store %arg15[%c120, %c0_57], %81 {strides = array<i32>} : memref<256x128xf32, #tpu.memory_space<vmem>>, vector<8x128xf32>,
    %83 = vector.extract_strided_slice %34 {offsets = [1, 0, 0, 0], sizes = [1, 1, 8, 128], strides = [1, 1, 1, 1]} : vector<2x16x8x128xf32> to vector<1x1x8x128xf32>
    %84 = vector.shape_cast %83 : vector<1x1x8x128xf32> to vector<8x128xf32>
    %c128 = arith.constant 128 : index
    %c0_58 = arith.constant 0 : index
    %85 = vector.load %arg15[%c128, %c0_58] : memref<256x128xf32, #tpu.memory_space<vmem>>, vector<8x128xf32>
    tpu.vector_store %arg15[%c128, %c0_58], %84 {strides = array<i32>} : memref<256x128xf32, #tpu.memory_space<vmem>>, vector<8x128xf32>,
    %86 = vector.extract_strided_slice %34 {offsets = [1, 1, 0, 0], sizes = [1, 1, 8, 128], strides = [1, 1, 1, 1]} : vector<2x16x8x128xf32> to vector<1x1x8x128xf32>
    %87 = vector.shape_cast %86 : vector<1x1x8x128xf32> to vector<8x128xf32>
    %c136 = arith.constant 136 : index
    %c0_59 = arith.constant 0 : index
    %88 = vector.load %arg15[%c136, %c0_59] : memref<256x128xf32, #tpu.memory_space<vmem>>, vector<8x128xf32>
    tpu.vector_store %arg15[%c136, %c0_59], %87 {strides = array<i32>} : memref<256x128xf32, #tpu.memory_space<vmem>>, vector<8x128xf32>,
    %89 = vector.extract_strided_slice %34 {offsets = [1, 2, 0, 0], sizes = [1, 1, 8, 128], strides = [1, 1, 1, 1]} : vector<2x16x8x128xf32> to vector<1x1x8x128xf32>
    %90 = vector.shape_cast %89 : vector<1x1x8x128xf32> to vector<8x128xf32>
    %c144 = arith.constant 144 : index
    %c0_60 = arith.constant 0 : index
    %91 = vector.load %arg15[%c144, %c0_60] : memref<256x128xf32, #tpu.memory_space<vmem>>, vector<8x128xf32>
    tpu.vector_store %arg15[%c144, %c0_60], %90 {strides = array<i32>} : memref<256x128xf32, #tpu.memory_space<vmem>>, vector<8x128xf32>,
    %92 = vector.extract_strided_slice %34 {offsets = [1, 3, 0, 0], sizes = [1, 1, 8, 128], strides = [1, 1, 1, 1]} : vector<2x16x8x128xf32> to vector<1x1x8x128xf32>
    %93 = vector.shape_cast %92 : vector<1x1x8x128xf32> to vector<8x128xf32>
    %c152 = arith.constant 152 : index
    %c0_61 = arith.constant 0 : index
    %94 = vector.load %arg15[%c152, %c0_61] : memref<256x128xf32, #tpu.memory_space<vmem>>, vector<8x128xf32>
    tpu.vector_store %arg15[%c152, %c0_61], %93 {strides = array<i32>} : memref<256x128xf32, #tpu.memory_space<vmem>>, vector<8x128xf32>,
    %95 = vector.extract_strided_slice %34 {offsets = [1, 4, 0, 0], sizes = [1, 1, 8, 128], strides = [1, 1, 1, 1]} : vector<2x16x8x128xf32> to vector<1x1x8x128xf32>
    %96 = vector.shape_cast %95 : vector<1x1x8x128xf32> to vector<8x128xf32>
    %c160 = arith.constant 160 : index
    %c0_62 = arith.constant 0 : index
    %97 = vector.load %arg15[%c160, %c0_62] : memref<256x128xf32, #tpu.memory_space<vmem>>, vector<8x128xf32>
    tpu.vector_store %arg15[%c160, %c0_62], %96 {strides = array<i32>} : memref<256x128xf32, #tpu.memory_space<vmem>>, vector<8x128xf32>,
    %98 = vector.extract_strided_slice %34 {offsets = [1, 5, 0, 0], sizes = [1, 1, 8, 128], strides = [1, 1, 1, 1]} : vector<2x16x8x128xf32> to vector<1x1x8x128xf32>
    %99 = vector.shape_cast %98 : vector<1x1x8x128xf32> to vector<8x128xf32>
    %c168 = arith.constant 168 : index
    %c0_63 = arith.constant 0 : index
    %100 = vector.load %arg15[%c168, %c0_63] : memref<256x128xf32, #tpu.memory_space<vmem>>, vector<8x128xf32>
    tpu.vector_store %arg15[%c168, %c0_63], %99 {strides = array<i32>} : memref<256x128xf32, #tpu.memory_space<vmem>>, vector<8x128xf32>,
    %101 = vector.extract_strided_slice %34 {offsets = [1, 6, 0, 0], sizes = [1, 1, 8, 128], strides = [1, 1, 1, 1]} : vector<2x16x8x128xf32> to vector<1x1x8x128xf32>
    %102 = vector.shape_cast %101 : vector<1x1x8x128xf32> to vector<8x128xf32>
    %c176 = arith.constant 176 : index
    %c0_64 = arith.constant 0 : index
    %103 = vector.load %arg15[%c176, %c0_64] : memref<256x128xf32, #tpu.memory_space<vmem>>, vector<8x128xf32>
    tpu.vector_store %arg15[%c176, %c0_64], %102 {strides = array<i32>} : memref<256x128xf32, #tpu.memory_space<vmem>>, vector<8x128xf32>,
    %104 = vector.extract_strided_slice %34 {offsets = [1, 7, 0, 0], sizes = [1, 1, 8, 128], strides = [1, 1, 1, 1]} : vector<2x16x8x128xf32> to vector<1x1x8x128xf32>
    %105 = vector.shape_cast %104 : vector<1x1x8x128xf32> to vector<8x128xf32>
    %c184 = arith.constant 184 : index
    %c0_65 = arith.constant 0 : index
    %106 = vector.load %arg15[%c184, %c0_65] : memref<256x128xf32, #tpu.memory_space<vmem>>, vector<8x128xf32>
    tpu.vector_store %arg15[%c184, %c0_65], %105 {strides = array<i32>} : memref<256x128xf32, #tpu.memory_space<vmem>>, vector<8x128xf32>,
    %107 = vector.extract_strided_slice %34 {offsets = [1, 8, 0, 0], sizes = [1, 1, 8, 128], strides = [1, 1, 1, 1]} : vector<2x16x8x128xf32> to vector<1x1x8x128xf32>
    %108 = vector.shape_cast %107 : vector<1x1x8x128xf32> to vector<8x128xf32>
    %c192 = arith.constant 192 : index
    %c0_66 = arith.constant 0 : index
    %109 = vector.load %arg15[%c192, %c0_66] : memref<256x128xf32, #tpu.memory_space<vmem>>, vector<8x128xf32>
    tpu.vector_store %arg15[%c192, %c0_66], %108 {strides = array<i32>} : memref<256x128xf32, #tpu.memory_space<vmem>>, vector<8x128xf32>,
    %110 = vector.extract_strided_slice %34 {offsets = [1, 9, 0, 0], sizes = [1, 1, 8, 128], strides = [1, 1, 1, 1]} : vector<2x16x8x128xf32> to vector<1x1x8x128xf32>
    %111 = vector.shape_cast %110 : vector<1x1x8x128xf32> to vector<8x128xf32>
    %c200 = arith.constant 200 : index
    %c0_67 = arith.constant 0 : index
    %112 = vector.load %arg15[%c200, %c0_67] : memref<256x128xf32, #tpu.memory_space<vmem>>, vector<8x128xf32>
    tpu.vector_store %arg15[%c200, %c0_67], %111 {strides = array<i32>} : memref<256x128xf32, #tpu.memory_space<vmem>>, vector<8x128xf32>,
    %113 = vector.extract_strided_slice %34 {offsets = [1, 10, 0, 0], sizes = [1, 1, 8, 128], strides = [1, 1, 1, 1]} : vector<2x16x8x128xf32> to vector<1x1x8x128xf32>
    %114 = vector.shape_cast %113 : vector<1x1x8x128xf32> to vector<8x128xf32>
    %c208 = arith.constant 208 : index
    %c0_68 = arith.constant 0 : index
    %115 = vector.load %arg15[%c208, %c0_68] : memref<256x128xf32, #tpu.memory_space<vmem>>, vector<8x128xf32>
    tpu.vector_store %arg15[%c208, %c0_68], %114 {strides = array<i32>} : memref<256x128xf32, #tpu.memory_space<vmem>>, vector<8x128xf32>,
    %116 = vector.extract_strided_slice %34 {offsets = [1, 11, 0, 0], sizes = [1, 1, 8, 128], strides = [1, 1, 1, 1]} : vector<2x16x8x128xf32> to vector<1x1x8x128xf32>
    %117 = vector.shape_cast %116 : vector<1x1x8x128xf32> to vector<8x128xf32>
    %c216 = arith.constant 216 : index
    %c0_69 = arith.constant 0 : index
    %118 = vector.load %arg15[%c216, %c0_69] : memref<256x128xf32, #tpu.memory_space<vmem>>, vector<8x128xf32>
    tpu.vector_store %arg15[%c216, %c0_69], %117 {strides = array<i32>} : memref<256x128xf32, #tpu.memory_space<vmem>>, vector<8x128xf32>,
    %119 = vector.extract_strided_slice %34 {offsets = [1, 12, 0, 0], sizes = [1, 1, 8, 128], strides = [1, 1, 1, 1]} : vector<2x16x8x128xf32> to vector<1x1x8x128xf32>
    %120 = vector.shape_cast %119 : vector<1x1x8x128xf32> to vector<8x128xf32>
    %c224 = arith.constant 224 : index
    %c0_70 = arith.constant 0 : index
    %121 = vector.load %arg15[%c224, %c0_70] : memref<256x128xf32, #tpu.memory_space<vmem>>, vector<8x128xf32>
    tpu.vector_store %arg15[%c224, %c0_70], %120 {strides = array<i32>} : memref<256x128xf32, #tpu.memory_space<vmem>>, vector<8x128xf32>,
    %122 = vector.extract_strided_slice %34 {offsets = [1, 13, 0, 0], sizes = [1, 1, 8, 128], strides = [1, 1, 1, 1]} : vector<2x16x8x128xf32> to vector<1x1x8x128xf32>
    %123 = vector.shape_cast %122 : vector<1x1x8x128xf32> to vector<8x128xf32>
    %c232 = arith.constant 232 : index
    %c0_71 = arith.constant 0 : index
    %124 = vector.load %arg15[%c232, %c0_71] : memref<256x128xf32, #tpu.memory_space<vmem>>, vector<8x128xf32>
    tpu.vector_store %arg15[%c232, %c0_71], %123 {strides = array<i32>} : memref<256x128xf32, #tpu.memory_space<vmem>>, vector<8x128xf32>,
    %125 = vector.extract_strided_slice %34 {offsets = [1, 14, 0, 0], sizes = [1, 1, 8, 128], strides = [1, 1, 1, 1]} : vector<2x16x8x128xf32> to vector<1x1x8x128xf32>
    %126 = vector.shape_cast %125 : vector<1x1x8x128xf32> to vector<8x128xf32>
    %c240 = arith.constant 240 : index
    %c0_72 = arith.constant 0 : index
    %127 = vector.load %arg15[%c240, %c0_72] : memref<256x128xf32, #tpu.memory_space<vmem>>, vector<8x128xf32>
    tpu.vector_store %arg15[%c240, %c0_72], %126 {strides = array<i32>} : memref<256x128xf32, #tpu.memory_space<vmem>>, vector<8x128xf32>,
    %128 = vector.extract_strided_slice %34 {offsets = [1, 15, 0, 0], sizes = [1, 1, 8, 128], strides = [1, 1, 1, 1]} : vector<2x16x8x128xf32> to vector<1x1x8x128xf32>
    %129 = vector.shape_cast %128 : vector<1x1x8x128xf32> to vector<8x128xf32>
    %c248 = arith.constant 248 : index
    %c0_73 = arith.constant 0 : index
    %130 = vector.load %arg15[%c248, %c0_73] : memref<256x128xf32, #tpu.memory_space<vmem>>, vector<8x128xf32>
    tpu.vector_store %arg15[%c248, %c0_73], %129 {strides = array<i32>} : memref<256x128xf32, #tpu.memory_space<vmem>>, vector<8x128xf32>,
    %c0_74 = arith.constant 0 : index
    %c0_75 = arith.constant 0 : index
    %131 = vector.load %arg15[%c0_74, %c0_75] : memref<256x128xf32, #tpu.memory_space<vmem>>, vector<256x128xf32>
    %c0_76 = arith.constant 0 : index
    %c0_77 = arith.constant 0 : index
    %c0_78 = arith.constant 0 : index
    %132 = vector.load %arg2[%c0_76, %c0_77, %c0_78] : memref<6x128x128xbf16, #tpu.memory_space<vmem>>, vector<1x128x128xbf16>
    %133 = vector.shape_cast %132 : vector<1x128x128xbf16> to vector<128x128xbf16>
    %134 = arith.truncf %131 : vector<256x128xf32> to vector<256x128xbf16>
    %cst = arith.constant dense<0.000000e+00> : vector<256x128xf32>
    %135 = tpu.matmul %134, %133, %cst {dimension_numbers = #tpu.dot_dimension_numbers<[1], [0], [0], [1], [0, 0, 1, 1], [], []>} : vector<256x128xbf16>, vector<128x128xbf16>, vector<256x128xf32> -> vector<256x128xf32>
    %c0_79 = arith.constant 0 : index
    %c0_80 = arith.constant 0 : index
    %c0_81 = arith.constant 0 : index
    %136 = vector.load %arg3[%c0_79, %c0_80, %c0_81] : memref<6x1x128xf32, #tpu.memory_space<vmem>>, vector<1x1x128xf32>
    %137 = vector.shape_cast %136 : vector<1x1x128xf32> to vector<1x128xf32>
    %c0_82 = arith.constant 0 : index
    %c0_83 = arith.constant 0 : index
    %c0_84 = arith.constant 0 : index
    %138 = vector.load %arg4[%c0_82, %c0_83, %c0_84] : memref<6x1x128xf32, #tpu.memory_space<vmem>>, vector<1x1x128xf32>
    %139 = vector.shape_cast %138 : vector<1x1x128xf32> to vector<1x128xf32>
    %cst_85 = arith.constant dense<0.000000e+00> : vector<128xf32>
    %140 = vector.multi_reduction <add>, %135, %cst_85 [0] : vector<256x128xf32> to vector<128xf32>
    %141 = vector.shape_cast %140 : vector<128xf32> to vector<1x128xf32>
    %cst_86 = arith.constant 2.560000e+02 : f32
    %142 = vector.broadcast %cst_86 : f32 to vector<1x128xf32>
    %143 = arith.divf %141, %142 : vector<1x128xf32>
    %144 = vector.broadcast %143 : vector<1x128xf32> to vector<256x128xf32>
    %145 = arith.subf %135, %144 : vector<256x128xf32>
    %146 = arith.mulf %145, %145 : vector<256x128xf32>
    %cst_87 = arith.constant dense<0.000000e+00> : vector<128xf32>
    %147 = vector.multi_reduction <add>, %146, %cst_87 [0] : vector<256x128xf32> to vector<128xf32>
    %148 = vector.shape_cast %147 : vector<128xf32> to vector<1x128xf32>
    %cst_88 = arith.constant 2.560000e+02 : f32
    %149 = vector.broadcast %cst_88 : f32 to vector<1x128xf32>
    %150 = arith.divf %148, %149 : vector<1x128xf32>
    %cst_89 = arith.constant 9.99999974E-6 : f32
    %151 = vector.broadcast %cst_89 : f32 to vector<1x128xf32>
    %152 = arith.addf %150, %151 : vector<1x128xf32>
    %153 = math.rsqrt %152 : vector<1x128xf32>
    %154 = arith.mulf %137, %153 : vector<1x128xf32>
    %155 = arith.mulf %143, %154 : vector<1x128xf32>
    %156 = arith.subf %139, %155 : vector<1x128xf32>
    %157 = vector.broadcast %154 : vector<1x128xf32> to vector<256x128xf32>
    %158 = arith.mulf %135, %157 : vector<256x128xf32>
    %159 = vector.broadcast %156 : vector<1x128xf32> to vector<256x128xf32>
    %160 = arith.addf %158, %159 : vector<256x128xf32>
    %cst_90 = arith.constant 0.000000e+00 : f32
    %161 = vector.broadcast %cst_90 : f32 to vector<256x128xf32>
    %162 = arith.maximumf %160, %161 : vector<256x128xf32>
    %c1_91 = arith.constant 1 : index
    %c0_92 = arith.constant 0 : index
    %c0_93 = arith.constant 0 : index
    %163 = vector.load %arg2[%c1_91, %c0_92, %c0_93] : memref<6x128x128xbf16, #tpu.memory_space<vmem>>, vector<1x128x128xbf16>
    %164 = vector.shape_cast %163 : vector<1x128x128xbf16> to vector<128x128xbf16>
    %165 = arith.truncf %162 : vector<256x128xf32> to vector<256x128xbf16>
    %cst_94 = arith.constant dense<0.000000e+00> : vector<256x128xf32>
    %166 = tpu.matmul %165, %164, %cst_94 {dimension_numbers = #tpu.dot_dimension_numbers<[1], [0], [0], [1], [0, 0, 1, 1], [], []>} : vector<256x128xbf16>, vector<128x128xbf16>, vector<256x128xf32> -> vector<256x128xf32>
    %c1_95 = arith.constant 1 : index
    %c0_96 = arith.constant 0 : index
    %c0_97 = arith.constant 0 : index
    %167 = vector.load %arg3[%c1_95, %c0_96, %c0_97] : memref<6x1x128xf32, #tpu.memory_space<vmem>>, vector<1x1x128xf32>
    %168 = vector.shape_cast %167 : vector<1x1x128xf32> to vector<1x128xf32>
    %c1_98 = arith.constant 1 : index
    %c0_99 = arith.constant 0 : index
    %c0_100 = arith.constant 0 : index
    %169 = vector.load %arg4[%c1_98, %c0_99, %c0_100] : memref<6x1x128xf32, #tpu.memory_space<vmem>>, vector<1x1x128xf32>
    %170 = vector.shape_cast %169 : vector<1x1x128xf32> to vector<1x128xf32>
    %cst_101 = arith.constant dense<0.000000e+00> : vector<128xf32>
    %171 = vector.multi_reduction <add>, %166, %cst_101 [0] : vector<256x128xf32> to vector<128xf32>
    %172 = vector.shape_cast %171 : vector<128xf32> to vector<1x128xf32>
    %cst_102 = arith.constant 2.560000e+02 : f32
    %173 = vector.broadcast %cst_102 : f32 to vector<1x128xf32>
    %174 = arith.divf %172, %173 : vector<1x128xf32>
    %175 = vector.broadcast %174 : vector<1x128xf32> to vector<256x128xf32>
    %176 = arith.subf %166, %175 : vector<256x128xf32>
    %177 = arith.mulf %176, %176 : vector<256x128xf32>
    %cst_103 = arith.constant dense<0.000000e+00> : vector<128xf32>
    %178 = vector.multi_reduction <add>, %177, %cst_103 [0] : vector<256x128xf32> to vector<128xf32>
    %179 = vector.shape_cast %178 : vector<128xf32> to vector<1x128xf32>
    %cst_104 = arith.constant 2.560000e+02 : f32
    %180 = vector.broadcast %cst_104 : f32 to vector<1x128xf32>
    %181 = arith.divf %179, %180 : vector<1x128xf32>
    %cst_105 = arith.constant 9.99999974E-6 : f32
    %182 = vector.broadcast %cst_105 : f32 to vector<1x128xf32>
    %183 = arith.addf %181, %182 : vector<1x128xf32>
    %184 = math.rsqrt %183 : vector<1x128xf32>
    %185 = arith.mulf %168, %184 : vector<1x128xf32>
    %186 = arith.mulf %174, %185 : vector<1x128xf32>
    %187 = arith.subf %170, %186 : vector<1x128xf32>
    %188 = vector.broadcast %185 : vector<1x128xf32> to vector<256x128xf32>
    %189 = arith.mulf %166, %188 : vector<256x128xf32>
    %190 = vector.broadcast %187 : vector<1x128xf32> to vector<256x128xf32>
    %191 = arith.addf %189, %190 : vector<256x128xf32>
    %cst_106 = arith.constant 0.000000e+00 : f32
    %192 = vector.broadcast %cst_106 : f32 to vector<256x128xf32>
    %193 = arith.maximumf %191, %192 : vector<256x128xf32>
    %c0_107 = arith.constant 0 : index
    %c0_108 = arith.constant 0 : index
    %194 = vector.load %arg5[%c0_107, %c0_108] : memref<64x256xbf16, #tpu.memory_space<vmem>>, vector<64x256xbf16>
    %195 = arith.truncf %193 : vector<256x128xf32> to vector<256x128xbf16>
    %cst_109 = arith.constant dense<0.000000e+00> : vector<64x128xf32>
    %196 = tpu.matmul %194, %195, %cst_109 {dimension_numbers = #tpu.dot_dimension_numbers<[1], [0], [0], [1], [0, 0, 1, 1], [], []>} : vector<64x256xbf16>, vector<256x128xbf16>, vector<64x128xf32> -> vector<64x128xf32>
    %c2_110 = arith.constant 2 : index
    %c0_111 = arith.constant 0 : index
    %c0_112 = arith.constant 0 : index
    %197 = vector.load %arg2[%c2_110, %c0_111, %c0_112] : memref<6x128x128xbf16, #tpu.memory_space<vmem>>, vector<1x128x128xbf16>
    %198 = vector.shape_cast %197 : vector<1x128x128xbf16> to vector<128x128xbf16>
    %199 = arith.truncf %196 : vector<64x128xf32> to vector<64x128xbf16>
    %cst_113 = arith.constant dense<0.000000e+00> : vector<64x128xf32>
    %200 = tpu.matmul %199, %198, %cst_113 {dimension_numbers = #tpu.dot_dimension_numbers<[1], [0], [0], [1], [0, 0, 1, 1], [], []>} : vector<64x128xbf16>, vector<128x128xbf16>, vector<64x128xf32> -> vector<64x128xf32>
    %c2_114 = arith.constant 2 : index
    %c0_115 = arith.constant 0 : index
    %c0_116 = arith.constant 0 : index
    %201 = vector.load %arg3[%c2_114, %c0_115, %c0_116] : memref<6x1x128xf32, #tpu.memory_space<vmem>>, vector<1x1x128xf32>
    %202 = vector.shape_cast %201 : vector<1x1x128xf32> to vector<1x128xf32>
    %c2_117 = arith.constant 2 : index
    %c0_118 = arith.constant 0 : index
    %c0_119 = arith.constant 0 : index
    %203 = vector.load %arg4[%c2_117, %c0_118, %c0_119] : memref<6x1x128xf32, #tpu.memory_space<vmem>>, vector<1x1x128xf32>
    %204 = vector.shape_cast %203 : vector<1x1x128xf32> to vector<1x128xf32>
    %cst_120 = arith.constant dense<0.000000e+00> : vector<128xf32>
    %205 = vector.multi_reduction <add>, %200, %cst_120 [0] : vector<64x128xf32> to vector<128xf32>
    %206 = vector.shape_cast %205 : vector<128xf32> to vector<1x128xf32>
    %cst_121 = arith.constant 6.400000e+01 : f32
    %207 = vector.broadcast %cst_121 : f32 to vector<1x128xf32>
    %208 = arith.divf %206, %207 : vector<1x128xf32>
    %209 = vector.broadcast %208 : vector<1x128xf32> to vector<64x128xf32>
    %210 = arith.subf %200, %209 : vector<64x128xf32>
    %211 = arith.mulf %210, %210 : vector<64x128xf32>
    %cst_122 = arith.constant dense<0.000000e+00> : vector<128xf32>
    %212 = vector.multi_reduction <add>, %211, %cst_122 [0] : vector<64x128xf32> to vector<128xf32>
    %213 = vector.shape_cast %212 : vector<128xf32> to vector<1x128xf32>
    %cst_123 = arith.constant 6.400000e+01 : f32
    %214 = vector.broadcast %cst_123 : f32 to vector<1x128xf32>
    %215 = arith.divf %213, %214 : vector<1x128xf32>
    %cst_124 = arith.constant 9.99999974E-6 : f32
    %216 = vector.broadcast %cst_124 : f32 to vector<1x128xf32>
    %217 = arith.addf %215, %216 : vector<1x128xf32>
    %218 = math.rsqrt %217 : vector<1x128xf32>
    %219 = arith.mulf %202, %218 : vector<1x128xf32>
    %220 = arith.mulf %208, %219 : vector<1x128xf32>
    %221 = arith.subf %204, %220 : vector<1x128xf32>
    %222 = vector.broadcast %219 : vector<1x128xf32> to vector<64x128xf32>
    %223 = arith.mulf %200, %222 : vector<64x128xf32>
    %224 = vector.broadcast %221 : vector<1x128xf32> to vector<64x128xf32>
    %225 = arith.addf %223, %224 : vector<64x128xf32>
    %cst_125 = arith.constant 0.000000e+00 : f32
    %226 = vector.broadcast %cst_125 : f32 to vector<64x128xf32>
    %227 = arith.maximumf %225, %226 : vector<64x128xf32>
    %c3_126 = arith.constant 3 : index
    %c0_127 = arith.constant 0 : index
    %c0_128 = arith.constant 0 : index
    %228 = vector.load %arg2[%c3_126, %c0_127, %c0_128] : memref<6x128x128xbf16, #tpu.memory_space<vmem>>, vector<1x128x128xbf16>
    %229 = vector.shape_cast %228 : vector<1x128x128xbf16> to vector<128x128xbf16>
    %230 = arith.truncf %227 : vector<64x128xf32> to vector<64x128xbf16>
    %cst_129 = arith.constant dense<0.000000e+00> : vector<64x128xf32>
    %231 = tpu.matmul %230, %229, %cst_129 {dimension_numbers = #tpu.dot_dimension_numbers<[1], [0], [0], [1], [0, 0, 1, 1], [], []>} : vector<64x128xbf16>, vector<128x128xbf16>, vector<64x128xf32> -> vector<64x128xf32>
    %c3_130 = arith.constant 3 : index
    %c0_131 = arith.constant 0 : index
    %c0_132 = arith.constant 0 : index
    %232 = vector.load %arg3[%c3_130, %c0_131, %c0_132] : memref<6x1x128xf32, #tpu.memory_space<vmem>>, vector<1x1x128xf32>
    %233 = vector.shape_cast %232 : vector<1x1x128xf32> to vector<1x128xf32>
    %c3_133 = arith.constant 3 : index
    %c0_134 = arith.constant 0 : index
    %c0_135 = arith.constant 0 : index
    %234 = vector.load %arg4[%c3_133, %c0_134, %c0_135] : memref<6x1x128xf32, #tpu.memory_space<vmem>>, vector<1x1x128xf32>
    %235 = vector.shape_cast %234 : vector<1x1x128xf32> to vector<1x128xf32>
    %cst_136 = arith.constant dense<0.000000e+00> : vector<128xf32>
    %236 = vector.multi_reduction <add>, %231, %cst_136 [0] : vector<64x128xf32> to vector<128xf32>
    %237 = vector.shape_cast %236 : vector<128xf32> to vector<1x128xf32>
    %cst_137 = arith.constant 6.400000e+01 : f32
    %238 = vector.broadcast %cst_137 : f32 to vector<1x128xf32>
    %239 = arith.divf %237, %238 : vector<1x128xf32>
    %240 = vector.broadcast %239 : vector<1x128xf32> to vector<64x128xf32>
    %241 = arith.subf %231, %240 : vector<64x128xf32>
    %242 = arith.mulf %241, %241 : vector<64x128xf32>
    %cst_138 = arith.constant dense<0.000000e+00> : vector<128xf32>
    %243 = vector.multi_reduction <add>, %242, %cst_138 [0] : vector<64x128xf32> to vector<128xf32>
    %244 = vector.shape_cast %243 : vector<128xf32> to vector<1x128xf32>
    %cst_139 = arith.constant 6.400000e+01 : f32
    %245 = vector.broadcast %cst_139 : f32 to vector<1x128xf32>
    %246 = arith.divf %244, %245 : vector<1x128xf32>
    %cst_140 = arith.constant 9.99999974E-6 : f32
    %247 = vector.broadcast %cst_140 : f32 to vector<1x128xf32>
    %248 = arith.addf %246, %247 : vector<1x128xf32>
    %249 = math.rsqrt %248 : vector<1x128xf32>
    %250 = arith.mulf %233, %249 : vector<1x128xf32>
    %251 = arith.mulf %239, %250 : vector<1x128xf32>
    %252 = arith.subf %235, %251 : vector<1x128xf32>
    %253 = vector.broadcast %250 : vector<1x128xf32> to vector<64x128xf32>
    %254 = arith.mulf %231, %253 : vector<64x128xf32>
    %255 = vector.broadcast %252 : vector<1x128xf32> to vector<64x128xf32>
    %256 = arith.addf %254, %255 : vector<64x128xf32>
    %cst_141 = arith.constant 0.000000e+00 : f32
    %257 = vector.broadcast %cst_141 : f32 to vector<64x128xf32>
    %258 = arith.maximumf %256, %257 : vector<64x128xf32>
    %c0_142 = arith.constant 0 : index
    %c0_143 = arith.constant 0 : index
    %259 = vector.load %arg6[%c0_142, %c0_143] : memref<16x64xbf16, #tpu.memory_space<vmem>>, vector<16x64xbf16>
    %260 = arith.truncf %258 : vector<64x128xf32> to vector<64x128xbf16>
    %cst_144 = arith.constant dense<0.000000e+00> : vector<16x128xf32>
    %261 = tpu.matmul %259, %260, %cst_144 {dimension_numbers = #tpu.dot_dimension_numbers<[1], [0], [0], [1], [0, 0, 1, 1], [], []>} : vector<16x64xbf16>, vector<64x128xbf16>, vector<16x128xf32> -> vector<16x128xf32>
    %c4 = arith.constant 4 : index
    %c0_145 = arith.constant 0 : index
    %c0_146 = arith.constant 0 : index
    %262 = vector.load %arg2[%c4, %c0_145, %c0_146] : memref<6x128x128xbf16, #tpu.memory_space<vmem>>, vector<1x128x128xbf16>
    %263 = vector.shape_cast %262 : vector<1x128x128xbf16> to vector<128x128xbf16>
    %264 = arith.truncf %261 : vector<16x128xf32> to vector<16x128xbf16>
    %cst_147 = arith.constant dense<0.000000e+00> : vector<16x128xf32>
    %265 = tpu.matmul %264, %263, %cst_147 {dimension_numbers = #tpu.dot_dimension_numbers<[1], [0], [0], [1], [0, 0, 1, 1], [], []>} : vector<16x128xbf16>, vector<128x128xbf16>, vector<16x128xf32> -> vector<16x128xf32>
    %c4_148 = arith.constant 4 : index
    %c0_149 = arith.constant 0 : index
    %c0_150 = arith.constant 0 : index
    %266 = vector.load %arg3[%c4_148, %c0_149, %c0_150] : memref<6x1x128xf32, #tpu.memory_space<vmem>>, vector<1x1x128xf32>
    %267 = vector.shape_cast %266 : vector<1x1x128xf32> to vector<1x128xf32>
    %c4_151 = arith.constant 4 : index
    %c0_152 = arith.constant 0 : index
    %c0_153 = arith.constant 0 : index
    %268 = vector.load %arg4[%c4_151, %c0_152, %c0_153] : memref<6x1x128xf32, #tpu.memory_space<vmem>>, vector<1x1x128xf32>
    %269 = vector.shape_cast %268 : vector<1x1x128xf32> to vector<1x128xf32>
    %cst_154 = arith.constant dense<0.000000e+00> : vector<128xf32>
    %270 = vector.multi_reduction <add>, %265, %cst_154 [0] : vector<16x128xf32> to vector<128xf32>
    %271 = vector.shape_cast %270 : vector<128xf32> to vector<1x128xf32>
    %cst_155 = arith.constant 1.600000e+01 : f32
    %272 = vector.broadcast %cst_155 : f32 to vector<1x128xf32>
    %273 = arith.divf %271, %272 : vector<1x128xf32>
    %274 = vector.broadcast %273 : vector<1x128xf32> to vector<16x128xf32>
    %275 = arith.subf %265, %274 : vector<16x128xf32>
    %276 = arith.mulf %275, %275 : vector<16x128xf32>
    %cst_156 = arith.constant dense<0.000000e+00> : vector<128xf32>
    %277 = vector.multi_reduction <add>, %276, %cst_156 [0] : vector<16x128xf32> to vector<128xf32>
    %278 = vector.shape_cast %277 : vector<128xf32> to vector<1x128xf32>
    %cst_157 = arith.constant 1.600000e+01 : f32
    %279 = vector.broadcast %cst_157 : f32 to vector<1x128xf32>
    %280 = arith.divf %278, %279 : vector<1x128xf32>
    %cst_158 = arith.constant 9.99999974E-6 : f32
    %281 = vector.broadcast %cst_158 : f32 to vector<1x128xf32>
    %282 = arith.addf %280, %281 : vector<1x128xf32>
    %283 = math.rsqrt %282 : vector<1x128xf32>
    %284 = arith.mulf %267, %283 : vector<1x128xf32>
    %285 = arith.mulf %273, %284 : vector<1x128xf32>
    %286 = arith.subf %269, %285 : vector<1x128xf32>
    %287 = vector.broadcast %284 : vector<1x128xf32> to vector<16x128xf32>
    %288 = arith.mulf %265, %287 : vector<16x128xf32>
    %289 = vector.broadcast %286 : vector<1x128xf32> to vector<16x128xf32>
    %290 = arith.addf %288, %289 : vector<16x128xf32>
    %cst_159 = arith.constant 0.000000e+00 : f32
    %291 = vector.broadcast %cst_159 : f32 to vector<16x128xf32>
    %292 = arith.maximumf %290, %291 : vector<16x128xf32>
    %c5 = arith.constant 5 : index
    %c0_160 = arith.constant 0 : index
    %c0_161 = arith.constant 0 : index
    %293 = vector.load %arg2[%c5, %c0_160, %c0_161] : memref<6x128x128xbf16, #tpu.memory_space<vmem>>, vector<1x128x128xbf16>
    %294 = vector.shape_cast %293 : vector<1x128x128xbf16> to vector<128x128xbf16>
    %295 = arith.truncf %292 : vector<16x128xf32> to vector<16x128xbf16>
    %cst_162 = arith.constant dense<0.000000e+00> : vector<16x128xf32>
    %296 = tpu.matmul %295, %294, %cst_162 {dimension_numbers = #tpu.dot_dimension_numbers<[1], [0], [0], [1], [0, 0, 1, 1], [], []>} : vector<16x128xbf16>, vector<128x128xbf16>, vector<16x128xf32> -> vector<16x128xf32>
    %c5_163 = arith.constant 5 : index
    %c0_164 = arith.constant 0 : index
    %c0_165 = arith.constant 0 : index
    %297 = vector.load %arg3[%c5_163, %c0_164, %c0_165] : memref<6x1x128xf32, #tpu.memory_space<vmem>>, vector<1x1x128xf32>
    %298 = vector.shape_cast %297 : vector<1x1x128xf32> to vector<1x128xf32>
    %c5_166 = arith.constant 5 : index
    %c0_167 = arith.constant 0 : index
    %c0_168 = arith.constant 0 : index
    %299 = vector.load %arg4[%c5_166, %c0_167, %c0_168] : memref<6x1x128xf32, #tpu.memory_space<vmem>>, vector<1x1x128xf32>
    %300 = vector.shape_cast %299 : vector<1x1x128xf32> to vector<1x128xf32>
    %cst_169 = arith.constant dense<0.000000e+00> : vector<128xf32>
    %301 = vector.multi_reduction <add>, %296, %cst_169 [0] : vector<16x128xf32> to vector<128xf32>
    %302 = vector.shape_cast %301 : vector<128xf32> to vector<1x128xf32>
    %cst_170 = arith.constant 1.600000e+01 : f32
    %303 = vector.broadcast %cst_170 : f32 to vector<1x128xf32>
    %304 = arith.divf %302, %303 : vector<1x128xf32>
    %305 = vector.broadcast %304 : vector<1x128xf32> to vector<16x128xf32>
    %306 = arith.subf %296, %305 : vector<16x128xf32>
    %307 = arith.mulf %306, %306 : vector<16x128xf32>
    %cst_171 = arith.constant dense<0.000000e+00> : vector<128xf32>
    %308 = vector.multi_reduction <add>, %307, %cst_171 [0] : vector<16x128xf32> to vector<128xf32>
    %309 = vector.shape_cast %308 : vector<128xf32> to vector<1x128xf32>
    %cst_172 = arith.constant 1.600000e+01 : f32
    %310 = vector.broadcast %cst_172 : f32 to vector<1x128xf32>
    %311 = arith.divf %309, %310 : vector<1x128xf32>
    %cst_173 = arith.constant 9.99999974E-6 : f32
    %312 = vector.broadcast %cst_173 : f32 to vector<1x128xf32>
    %313 = arith.addf %311, %312 : vector<1x128xf32>
    %314 = math.rsqrt %313 : vector<1x128xf32>
    %315 = arith.mulf %298, %314 : vector<1x128xf32>
    %316 = arith.mulf %304, %315 : vector<1x128xf32>
    %317 = arith.subf %300, %316 : vector<1x128xf32>
    %318 = vector.broadcast %315 : vector<1x128xf32> to vector<16x128xf32>
    %319 = arith.mulf %296, %318 : vector<16x128xf32>
    %320 = vector.broadcast %317 : vector<1x128xf32> to vector<16x128xf32>
    %321 = arith.addf %319, %320 : vector<16x128xf32>
    %cst_174 = arith.constant 0.000000e+00 : f32
    %322 = vector.broadcast %cst_174 : f32 to vector<16x128xf32>
    %323 = arith.maximumf %321, %322 : vector<16x128xf32>
    %c0_175 = arith.constant 0 : index
    %c0_176 = arith.constant 0 : index
    %324 = vector.load %arg7[%c0_175, %c0_176] : memref<2x16xbf16, #tpu.memory_space<vmem>>, vector<2x16xbf16>
    %325 = arith.truncf %323 : vector<16x128xf32> to vector<16x128xbf16>
    %cst_177 = arith.constant dense<0.000000e+00> : vector<2x128xf32>
    %326 = tpu.matmul %324, %325, %cst_177 {dimension_numbers = #tpu.dot_dimension_numbers<[1], [0], [0], [1], [0, 0, 1, 1], [], []>} : vector<2x16xbf16>, vector<16x128xbf16>, vector<2x128xf32> -> vector<2x128xf32>
    %c0_178 = arith.constant 0 : index
    %c0_179 = arith.constant 0 : index
    %327 = vector.load %arg8[%c0_178, %c0_179] : memref<128x128xbf16, #tpu.memory_space<vmem>>, vector<128x128xbf16>
    %328 = arith.truncf %326 : vector<2x128xf32> to vector<2x128xbf16>
    %cst_180 = arith.constant dense<0.000000e+00> : vector<2x128xf32>
    %329 = tpu.matmul %328, %327, %cst_180 {dimension_numbers = #tpu.dot_dimension_numbers<[1], [0], [0], [1], [0, 0, 1, 1], [], []>} : vector<2x128xbf16>, vector<128x128xbf16>, vector<2x128xf32> -> vector<2x128xf32>
    %c0_181 = arith.constant 0 : index
    %c0_182 = arith.constant 0 : index
    %330 = vector.load %arg9[%c0_181, %c0_182] : memref<1x128xf32, #tpu.memory_space<vmem>>, vector<1x128xf32>
    %331 = vector.broadcast %330 : vector<1x128xf32> to vector<2x128xf32>
    %332 = arith.addf %329, %331 : vector<2x128xf32>
    %c0_183 = arith.constant 0 : index
    %c0_184 = arith.constant 0 : index
    %333 = vector.load %arg10[%c0_183, %c0_184] : memref<1x128xf32, #tpu.memory_space<vmem>>, vector<1x128xf32>
    %c0_185 = arith.constant 0 : index
    %c0_186 = arith.constant 0 : index
    %334 = vector.load %arg11[%c0_185, %c0_186] : memref<1x128xf32, #tpu.memory_space<vmem>>, vector<1x128xf32>
    %cst_187 = arith.constant dense<0.000000e+00> : vector<128xf32>
    %335 = vector.multi_reduction <add>, %332, %cst_187 [0] : vector<2x128xf32> to vector<128xf32>
    %336 = vector.shape_cast %335 : vector<128xf32> to vector<1x128xf32>
    %cst_188 = arith.constant 2.000000e+00 : f32
    %337 = vector.broadcast %cst_188 : f32 to vector<1x128xf32>
    %338 = arith.divf %336, %337 : vector<1x128xf32>
    %339 = vector.broadcast %338 : vector<1x128xf32> to vector<2x128xf32>
    %340 = arith.subf %332, %339 : vector<2x128xf32>
    %341 = arith.mulf %340, %340 : vector<2x128xf32>
    %cst_189 = arith.constant dense<0.000000e+00> : vector<128xf32>
    %342 = vector.multi_reduction <add>, %341, %cst_189 [0] : vector<2x128xf32> to vector<128xf32>
    %343 = vector.shape_cast %342 : vector<128xf32> to vector<1x128xf32>
    %cst_190 = arith.constant 2.000000e+00 : f32
    %344 = vector.broadcast %cst_190 : f32 to vector<1x128xf32>
    %345 = arith.divf %343, %344 : vector<1x128xf32>
    %cst_191 = arith.constant 9.99999974E-6 : f32
    %346 = vector.broadcast %cst_191 : f32 to vector<1x128xf32>
    %347 = arith.addf %345, %346 : vector<1x128xf32>
    %348 = math.rsqrt %347 : vector<1x128xf32>
    %349 = arith.mulf %333, %348 : vector<1x128xf32>
    %350 = arith.mulf %338, %349 : vector<1x128xf32>
    %351 = arith.subf %334, %350 : vector<1x128xf32>
    %352 = vector.broadcast %349 : vector<1x128xf32> to vector<2x128xf32>
    %353 = arith.mulf %332, %352 : vector<2x128xf32>
    %354 = vector.broadcast %351 : vector<1x128xf32> to vector<2x128xf32>
    %355 = arith.addf %353, %354 : vector<2x128xf32>
    %cst_192 = arith.constant 0.000000e+00 : f32
    %356 = vector.broadcast %cst_192 : f32 to vector<2x128xf32>
    %357 = arith.maximumf %355, %356 : vector<2x128xf32>
    %c0_193 = arith.constant 0 : index
    %c0_194 = arith.constant 0 : index
    %358 = vector.load %arg12[%c0_193, %c0_194] : memref<128x128xbf16, #tpu.memory_space<vmem>>, vector<128x128xbf16>
    %359 = arith.truncf %357 : vector<2x128xf32> to vector<2x128xbf16>
    %cst_195 = arith.constant dense<0.000000e+00> : vector<2x128xf32>
    %360 = tpu.matmul %359, %358, %cst_195 {dimension_numbers = #tpu.dot_dimension_numbers<[1], [0], [0], [1], [0, 0, 1, 1], [], []>} : vector<2x128xbf16>, vector<128x128xbf16>, vector<2x128xf32> -> vector<2x128xf32>
    %c0_196 = arith.constant 0 : index
    %c0_197 = arith.constant 0 : index
    %361 = vector.load %arg13[%c0_196, %c0_197] : memref<1x128xf32, #tpu.memory_space<vmem>>, vector<1x128xf32>
    %362 = vector.broadcast %361 : vector<1x128xf32> to vector<2x128xf32>
    %363 = arith.addf %360, %362 : vector<2x128xf32>
    %c0_198 = arith.constant 0 : index
    %c0_199 = arith.constant 0 : index
    %364 = vector.load %arg14[%c0_198, %c0_199] : memref<2x128xf32, #tpu.memory_space<vmem>>, vector<2x128xf32>
    tpu.vector_store %arg14[%c0_198, %c0_199], %363 {strides = array<i32>} : memref<2x128xf32, #tpu.memory_space<vmem>>, vector<2x128xf32>,
    return
  }
  func.func @transform_0(%arg0: i32) -> (i32, i32, i32, i32, i32) {
    %c0_i32 = arith.constant 0 : i32
    %c0_i32_0 = arith.constant 0 : i32
    %c0_i32_1 = arith.constant 0 : i32
    %c0_i32_2 = arith.constant 0 : i32
    %c0_i32_3 = arith.constant 0 : i32
    %c0_i32_4 = arith.constant 0 : i32
    return %c0_i32, %c0_i32_0, %c0_i32_1, %c0_i32_2, %c0_i32_3 : i32, i32, i32, i32, i32
  }
  func.func @transform_1(%arg0: i32) -> (i32, i32, i32) {
    %c0_i32 = arith.constant 0 : i32
    %c0_i32_0 = arith.constant 0 : i32
    %c0_i32_1 = arith.constant 0 : i32
    %c0_i32_2 = arith.constant 0 : i32
    return %c0_i32, %c0_i32_0, %c0_i32_1 : i32, i32, i32
  }
  func.func @transform_2(%arg0: i32) -> (i32, i32, i32) {
    %c0_i32 = arith.constant 0 : i32
    %c0_i32_0 = arith.constant 0 : i32
    %c0_i32_1 = arith.constant 0 : i32
    %c0_i32_2 = arith.constant 0 : i32
    return %c0_i32, %c0_i32_0, %c0_i32_1 : i32, i32, i32
  }
  func.func @transform_3(%arg0: i32) -> (i32, i32, i32) {
    %c0_i32 = arith.constant 0 : i32
    %c0_i32_0 = arith.constant 0 : i32
    %c0_i32_1 = arith.constant 0 : i32
    %c0_i32_2 = arith.constant 0 : i32
    return %c0_i32, %c0_i32_0, %c0_i32_1 : i32, i32, i32
  }
  func.func @transform_4(%arg0: i32) -> (i32, i32) {
    %c0_i32 = arith.constant 0 : i32
    %c0_i32_0 = arith.constant 0 : i32
    %c0_i32_1 = arith.constant 0 : i32
    return %c0_i32, %c0_i32_0 : i32, i32
  }
  func.func @transform_5(%arg0: i32) -> (i32, i32) {
    %c0_i32 = arith.constant 0 : i32
    %c0_i32_0 = arith.constant 0 : i32
    %c0_i32_1 = arith.constant 0 : i32
    return %c0_i32, %c0_i32_0 : i32, i32
  }
  func.func @transform_6(%arg0: i32) -> (i32, i32) {
    %c0_i32 = arith.constant 0 : i32
    %c0_i32_0 = arith.constant 0 : i32
    %c0_i32_1 = arith.constant 0 : i32
    return %c0_i32, %c0_i32_0 : i32, i32
  }
  func.func @transform_7(%arg0: i32) -> (i32, i32) {
    %c0_i32 = arith.constant 0 : i32
    %c0_i32_0 = arith.constant 0 : i32
    %c0_i32_1 = arith.constant 0 : i32
    return %c0_i32, %c0_i32_0 : i32, i32
  }
  func.func @transform_8(%arg0: i32) -> (i32, i32) {
    %c0_i32 = arith.constant 0 : i32
    %c0_i32_0 = arith.constant 0 : i32
    %c0_i32_1 = arith.constant 0 : i32
    return %c0_i32, %c0_i32_0 : i32, i32
  }
  func.func @transform_9(%arg0: i32) -> (i32, i32) {
    %c0_i32 = arith.constant 0 : i32
    %c0_i32_0 = arith.constant 0 : i32
    %c0_i32_1 = arith.constant 0 : i32
    return %c0_i32, %c0_i32_0 : i32, i32
  }
  func.func @transform_10(%arg0: i32) -> (i32, i32) {
    %c0_i32 = arith.constant 0 : i32
    %c0_i32_0 = arith.constant 0 : i32
    %c0_i32_1 = arith.constant 0 : i32
    return %c0_i32, %c0_i32_0 : i32, i32
  }
  func.func @transform_11(%arg0: i32) -> (i32, i32) {
    %c0_i32 = arith.constant 0 : i32
    %c0_i32_0 = arith.constant 0 : i32
    %c0_i32_1 = arith.constant 0 : i32
    return %c0_i32, %c0_i32_0 : i32, i32
  }
  func.func @transform_12(%arg0: i32) -> (i32, i32) {
    %c0_i32 = arith.constant 0 : i32
    %c0_i32_0 = arith.constant 0 : i32
    %c0_i32_1 = arith.constant 0 : i32
    return %c0_i32, %c0_i32_0 : i32, i32
  }
  func.func @transform_13(%arg0: i32) -> (i32, i32) {
    %c0_i32 = arith.constant 0 : i32
    %c0_i32_0 = arith.constant 0 : i32
    %c0_i32_1 = arith.constant 0 : i32
    return %c0_i32, %c0_i32_0 : i32, i32
  }
}

</mosaic_0001>

<bundles_post_ra>
// kernel: osnet_forward.2
= control target key start
LH: loop header
LB: loop body
LE: loop exit
PB: predicated region body
PF: predicated region fallthrough
CT: control target
= control target key end

     0   :  { %v4057_v0 = vmov 0   ;;  %s6816_s1 = inlined_call_operand.vmem [shape: bf16[256,128], index: 1, kind: input, shape index: {}]   ;;  %s6817_s0 = inlined_call_operand.vmem [shape: bf16[1024,256], index: 0, kind: input, shape index: {}]   ;;  %s6818_s2 = inlined_call_operand.vmem [shape: f32[1,128], index: 2, kind: input, shape index: {}]   ;;  %s6819_s3 = inlined_call_operand.vmem [shape: f32[1,128], index: 3, kind: input, shape index: {}]   ;;  %s6820_s4 = inlined_call_operand.vmem [shape: bf16[1024,128], index: 4, kind: output, shape index: {}]  }
   0x1   :  { %914 = vmatprep.subr.bf16.mxu0 %v4057_v0  ;;  %v3847_v1 = vld [vmem:[%s6816_s1 + $0x38] sm:$0xff]   ;;  %3814 = vmatprep.subr.bf16.mxu1 %v4057_v0  ;;  %v3848_v2 = vld [vmem:[%s6816_s1 + $0x30] sm:$0xff]   ;;  %v3849_v3 = vld [vmem:[%s6816_s1 + $0x28] sm:$0xff]  }
   0x2   :  { %915 = vmatpush1.bf16.msra.mxu0 %v3847_v1  ;;  %3830 = vmatpush1.bf16.msra.mxu1 %v3847_v1  ;;  %v3850_v4 = vld [vmem:[%s6816_s1 + $0x20] sm:$0xff]   ;;  %v3851_v5 = vld [vmem:[%s6816_s1 + $0x18] sm:$0xff]   ;;  %v3852_v7 = vld [vmem:[%s6816_s1 + $0x10] sm:$0xff]  }
   0x3   :  { %916 = vmatprep.subr.bf16.mxu0 %v4057_v0  ;;  %3815 = vmatprep.subr.bf16.mxu1 %v4057_v0  ;;  %v3865_v6 = vld [vmem:[%s6817_s0 + $0x4] ss:$8 sps:$4 sm:$0xff]   ;;  %v3855_v10 = vld [vmem:[%s6816_s1 + $0x78] sm:$0xff]   ;;  %v3856_v11 = vld [vmem:[%s6816_s1 + $0x70] sm:$0xff]  }
   0x4   :  { %946 = vmatprep.mubr.bf16.mxu0 %v3865_v6  ;;  %v3853_v8 = vld [vmem:[%s6816_s1 + $0x8] sm:$0xff]   ;;  %v3854_v9 = vld [vmem:[%s6816_s1] sm:$0xff]   ;;  %v3859_v14 = vld [vmem:[%s6816_s1 + $0x58] sm:$0xff]  }
   0x5   :  { %v3857_v12 = vld [vmem:[%s6816_s1 + $0x68] sm:$0xff]   ;;  %v3858_v13 = vld [vmem:[%s6816_s1 + $0x60] sm:$0xff]   ;;  %v3860_v15 = vld [vmem:[%s6816_s1 + $0x50] sm:$0xff]  }
   0x6   :  { %917 = vmatpush1.bf16.msra.mxu0 %v3848_v2  ;;  %3831 = vmatpush1.bf16.msra.mxu1 %v3848_v2  ;;  %v3861_v16 = vld [vmem:[%s6816_s1 + $0x48] sm:$0xff]   ;;  %v3862_v18 = vld [vmem:[%s6816_s1 + $0x40] sm:$0xff]   ;;  %v3866_v21 = vld [vmem:[%s6817_s0 + $0x14] ss:$8 sps:$4 sm:$0xff]  }
   0x7   :  { %918 = vmatprep.subr.bf16.mxu0 %v4057_v0  ;;  %3816 = vmatprep.subr.bf16.mxu1 %v4057_v0  ;;  %v3913_v17 = vld [vmem:[%s6817_s0 + $0x204] ss:$8 sps:$4 sm:$0xff]   ;;  %v3863_v19 = vld [vmem:[%s6817_s0] ss:$8 sps:$4 sm:$0xff]   ;;  %v3917_v22 = vld [vmem:[%s6817_s0 + $0x214] ss:$8 sps:$4 sm:$0xff]  }
   0x8   :  { %v3911_v20 = vld [vmem:[%s6817_s0 + $0x200] ss:$8 sps:$4 sm:$0xff]   ;;  %1202 = vmatprep.mubr.bf16.mxu1 %v3913_v17  ;;  %v3868_v23 = vld [vmem:[%s6817_s0 + $0x10] ss:$8 sps:$4 sm:$0xff]   ;;  %v3869_v25 = vld [vmem:[%s6817_s0 + $0x24] ss:$8 sps:$4 sm:$0xff]  }
   0x9   :  { %v3919_v24 = vld [vmem:[%s6817_s0 + $0x210] ss:$8 sps:$4 sm:$0xff]   ;;  %v3923_v26 = vld [vmem:[%s6817_s0 + $0x224] ss:$8 sps:$4 sm:$0xff]   ;;  %v3871_v27 = vld [vmem:[%s6817_s0 + $0x20] ss:$8 sps:$4 sm:$0xff]  }
   0xa   :  { %919 = vmatpush1.bf16.msra.mxu0 %v3849_v3  ;;  %3832 = vmatpush1.bf16.msra.mxu1 %v3849_v3  ;;  %v3925_v28 = vld [vmem:[%s6817_s0 + $0x220] ss:$8 sps:$4 sm:$0xff]   ;;  %v3872_v29 = vld [vmem:[%s6817_s0 + $0x34] ss:$8 sps:$4 sm:$0xff]   ;;  %v3874_v31 = vld [vmem:[%s6817_s0 + $0x30] ss:$8 sps:$4 sm:$0xff]  }
   0xb   :  { %920 = vmatprep.subr.bf16.mxu0 %v4057_v0  ;;  %3817 = vmatprep.subr.bf16.mxu1 %v4057_v0  ;;  %v3929_v30 = vld [vmem:[%s6817_s0 + $0x234] ss:$8 sps:$4 sm:$0xff]   ;;  %v3931_v32 = vld [vmem:[%s6817_s0 + $0x230] ss:$8 sps:$4 sm:$0xff]   ;;  %v3875_v33 = vld [vmem:[%s6817_s0 + $0x44] ss:$8 sps:$4 sm:$0xff]  }
   0xc   :  { %v3935_v34 = vld [vmem:[%s6817_s0 + $0x244] ss:$8 sps:$4 sm:$0xff]   ;;  %v3877_v35 = vld [vmem:[%s6817_s0 + $0x40] ss:$8 sps:$4 sm:$0xff]   ;;  %v3878_v37 = vld [vmem:[%s6817_s0 + $0x54] ss:$8 sps:$4 sm:$0xff]  }
   0xd   :  { %v3937_v36 = vld [vmem:[%s6817_s0 + $0x240] ss:$8 sps:$4 sm:$0xff]   ;;  %v3941_v38 = vld [vmem:[%s6817_s0 + $0x254] ss:$8 sps:$4 sm:$0xff]   ;;  %v3880_v39 = vld [vmem:[%s6817_s0 + $0x50] ss:$8 sps:$4 sm:$0xff]  }
   0xe   :  { %921 = vmatpush1.bf16.msra.mxu0 %v3850_v4  ;;  %3833 = vmatpush1.bf16.msra.mxu1 %v3850_v4  ;;  %v3943_v40 = vld [vmem:[%s6817_s0 + $0x250] ss:$8 sps:$4 sm:$0xff]   ;;  %v3881_v41 = vld [vmem:[%s6817_s0 + $0x64] ss:$8 sps:$4 sm:$0xff]   ;;  %v3883_v43 = vld [vmem:[%s6817_s0 + $0x60] ss:$8 sps:$4 sm:$0xff]  }
   0xf   :  { %922 = vmatprep.subr.bf16.mxu0 %v4057_v0  ;;  %3818 = vmatprep.subr.bf16.mxu1 %v4057_v0  ;;  %v3947_v42 = vld [vmem:[%s6817_s0 + $0x264] ss:$8 sps:$4 sm:$0xff]   ;;  %v3949_v44 = vld [vmem:[%s6817_s0 + $0x260] ss:$8 sps:$4 sm:$0xff]   ;;  %v3884_v45 = vld [vmem:[%s6817_s0 + $0x74] ss:$8 sps:$4 sm:$0xff]  }
  0x10   :  { %v3953_v46 = vld [vmem:[%s6817_s0 + $0x274] ss:$8 sps:$4 sm:$0xff]   ;;  %v3886_v47 = vld [vmem:[%s6817_s0 + $0x70] ss:$8 sps:$4 sm:$0xff]   ;;  %v3887_v49 = vld [vmem:[%s6817_s0 + $0x84] ss:$8 sps:$4 sm:$0xff]  }
  0x11   :  { %v3955_v48 = vld [vmem:[%s6817_s0 + $0x270] ss:$8 sps:$4 sm:$0xff]   ;;  %v3959_v50 = vld [vmem:[%s6817_s0 + $0x284] ss:$8 sps:$4 sm:$0xff]   ;;  %v3889_v51 = vld [vmem:[%s6817_s0 + $0x80] ss:$8 sps:$4 sm:$0xff]  }
  0x12   :  { %923 = vmatpush1.bf16.msra.mxu0 %v3851_v5  ;;  %3834 = vmatpush1.bf16.msra.mxu1 %v3851_v5  ;;  %v3961_v52 = vld [vmem:[%s6817_s0 + $0x280] ss:$8 sps:$4 sm:$0xff]   ;;  %v3890_v53 = vld [vmem:[%s6817_s0 + $0x94] ss:$8 sps:$4 sm:$0xff]   ;;  %v3892_v55 = vld [vmem:[%s6817_s0 + $0x90] ss:$8 sps:$4 sm:$0xff]  }
  0x13   :  { %924 = vmatprep.subr.bf16.mxu0 %v4057_v0  ;;  %3819 = vmatprep.subr.bf16.mxu1 %v4057_v0  ;;  %v3965_v54 = vld [vmem:[%s6817_s0 + $0x294] ss:$8 sps:$4 sm:$0xff]   ;;  %v3967_v56 = vld [vmem:[%s6817_s0 + $0x290] ss:$8 sps:$4 sm:$0xff]   ;;  %v3893_v57 = vld [vmem:[%s6817_s0 + $0xa4] ss:$8 sps:$4 sm:$0xff]  }
  0x14   :  { %v3971_v58 = vld [vmem:[%s6817_s0 + $0x2a4] ss:$8 sps:$4 sm:$0xff]   ;;  %v3895_v59 = vld [vmem:[%s6817_s0 + $0xa0] ss:$8 sps:$4 sm:$0xff]   ;;  %v3896_v61 = vld [vmem:[%s6817_s0 + $0xb4] ss:$8 sps:$4 sm:$0xff]  }
  0x15   :  { %v3973_v60 = vld [vmem:[%s6817_s0 + $0x2a0] ss:$8 sps:$4 sm:$0xff]   ;;  %v3977_v62 = vld [vmem:[%s6817_s0 + $0x2b4] ss:$8 sps:$4 sm:$0xff]   ;;  %v3898_v63 = vld [vmem:[%s6817_s0 + $0xb0] ss:$8 sps:$4 sm:$0xff]  }
  0x16   :  { %925 = vmatpush1.bf16.msra.mxu0 %v3852_v7  ;;  %3835 = vmatpush1.bf16.msra.mxu1 %v3852_v7  ;;  %v3899_v1 = vld [vmem:[%s6817_s0 + $0xc4] ss:$8 sps:$4 sm:$0xff]   ;;  %v3901_v3 = vld [vmem:[%s6817_s0 + $0xc0] ss:$8 sps:$4 sm:$0xff]   ;;  %v3902_v5 = vld [vmem:[%s6817_s0 + $0xd4] ss:$8 sps:$4 sm:$0xff]  }
  0x17   :  { %926 = vmatprep.subr.bf16.mxu0 %v4057_v0  ;;  %3820 = vmatprep.subr.bf16.mxu1 %v4057_v0  ;;  %v3983_v2 = vld [vmem:[%s6817_s0 + $0x2c4] ss:$8 sps:$4 sm:$0xff]   ;;  %v3985_v4 = vld [vmem:[%s6817_s0 + $0x2c0] ss:$8 sps:$4 sm:$0xff]   ;;  %v3989_v6 = vld [vmem:[%s6817_s0 + $0x2d4] ss:$8 sps:$4 sm:$0xff]  }
  0x18   :  { %v3904_v7 = vld [vmem:[%s6817_s0 + $0xd0] ss:$8 sps:$4 sm:$0xff]   ;;  %v3914_v17 = vld [vmem:[%s6817_s0 + $0x104] ss:$8 sps:$4 sm:$0xff]  }
  0x1a   :  { %927 = vmatpush1.bf16.msra.mxu0 %v3853_v8  ;;  %3836 = vmatpush1.bf16.msra.mxu1 %v3853_v8  ;;  %v3991_v8 = vld [vmem:[%s6817_s0 + $0x2d0] ss:$8 sps:$4 sm:$0xff]  }
  0x1b   :  { %928 = vmatprep.subr.bf16.mxu0 %v4057_v0  ;;  %3821 = vmatprep.subr.bf16.mxu1 %v4057_v0 }
  0x1e   :  { %929 = vmatpush1.bf16.msra.mxu0 %v3854_v9  ;;  %3837 = vmatpush1.bf16.msra.mxu1 %v3854_v9  ;;  %v3905_v9 = vld [vmem:[%s6817_s0 + $0xe4] ss:$8 sps:$4 sm:$0xff]  }
  0x1f   :  { %930 = vmatprep.subr.bf16.mxu0 %v4057_v0  ;;  %3822 = vmatprep.subr.bf16.mxu1 %v4057_v0 }
  0x22   :  { %931 = vmatpush2.bf16.msra.mxu0 %v3855_v10  ;;  %3838 = vmatpush2.bf16.msra.mxu1 %v3855_v10  ;;  %v3995_v10 = vld [vmem:[%s6817_s0 + $0x2e4] ss:$8 sps:$4 sm:$0xff]  }
  0x23   :  { %932 = vmatprep.subr.bf16.mxu0 %v4057_v0  ;;  %3823 = vmatprep.subr.bf16.mxu1 %v4057_v0 }
  0x26   :  { %933 = vmatpush2.bf16.msra.mxu0 %v3856_v11  ;;  %3839 = vmatpush2.bf16.msra.mxu1 %v3856_v11  ;;  %v3907_v11 = vld [vmem:[%s6817_s0 + $0xe0] ss:$8 sps:$4 sm:$0xff]  }
  0x27   :  { %934 = vmatprep.subr.bf16.mxu0 %v4057_v0  ;;  %3824 = vmatprep.subr.bf16.mxu1 %v4057_v0 }
  0x2a   :  { %935 = vmatpush2.bf16.msra.mxu0 %v3857_v12  ;;  %3840 = vmatpush2.bf16.msra.mxu1 %v3857_v12  ;;  %v3997_v12 = vld [vmem:[%s6817_s0 + $0x2e0] ss:$8 sps:$4 sm:$0xff]  }
  0x2b   :  { %936 = vmatprep.subr.bf16.mxu0 %v4057_v0  ;;  %3825 = vmatprep.subr.bf16.mxu1 %v4057_v0 }
  0x2e   :  { %937 = vmatpush2.bf16.msra.mxu0 %v3858_v13  ;;  %3841 = vmatpush2.bf16.msra.mxu1 %v3858_v13  ;;  %v3908_v13 = vld [vmem:[%s6817_s0 + $0xf4] ss:$8 sps:$4 sm:$0xff]  }
  0x2f   :  { %938 = vmatprep.subr.bf16.mxu0 %v4057_v0  ;;  %3826 = vmatprep.subr.bf16.mxu1 %v4057_v0 }
  0x32   :  { %939 = vmatpush2.bf16.msra.mxu0 %v3859_v14  ;;  %3842 = vmatpush2.bf16.msra.mxu1 %v3859_v14  ;;  %v4001_v14 = vld [vmem:[%s6817_s0 + $0x2f4] ss:$8 sps:$4 sm:$0xff]  }
  0x33   :  { %940 = vmatprep.subr.bf16.mxu0 %v4057_v0  ;;  %3827 = vmatprep.subr.bf16.mxu1 %v4057_v0 }
  0x36   :  { %941 = vmatpush2.bf16.msra.mxu0 %v3860_v15  ;;  %3843 = vmatpush2.bf16.msra.mxu1 %v3860_v15  ;;  %v3910_v15 = vld [vmem:[%s6817_s0 + $0xf0] ss:$8 sps:$4 sm:$0xff]  }
  0x37   :  { %942 = vmatprep.subr.bf16.mxu0 %v4057_v0  ;;  %3828 = vmatprep.subr.bf16.mxu1 %v4057_v0 }
  0x3a   :  { %943 = vmatpush2.bf16.msra.mxu0 %v3861_v16  ;;  %3844 = vmatpush2.bf16.msra.mxu1 %v3861_v16  ;;  %v4003_v16 = vld [vmem:[%s6817_s0 + $0x2f0] ss:$8 sps:$4 sm:$0xff]  }
  0x3b   :  { %944 = vmatprep.subr.bf16.mxu0 %v4057_v0  ;;  %3829 = vmatprep.subr.bf16.mxu1 %v4057_v0  ;;  %v3979_v0 = vld [vmem:[%s6817_s0 + $0x2b0] ss:$8 sps:$4 sm:$0xff]  }
  0x3e   :  { %945 = vmatpush2.bf16.msra.mxu0 %v3862_v18  ;;  %3845 = vmatpush2.bf16.msra.mxu1 %v3862_v18  ;;  %v4007_v18 = vld [vmem:[%s6817_s0 + $0x304] ss:$8 sps:$4 sm:$0xff]  }
  0x41   :  { %947 = vmatmul.mubr.bf16.vlgmr.msra.gmra.mxu0 %v3863_v19  ;;  %1203 = vmatmul.mubr.bf16.vlgmr.msra.gmra.mxu1 %v3911_v20  ;;  %v3916_v19 = vld [vmem:[%s6817_s0 + $0x100] ss:$8 sps:$4 sm:$0xff]  }
  0x42   :  { %954 = vmatprep.mubr.bf16.mxu0 %v3866_v21  ;;  %1210 = vmatprep.mubr.bf16.mxu1 %v3917_v22  ;;  %v4009_v20 = vld [vmem:[%s6817_s0 + $0x300] ss:$8 sps:$4 sm:$0xff]   ;;  %v3920_v21 = vld [vmem:[%s6817_s0 + $0x114] ss:$8 sps:$4 sm:$0xff]  }
  0x43   :  { %v4010_v22 = vld [vmem:[%s6817_s0 + $0x314] ss:$8 sps:$4 sm:$0xff]  }
  0x49   :  { %955 = vmatmul.mubr.bf16.gmra.mxu0 %v3868_v23  ;;  %1211 = vmatmul.mubr.bf16.gmra.mxu1 %v3919_v24  ;;  %v3922_v23 = vld [vmem:[%s6817_s0 + $0x110] ss:$8 sps:$4 sm:$0xff]  }
  0x4a   :  { %962 = vmatprep.mubr.bf16.mxu0 %v3869_v25  ;;  %1218 = vmatprep.mubr.bf16.mxu1 %v3923_v26  ;;  %v4012_v24 = vld [vmem:[%s6817_s0 + $0x310] ss:$8 sps:$4 sm:$0xff]   ;;  %v3926_v25 = vld [vmem:[%s6817_s0 + $0x124] ss:$8 sps:$4 sm:$0xff]  }
  0x4b   :  { %v4013_v26 = vld [vmem:[%s6817_s0 + $0x324] ss:$8 sps:$4 sm:$0xff]  }
  0x51   :  { %963 = vmatmul.mubr.bf16.gmra.mxu0 %v3871_v27  ;;  %1219 = vmatmul.mubr.bf16.gmra.mxu1 %v3925_v28  ;;  %v3928_v27 = vld [vmem:[%s6817_s0 + $0x120] ss:$8 sps:$4 sm:$0xff]  }
  0x52   :  { %970 = vmatprep.mubr.bf16.mxu0 %v3872_v29  ;;  %1226 = vmatprep.mubr.bf16.mxu1 %v3929_v30  ;;  %v4015_v28 = vld [vmem:[%s6817_s0 + $0x320] ss:$8 sps:$4 sm:$0xff]   ;;  %v3932_v29 = vld [vmem:[%s6817_s0 + $0x134] ss:$8 sps:$4 sm:$0xff]  }
  0x53   :  { %v4016_v30 = vld [vmem:[%s6817_s0 + $0x334] ss:$8 sps:$4 sm:$0xff]  }
  0x59   :  { %971 = vmatmul.mubr.bf16.gmra.mxu0 %v3874_v31  ;;  %1227 = vmatmul.mubr.bf16.gmra.mxu1 %v3931_v32  ;;  %v3934_v31 = vld [vmem:[%s6817_s0 + $0x130] ss:$8 sps:$4 sm:$0xff]  }
  0x5a   :  { %978 = vmatprep.mubr.bf16.mxu0 %v3875_v33  ;;  %1234 = vmatprep.mubr.bf16.mxu1 %v3935_v34  ;;  %v4018_v32 = vld [vmem:[%s6817_s0 + $0x330] ss:$8 sps:$4 sm:$0xff]   ;;  %v3938_v33 = vld [vmem:[%s6817_s0 + $0x144] ss:$8 sps:$4 sm:$0xff]  }
  0x5b   :  { %v4019_v34 = vld [vmem:[%s6817_s0 + $0x344] ss:$8 sps:$4 sm:$0xff]  }
  0x61   :  { %979 = vmatmul.mubr.bf16.gmra.mxu0 %v3877_v35  ;;  %1235 = vmatmul.mubr.bf16.gmra.mxu1 %v3937_v36  ;;  %v3940_v35 = vld [vmem:[%s6817_s0 + $0x140] ss:$8 sps:$4 sm:$0xff]  }
  0x62   :  { %986 = vmatprep.mubr.bf16.mxu0 %v3878_v37  ;;  %1242 = vmatprep.mubr.bf16.mxu1 %v3941_v38  ;;  %v4021_v36 = vld [vmem:[%s6817_s0 + $0x340] ss:$8 sps:$4 sm:$0xff]   ;;  %v3944_v37 = vld [vmem:[%s6817_s0 + $0x154] ss:$8 sps:$4 sm:$0xff]  }
  0x63   :  { %v4022_v38 = vld [vmem:[%s6817_s0 + $0x354] ss:$8 sps:$4 sm:$0xff]  }
  0x69   :  { %987 = vmatmul.mubr.bf16.gmra.mxu0 %v3880_v39  ;;  %1243 = vmatmul.mubr.bf16.gmra.mxu1 %v3943_v40  ;;  %v3946_v39 = vld [vmem:[%s6817_s0 + $0x150] ss:$8 sps:$4 sm:$0xff]  }
  0x6a   :  { %994 = vmatprep.mubr.bf16.mxu0 %v3881_v41  ;;  %1250 = vmatprep.mubr.bf16.mxu1 %v3947_v42  ;;  %v4024_v40 = vld [vmem:[%s6817_s0 + $0x350] ss:$8 sps:$4 sm:$0xff]   ;;  %v3950_v41 = vld [vmem:[%s6817_s0 + $0x164] ss:$8 sps:$4 sm:$0xff]  }
  0x6b   :  { %v4025_v42 = vld [vmem:[%s6817_s0 + $0x364] ss:$8 sps:$4 sm:$0xff]  }
  0x71   :  { %995 = vmatmul.mubr.bf16.gmra.mxu0 %v3883_v43  ;;  %1251 = vmatmul.mubr.bf16.gmra.mxu1 %v3949_v44  ;;  %v3952_v43 = vld [vmem:[%s6817_s0 + $0x160] ss:$8 sps:$4 sm:$0xff]  }
  0x72   :  { %1002 = vmatprep.mubr.bf16.mxu0 %v3884_v45  ;;  %1258 = vmatprep.mubr.bf16.mxu1 %v3953_v46  ;;  %v4027_v44 = vld [vmem:[%s6817_s0 + $0x360] ss:$8 sps:$4 sm:$0xff]   ;;  %v3956_v45 = vld [vmem:[%s6817_s0 + $0x174] ss:$8 sps:$4 sm:$0xff]  }
  0x73   :  { %v4028_v46 = vld [vmem:[%s6817_s0 + $0x374] ss:$8 sps:$4 sm:$0xff]  }
  0x79   :  { %1003 = vmatmul.mubr.bf16.gmra.mxu0 %v3886_v47  ;;  %1259 = vmatmul.mubr.bf16.gmra.mxu1 %v3955_v48  ;;  %v3958_v47 = vld [vmem:[%s6817_s0 + $0x170] ss:$8 sps:$4 sm:$0xff]  }
  0x7a   :  { %1010 = vmatprep.mubr.bf16.mxu0 %v3887_v49  ;;  %1266 = vmatprep.mubr.bf16.mxu1 %v3959_v50  ;;  %v4030_v48 = vld [vmem:[%s6817_s0 + $0x370] ss:$8 sps:$4 sm:$0xff]   ;;  %v3962_v49 = vld [vmem:[%s6817_s0 + $0x184] ss:$8 sps:$4 sm:$0xff]  }
  0x7b   :  { %v4031_v50 = vld [vmem:[%s6817_s0 + $0x384] ss:$8 sps:$4 sm:$0xff]  }
  0x81   :  { %1011 = vmatmul.mubr.bf16.gmra.mxu0 %v3889_v51  ;;  %1267 = vmatmul.mubr.bf16.gmra.mxu1 %v3961_v52  ;;  %v3964_v51 = vld [vmem:[%s6817_s0 + $0x180] ss:$8 sps:$4 sm:$0xff]  }
  0x82   :  { %1018 = vmatprep.mubr.bf16.mxu0 %v3890_v53  ;;  %1274 = vmatprep.mubr.bf16.mxu1 %v3965_v54  ;;  %v4033_v52 = vld [vmem:[%s6817_s0 + $0x380] ss:$8 sps:$4 sm:$0xff]   ;;  %v3968_v53 = vld [vmem:[%s6817_s0 + $0x194] ss:$8 sps:$4 sm:$0xff]  }
  0x83   :  { %v4034_v54 = vld [vmem:[%s6817_s0 + $0x394] ss:$8 sps:$4 sm:$0xff]  }
  0x89   :  { %1019 = vmatmul.mubr.bf16.gmra.mxu0 %v3892_v55  ;;  %1275 = vmatmul.mubr.bf16.gmra.mxu1 %v3967_v56 }
  0x8a   :  { %1026 = vmatprep.mubr.bf16.mxu0 %v3893_v57  ;;  %1282 = vmatprep.mubr.bf16.mxu1 %v3971_v58 }
  0x91   :  { %1027 = vmatmul.mubr.bf16.gmra.mxu0 %v3895_v59  ;;  %1283 = vmatmul.mubr.bf16.gmra.mxu1 %v3973_v60  ;;  %v3970_v60 = vld [vmem:[%s6817_s0 + $0x190] ss:$8 sps:$4 sm:$0xff]  }
  0x92   :  { %1034 = vmatprep.mubr.bf16.mxu0 %v3896_v61  ;;  %1290 = vmatprep.mubr.bf16.mxu1 %v3977_v62  ;;  %v4036_v62 = vld [vmem:[%s6817_s0 + $0x390] ss:$8 sps:$4 sm:$0xff]  }
  0x99   :  { %1035 = vmatmul.mubr.bf16.gmra.mxu0 %v3898_v63  ;;  %1291 = vmatmul.mubr.bf16.gmra.mxu1 %v3979_v0  ;;  %v3974_v63 = vld [vmem:[%s6817_s0 + $0x1a4] ss:$8 sps:$4 sm:$0xff]  }
  0x9a   :  { %1042 = vmatprep.mubr.bf16.mxu0 %v3899_v1  ;;  %1298 = vmatprep.mubr.bf16.mxu1 %v3983_v2  ;;  %v4037_v2 = vld [vmem:[%s6817_s0 + $0x3a4] ss:$8 sps:$4 sm:$0xff]  }
  0xa1   :  { %1043 = vmatmul.mubr.bf16.gmra.mxu0 %v3901_v3  ;;  %1299 = vmatmul.mubr.bf16.gmra.mxu1 %v3985_v4 }
  0xa2   :  { %1050 = vmatprep.mubr.bf16.mxu0 %v3902_v5  ;;  %1306 = vmatprep.mubr.bf16.mxu1 %v3989_v6 }
  0xa9   :  { %1051 = vmatmul.mubr.bf16.gmra.mxu0 %v3904_v7  ;;  %1307 = vmatmul.mubr.bf16.gmra.mxu1 %v3991_v8  ;;  %v3976_v8 = vld [vmem:[%s6817_s0 + $0x1a0] ss:$8 sps:$4 sm:$0xff]  }
  0xaa   :  { %1058 = vmatprep.mubr.bf16.mxu0 %v3905_v9  ;;  %1314 = vmatprep.mubr.bf16.mxu1 %v3995_v10  ;;  %v4039_v10 = vld [vmem:[%s6817_s0 + $0x3a0] ss:$8 sps:$4 sm:$0xff]  }
  0xb1   :  { %1059 = vmatmul.mubr.bf16.gmra.mxu0 %v3907_v11  ;;  %1315 = vmatmul.mubr.bf16.gmra.mxu1 %v3997_v12  ;;  %v3980_v11 = vld [vmem:[%s6817_s0 + $0x1b4] ss:$8 sps:$4 sm:$0xff]  }
  0xb2   :  { %1066 = vmatprep.mubr.bf16.mxu0 %v3908_v13  ;;  %1322 = vmatprep.mubr.bf16.mxu1 %v4001_v14  ;;  %v4040_v14 = vld [vmem:[%s6817_s0 + $0x3b4] ss:$8 sps:$4 sm:$0xff]  }
  0xb9   :  { %1067 = vmatmul.mubr.bf16.gmra.mxu0 %v3910_v15  ;;  %1323 = vmatmul.mubr.bf16.gmra.mxu1 %v4003_v16 }
  0xba   :  { %1074 = vmatprep.mubr.bf16.mxu0 %v3914_v17  ;;  %1330 = vmatprep.mubr.bf16.mxu1 %v4007_v18 }
  0xc1   :  { %1075 = vmatmul.mubr.bf16.gmra.mxu0 %v3916_v19  ;;  %1331 = vmatmul.mubr.bf16.gmra.mxu1 %v4009_v20  ;;  %v3982_v20 = vld [vmem:[%s6817_s0 + $0x1b0] ss:$8 sps:$4 sm:$0xff]  }
  0xc2   :  { %1082 = vmatprep.mubr.bf16.mxu0 %v3920_v21  ;;  %1338 = vmatprep.mubr.bf16.mxu1 %v4010_v22  ;;  %v4042_v22 = vld [vmem:[%s6817_s0 + $0x3b0] ss:$8 sps:$4 sm:$0xff]  }
  0xc9   :  { %1083 = vmatmul.mubr.bf16.gmra.mxu0 %v3922_v23  ;;  %1339 = vmatmul.mubr.bf16.gmra.mxu1 %v4012_v24  ;;  %v3988_v23 = vld [vmem:[%s6817_s0 + $0x1c4] ss:$8 sps:$4 sm:$0xff]  }
  0xca   :  { %1090 = vmatprep.mubr.bf16.mxu0 %v3926_v25  ;;  %1346 = vmatprep.mubr.bf16.mxu1 %v4013_v26  ;;  %v4045_v26 = vld [vmem:[%s6817_s0 + $0x3c4] ss:$8 sps:$4 sm:$0xff]  }
  0xd1   :  { %1091 = vmatmul.mubr.bf16.gmra.mxu0 %v3928_v27  ;;  %1347 = vmatmul.mubr.bf16.gmra.mxu1 %v4015_v28 }
  0xd2   :  { %1098 = vmatprep.mubr.bf16.mxu0 %v3932_v29  ;;  %1354 = vmatprep.mubr.bf16.mxu1 %v4016_v30 }
  0xd9   :  { %1099 = vmatmul.mubr.bf16.gmra.mxu0 %v3934_v31  ;;  %1355 = vmatmul.mubr.bf16.gmra.mxu1 %v4018_v32  ;;  %v3986_v32 = vld [vmem:[%s6817_s0 + $0x1c0] ss:$8 sps:$4 sm:$0xff]  }
  0xda   :  { %1106 = vmatprep.mubr.bf16.mxu0 %v3938_v33  ;;  %1362 = vmatprep.mubr.bf16.mxu1 %v4019_v34  ;;  %v4043_v34 = vld [vmem:[%s6817_s0 + $0x3c0] ss:$8 sps:$4 sm:$0xff]  }
  0xe1   :  { %1107 = vmatmul.mubr.bf16.gmra.mxu0 %v3940_v35  ;;  %1363 = vmatmul.mubr.bf16.gmra.mxu1 %v4021_v36  ;;  %v3994_v35 = vld [vmem:[%s6817_s0 + $0x1d4] ss:$8 sps:$4 sm:$0xff]  }
  0xe2   :  { %1114 = vmatprep.mubr.bf16.mxu0 %v3944_v37  ;;  %1370 = vmatprep.mubr.bf16.mxu1 %v4022_v38  ;;  %v4048_v38 = vld [vmem:[%s6817_s0 + $0x3d4] ss:$8 sps:$4 sm:$0xff]  }
  0xe9   :  { %1115 = vmatmul.mubr.bf16.gmra.mxu0 %v3946_v39  ;;  %1371 = vmatmul.mubr.bf16.gmra.mxu1 %v4024_v40 }
  0xea   :  { %1122 = vmatprep.mubr.bf16.mxu0 %v3950_v41  ;;  %1378 = vmatprep.mubr.bf16.mxu1 %v4025_v42 }
  0xf1   :  { %1123 = vmatmul.mubr.bf16.gmra.mxu0 %v3952_v43  ;;  %1379 = vmatmul.mubr.bf16.gmra.mxu1 %v4027_v44  ;;  %v3992_v44 = vld [vmem:[%s6817_s0 + $0x1d0] ss:$8 sps:$4 sm:$0xff]  }
  0xf2   :  { %1130 = vmatprep.mubr.bf16.mxu0 %v3956_v45  ;;  %1386 = vmatprep.mubr.bf16.mxu1 %v4028_v46  ;;  %v4046_v46 = vld [vmem:[%s6817_s0 + $0x3d0] ss:$8 sps:$4 sm:$0xff]  }
  0xf9   :  { %1131 = vmatmul.mubr.bf16.gmra.mxu0 %v3958_v47  ;;  %1387 = vmatmul.mubr.bf16.gmra.mxu1 %v4030_v48  ;;  %v4000_v47 = vld [vmem:[%s6817_s0 + $0x1e4] ss:$8 sps:$4 sm:$0xff]  }
  0xfa   :  { %1138 = vmatprep.mubr.bf16.mxu0 %v3962_v49  ;;  %1394 = vmatprep.mubr.bf16.mxu1 %v4031_v50  ;;  %v4051_v50 = vld [vmem:[%s6817_s0 + $0x3e4] ss:$8 sps:$4 sm:$0xff]  }
 0x101   :  { %v4469_v55 = vpop.f32.mrf.mxu0  ;;  %1139 = vmatmul.mubr.bf16.gmra.mxu0 %v3964_v51  ;;  %v4471_v56 = vpop.f32.mrf.mxu1  ;;  %1395 = vmatmul.mubr.bf16.gmra.mxu1 %v4033_v52 }
 0x102   :  { %7123 = vst [vmem:[#allocation2_spill] sm:$0xff] %v4469_v55  ;;  %1146 = vmatprep.mubr.bf16.mxu0 %v3968_v53  ;;  %1402 = vmatprep.mubr.bf16.mxu1 %v4034_v54 }
 0x103   :  { %v950_v57 = vpop.f32.mrf.mxu0  ;;  %v1206_v58 = vpop.f32.mrf.mxu1 }
 0x104   :  { %v3998_v58 = vld [vmem:[%s6817_s0 + $0x1e0] ss:$8 sps:$4 sm:$0xff]  }
 0x105   :  { %v4473_v59 = vpop.f32.mrf.mxu0  ;;  %v4478_v61 = vpop.f32.mrf.mxu1 }
 0x106   :  { %7124 = vst [vmem:[#allocation3_spill] sm:$0xff] %v4473_v59 }
 0x107   :  { %v953_v0 = vpop.f32.mrf.mxu0  ;;  %v1209_v1 = vpop.f32.mrf.mxu1 }
 0x109   :  { %v4489_v3 = vpop.f32.mrf.mxu0  ;;  %1147 = vmatmul.mubr.bf16.gmra.mxu0 %v3970_v60  ;;  %v4491_v4 = vpop.f32.mrf.mxu1  ;;  %1403 = vmatmul.mubr.bf16.gmra.mxu1 %v4036_v62  ;;  %v4049_v62 = vld [vmem:[%s6817_s0 + $0x3e0] ss:$8 sps:$4 sm:$0xff]  }
 0x10a   :  { %7125 = vst [vmem:[#allocation4_spill] sm:$0xff] %v4489_v3  ;;  %1154 = vmatprep.mubr.bf16.mxu0 %v3974_v63  ;;  %1410 = vmatprep.mubr.bf16.mxu1 %v4037_v2  ;;  %v4006_v63 = vld [vmem:[%s6817_s0 + $0x1f4] ss:$8 sps:$4 sm:$0xff]  }
 0x10b   :  { %v958_v5 = vpop.f32.mrf.mxu0  ;;  %v1214_v6 = vpop.f32.mrf.mxu1  ;;  %v4054_v2 = vld [vmem:[%s6817_s0 + $0x3f4] ss:$8 sps:$4 sm:$0xff]  }
 0x10d   :  { %v4493_v7 = vpop.f32.mrf.mxu0  ;;  %v4498_v9 = vpop.f32.mrf.mxu1 }
 0x10e   :  { %7126 = vst [vmem:[#allocation5_spill] sm:$0xff] %v4493_v7 }
 0x10f   :  { %v961_v12 = vpop.f32.mrf.mxu0  ;;  %v1217_v13 = vpop.f32.mrf.mxu1 }
 0x110   :  { %v4004_v12 = vld [vmem:[%s6817_s0 + $0x1f0] ss:$8 sps:$4 sm:$0xff]  }
 0x111   :  { %v4509_v15 = vpop.f32.mrf.mxu0  ;;  %1155 = vmatmul.mubr.bf16.gmra.mxu0 %v3976_v8  ;;  %v4511_v16 = vpop.f32.mrf.mxu1  ;;  %1411 = vmatmul.mubr.bf16.gmra.mxu1 %v4039_v10 }
 0x112   :  { %7127 = vst [vmem:[#allocation6_spill] sm:$0xff] %v4509_v15  ;;  %1162 = vmatprep.mubr.bf16.mxu0 %v3980_v11  ;;  %1418 = vmatprep.mubr.bf16.mxu1 %v4040_v14  ;;  %v4052_v14 = vld [vmem:[%s6817_s0 + $0x3f0] ss:$8 sps:$4 sm:$0xff]  }
 0x113   :  { %v966_v17 = vpop.f32.mrf.mxu0  ;;  %v1222_v18 = vpop.f32.mrf.mxu1 }
 0x115   :  { %v4513_v19 = vpop.f32.mrf.mxu0  ;;  %v4518_v21 = vpop.f32.mrf.mxu1 }
 0x116   :  { %7128 = vst [vmem:[#allocation7_spill] sm:$0xff] %v4513_v19  ;;  %7129 = vst [vmem:[#allocation8_spill] sm:$0xff] %v4518_v21 }
 0x117   :  { %v969_v24 = vpop.f32.mrf.mxu0  ;;  %v1225_v25 = vpop.f32.mrf.mxu1 }
 0x119   :  { %v4529_v27 = vpop.f32.mrf.mxu0  ;;  %1163 = vmatmul.mubr.bf16.gmra.mxu0 %v3982_v20  ;;  %v4531_v28 = vpop.f32.mrf.mxu1  ;;  %1419 = vmatmul.mubr.bf16.gmra.mxu1 %v4042_v22 }
 0x11a   :  { %7130 = vst [vmem:[#allocation9_spill] sm:$0xff] %v4529_v27  ;;  %7131 = vst [vmem:[#allocation10_spill] sm:$0xff] %v4531_v28  ;;  %1170 = vmatprep.mubr.bf16.mxu0 %v3988_v23  ;;  %1426 = vmatprep.mubr.bf16.mxu1 %v4045_v26 }
 0x11b   :  { %v974_v29 = vpop.f32.mrf.mxu0  ;;  %v1230_v30 = vpop.f32.mrf.mxu1 }
 0x11d   :  { %v4533_v31 = vpop.f32.mrf.mxu0  ;;  %v4538_v33 = vpop.f32.mrf.mxu1 }
 0x11e   :  { %7132 = vst [vmem:[#allocation11_spill] sm:$0xff] %v4533_v31  ;;  %7133 = vst [vmem:[#allocation12_spill] sm:$0xff] %v4538_v33 }
 0x11f   :  { %v977_v36 = vpop.f32.mrf.mxu0  ;;  %v1233_v37 = vpop.f32.mrf.mxu1 }
 0x121   :  { %v4549_v39 = vpop.f32.mrf.mxu0  ;;  %1171 = vmatmul.mubr.bf16.gmra.mxu0 %v3986_v32  ;;  %v4551_v40 = vpop.f32.mrf.mxu1  ;;  %1427 = vmatmul.mubr.bf16.gmra.mxu1 %v4043_v34 }
 0x122   :  { %7134 = vst [vmem:[#allocation13_spill] sm:$0xff] %v4549_v39  ;;  %7135 = vst [vmem:[#allocation14_spill] sm:$0xff] %v4551_v40  ;;  %1178 = vmatprep.mubr.bf16.mxu0 %v3994_v35  ;;  %1434 = vmatprep.mubr.bf16.mxu1 %v4048_v38 }
 0x123   :  { %v982_v41 = vpop.f32.mrf.mxu0  ;;  %v1238_v42 = vpop.f32.mrf.mxu1 }
 0x125   :  { %v4553_v43 = vpop.f32.mrf.mxu0  ;;  %v4558_v45 = vpop.f32.mrf.mxu1 }
 0x126   :  { %7136 = vst [vmem:[#allocation15_spill] sm:$0xff] %v4553_v43  ;;  %7137 = vst [vmem:[#allocation16_spill] sm:$0xff] %v4558_v45 }
 0x127   :  { %v985_v48 = vpop.f32.mrf.mxu0  ;;  %v1241_v49 = vpop.f32.mrf.mxu1 }
 0x129   :  { %v4569_v51 = vpop.f32.mrf.mxu0  ;;  %1179 = vmatmul.mubr.bf16.gmra.mxu0 %v3992_v44  ;;  %v4571_v52 = vpop.f32.mrf.mxu1  ;;  %1435 = vmatmul.mubr.bf16.gmra.mxu1 %v4046_v46 }
 0x12a   :  { %7138 = vst [vmem:[#allocation17_spill] sm:$0xff] %v4569_v51  ;;  %7139 = vst [vmem:[#allocation18_spill] sm:$0xff] %v4571_v52  ;;  %1186 = vmatprep.mubr.bf16.mxu0 %v4000_v47  ;;  %1442 = vmatprep.mubr.bf16.mxu1 %v4051_v50 }
 0x12b   :  { %v990_v53 = vpop.f32.mrf.mxu0  ;;  %v1246_v54 = vpop.f32.mrf.mxu1 }
 0x12d   :  { %v4573_v57 = vpop.f32.mrf.mxu0  ;;  %v4578_v60 = vpop.f32.mrf.mxu1 }
 0x12e   :  { %7140 = vst [vmem:[#allocation19_spill] sm:$0xff] %v4573_v57  ;;  %7141 = vst [vmem:[#allocation20_spill] sm:$0xff] %v4578_v60 }
 0x12f   :  { %v993_v0 = vpop.f32.mrf.mxu0  ;;  %v1249_v1 = vpop.f32.mrf.mxu1 }
 0x131   :  { %v4589_v5 = vpop.f32.mrf.mxu0  ;;  %1187 = vmatmul.mubr.bf16.gmra.mxu0 %v3998_v58  ;;  %v4591_v6 = vpop.f32.mrf.mxu1  ;;  %1443 = vmatmul.mubr.bf16.gmra.mxu1 %v4049_v62 }
 0x132   :  { %7142 = vst [vmem:[#allocation21_spill] sm:$0xff] %v4589_v5  ;;  %7143 = vst [vmem:[#allocation22_spill] sm:$0xff] %v4591_v6  ;;  %1194 = vmatprep.mubr.bf16.mxu0 %v4006_v63  ;;  %1450 = vmatprep.mubr.bf16.mxu1 %v4054_v2 }
 0x133   :  { %v998_v8 = vpop.f32.mrf.mxu0  ;;  %v1254_v10 = vpop.f32.mrf.mxu1 }
 0x135   :  { %v4593_v11 = vpop.f32.mrf.mxu0  ;;  %v4598_v13 = vpop.f32.mrf.mxu1 }
 0x136   :  { %7144 = vst [vmem:[#allocation23_spill] sm:$0xff] %v4593_v11  ;;  %7145 = vst [vmem:[#allocation24_spill] sm:$0xff] %v4598_v13 }
 0x137   :  { %v1001_v17 = vpop.f32.mrf.mxu0  ;;  %v1257_v18 = vpop.f32.mrf.mxu1 }
 0x139   :  { %v4603_v20 = vpop.f32.mrf.mxu0  ;;  %1195 = vmatmul.mubr.bf16.gmra.mxu0 %v4004_v12  ;;  %v4605_v22 = vpop.f32.mrf.mxu1  ;;  %1451 = vmatmul.mubr.bf16.gmra.mxu1 %v4052_v14 }
 0x13a   :  { %7146 = vst [vmem:[#allocation25_spill] sm:$0xff] %v4603_v20  ;;  %7147 = vst [vmem:[#allocation26_spill] sm:$0xff] %v4605_v22 }
 0x13b   :  { %v1006_v23 = vpop.f32.mrf.mxu0  ;;  %v1262_v24 = vpop.f32.mrf.mxu1 }
 0x13d   :  { %v4607_v25 = vpop.f32.mrf.mxu0  ;;  %v4609_v26 = vpop.f32.mrf.mxu1 }
 0x13e   :  { %7148 = vst [vmem:[#allocation27_spill] sm:$0xff] %v4607_v25  ;;  %7149 = vst [vmem:[#allocation28_spill] sm:$0xff] %v4609_v26 }
 0x13f   :  { %v1009_v29 = vpop.f32.mrf.mxu0  ;;  %v1265_v30 = vpop.f32.mrf.mxu1 }
 0x141   :  { %v4611_v32 = vpop.f32.mrf.mxu0  ;;  %v4613_v34 = vpop.f32.mrf.mxu1 }
 0x142   :  { %7150 = vst [vmem:[#allocation29_spill] sm:$0xff] %v4611_v32  ;;  %7151 = vst [vmem:[#allocation30_spill] sm:$0xff] %v4613_v34 }
 0x143   :  { %v1014_v35 = vpop.f32.mrf.mxu0  ;;  %v1270_v36 = vpop.f32.mrf.mxu1 }
 0x145   :  { %v4615_v37 = vpop.f32.mrf.mxu0  ;;  %v4617_v38 = vpop.f32.mrf.mxu1 }
 0x146   :  { %7152 = vst [vmem:[#allocation31_spill] sm:$0xff] %v4615_v37  ;;  %7153 = vst [vmem:[#allocation32_spill] sm:$0xff] %v4617_v38 }
 0x147   :  { %v1017_v41 = vpop.f32.mrf.mxu0  ;;  %v1273_v42 = vpop.f32.mrf.mxu1 }
 0x149   :  { %v4619_v44 = vpop.f32.mrf.mxu0  ;;  %v4621_v46 = vpop.f32.mrf.mxu1 }
 0x14a   :  { %7154 = vst [vmem:[#allocation33_spill] sm:$0xff] %v4619_v44  ;;  %7155 = vst [vmem:[#allocation34_spill] sm:$0xff] %v4621_v46 }
 0x14b   :  { %v1022_v47 = vpop.f32.mrf.mxu0  ;;  %v1278_v48 = vpop.f32.mrf.mxu1 }
 0x14d   :  { %v4623_v49 = vpop.f32.mrf.mxu0  ;;  %v4625_v50 = vpop.f32.mrf.mxu1 }
 0x14e   :  { %7156 = vst [vmem:[#allocation35_spill] sm:$0xff] %v4623_v49  ;;  %7157 = vst [vmem:[#allocation36_spill] sm:$0xff] %v4625_v50 }
 0x14f   :  { %v1025_v53 = vpop.f32.mrf.mxu0  ;;  %v1281_v54 = vpop.f32.mrf.mxu1 }
 0x151   :  { %v4627_v58 = vpop.f32.mrf.mxu0  ;;  %v4629_v62 = vpop.f32.mrf.mxu1 }
 0x152   :  { %7158 = vst [vmem:[#allocation37_spill] sm:$0xff] %v4627_v58  ;;  %7159 = vst [vmem:[#allocation38_spill] sm:$0xff] %v4629_v62 }
 0x153   :  { %v1030_v63 = vpop.f32.mrf.mxu0  ;;  %v1286_v0 = vpop.f32.mrf.mxu1 }
 0x155   :  { %v4631_v1 = vpop.f32.mrf.mxu0  ;;  %v4633_v2 = vpop.f32.mrf.mxu1 }
 0x156   :  { %7160 = vst [vmem:[#allocation39_spill] sm:$0xff] %v4631_v1  ;;  %7161 = vst [vmem:[#allocation40_spill] sm:$0xff] %v4633_v2 }
 0x157   :  { %v1033_v8 = vpop.f32.mrf.mxu0  ;;  %v1289_v10 = vpop.f32.mrf.mxu1 }
 0x159   :  { %v4635_v12 = vpop.f32.mrf.mxu0  ;;  %v4637_v14 = vpop.f32.mrf.mxu1 }
 0x15a   :  { %7162 = vst [vmem:[#allocation41_spill] sm:$0xff] %v4635_v12  ;;  %7163 = vst [vmem:[#allocation42_spill] sm:$0xff] %v4637_v14 }
 0x15b   :  { %v1038_v17 = vpop.f32.mrf.mxu0  ;;  %v1294_v18 = vpop.f32.mrf.mxu1 }
 0x15d   :  { %v4639_v23 = vpop.f32.mrf.mxu0  ;;  %v4641_v24 = vpop.f32.mrf.mxu1 }
 0x15e   :  { %7164 = vst [vmem:[#allocation43_spill] sm:$0xff] %v4639_v23  ;;  %7165 = vst [vmem:[#allocation44_spill] sm:$0xff] %v4641_v24 }
 0x15f   :  { %v1041_v29 = vpop.f32.mrf.mxu0  ;;  %v1297_v30 = vpop.f32.mrf.mxu1 }
 0x161   :  { %v4643_v35 = vpop.f32.mrf.mxu0  ;;  %v4645_v36 = vpop.f32.mrf.mxu1 }
 0x162   :  { %7166 = vst [vmem:[#allocation45_spill] sm:$0xff] %v4643_v35  ;;  %7167 = vst [vmem:[#allocation46_spill] sm:$0xff] %v4645_v36 }
 0x163   :  { %v1046_v41 = vpop.f32.mrf.mxu0  ;;  %v1302_v42 = vpop.f32.mrf.mxu1 }
 0x165   :  { %v4647_v47 = vpop.f32.mrf.mxu0  ;;  %v4649_v48 = vpop.f32.mrf.mxu1 }
 0x166   :  { %7168 = vst [vmem:[#allocation47_spill] sm:$0xff] %v4647_v47  ;;  %7169 = vst [vmem:[#allocation48_spill] sm:$0xff] %v4649_v48 }
 0x167   :  { %v1049_v53 = vpop.f32.mrf.mxu0  ;;  %v1305_v54 = vpop.f32.mrf.mxu1 }
 0x169   :  { %v4651_v63 = vpop.f32.mrf.mxu0  ;;  %v4653_v0 = vpop.f32.mrf.mxu1 }
 0x16a   :  { %7170 = vst [vmem:[#allocation49_spill] sm:$0xff] %v4651_v63  ;;  %7171 = vst [vmem:[#allocation50_spill] sm:$0xff] %v4653_v0 }
 0x16b   :  { %v1054_v8 = vpop.f32.mrf.mxu0  ;;  %v1310_v10 = vpop.f32.mrf.mxu1 }
 0x16d   :  { %v4655_v17 = vpop.f32.mrf.mxu0  ;;  %v4657_v18 = vpop.f32.mrf.mxu1 }
 0x16e   :  { %7172 = vst [vmem:[#allocation51_spill] sm:$0xff] %v4655_v17  ;;  %7173 = vst [vmem:[#allocation52_spill] sm:$0xff] %v4657_v18 }
 0x16f   :  { %v1057_v29 = vpop.f32.mrf.mxu0  ;;  %v1313_v30 = vpop.f32.mrf.mxu1 }
 0x171   :  { %v4659_v41 = vpop.f32.mrf.mxu0  ;;  %v4661_v42 = vpop.f32.mrf.mxu1 }
 0x172   :  { %7174 = vst [vmem:[#allocation53_spill] sm:$0xff] %v4659_v41  ;;  %7175 = vst [vmem:[#allocation54_spill] sm:$0xff] %v4661_v42 }
 0x173   :  { %v1062_v36 = vpop.f32.mrf.mxu0  ;;  %v1318_v48 = vpop.f32.mrf.mxu1 }
 0x175   :  { %v4663_v53 = vpop.f32.mrf.mxu0  ;;  %v4665_v54 = vpop.f32.mrf.mxu1 }
 0x176   :  { %7176 = vst [vmem:[#allocation55_spill] sm:$0xff] %v4663_v53  ;;  %7177 = vst [vmem:[#allocation56_spill] sm:$0xff] %v4665_v54 }
 0x177   :  { %v1065_v24 = vpop.f32.mrf.mxu0  ;;  %v1321_v0 = vpop.f32.mrf.mxu1 }
 0x178   :  { %v1461_v24 = vadd.f32 %v4473_v59, %v4469_v55 }
 0x179   :  { %v4667_v8 = vpop.f32.mrf.mxu0  ;;  %v4669_v10 = vpop.f32.mrf.mxu1 }
 0x17a   :  { %7178 = vst [vmem:[#allocation57_spill] sm:$0xff] %v4667_v8  ;;  %7179 = vst [vmem:[#allocation58_spill] sm:$0xff] %v4669_v10  ;;  %v1462_v62 = vadd.f32 %v1461_v24, %v4489_v3 }
 0x17b   :  { %v1070_v14 = vpop.f32.mrf.mxu0  ;;  %v1326_v18 = vpop.f32.mrf.mxu1 }
 0x17c   :  { %v1463_v18 = vadd.f32 %v1462_v62, %v4493_v7 }
 0x17d   :  { %v4671_v29 = vpop.f32.mrf.mxu0  ;;  %v4673_v30 = vpop.f32.mrf.mxu1 }
 0x17e   :  { %7180 = vst [vmem:[#allocation59_spill] sm:$0xff] %v4671_v29  ;;  %7181 = vst [vmem:[#allocation60_spill] sm:$0xff] %v4673_v30 }
 0x17f   :  { %v1073_v2 = vpop.f32.mrf.mxu0  ;;  %v1329_v42 = vpop.f32.mrf.mxu1 }
 0x180   :  { %v1464_v42 = vadd.f32 %v1463_v18, %v4509_v15 }
 0x181   :  { %v4675_v36 = vpop.f32.mrf.mxu0  ;;  %v4677_v48 = vpop.f32.mrf.mxu1 }
 0x182   :  { %7182 = vst [vmem:[#allocation61_spill] sm:$0xff] %v4675_v36  ;;  %7183 = vst [vmem:[#allocation62_spill] sm:$0xff] %v4677_v48  ;;  %v1465_v59 = vadd.f32 %v1464_v42, %v4513_v19 }
 0x183   :  { %v1078_v0 = vpop.f32.mrf.mxu0  ;;  %v1334_v54 = vpop.f32.mrf.mxu1 }
 0x184   :  { %v1466_v24 = vadd.f32 %v1465_v59, %v4529_v27 }
 0x185   :  { %v4682_v10 = vpop.f32.mrf.mxu0  ;;  %v4684_v14 = vpop.f32.mrf.mxu1 }
 0x186   :  { %7184 = vst [vmem:[#allocation63_spill] sm:$0xff] %v4682_v10  ;;  %v1467_v62 = vadd.f32 %v1466_v24, %v4533_v31 }
 0x187   :  { %v1081_v30 = vpop.f32.mrf.mxu0  ;;  %v1337_v2 = vpop.f32.mrf.mxu1 }
 0x188   :  { %v1468_v18 = vadd.f32 %v1467_v62, %v4549_v39 }
 0x189   :  { %v4688_v50 = vpop.f32.mrf.mxu0  ;;  %v4690_v48 = vpop.f32.mrf.mxu1 }
 0x18a   :  { %7185 = vst [vmem:[#allocation64_spill] sm:$0xff] %v4688_v50  ;;  %v1469_v42 = vadd.f32 %v1468_v18, %v4553_v43 }
 0x18b   :  { %v1086_v0 = vpop.f32.mrf.mxu0  ;;  %v1342_v54 = vpop.f32.mrf.mxu1 }
 0x18c   :  { %v1470_v59 = vadd.f32 %v1469_v42, %v4569_v51 }
 0x18d   :  { %v4694_v3 = vpop.f32.mrf.mxu0  ;;  %v4696_v55 = vpop.f32.mrf.mxu1 }
 0x18e   :  { %7186 = vst [vmem:[#allocation65_spill] sm:$0xff] %v4694_v3  ;;  %v1471_v24 = vadd.f32 %v1470_v59, %v4573_v57 }
 0x18f   :  { %v1089_v30 = vpop.f32.mrf.mxu0  ;;  %v1345_v2 = vpop.f32.mrf.mxu1 }
 0x190   :  { %v1472_v62 = vadd.f32 %v1471_v24, %v4589_v5 }
 0x191   :  { %v4700_v15 = vpop.f32.mrf.mxu0  ;;  %v4702_v7 = vpop.f32.mrf.mxu1 }
 0x192   :  { %7187 = vst [vmem:[#allocation66_spill] sm:$0xff] %v4700_v15  ;;  %v1473_v18 = vadd.f32 %v1472_v62, %v4593_v11 }
 0x193   :  { %v1094_v0 = vpop.f32.mrf.mxu0  ;;  %v1350_v54 = vpop.f32.mrf.mxu1 }
 0x194   :  { %v1474_v42 = vadd.f32 %v1473_v18, %v4603_v20 }
 0x195   :  { %v4706_v27 = vpop.f32.mrf.mxu0  ;;  %v4708_v19 = vpop.f32.mrf.mxu1 }
 0x196   :  { %7188 = vst [vmem:[#allocation67_spill] sm:$0xff] %v4706_v27  ;;  %v1475_v59 = vadd.f32 %v1474_v42, %v4607_v25 }
 0x197   :  { %v1097_v30 = vpop.f32.mrf.mxu0  ;;  %v1353_v2 = vpop.f32.mrf.mxu1 }
 0x198   :  { %v1476_v24 = vadd.f32 %v1475_v59, %v4611_v32 }
 0x199   :  { %v4712_v39 = vpop.f32.mrf.mxu0  ;;  %v4714_v31 = vpop.f32.mrf.mxu1 }
 0x19a   :  { %7189 = vst [vmem:[#allocation68_spill] sm:$0xff] %v4712_v39  ;;  %v1477_v62 = vadd.f32 %v1476_v24, %v4615_v37 }
 0x19b   :  { %v1102_v0 = vpop.f32.mrf.mxu0  ;;  %v1358_v54 = vpop.f32.mrf.mxu1 }
 0x19c   :  { %v1478_v18 = vadd.f32 %v1477_v62, %v4619_v44 }
 0x19d   :  { %v4718_v51 = vpop.f32.mrf.mxu0  ;;  %v4720_v43 = vpop.f32.mrf.mxu1 }
 0x19e   :  { %7190 = vst [vmem:[#allocation69_spill] sm:$0xff] %v4718_v51  ;;  %v1479_v42 = vadd.f32 %v1478_v18, %v4623_v49 }
 0x19f   :  { %v1105_v30 = vpop.f32.mrf.mxu0  ;;  %v1361_v2 = vpop.f32.mrf.mxu1 }
 0x1a0   :  { %v1480_v59 = vadd.f32 %v1479_v42, %v4627_v58 }
 0x1a1   :  { %v4724_v5 = vpop.f32.mrf.mxu0  ;;  %v4726_v57 = vpop.f32.mrf.mxu1 }
 0x1a2   :  { %7191 = vst [vmem:[#allocation70_spill] sm:$0xff] %v4724_v5  ;;  %v1481_v24 = vadd.f32 %v1480_v59, %v4631_v1 }
 0x1a3   :  { %v1110_v0 = vpop.f32.mrf.mxu0  ;;  %v1366_v54 = vpop.f32.mrf.mxu1 }
 0x1a4   :  { %v1482_v62 = vadd.f32 %v1481_v24, %v4635_v12 }
 0x1a5   :  { %v4730_v20 = vpop.f32.mrf.mxu0  ;;  %v4732_v11 = vpop.f32.mrf.mxu1 }
 0x1a6   :  { %7192 = vst [vmem:[#allocation71_spill] sm:$0xff] %v4730_v20  ;;  %v1483_v18 = vadd.f32 %v1482_v62, %v4639_v23 }
 0x1a7   :  { %v1113_v30 = vpop.f32.mrf.mxu0  ;;  %v1369_v2 = vpop.f32.mrf.mxu1 }
 0x1a8   :  { %v1484_v42 = vadd.f32 %v1483_v18, %v4643_v35 }
 0x1a9   :  { %v4736_v32 = vpop.f32.mrf.mxu0  ;;  %v4738_v25 = vpop.f32.mrf.mxu1 }
 0x1aa   :  { %7193 = vst [vmem:[#allocation72_spill] sm:$0xff] %v4736_v32  ;;  %v1485_v59 = vadd.f32 %v1484_v42, %v4647_v47 }
 0x1ab   :  { %v1118_v0 = vpop.f32.mrf.mxu0  ;;  %v1374_v54 = vpop.f32.mrf.mxu1 }
 0x1ac   :  { %v1486_v24 = vadd.f32 %v1485_v59, %v4651_v63 }
 0x1ad   :  { %v4742_v44 = vpop.f32.mrf.mxu0  ;;  %v4744_v37 = vpop.f32.mrf.mxu1 }
 0x1ae   :  { %7194 = vst [vmem:[#allocation73_spill] sm:$0xff] %v4742_v44  ;;  %v1487_v62 = vadd.f32 %v1486_v24, %v4655_v17 }
 0x1af   :  { %v1121_v30 = vpop.f32.mrf.mxu0  ;;  %v1377_v2 = vpop.f32.mrf.mxu1 }
 0x1b0   :  { %v1488_v18 = vadd.f32 %v1487_v62, %v4659_v41 }
 0x1b1   :  { %v4748_v58 = vpop.f32.mrf.mxu0  ;;  %v4750_v49 = vpop.f32.mrf.mxu1 }
 0x1b2   :  { %7195 = vst [vmem:[#allocation74_spill] sm:$0xff] %v4748_v58  ;;  %v1489_v42 = vadd.f32 %v1488_v18, %v4663_v53 }
 0x1b3   :  { %v1126_v0 = vpop.f32.mrf.mxu0  ;;  %v1382_v54 = vpop.f32.mrf.mxu1 }
 0x1b4   :  { %v1490_v59 = vadd.f32 %v1489_v42, %v4667_v8 }
 0x1b5   :  { %v4754_v12 = vpop.f32.mrf.mxu0  ;;  %v4756_v1 = vpop.f32.mrf.mxu1 }
 0x1b6   :  { %7196 = vst [vmem:[#allocation75_spill] sm:$0xff] %v4754_v12  ;;  %v1491_v24 = vadd.f32 %v1490_v59, %v4671_v29 }
 0x1b7   :  { %v1129_v30 = vpop.f32.mrf.mxu0  ;;  %v1385_v2 = vpop.f32.mrf.mxu1 }
 0x1b8   :  { %v1492_v62 = vadd.f32 %v1491_v24, %v4675_v36 }
 0x1b9   :  { %v4760_v35 = vpop.f32.mrf.mxu0  ;;  %v4762_v23 = vpop.f32.mrf.mxu1 }
 0x1ba   :  { %7197 = vst [vmem:[#allocation76_spill] sm:$0xff] %v4760_v35  ;;  %7198 = vst [vmem:[#allocation77_spill] sm:$0xff] %v4762_v23  ;;  %v1493_v18 = vadd.f32 %v1492_v62, %v4682_v10 }
 0x1bb   :  { %v1134_v0 = vpop.f32.mrf.mxu0  ;;  %v1390_v54 = vpop.f32.mrf.mxu1 }
 0x1bc   :  { %v1494_v42 = vadd.f32 %v1493_v18, %v4688_v50 }
 0x1bd   :  { %v4766_v63 = vpop.f32.mrf.mxu0  ;;  %v4768_v47 = vpop.f32.mrf.mxu1 }
 0x1be   :  { %7199 = vst [vmem:[#allocation78_spill] sm:$0xff] %v4766_v63  ;;  %7200 = vst [vmem:[#allocation79_spill] sm:$0xff] %v4768_v47  ;;  %v1495_v59 = vadd.f32 %v1494_v42, %v4694_v3 }
 0x1bf   :  { %v1137_v30 = vpop.f32.mrf.mxu0  ;;  %v1393_v2 = vpop.f32.mrf.mxu1 }
 0x1c0   :  { %v1496_v24 = vadd.f32 %v1495_v59, %v4700_v15 }
 0x1c1   :  { %v4772_v41 = vpop.f32.mrf.mxu0  ;;  %v4774_v17 = vpop.f32.mrf.mxu1 }
 0x1c2   :  { %7201 = vst [vmem:[#allocation80_spill] sm:$0xff] %v4772_v41  ;;  %7202 = vst [vmem:[#allocation81_spill] sm:$0xff] %v4774_v17  ;;  %v1497_v62 = vadd.f32 %v1496_v24, %v4706_v27 }
 0x1c3   :  { %v1142_v0 = vpop.f32.mrf.mxu0  ;;  %v1398_v54 = vpop.f32.mrf.mxu1 }
 0x1c4   :  { %v1498_v18 = vadd.f32 %v1497_v62, %v4712_v39 }
 0x1c5   :  { %v4778_v8 = vpop.f32.mrf.mxu0  ;;  %v4780_v53 = vpop.f32.mrf.mxu1 }
 0x1c6   :  { %7203 = vst [vmem:[#allocation82_spill] sm:$0xff] %v4778_v8  ;;  %7204 = vst [vmem:[#allocation83_spill] sm:$0xff] %v4780_v53  ;;  %v1499_v42 = vadd.f32 %v1498_v18, %v4718_v51 }
 0x1c7   :  { %v1145_v30 = vpop.f32.mrf.mxu0  ;;  %v1401_v2 = vpop.f32.mrf.mxu1 }
 0x1c8   :  { %v1500_v59 = vadd.f32 %v1499_v42, %v4724_v5 }
 0x1c9   :  { %v4784_v36 = vpop.f32.mrf.mxu0  ;;  %v4786_v29 = vpop.f32.mrf.mxu1 }
 0x1ca   :  { %7205 = vst [vmem:[#allocation84_spill] sm:$0xff] %v4784_v36  ;;  %7206 = vst [vmem:[#allocation85_spill] sm:$0xff] %v4786_v29  ;;  %v1501_v24 = vadd.f32 %v1500_v59, %v4730_v20 }
 0x1cb   :  { %v1150_v0 = vpop.f32.mrf.mxu0  ;;  %v1406_v54 = vpop.f32.mrf.mxu1 }
 0x1cc   :  { %v1502_v62 = vadd.f32 %v1501_v24, %v4736_v32 }
 0x1cd   :  { %v4790_v50 = vpop.f32.mrf.mxu0  ;;  %v4792_v10 = vpop.f32.mrf.mxu1 }
 0x1ce   :  { %7207 = vst [vmem:[#allocation86_spill] sm:$0xff] %v4790_v50  ;;  %7208 = vst [vmem:[#allocation87_spill] sm:$0xff] %v4792_v10  ;;  %v1503_v18 = vadd.f32 %v1502_v62, %v4742_v44 }
 0x1cf   :  { %v1153_v30 = vpop.f32.mrf.mxu0  ;;  %v1409_v2 = vpop.f32.mrf.mxu1 }
 0x1d0   :  { %v1504_v42 = vadd.f32 %v1503_v18, %v4748_v58 }
 0x1d1   :  { %v4796_v15 = vpop.f32.mrf.mxu0  ;;  %v4798_v3 = vpop.f32.mrf.mxu1 }
 0x1d2   :  { %7209 = vst [vmem:[#allocation88_spill] sm:$0xff] %v4796_v15  ;;  %7210 = vst [vmem:[#allocation89_spill] sm:$0xff] %v4798_v3  ;;  %v1505_v59 = vadd.f32 %v1504_v42, %v4754_v12 }
 0x1d3   :  { %v1158_v0 = vpop.f32.mrf.mxu0  ;;  %v1414_v54 = vpop.f32.mrf.mxu1 }
 0x1d4   :  { %v1506_v24 = vadd.f32 %v1505_v59, %v4760_v35 }
 0x1d5   :  { %v4802_v39 = vpop.f32.mrf.mxu0  ;;  %v4804_v27 = vpop.f32.mrf.mxu1 }
 0x1d6   :  { %7211 = vst [vmem:[#allocation90_spill] sm:$0xff] %v4802_v39  ;;  %7212 = vst [vmem:[#allocation91_spill] sm:$0xff] %v4804_v27  ;;  %v1507_v62 = vadd.f32 %v1506_v24, %v4766_v63 }
 0x1d7   :  { %v1161_v30 = vpop.f32.mrf.mxu0  ;;  %v1417_v2 = vpop.f32.mrf.mxu1 }
 0x1d8   :  { %v1508_v18 = vadd.f32 %v1507_v62, %v4772_v41 }
 0x1d9   :  { %v4808_v5 = vpop.f32.mrf.mxu0  ;;  %v4810_v51 = vpop.f32.mrf.mxu1 }
 0x1da   :  { %7213 = vst [vmem:[#allocation92_spill] sm:$0xff] %v4808_v5  ;;  %7214 = vst [vmem:[#allocation93_spill] sm:$0xff] %v4810_v51  ;;  %v1509_v42 = vadd.f32 %v1508_v18, %v4778_v8 }
 0x1db   :  { %v1166_v0 = vpop.f32.mrf.mxu0  ;;  %v1422_v54 = vpop.f32.mrf.mxu1 }
 0x1dc   :  { %v1510_v59 = vadd.f32 %v1509_v42, %v4784_v36 }
 0x1dd   :  { %v4814_v32 = vpop.f32.mrf.mxu0  ;;  %v4816_v20 = vpop.f32.mrf.mxu1 }
 0x1de   :  { %7215 = vst [vmem:[#allocation94_spill] sm:$0xff] %v4814_v32  ;;  %7216 = vst [vmem:[#allocation95_spill] sm:$0xff] %v4816_v20  ;;  %v1511_v24 = vadd.f32 %v1510_v59, %v4790_v50 }
 0x1df   :  { %v1169_v30 = vpop.f32.mrf.mxu0  ;;  %v1425_v2 = vpop.f32.mrf.mxu1 }
 0x1e0   :  { %v1512_v62 = vadd.f32 %v1511_v24, %v4796_v15 }
 0x1e1   :  { %v4820_v58 = vpop.f32.mrf.mxu0  ;;  %v4822_v44 = vpop.f32.mrf.mxu1 }
 0x1e2   :  { %7217 = vst [vmem:[#allocation96_spill] sm:$0xff] %v4820_v58  ;;  %7218 = vst [vmem:[#allocation97_spill] sm:$0xff] %v4822_v44  ;;  %v1513_v18 = vadd.f32 %v1512_v62, %v4802_v39 }
 0x1e3   :  { %v1174_v0 = vpop.f32.mrf.mxu0  ;;  %v1430_v54 = vpop.f32.mrf.mxu1 }
 0x1e4   :  { %v1514_v42 = vadd.f32 %v1513_v18, %v4808_v5 }
 0x1e5   :  { %v4826_v35 = vpop.f32.mrf.mxu0  ;;  %v4828_v12 = vpop.f32.mrf.mxu1 }
 0x1e6   :  { %7219 = vst [vmem:[#allocation98_spill] sm:$0xff] %v4826_v35  ;;  %7220 = vst [vmem:[#allocation99_spill] sm:$0xff] %v4828_v12  ;;  %v1515_v59 = vadd.f32 %v1514_v42, %v4814_v32 }
 0x1e7   :  { %v1177_v30 = vpop.f32.mrf.mxu0  ;;  %v1433_v2 = vpop.f32.mrf.mxu1 }
 0x1e8   :  { %v1516_v24 = vadd.f32 %v1515_v59, %v4820_v58 }
 0x1e9   :  { %v4832_v41 = vpop.f32.mrf.mxu0  ;;  %v4834_v63 = vpop.f32.mrf.mxu1 }
 0x1ea   :  { %7221 = vst [vmem:[#allocation100_spill] sm:$0xff] %v4832_v41  ;;  %7222 = vst [vmem:[#allocation101_spill] sm:$0xff] %v4834_v63  ;;  %v1517_v62 = vadd.f32 %v1516_v24, %v4826_v35 }
 0x1eb   :  { %v1182_v0 = vpop.f32.mrf.mxu0  ;;  %v1438_v54 = vpop.f32.mrf.mxu1 }
 0x1ec   :  { %v1518_v18 = vadd.f32 %v1517_v62, %v4832_v41 }
 0x1ed   :  { %v4838_v36 = vpop.f32.mrf.mxu0  ;;  %v4840_v8 = vpop.f32.mrf.mxu1 }
 0x1ee   :  { %7223 = vst [vmem:[#allocation102_spill] sm:$0xff] %v4838_v36  ;;  %7224 = vst [vmem:[#allocation103_spill] sm:$0xff] %v4840_v8  ;;  %v1519_v42 = vadd.f32 %v1518_v18, %v4838_v36 }
 0x1ef   :  { %v1185_v30 = vpop.f32.mrf.mxu0  ;;  %v1441_v2 = vpop.f32.mrf.mxu1 }
 0x1f1   :  { %v4844_v15 = vpop.f32.mrf.mxu0  ;;  %v4846_v50 = vpop.f32.mrf.mxu1 }
 0x1f2   :  { %7225 = vst [vmem:[#allocation104_spill] sm:$0xff] %v4844_v15  ;;  %7226 = vst [vmem:[#allocation105_spill] sm:$0xff] %v4846_v50  ;;  %v1520_v59 = vadd.f32 %v1519_v42, %v4844_v15 }
 0x1f3   :  { %v1190_v0 = vpop.f32.mrf.mxu0  ;;  %v1446_v54 = vpop.f32.mrf.mxu1 }
 0x1f5   :  { %v4850_v5 = vpop.f32.mrf.mxu0  ;;  %v4852_v39 = vpop.f32.mrf.mxu1 }
 0x1f6   :  { %7227 = vst [vmem:[#allocation106_spill] sm:$0xff] %v4852_v39  ;;  %v1521_v24 = vadd.f32 %v1520_v59, %v4850_v5 }
 0x1f7   :  { %v1193_v30 = vpop.f32.mrf.mxu0  ;;  %v1449_v2 = vpop.f32.mrf.mxu1 }
 0x1f9   :  { %v4856_v58 = vpop.f32.mrf.mxu0  ;;  %v4858_v32 = vpop.f32.mrf.mxu1 }
 0x1fa   :  { %7228 = vst [vmem:[#allocation107_spill] sm:$0xff] %v4856_v58  ;;  %7229 = vst [vmem:[#allocation108_spill] sm:$0xff] %v4858_v32  ;;  %v1522_v62 = vadd.f32 %v1521_v24, %v4856_v58 }
 0x1fb   :  { %v1198_v0 = vpop.f32.mrf.mxu0  ;;  %v1454_v54 = vpop.f32.mrf.mxu1 }
 0x1fd   :  { %v4862_v41 = vpop.f32.mrf.mxu0  ;;  %v4864_v35 = vpop.f32.mrf.mxu1 }
 0x1fe   :  { %7230 = vst [vmem:[#allocation109_spill] sm:$0xff] %v4864_v35  ;;  %v1523_v18 = vadd.f32 %v1522_v62, %v4862_v41 }
 0x1ff   :  { %v1201_v30 = vpop.f32.mrf.mxu0  ;;  %v1457_v2 = vpop.f32.mrf.mxu1 }
 0x200   :  { %v1524_v42 = vadd.f32 %v1523_v18, %v4471_v56 }
 0x202   :  { %v1525_v15 = vadd.f32 %v1524_v42, %v4478_v61 }
 0x204   :  { %v1526_v36 = vadd.f32 %v1525_v15, %v4491_v4 }
 0x206   :  { %v1527_v59 = vadd.f32 %v1526_v36, %v4498_v9 }
 0x208   :  { %v1528_v0 = vadd.f32 %v1527_v59, %v4511_v16 }
 0x20a   :  { %v1529_v24 = vadd.f32 %v1528_v0, %v4518_v21 }
 0x20c   :  { %v1530_v54 = vadd.f32 %v1529_v24, %v4531_v28 }
 0x20e   :  { %v1531_v58 = vadd.f32 %v1530_v54, %v4538_v33  ;;  %v7231_v54 = vld [vmem:[#allocation36_spill] sm:$0xff] }
 0x210   :  { %v1532_v62 = vadd.f32 %v1531_v58, %v4551_v40 }
 0x212   :  { %v1533_v30 = vadd.f32 %v1532_v62, %v4558_v45  ;;  %v7232_v45 = vld [vmem:[#allocation38_spill] sm:$0xff] }
 0x214   :  { %v1534_v18 = vadd.f32 %v1533_v30, %v4571_v52  ;;  %v7233_v52 = vld [vmem:[#allocation40_spill] sm:$0xff] }
 0x216   :  { %v1535_v2 = vadd.f32 %v1534_v18, %v4578_v60  ;;  %v7234_v60 = vld [vmem:[#allocation42_spill] sm:$0xff] }
 0x218   :  { %v1536_v15 = vadd.f32 %v1535_v2, %v4591_v6  ;;  %v7235_v6 = vld [vmem:[#allocation44_spill] sm:$0xff] }
 0x21a   :  { %v1537_v36 = vadd.f32 %v1536_v15, %v4598_v13  ;;  %v7236_v13 = vld [vmem:[#allocation46_spill] sm:$0xff] }
 0x21c   :  { %v1538_v42 = vadd.f32 %v1537_v36, %v4605_v22  ;;  %v7237_v22 = vld [vmem:[#allocation48_spill] sm:$0xff] }
 0x21e   :  { %v1539_v59 = vadd.f32 %v1538_v42, %v4609_v26  ;;  %v7238_v26 = vld [vmem:[#allocation50_spill] sm:$0xff] }
 0x220   :  { %v1540_v0 = vadd.f32 %v1539_v59, %v4613_v34  ;;  %v7239_v34 = vld [vmem:[#allocation52_spill] sm:$0xff] }
 0x222   :  { %v1541_v24 = vadd.f32 %v1540_v0, %v4617_v38  ;;  %v7240_v38 = vld [vmem:[#allocation54_spill] sm:$0xff] }
 0x224   :  { %v1542_v58 = vadd.f32 %v1541_v24, %v4621_v46  ;;  %v7241_v46 = vld [vmem:[#allocation56_spill] sm:$0xff] }
 0x226   :  { %v1543_v62 = vadd.f32 %v1542_v58, %v7231_v54  ;;  %v7242_v54 = vld [vmem:[#allocation58_spill] sm:$0xff] }
 0x228   :  { %v1544_v30 = vadd.f32 %v1543_v62, %v7232_v45  ;;  %v7243_v45 = vld [vmem:[#allocation60_spill] sm:$0xff] }
 0x22a   :  { %v1545_v18 = vadd.f32 %v1544_v30, %v7233_v52  ;;  %v7244_v52 = vld [vmem:[#allocation62_spill] sm:$0xff] }
 0x22c   :  { %v1546_v2 = vadd.f32 %v1545_v18, %v7234_v60 }
 0x22e   :  { %v1547_v15 = vadd.f32 %v1546_v2, %v7235_v6 }
 0x230   :  { %v1548_v36 = vadd.f32 %v1547_v15, %v7236_v13 }
 0x232   :  { %v1549_v42 = vadd.f32 %v1548_v36, %v7237_v22 }
 0x234   :  { %v1550_v59 = vadd.f32 %v1549_v42, %v7238_v26 }
 0x236   :  { %v1551_v0 = vadd.f32 %v1550_v59, %v7239_v34 }
 0x238   :  { %v1552_v24 = vadd.f32 %v1551_v0, %v7240_v38 }
 0x23a   :  { %v1553_v58 = vadd.f32 %v1552_v24, %v7241_v46 }
 0x23c   :  { %v1554_v62 = vadd.f32 %v1553_v58, %v7242_v54 }
 0x23e   :  { %v1555_v30 = vadd.f32 %v1554_v62, %v7243_v45 }
 0x240   :  { %v1556_v18 = vadd.f32 %v1555_v30, %v7244_v52 }
 0x242   :  { %v1557_v2 = vadd.f32 %v1556_v18, %v4684_v14 }
 0x244   :  { %v1558_v15 = vadd.f32 %v1557_v2, %v4690_v48 }
 0x246   :  { %v1559_v36 = vadd.f32 %v1558_v15, %v4696_v55 }
 0x248   :  { %v1560_v42 = vadd.f32 %v1559_v36, %v4702_v7 }
 0x24a   :  { %v1561_v59 = vadd.f32 %v1560_v42, %v4708_v19 }
 0x24c   :  { %v1562_v0 = vadd.f32 %v1561_v59, %v4714_v31 }
 0x24e   :  { %v1563_v24 = vadd.f32 %v1562_v0, %v4720_v43 }
 0x250   :  { %v1564_v58 = vadd.f32 %v1563_v24, %v4726_v57 }
 0x252   :  { %v1565_v62 = vadd.f32 %v1564_v58, %v4732_v11 }
 0x254   :  { %v1566_v30 = vadd.f32 %v1565_v62, %v4738_v25 }
 0x256   :  { %v1567_v18 = vadd.f32 %v1566_v30, %v4744_v37 }
 0x258   :  { %v1568_v2 = vadd.f32 %v1567_v18, %v4750_v49 }
 0x25a   :  { %v1569_v15 = vadd.f32 %v1568_v2, %v4756_v1 }
 0x25c   :  { %v1570_v36 = vadd.f32 %v1569_v15, %v4762_v23 }
 0x25e   :  { %v1571_v42 = vadd.f32 %v1570_v36, %v4768_v47 }
 0x260   :  { %v1572_v59 = vadd.f32 %v1571_v42, %v4774_v17 }
 0x262   :  { %v1573_v0 = vadd.f32 %v1572_v59, %v4780_v53 }
 0x264   :  { %v1574_v24 = vadd.f32 %v1573_v0, %v4786_v29 }
 0x266   :  { %v1575_v58 = vadd.f32 %v1574_v24, %v4792_v10 }
 0x268   :  { %v1576_v62 = vadd.f32 %v1575_v58, %v4798_v3 }
 0x26a   :  { %v1577_v30 = vadd.f32 %v1576_v62, %v4804_v27 }
 0x26c   :  { %v1578_v18 = vadd.f32 %v1577_v30, %v4810_v51 }
 0x26e   :  { %v1579_v2 = vadd.f32 %v1578_v18, %v4816_v20 }
 0x270   :  { %v1580_v15 = vadd.f32 %v1579_v2, %v4822_v44 }
 0x272   :  { %v1581_v36 = vadd.f32 %v1580_v15, %v4828_v12  ;;  %v7245_v15 = vld [vmem:[#allocation2_spill] sm:$0xff]  ;;  %v7253_v12 = vld [vmem:[#allocation13_spill] sm:$0xff] }
 0x274   :  { %v1582_v42 = vadd.f32 %v1581_v36, %v4834_v63 }
 0x276   :  { %v1583_v59 = vadd.f32 %v1582_v42, %v4840_v8  ;;  %v7246_v42 = vld [vmem:[#allocation3_spill] sm:$0xff] }
 0x278   :  { %v1584_v0 = vadd.f32 %v1583_v59, %v4846_v50 }
 0x27a   :  { %v1585_v24 = vadd.f32 %v1584_v0, %v4852_v39  ;;  %v7247_v0 = vld [vmem:[#allocation4_spill] sm:$0xff] }
 0x27c   :  { %v1586_v58 = vadd.f32 %v1585_v24, %v4858_v32 }
 0x27e   :  { %v1587_v62 = vadd.f32 %v1586_v58, %v4864_v35  ;;  %v7248_v58 = vld [vmem:[#allocation5_spill] sm:$0xff] }
 0x280   :  { %v1588_v27 = vrot.slane %v1587_v62, 4 }
 0x282   :  { %v1589_v30 = vadd.f32 %v1588_v27, %v1587_v62 }
 0x284   :  { %v1590_v51 = vrot.slane %v1589_v30, 2 }
 0x286   :  { %v1591_v18 = vadd.f32 %v1590_v51, %v1589_v30  ;;  %v7249_v51 = vld [vmem:[#allocation6_spill] sm:$0xff] }
 0x288   :  { %v1592_v20 = vrot.slane %v1591_v18, 1 }
 0x28a   :  { %v1593_v2 = vadd.f32 %v1592_v20, %v1591_v18  ;;  %v7250_v18 = vld [vmem:[#allocation7_spill] sm:$0xff] }
 0x28c   :  { %v4931_v44 = vmul.f32 0.0009765625, %v1593_v2 }
 0x28e   :  { %v1596_v36 = vsub.f32 %v7245_v15, %v4931_v44  ;;  %v1597_v59 = vsub.f32 %v7246_v42, %v4931_v44  ;;  %v1598_v39 = vsub.f32 %v7247_v0, %v4931_v44  ;;  %v1599_v27 = vsub.f32 %v7248_v58, %v4931_v44  ;;  %v7251_v42 = vld [vmem:[#allocation9_spill] sm:$0xff] }
 0x28f   :  { %v1600_v62 = vsub.f32 %v7249_v51, %v4931_v44  ;;  %v1601_v2 = vsub.f32 %v7250_v18, %v4931_v44  ;;  %v1602_v50 = vsub.f32 %v7251_v42, %v4931_v44  ;;  %v1604_v51 = vsub.f32 %v7253_v12, %v4931_v44 }
 0x290   :  { %v1724_v24 = vmul.f32 %v1596_v36, %v1596_v36  ;;  %v1725_v32 = vmul.f32 %v1597_v59, %v1597_v59  ;;  %v1726_v20 = vmul.f32 %v1598_v39, %v1598_v39  ;;  %v1727_v15 = vmul.f32 %v1599_v27, %v1599_v27  ;;  %v7252_v36 = vld [vmem:[#allocation11_spill] sm:$0xff] }
 0x291   :  { %v1728_v8 = vmul.f32 %v1600_v62, %v1600_v62  ;;  %v1603_v59 = vsub.f32 %v7252_v36, %v4931_v44  ;;  %v1729_v63 = vmul.f32 %v1601_v2, %v1601_v2  ;;  %v1730_v39 = vmul.f32 %v1602_v50, %v1602_v50 }
 0x292   :  { %v1852_v30 = vadd.f32 %v1725_v32, %v1724_v24  ;;  %v7254_v24 = vld [vmem:[#allocation15_spill] sm:$0xff]  ;;  %v1732_v62 = vmul.f32 %v1604_v51, %v1604_v51 }
 0x293   :  { %v1605_v18 = vsub.f32 %v7254_v24, %v4931_v44  ;;  %v1731_v27 = vmul.f32 %v1603_v59, %v1603_v59 }
 0x294   :  { %v1853_v35 = vadd.f32 %v1852_v30, %v1726_v20  ;;  %v7255_v30 = vld [vmem:[#allocation17_spill] sm:$0xff] }
 0x295   :  { %v1606_v42 = vsub.f32 %v7255_v30, %v4931_v44  ;;  %v1733_v2 = vmul.f32 %v1605_v18, %v1605_v18 }
 0x296   :  { %v1854_v0 = vadd.f32 %v1853_v35, %v1727_v15  ;;  %v7256_v15 = vld [vmem:[#allocation19_spill] sm:$0xff] }
 0x297   :  { %v1607_v36 = vsub.f32 %v7256_v15, %v4931_v44  ;;  %v1734_v50 = vmul.f32 %v1606_v42, %v1606_v42 }
 0x298   :  { %v1855_v58 = vadd.f32 %v1854_v0, %v1728_v8  ;;  %v7257_v0 = vld [vmem:[#allocation21_spill] sm:$0xff] }
 0x299   :  { %v1608_v12 = vsub.f32 %v7257_v0, %v4931_v44  ;;  %v1735_v59 = vmul.f32 %v1607_v36, %v1607_v36 }
 0x29a   :  { %v1856_v32 = vadd.f32 %v1855_v58, %v1729_v63  ;;  %v7258_v58 = vld [vmem:[#allocation23_spill] sm:$0xff] }
 0x29b   :  { %v1609_v24 = vsub.f32 %v7258_v58, %v4931_v44  ;;  %v1736_v51 = vmul.f32 %v1608_v12, %v1608_v12 }
 0x29c   :  { %v1857_v20 = vadd.f32 %v1856_v32, %v1730_v39  ;;  %v7259_v32 = vld [vmem:[#allocation25_spill] sm:$0xff] }
 0x29d   :  { %v1610_v30 = vsub.f32 %v7259_v32, %v4931_v44  ;;  %v1737_v18 = vmul.f32 %v1609_v24, %v1609_v24 }
 0x29e   :  { %v1858_v35 = vadd.f32 %v1857_v20, %v1731_v27  ;;  %v7260_v20 = vld [vmem:[#allocation27_spill] sm:$0xff] }
 0x29f   :  { %v1611_v15 = vsub.f32 %v7260_v20, %v4931_v44  ;;  %v1738_v42 = vmul.f32 %v1610_v30, %v1610_v30 }
 0x2a0   :  { %v1859_v8 = vadd.f32 %v1858_v35, %v1732_v62  ;;  %v7261_v35 = vld [vmem:[#allocation29_spill] sm:$0xff] }
 0x2a1   :  { %v1612_v0 = vsub.f32 %v7261_v35, %v4931_v44  ;;  %v1739_v36 = vmul.f32 %v1611_v15, %v1611_v15 }
 0x2a2   :  { %v1860_v63 = vadd.f32 %v1859_v8, %v1733_v2  ;;  %v7262_v8 = vld [vmem:[#allocation31_spill] sm:$0xff] }
 0x2a3   :  { %v1613_v58 = vsub.f32 %v7262_v8, %v4931_v44  ;;  %v1740_v12 = vmul.f32 %v1612_v0, %v1612_v0 }
 0x2a4   :  { %v1861_v39 = vadd.f32 %v1860_v63, %v1734_v50  ;;  %v7263_v63 = vld [vmem:[#allocation33_spill] sm:$0xff] }
 0x2a5   :  { %v1614_v32 = vsub.f32 %v7263_v63, %v4931_v44  ;;  %v1741_v24 = vmul.f32 %v1613_v58, %v1613_v58 }
 0x2a6   :  { %v1862_v27 = vadd.f32 %v1861_v39, %v1735_v59  ;;  %v7264_v39 = vld [vmem:[#allocation35_spill] sm:$0xff] }
 0x2a7   :  { %v1615_v20 = vsub.f32 %v7264_v39, %v4931_v44  ;;  %v1742_v30 = vmul.f32 %v1614_v32, %v1614_v32 }
 0x2a8   :  { %v1863_v62 = vadd.f32 %v1862_v27, %v1736_v51  ;;  %v7265_v27 = vld [vmem:[#allocation37_spill] sm:$0xff] }
 0x2a9   :  { %v1616_v35 = vsub.f32 %v7265_v27, %v4931_v44  ;;  %v1743_v15 = vmul.f32 %v1615_v20, %v1615_v20 }
 0x2aa   :  { %v1864_v2 = vadd.f32 %v1863_v62, %v1737_v18  ;;  %v7266_v62 = vld [vmem:[#allocation39_spill] sm:$0xff] }
 0x2ab   :  { %v1617_v8 = vsub.f32 %v7266_v62, %v4931_v44  ;;  %v1744_v0 = vmul.f32 %v1616_v35, %v1616_v35 }
 0x2ac   :  { %v1865_v50 = vadd.f32 %v1864_v2, %v1738_v42  ;;  %v7267_v2 = vld [vmem:[#allocation41_spill] sm:$0xff] }
 0x2ad   :  { %v1618_v63 = vsub.f32 %v7267_v2, %v4931_v44  ;;  %v1745_v58 = vmul.f32 %v1617_v8, %v1617_v8 }
 0x2ae   :  { %v1866_v59 = vadd.f32 %v1865_v50, %v1739_v36  ;;  %v7268_v50 = vld [vmem:[#allocation43_spill] sm:$0xff] }
 0x2af   :  { %v1619_v39 = vsub.f32 %v7268_v50, %v4931_v44  ;;  %v1746_v32 = vmul.f32 %v1618_v63, %v1618_v63 }
 0x2b0   :  { %v1867_v51 = vadd.f32 %v1866_v59, %v1740_v12  ;;  %v7269_v59 = vld [vmem:[#allocation45_spill] sm:$0xff] }
 0x2b1   :  { %v1620_v27 = vsub.f32 %v7269_v59, %v4931_v44  ;;  %v1747_v20 = vmul.f32 %v1619_v39, %v1619_v39 }
 0x2b2   :  { %v1868_v18 = vadd.f32 %v1867_v51, %v1741_v24  ;;  %v7270_v51 = vld [vmem:[#allocation47_spill] sm:$0xff] }
 0x2b3   :  { %v1621_v62 = vsub.f32 %v7270_v51, %v4931_v44  ;;  %v1748_v35 = vmul.f32 %v1620_v27, %v1620_v27 }
 0x2b4   :  { %v1869_v42 = vadd.f32 %v1868_v18, %v1742_v30  ;;  %v7271_v18 = vld [vmem:[#allocation49_spill] sm:$0xff] }
 0x2b5   :  { %v1622_v2 = vsub.f32 %v7271_v18, %v4931_v44  ;;  %v1749_v8 = vmul.f32 %v1621_v62, %v1621_v62 }
 0x2b6   :  { %v1870_v36 = vadd.f32 %v1869_v42, %v1743_v15  ;;  %v7272_v42 = vld [vmem:[#allocation51_spill] sm:$0xff] }
 0x2b7   :  { %v1623_v50 = vsub.f32 %v7272_v42, %v4931_v44  ;;  %v1750_v63 = vmul.f32 %v1622_v2, %v1622_v2 }
 0x2b8   :  { %v1871_v12 = vadd.f32 %v1870_v36, %v1744_v0  ;;  %v7273_v36 = vld [vmem:[#allocation53_spill] sm:$0xff] }
 0x2b9   :  { %v1624_v59 = vsub.f32 %v7273_v36, %v4931_v44  ;;  %v1751_v39 = vmul.f32 %v1623_v50, %v1623_v50 }
 0x2ba   :  { %v1872_v24 = vadd.f32 %v1871_v12, %v1745_v58  ;;  %v7274_v12 = vld [vmem:[#allocation55_spill] sm:$0xff] }
 0x2bb   :  { %v1625_v51 = vsub.f32 %v7274_v12, %v4931_v44  ;;  %v1752_v27 = vmul.f32 %v1624_v59, %v1624_v59 }
 0x2bc   :  { %v1873_v30 = vadd.f32 %v1872_v24, %v1746_v32  ;;  %v7275_v24 = vld [vmem:[#allocation57_spill] sm:$0xff] }
 0x2bd   :  { %v1626_v18 = vsub.f32 %v7275_v24, %v4931_v44  ;;  %v1753_v62 = vmul.f32 %v1625_v51, %v1625_v51 }
 0x2be   :  { %v1874_v15 = vadd.f32 %v1873_v30, %v1747_v20  ;;  %v7276_v30 = vld [vmem:[#allocation59_spill] sm:$0xff] }
 0x2bf   :  { %v1627_v42 = vsub.f32 %v7276_v30, %v4931_v44  ;;  %v1754_v2 = vmul.f32 %v1626_v18, %v1626_v18 }
 0x2c0   :  { %v1875_v0 = vadd.f32 %v1874_v15, %v1748_v35  ;;  %v7277_v15 = vld [vmem:[#allocation61_spill] sm:$0xff] }
 0x2c1   :  { %v1628_v36 = vsub.f32 %v7277_v15, %v4931_v44  ;;  %v1755_v50 = vmul.f32 %v1627_v42, %v1627_v42 }
 0x2c2   :  { %v1876_v58 = vadd.f32 %v1875_v0, %v1749_v8  ;;  %v7278_v0 = vld [vmem:[#allocation63_spill] sm:$0xff] }
 0x2c3   :  { %v1629_v12 = vsub.f32 %v7278_v0, %v4931_v44  ;;  %v1756_v59 = vmul.f32 %v1628_v36, %v1628_v36 }
 0x2c4   :  { %v1877_v32 = vadd.f32 %v1876_v58, %v1750_v63  ;;  %v7279_v58 = vld [vmem:[#allocation64_spill] sm:$0xff] }
 0x2c5   :  { %v1630_v24 = vsub.f32 %v7279_v58, %v4931_v44  ;;  %v1757_v51 = vmul.f32 %v1629_v12, %v1629_v12 }
 0x2c6   :  { %v1878_v20 = vadd.f32 %v1877_v32, %v1751_v39  ;;  %v7280_v32 = vld [vmem:[#allocation65_spill] sm:$0xff] }
 0x2c7   :  { %v1631_v30 = vsub.f32 %v7280_v32, %v4931_v44  ;;  %v1758_v18 = vmul.f32 %v1630_v24, %v1630_v24 }
 0x2c8   :  { %v1879_v35 = vadd.f32 %v1878_v20, %v1752_v27  ;;  %v7281_v20 = vld [vmem:[#allocation66_spill] sm:$0xff] }
 0x2c9   :  { %v1632_v15 = vsub.f32 %v7281_v20, %v4931_v44  ;;  %v1759_v42 = vmul.f32 %v1631_v30, %v1631_v30 }
 0x2ca   :  { %v1880_v8 = vadd.f32 %v1879_v35, %v1753_v62  ;;  %v7282_v35 = vld [vmem:[#allocation67_spill] sm:$0xff] }
 0x2cb   :  { %v1633_v0 = vsub.f32 %v7282_v35, %v4931_v44  ;;  %v1760_v36 = vmul.f32 %v1632_v15, %v1632_v15 }
 0x2cc   :  { %v1881_v63 = vadd.f32 %v1880_v8, %v1754_v2  ;;  %v7283_v8 = vld [vmem:[#allocation68_spill] sm:$0xff] }
 0x2cd   :  { %v1634_v58 = vsub.f32 %v7283_v8, %v4931_v44  ;;  %v1761_v12 = vmul.f32 %v1633_v0, %v1633_v0 }
 0x2ce   :  { %v1882_v39 = vadd.f32 %v1881_v63, %v1755_v50  ;;  %v7284_v63 = vld [vmem:[#allocation69_spill] sm:$0xff] }
 0x2cf   :  { %v1635_v32 = vsub.f32 %v7284_v63, %v4931_v44  ;;  %v1762_v24 = vmul.f32 %v1634_v58, %v1634_v58 }
 0x2d0   :  { %v1883_v27 = vadd.f32 %v1882_v39, %v1756_v59  ;;  %v7285_v39 = vld [vmem:[#allocation70_spill] sm:$0xff] }
 0x2d1   :  { %v1636_v20 = vsub.f32 %v7285_v39, %v4931_v44  ;;  %v1763_v30 = vmul.f32 %v1635_v32, %v1635_v32 }
 0x2d2   :  { %v1884_v62 = vadd.f32 %v1883_v27, %v1757_v51  ;;  %v7286_v27 = vld [vmem:[#allocation71_spill] sm:$0xff] }
 0x2d3   :  { %v1637_v35 = vsub.f32 %v7286_v27, %v4931_v44  ;;  %v1764_v15 = vmul.f32 %v1636_v20, %v1636_v20 }
 0x2d4   :  { %v1885_v2 = vadd.f32 %v1884_v62, %v1758_v18  ;;  %v7287_v62 = vld [vmem:[#allocation72_spill] sm:$0xff] }
 0x2d5   :  { %v1638_v8 = vsub.f32 %v7287_v62, %v4931_v44  ;;  %v1765_v0 = vmul.f32 %v1637_v35, %v1637_v35 }
 0x2d6   :  { %v1886_v50 = vadd.f32 %v1885_v2, %v1759_v42  ;;  %v7288_v2 = vld [vmem:[#allocation73_spill] sm:$0xff] }
 0x2d7   :  { %v1639_v63 = vsub.f32 %v7288_v2, %v4931_v44  ;;  %v1766_v58 = vmul.f32 %v1638_v8, %v1638_v8 }
 0x2d8   :  { %v1887_v59 = vadd.f32 %v1886_v50, %v1760_v36  ;;  %v7289_v50 = vld [vmem:[#allocation74_spill] sm:$0xff] }
 0x2d9   :  { %v1640_v39 = vsub.f32 %v7289_v50, %v4931_v44  ;;  %v1767_v32 = vmul.f32 %v1639_v63, %v1639_v63 }
 0x2da   :  { %v1888_v51 = vadd.f32 %v1887_v59, %v1761_v12  ;;  %v7290_v59 = vld [vmem:[#allocation75_spill] sm:$0xff] }
 0x2db   :  { %v1641_v27 = vsub.f32 %v7290_v59, %v4931_v44  ;;  %v1768_v20 = vmul.f32 %v1640_v39, %v1640_v39 }
 0x2dc   :  { %v1889_v18 = vadd.f32 %v1888_v51, %v1762_v24  ;;  %v7291_v51 = vld [vmem:[#allocation76_spill] sm:$0xff] }
 0x2dd   :  { %v1642_v62 = vsub.f32 %v7291_v51, %v4931_v44  ;;  %v1769_v35 = vmul.f32 %v1641_v27, %v1641_v27 }
 0x2de   :  { %v1890_v42 = vadd.f32 %v1889_v18, %v1763_v30  ;;  %v7292_v18 = vld [vmem:[#allocation78_spill] sm:$0xff] }
 0x2df   :  { %v1643_v2 = vsub.f32 %v7292_v18, %v4931_v44  ;;  %v1770_v8 = vmul.f32 %v1642_v62, %v1642_v62 }
 0x2e0   :  { %v1891_v36 = vadd.f32 %v1890_v42, %v1764_v15  ;;  %v7293_v42 = vld [vmem:[#allocation80_spill] sm:$0xff] }
 0x2e1   :  { %v1644_v50 = vsub.f32 %v7293_v42, %v4931_v44  ;;  %v1771_v63 = vmul.f32 %v1643_v2, %v1643_v2 }
 0x2e2   :  { %v1892_v12 = vadd.f32 %v1891_v36, %v1765_v0  ;;  %v7294_v36 = vld [vmem:[#allocation82_spill] sm:$0xff] }
 0x2e3   :  { %v1645_v59 = vsub.f32 %v7294_v36, %v4931_v44  ;;  %v1772_v39 = vmul.f32 %v1644_v50, %v1644_v50 }
 0x2e4   :  { %v1893_v24 = vadd.f32 %v1892_v12, %v1766_v58  ;;  %v7295_v12 = vld [vmem:[#allocation84_spill] sm:$0xff] }
 0x2e5   :  { %v1646_v51 = vsub.f32 %v7295_v12, %v4931_v44  ;;  %v1773_v27 = vmul.f32 %v1645_v59, %v1645_v59 }
 0x2e6   :  { %v1894_v30 = vadd.f32 %v1893_v24, %v1767_v32  ;;  %v7296_v24 = vld [vmem:[#allocation86_spill] sm:$0xff] }
 0x2e7   :  { %v1647_v18 = vsub.f32 %v7296_v24, %v4931_v44  ;;  %v1774_v62 = vmul.f32 %v1646_v51, %v1646_v51 }
 0x2e8   :  { %v1895_v15 = vadd.f32 %v1894_v30, %v1768_v20  ;;  %v7297_v30 = vld [vmem:[#allocation88_spill] sm:$0xff] }
 0x2e9   :  { %v1648_v42 = vsub.f32 %v7297_v30, %v4931_v44  ;;  %v1775_v2 = vmul.f32 %v1647_v18, %v1647_v18 }
 0x2ea   :  { %v1896_v0 = vadd.f32 %v1895_v15, %v1769_v35  ;;  %v7298_v15 = vld [vmem:[#allocation90_spill] sm:$0xff] }
 0x2eb   :  { %v1649_v36 = vsub.f32 %v7298_v15, %v4931_v44  ;;  %v1776_v50 = vmul.f32 %v1648_v42, %v1648_v42 }
 0x2ec   :  { %v1897_v58 = vadd.f32 %v1896_v0, %v1770_v8  ;;  %v7299_v0 = vld [vmem:[#allocation92_spill] sm:$0xff] }
 0x2ed   :  { %v1650_v12 = vsub.f32 %v7299_v0, %v4931_v44  ;;  %v1777_v59 = vmul.f32 %v1649_v36, %v1649_v36 }
 0x2ee   :  { %v1898_v32 = vadd.f32 %v1897_v58, %v1771_v63  ;;  %v7300_v58 = vld [vmem:[#allocation94_spill] sm:$0xff] }
 0x2ef   :  { %v1651_v24 = vsub.f32 %v7300_v58, %v4931_v44  ;;  %v1778_v51 = vmul.f32 %v1650_v12, %v1650_v12 }
 0x2f0   :  { %v1899_v20 = vadd.f32 %v1898_v32, %v1772_v39  ;;  %v7301_v32 = vld [vmem:[#allocation96_spill] sm:$0xff] }
 0x2f1   :  { %v1652_v30 = vsub.f32 %v7301_v32, %v4931_v44  ;;  %v1779_v18 = vmul.f32 %v1651_v24, %v1651_v24 }
 0x2f2   :  { %v1900_v35 = vadd.f32 %v1899_v20, %v1773_v27  ;;  %v7302_v20 = vld [vmem:[#allocation98_spill] sm:$0xff] }
 0x2f3   :  { %v1653_v15 = vsub.f32 %v7302_v20, %v4931_v44  ;;  %v1780_v42 = vmul.f32 %v1652_v30, %v1652_v30 }
 0x2f4   :  { %v1901_v8 = vadd.f32 %v1900_v35, %v1774_v62  ;;  %v7303_v35 = vld [vmem:[#allocation100_spill] sm:$0xff] }
 0x2f5   :  { %v1654_v0 = vsub.f32 %v7303_v35, %v4931_v44  ;;  %v1781_v36 = vmul.f32 %v1653_v15, %v1653_v15 }
 0x2f6   :  { %v1902_v63 = vadd.f32 %v1901_v8, %v1775_v2  ;;  %v7304_v8 = vld [vmem:[#allocation102_spill] sm:$0xff] }
 0x2f7   :  { %v1655_v58 = vsub.f32 %v7304_v8, %v4931_v44  ;;  %v1782_v12 = vmul.f32 %v1654_v0, %v1654_v0 }
 0x2f8   :  { %v1903_v39 = vadd.f32 %v1902_v63, %v1776_v50  ;;  %v7305_v63 = vld [vmem:[#allocation104_spill] sm:$0xff] }
 0x2f9   :  { %v1656_v32 = vsub.f32 %v7305_v63, %v4931_v44  ;;  %v1783_v24 = vmul.f32 %v1655_v58, %v1655_v58 }
 0x2fa   :  { %v1904_v27 = vadd.f32 %v1903_v39, %v1777_v59  ;;  %v1657_v39 = vsub.f32 %v4850_v5, %v4931_v44 }
 0x2fb   :  { %v1784_v30 = vmul.f32 %v1656_v32, %v1656_v32 }
 0x2fc   :  { %v1905_v62 = vadd.f32 %v1904_v27, %v1778_v51  ;;  %v7306_v27 = vld [vmem:[#allocation107_spill] sm:$0xff]  ;;  %v1785_v15 = vmul.f32 %v1657_v39, %v1657_v39 }
 0x2fd   :  { %v1658_v35 = vsub.f32 %v7306_v27, %v4931_v44 }
 0x2fe   :  { %v1906_v2 = vadd.f32 %v1905_v62, %v1779_v18  ;;  %v1659_v62 = vsub.f32 %v4862_v41, %v4931_v44 }
 0x2ff   :  { %v1786_v0 = vmul.f32 %v1658_v35, %v1658_v35 }
 0x300   :  { %v1907_v50 = vadd.f32 %v1906_v2, %v1780_v42  ;;  %v1660_v2 = vsub.f32 %v4471_v56, %v4931_v44  ;;  %v1787_v58 = vmul.f32 %v1659_v62, %v1659_v62 }
 0x302   :  { %v1908_v59 = vadd.f32 %v1907_v50, %v1781_v36  ;;  %v1661_v50 = vsub.f32 %v4478_v61, %v4931_v44  ;;  %v1788_v32 = vmul.f32 %v1660_v2, %v1660_v2 }
 0x304   :  { %v1909_v51 = vadd.f32 %v1908_v59, %v1782_v12  ;;  %v1662_v59 = vsub.f32 %v4491_v4, %v4931_v44  ;;  %v1789_v39 = vmul.f32 %v1661_v50, %v1661_v50 }
 0x306   :  { %v1910_v18 = vadd.f32 %v1909_v51, %v1783_v24  ;;  %v1663_v51 = vsub.f32 %v4498_v9, %v4931_v44  ;;  %v1790_v35 = vmul.f32 %v1662_v59, %v1662_v59 }
 0x308   :  { %v1911_v42 = vadd.f32 %v1910_v18, %v1784_v30  ;;  %v1664_v18 = vsub.f32 %v4511_v16, %v4931_v44  ;;  %v1791_v62 = vmul.f32 %v1663_v51, %v1663_v51 }
 0x30a   :  { %v1912_v36 = vadd.f32 %v1911_v42, %v1785_v15  ;;  %v1665_v42 = vsub.f32 %v4518_v21, %v4931_v44  ;;  %v1792_v2 = vmul.f32 %v1664_v18, %v1664_v18 }
 0x30c   :  { %v1913_v12 = vadd.f32 %v1912_v36, %v1786_v0  ;;  %v1666_v36 = vsub.f32 %v4531_v28, %v4931_v44  ;;  %v1793_v50 = vmul.f32 %v1665_v42, %v1665_v42 }
 0x30e   :  { %v1914_v24 = vadd.f32 %v1913_v12, %v1787_v58  ;;  %v1667_v12 = vsub.f32 %v4538_v33, %v4931_v44  ;;  %v1794_v59 = vmul.f32 %v1666_v36, %v1666_v36 }
 0x310   :  { %v1915_v30 = vadd.f32 %v1914_v24, %v1788_v32  ;;  %v1668_v24 = vsub.f32 %v4551_v40, %v4931_v44  ;;  %v1795_v51 = vmul.f32 %v1667_v12, %v1667_v12 }
 0x312   :  { %v1916_v15 = vadd.f32 %v1915_v30, %v1789_v39  ;;  %v7307_v30 = vld [vmem:[#allocation16_spill] sm:$0xff]  ;;  %v1796_v18 = vmul.f32 %v1668_v24, %v1668_v24 }
 0x313   :  { %v1669_v21 = vsub.f32 %v7307_v30, %v4931_v44 }
 0x314   :  { %v1917_v0 = vadd.f32 %v1916_v15, %v1790_v35  ;;  %v7308_v15 = vld [vmem:[#allocation18_spill] sm:$0xff] }
 0x315   :  { %v1670_v28 = vsub.f32 %v7308_v15, %v4931_v44  ;;  %v1797_v42 = vmul.f32 %v1669_v21, %v1669_v21 }
 0x316   :  { %v1918_v58 = vadd.f32 %v1917_v0, %v1791_v62  ;;  %v7309_v0 = vld [vmem:[#allocation20_spill] sm:$0xff] }
 0x317   :  { %v1671_v33 = vsub.f32 %v7309_v0, %v4931_v44  ;;  %v1798_v36 = vmul.f32 %v1670_v28, %v1670_v28 }
 0x318   :  { %v1919_v32 = vadd.f32 %v1918_v58, %v1792_v2  ;;  %v7310_v58 = vld [vmem:[#allocation22_spill] sm:$0xff] }
 0x319   :  { %v1672_v40 = vsub.f32 %v7310_v58, %v4931_v44  ;;  %v1799_v12 = vmul.f32 %v1671_v33, %v1671_v33 }
 0x31a   :  { %v1920_v39 = vadd.f32 %v1919_v32, %v1793_v50  ;;  %v7311_v32 = vld [vmem:[#allocation24_spill] sm:$0xff] }
 0x31b   :  { %v1673_v30 = vsub.f32 %v7311_v32, %v4931_v44  ;;  %v1800_v24 = vmul.f32 %v1672_v40, %v1672_v40 }
 0x31c   :  { %v1921_v35 = vadd.f32 %v1920_v39, %v1794_v59  ;;  %v7312_v39 = vld [vmem:[#allocation26_spill] sm:$0xff] }
 0x31d   :  { %v1674_v15 = vsub.f32 %v7312_v39, %v4931_v44  ;;  %v1801_v21 = vmul.f32 %v1673_v30, %v1673_v30 }
 0x31e   :  { %v1922_v62 = vadd.f32 %v1921_v35, %v1795_v51  ;;  %v7313_v35 = vld [vmem:[#allocation28_spill] sm:$0xff] }
 0x31f   :  { %v1675_v0 = vsub.f32 %v7313_v35, %v4931_v44  ;;  %v1802_v28 = vmul.f32 %v1674_v15, %v1674_v15 }
 0x320   :  { %v1923_v2 = vadd.f32 %v1922_v62, %v1796_v18  ;;  %v7314_v62 = vld [vmem:[#allocation30_spill] sm:$0xff] }
 0x321   :  { %v1676_v58 = vsub.f32 %v7314_v62, %v4931_v44  ;;  %v1803_v33 = vmul.f32 %v1675_v0, %v1675_v0 }
 0x322   :  { %v1924_v50 = vadd.f32 %v1923_v2, %v1797_v42  ;;  %v7315_v2 = vld [vmem:[#allocation32_spill] sm:$0xff] }
 0x323   :  { %v1677_v32 = vsub.f32 %v7315_v2, %v4931_v44  ;;  %v1804_v40 = vmul.f32 %v1676_v58, %v1676_v58 }
 0x324   :  { %v1925_v59 = vadd.f32 %v1924_v50, %v1798_v36  ;;  %v7316_v50 = vld [vmem:[#allocation34_spill] sm:$0xff] }
 0x325   :  { %v1678_v39 = vsub.f32 %v7316_v50, %v4931_v44  ;;  %v1805_v30 = vmul.f32 %v1677_v32, %v1677_v32 }
 0x326   :  { %v1926_v51 = vadd.f32 %v1925_v59, %v1799_v12  ;;  %v7317_v59 = vld [vmem:[#allocation36_spill] sm:$0xff] }
 0x327   :  { %v1679_v35 = vsub.f32 %v7317_v59, %v4931_v44  ;;  %v1806_v15 = vmul.f32 %v1678_v39, %v1678_v39 }
 0x328   :  { %v1927_v18 = vadd.f32 %v1926_v51, %v1800_v24  ;;  %v7318_v51 = vld [vmem:[#allocation38_spill] sm:$0xff] }
 0x329   :  { %v1680_v62 = vsub.f32 %v7318_v51, %v4931_v44  ;;  %v1807_v0 = vmul.f32 %v1679_v35, %v1679_v35 }
 0x32a   :  { %v1928_v42 = vadd.f32 %v1927_v18, %v1801_v21  ;;  %v7319_v18 = vld [vmem:[#allocation40_spill] sm:$0xff] }
 0x32b   :  { %v1681_v2 = vsub.f32 %v7319_v18, %v4931_v44  ;;  %v1808_v58 = vmul.f32 %v1680_v62, %v1680_v62 }
 0x32c   :  { %v1929_v36 = vadd.f32 %v1928_v42, %v1802_v28  ;;  %v1682_v42 = vsub.f32 %v7234_v60, %v4931_v44 }
 0x32d   :  { %v1809_v32 = vmul.f32 %v1681_v2, %v1681_v2 }
 0x32e   :  { %v1930_v12 = vadd.f32 %v1929_v36, %v1803_v33  ;;  %v1683_v36 = vsub.f32 %v7235_v6, %v4931_v44  ;;  %v1810_v39 = vmul.f32 %v1682_v42, %v1682_v42 }
 0x330   :  { %v1931_v24 = vadd.f32 %v1930_v12, %v1804_v40  ;;  %v1684_v12 = vsub.f32 %v7236_v13, %v4931_v44  ;;  %v1811_v35 = vmul.f32 %v1683_v36, %v1683_v36 }
 0x332   :  { %v1932_v21 = vadd.f32 %v1931_v24, %v1805_v30  ;;  %v1685_v24 = vsub.f32 %v7237_v22, %v4931_v44  ;;  %v1812_v62 = vmul.f32 %v1684_v12, %v1684_v12 }
 0x334   :  { %v1933_v28 = vadd.f32 %v1932_v21, %v1806_v15  ;;  %v1686_v21 = vsub.f32 %v7238_v26, %v4931_v44  ;;  %v1813_v2 = vmul.f32 %v1685_v24, %v1685_v24 }
 0x336   :  { %v1934_v33 = vadd.f32 %v1933_v28, %v1807_v0  ;;  %v1687_v28 = vsub.f32 %v7239_v34, %v4931_v44  ;;  %v1814_v42 = vmul.f32 %v1686_v21, %v1686_v21 }
 0x338   :  { %v1935_v40 = vadd.f32 %v1934_v33, %v1808_v58  ;;  %v1688_v33 = vsub.f32 %v7240_v38, %v4931_v44  ;;  %v1815_v36 = vmul.f32 %v1687_v28, %v1687_v28 }
 0x33a   :  { %v1936_v30 = vadd.f32 %v1935_v40, %v1809_v32  ;;  %v1689_v40 = vsub.f32 %v7241_v46, %v4931_v44  ;;  %v1816_v12 = vmul.f32 %v1688_v33, %v1688_v33 }
 0x33c   :  { %v1937_v15 = vadd.f32 %v1936_v30, %v1810_v39  ;;  %v1690_v30 = vsub.f32 %v7242_v54, %v4931_v44  ;;  %v1817_v24 = vmul.f32 %v1689_v40, %v1689_v40 }
 0x33e   :  { %v1938_v0 = vadd.f32 %v1937_v15, %v1811_v35  ;;  %v1691_v15 = vsub.f32 %v7243_v45, %v4931_v44  ;;  %v1818_v21 = vmul.f32 %v1690_v30, %v1690_v30 }
 0x340   :  { %v1939_v58 = vadd.f32 %v1938_v0, %v1812_v62  ;;  %v1692_v0 = vsub.f32 %v7244_v52, %v4931_v44  ;;  %v1819_v28 = vmul.f32 %v1691_v15, %v1691_v15 }
 0x342   :  { %v1940_v32 = vadd.f32 %v1939_v58, %v1813_v2  ;;  %v1693_v58 = vsub.f32 %v4684_v14, %v4931_v44  ;;  %v1820_v33 = vmul.f32 %v1692_v0, %v1692_v0 }
 0x344   :  { %v1941_v39 = vadd.f32 %v1940_v32, %v1814_v42  ;;  %v1694_v32 = vsub.f32 %v4690_v48, %v4931_v44  ;;  %v1821_v40 = vmul.f32 %v1693_v58, %v1693_v58 }
 0x346   :  { %v1942_v35 = vadd.f32 %v1941_v39, %v1815_v36  ;;  %v1695_v39 = vsub.f32 %v4696_v55, %v4931_v44  ;;  %v1822_v30 = vmul.f32 %v1694_v32, %v1694_v32 }
 0x348   :  { %v1943_v62 = vadd.f32 %v1942_v35, %v1816_v12  ;;  %v1696_v35 = vsub.f32 %v4702_v7, %v4931_v44  ;;  %v1823_v15 = vmul.f32 %v1695_v39, %v1695_v39 }
 0x34a   :  { %v1944_v2 = vadd.f32 %v1943_v62, %v1817_v24  ;;  %v1697_v62 = vsub.f32 %v4708_v19, %v4931_v44  ;;  %v1824_v0 = vmul.f32 %v1696_v35, %v1696_v35 }
 0x34c   :  { %v1945_v42 = vadd.f32 %v1944_v2, %v1818_v21  ;;  %v1698_v2 = vsub.f32 %v4714_v31, %v4931_v44  ;;  %v1825_v58 = vmul.f32 %v1697_v62, %v1697_v62 }
 0x34e   :  { %v1946_v36 = vadd.f32 %v1945_v42, %v1819_v28  ;;  %v1699_v42 = vsub.f32 %v4720_v43, %v4931_v44  ;;  %v1826_v32 = vmul.f32 %v1698_v2, %v1698_v2 }
 0x350   :  { %v1947_v12 = vadd.f32 %v1946_v36, %v1820_v33  ;;  %v1700_v36 = vsub.f32 %v4726_v57, %v4931_v44  ;;  %v1827_v39 = vmul.f32 %v1699_v42, %v1699_v42 }
 0x352   :  { %v1948_v24 = vadd.f32 %v1947_v12, %v1821_v40  ;;  %v1701_v12 = vsub.f32 %v4732_v11, %v4931_v44  ;;  %v1828_v35 = vmul.f32 %v1700_v36, %v1700_v36 }
 0x354   :  { %v1949_v21 = vadd.f32 %v1948_v24, %v1822_v30  ;;  %v1702_v24 = vsub.f32 %v4738_v25, %v4931_v44  ;;  %v1829_v62 = vmul.f32 %v1701_v12, %v1701_v12 }
 0x356   :  { %v1950_v28 = vadd.f32 %v1949_v21, %v1823_v15  ;;  %v1703_v21 = vsub.f32 %v4744_v37, %v4931_v44  ;;  %v1830_v2 = vmul.f32 %v1702_v24, %v1702_v24 }
 0x358   :  { %v1951_v33 = vadd.f32 %v1950_v28, %v1824_v0  ;;  %v1704_v28 = vsub.f32 %v4750_v49, %v4931_v44  ;;  %v1831_v42 = vmul.f32 %v1703_v21, %v1703_v21 }
 0x35a   :  { %v1952_v40 = vadd.f32 %v1951_v33, %v1825_v58  ;;  %v1705_v33 = vsub.f32 %v4756_v1, %v4931_v44  ;;  %v1832_v36 = vmul.f32 %v1704_v28, %v1704_v28 }
 0x35c   :  { %v1953_v30 = vadd.f32 %v1952_v40, %v1826_v32  ;;  %v1706_v40 = vsub.f32 %v4762_v23, %v4931_v44  ;;  %v1833_v12 = vmul.f32 %v1705_v33, %v1705_v33 }
 0x35e   :  { %v1954_v15 = vadd.f32 %v1953_v30, %v1827_v39  ;;  %v1707_v30 = vsub.f32 %v4768_v47, %v4931_v44  ;;  %v1834_v24 = vmul.f32 %v1706_v40, %v1706_v40 }
 0x360   :  { %v1955_v0 = vadd.f32 %v1954_v15, %v1828_v35  ;;  %v1708_v15 = vsub.f32 %v4774_v17, %v4931_v44  ;;  %v1835_v21 = vmul.f32 %v1707_v30, %v1707_v30 }
 0x362   :  { %v1956_v58 = vadd.f32 %v1955_v0, %v1829_v62  ;;  %v1709_v0 = vsub.f32 %v4780_v53, %v4931_v44  ;;  %v1836_v28 = vmul.f32 %v1708_v15, %v1708_v15 }
 0x364   :  { %v1957_v32 = vadd.f32 %v1956_v58, %v1830_v2  ;;  %v1710_v58 = vsub.f32 %v4786_v29, %v4931_v44  ;;  %v1837_v33 = vmul.f32 %v1709_v0, %v1709_v0 }
 0x366   :  { %v1958_v39 = vadd.f32 %v1957_v32, %v1831_v42  ;;  %v1711_v32 = vsub.f32 %v4792_v10, %v4931_v44  ;;  %v1838_v40 = vmul.f32 %v1710_v58, %v1710_v58 }
 0x368   :  { %v1959_v35 = vadd.f32 %v1958_v39, %v1832_v36  ;;  %v1712_v39 = vsub.f32 %v4798_v3, %v4931_v44  ;;  %v1839_v30 = vmul.f32 %v1711_v32, %v1711_v32 }
 0x36a   :  { %v1960_v62 = vadd.f32 %v1959_v35, %v1833_v12  ;;  %v7320_v35 = vld [vmem:[#allocation91_spill] sm:$0xff]  ;;  %v1840_v15 = vmul.f32 %v1712_v39, %v1712_v39 }
 0x36b   :  { %v1713_v53 = vsub.f32 %v7320_v35, %v4931_v44 }
 0x36c   :  { %v1961_v2 = vadd.f32 %v1960_v62, %v1834_v24  ;;  %v7321_v62 = vld [vmem:[#allocation93_spill] sm:$0xff] }
 0x36d   :  { %v1714_v29 = vsub.f32 %v7321_v62, %v4931_v44  ;;  %v1841_v0 = vmul.f32 %v1713_v53, %v1713_v53 }
 0x36e   :  { %v1962_v42 = vadd.f32 %v1961_v2, %v1835_v21  ;;  %v7322_v2 = vld [vmem:[#allocation95_spill] sm:$0xff] }
 0x36f   :  { %v1715_v10 = vsub.f32 %v7322_v2, %v4931_v44  ;;  %v1842_v58 = vmul.f32 %v1714_v29, %v1714_v29 }
 0x370   :  { %v1963_v36 = vadd.f32 %v1962_v42, %v1836_v28  ;;  %v7323_v42 = vld [vmem:[#allocation97_spill] sm:$0xff] }
 0x371   :  { %v1716_v3 = vsub.f32 %v7323_v42, %v4931_v44  ;;  %v1843_v32 = vmul.f32 %v1715_v10, %v1715_v10 }
 0x372   :  { %v1964_v12 = vadd.f32 %v1963_v36, %v1837_v33  ;;  %v7324_v36 = vld [vmem:[#allocation99_spill] sm:$0xff] }
 0x373   :  { %v1717_v35 = vsub.f32 %v7324_v36, %v4931_v44  ;;  %v1844_v39 = vmul.f32 %v1716_v3, %v1716_v3 }
 0x374   :  { %v1965_v24 = vadd.f32 %v1964_v12, %v1838_v40  ;;  %v7325_v12 = vld [vmem:[#allocation101_spill] sm:$0xff] }
 0x375   :  { %v1718_v62 = vsub.f32 %v7325_v12, %v4931_v44  ;;  %v1845_v53 = vmul.f32 %v1717_v35, %v1717_v35 }
 0x376   :  { %v1966_v21 = vadd.f32 %v1965_v24, %v1839_v30  ;;  %v7326_v24 = vld [vmem:[#allocation103_spill] sm:$0xff] }
 0x377   :  { %v1719_v2 = vsub.f32 %v7326_v24, %v4931_v44  ;;  %v1846_v29 = vmul.f32 %v1718_v62, %v1718_v62 }
 0x378   :  { %v1967_v28 = vadd.f32 %v1966_v21, %v1840_v15  ;;  %v7327_v21 = vld [vmem:[#allocation105_spill] sm:$0xff] }
 0x379   :  { %v1720_v42 = vsub.f32 %v7327_v21, %v4931_v44  ;;  %v1847_v10 = vmul.f32 %v1719_v2, %v1719_v2 }
 0x37a   :  { %v1968_v33 = vadd.f32 %v1967_v28, %v1841_v0  ;;  %v7328_v28 = vld [vmem:[#allocation106_spill] sm:$0xff] }
 0x37b   :  { %v1721_v36 = vsub.f32 %v7328_v28, %v4931_v44  ;;  %v1848_v3 = vmul.f32 %v1720_v42, %v1720_v42  ;;  %v1992_v42 = vlaneseq }
 0x37c   :  { %v1969_v40 = vadd.f32 %v1968_v33, %v1842_v58  ;;  %v7329_v33 = vld [vmem:[#allocation108_spill] sm:$0xff] }
 0x37d   :  { %v1722_v12 = vsub.f32 %v7329_v33, %v4931_v44  ;;  %v1849_v35 = vmul.f32 %v1721_v36, %v1721_v36  ;;  %v1459_v36 = vld [vmem:[%s6818_s2] sm:$0x1] }
 0x37e   :  { %v1970_v30 = vadd.f32 %v1969_v40, %v1843_v32  ;;  %v7330_v40 = vld [vmem:[#allocation109_spill] sm:$0xff] }
 0x37f   :  { %v1723_v24 = vsub.f32 %v7330_v40, %v4931_v44 }
 0x380   :  { %v1971_v15 = vadd.f32 %v1970_v30, %v1844_v39  ;;  %v1850_v30 = vmul.f32 %v1722_v12, %v1722_v12 }
 0x381   :  { %v1851_v21 = vmul.f32 %v1723_v24, %v1723_v24 }
 0x382   :  { %v1972_v0 = vadd.f32 %v1971_v15, %v1845_v53 }
 0x384   :  { %v1973_v58 = vadd.f32 %v1972_v0, %v1846_v29 }
 0x386   :  { %v1974_v32 = vadd.f32 %v1973_v58, %v1847_v10  ;;  %v5189_v10 = vshrl.u32 %v1992_v42, 7  ;;  %v7331_v58 = vld [vmem:[#allocation2_spill] sm:$0xff]  ;;  %v7338_v42 = vld [vmem:[#allocation11_spill] sm:$0xff] }
 0x388   :  { %v1975_v39 = vadd.f32 %v1974_v32, %v1848_v3  ;;  %v7012_v12 = vsub.s32 0, %v5189_v10  ;;  %v7332_v3 = vld [vmem:[#allocation3_spill] sm:$0xff] }
 0x38a   :  { %v1976_v17 = vadd.f32 %v1975_v39, %v1849_v35  ;;  %v7333_v35 = vld [vmem:[#allocation4_spill] sm:$0xff] }
 0x38c   :  { %v1977_v62 = vadd.f32 %v1976_v17, %v1850_v30 }
 0x38e   :  { %v1978_v53 = vadd.f32 %v1977_v62, %v1851_v21  ;;  %v7335_v62 = vld [vmem:[#allocation6_spill] sm:$0xff] }
 0x390   :  { %v1979_v15 = vrot.slane %v1978_v53, 4 }
 0x392   :  { %v1980_v47 = vadd.f32 %v1979_v15, %v1978_v53  ;;  %v7336_v15 = vld [vmem:[#allocation7_spill] sm:$0xff] }
 0x394   :  { %v1981_v28 = vrot.slane %v1980_v47, 2 }
 0x396   :  { %v1982_v2 = vadd.f32 %v1981_v28, %v1980_v47  ;;  %v5198_v47 = vld [vmem:[%s6819_s3] sm:$0x1]  ;;  %v7348_v28 = vld [vmem:[#allocation23_spill] sm:$0xff] }
 0x398   :  { %v1983_v29 = vrot.slane %v1982_v2, 1 }
 0x39a   :  { %v1984_v0 = vadd.f32 %v1983_v29, %v1982_v2  ;;  %v7337_v29 = vld [vmem:[#allocation9_spill] sm:$0xff] }
 0x39c   :  { %v1985_v23 = vmul.f32 0.0009765625, %v1984_v0 }
 0x39e   :  { %v1986_v33 = vadd.f32 1e-05, %v1985_v23 }
 0x3a0   :  { %4055 = vrsqrt.f32 %v1986_v33 }
 0x3ad   :  { %v4056_v17 = vpop.eup %4055 }
 0x3ae   :  { %v1988_v24 = vmul.f32 %v4056_v17, %v1459_v36  ;;  %v7339_v17 = vld [vmem:[#allocation13_spill] sm:$0xff] }
 0x3b0   :  { %v5201_v21 = vmul.f32 %v1988_v24, %v4931_v44  ;;  %v5205_v23 = vrot.slane %v1988_v24, %v7012_v12  ;;  %v7334_v44 = vld [vmem:[#allocation5_spill] sm:$0xff] }
 0x3b1   :  { %v7350_v12 = vld [vmem:[#allocation25_spill] sm:$0xff] }
 0x3b2   :  { %v5211_v33 = vmul.f32 %v5205_v23, %v7331_v58  ;;  %v5215_v32 = vmul.f32 %v5205_v23, %v7332_v3  ;;  %v5219_v39 = vmul.f32 %v5205_v23, %v7333_v35  ;;  %v5223_v30 = vmul.f32 %v5205_v23, %v7334_v44  ;;  %v7340_v58 = vld [vmem:[#allocation15_spill] sm:$0xff]  ;;  %v7342_v35 = vld [vmem:[#allocation17_spill] sm:$0xff] }
 0x3b3   :  { %v5227_v53 = vmul.f32 %v5205_v23, %v7335_v62  ;;  %v5231_v2 = vmul.f32 %v5205_v23, %v7336_v15  ;;  %v5235_v0 = vmul.f32 %v5205_v23, %v7337_v29  ;;  %v5239_v36 = vmul.f32 %v5205_v23, %v7338_v42  ;;  %v7344_v62 = vld [vmem:[#allocation19_spill] sm:$0xff]  ;;  %v7346_v29 = vld [vmem:[#allocation21_spill] sm:$0xff] }
 0x3b4   :  { %v5243_v24 = vmul.f32 %v5205_v23, %v7339_v17  ;;  %v5247_v3 = vmul.f32 %v5205_v23, %v7340_v58  ;;  %v5251_v44 = vmul.f32 %v5205_v23, %v7342_v35  ;;  %v5255_v15 = vmul.f32 %v5205_v23, %v7344_v62 }
 0x3b5   :  { %v5259_v42 = vmul.f32 %v5205_v23, %v7346_v29  ;;  %v5263_v17 = vmul.f32 %v5205_v23, %v7348_v28  ;;  %v5267_v58 = vmul.f32 %v5205_v23, %v7350_v12 }
 0x3b6   :  { %7341 = vst [vmem:[#allocation42_spill] sm:$0xff] %v5247_v3  ;;  %7343 = vst [vmem:[#allocation44_spill] sm:$0xff] %v5251_v44  ;;  %v7352_v3 = vld [vmem:[#allocation27_spill] sm:$0xff]  ;;  %v7354_v44 = vld [vmem:[#allocation29_spill] sm:$0xff] }
 0x3b7   :  { %7345 = vst [vmem:[#allocation46_spill] sm:$0xff] %v5255_v15  ;;  %7347 = vst [vmem:[#allocation48_spill] sm:$0xff] %v5259_v42  ;;  %v5271_v35 = vmul.f32 %v5205_v23, %v7352_v3  ;;  %v5275_v62 = vmul.f32 %v5205_v23, %v7354_v44  ;;  %v7356_v15 = vld [vmem:[#allocation31_spill] sm:$0xff]  ;;  %v7358_v42 = vld [vmem:[#allocation33_spill] sm:$0xff] }
 0x3b8   :  { %7349 = vst [vmem:[#allocation50_spill] sm:$0xff] %v5263_v17  ;;  %7351 = vst [vmem:[#allocation52_spill] sm:$0xff] %v5267_v58  ;;  %v5279_v29 = vmul.f32 %v5205_v23, %v7356_v15  ;;  %v5283_v28 = vmul.f32 %v5205_v23, %v7358_v42  ;;  %v7360_v17 = vld [vmem:[#allocation35_spill] sm:$0xff]  ;;  %v7362_v58 = vld [vmem:[#allocation37_spill] sm:$0xff] }
 0x3b9   :  { %7353 = vst [vmem:[#allocation54_spill] sm:$0xff] %v5271_v35  ;;  %7355 = vst [vmem:[#allocation56_spill] sm:$0xff] %v5275_v62  ;;  %v5287_v12 = vmul.f32 %v5205_v23, %v7360_v17  ;;  %v5291_v3 = vmul.f32 %v5205_v23, %v7362_v58  ;;  %v7364_v35 = vld [vmem:[#allocation39_spill] sm:$0xff]  ;;  %v7366_v62 = vld [vmem:[#allocation41_spill] sm:$0xff] }
 0x3ba   :  { %7357 = vst [vmem:[#allocation58_spill] sm:$0xff] %v5279_v29  ;;  %7359 = vst [vmem:[#allocation60_spill] sm:$0xff] %v5283_v28  ;;  %v5295_v44 = vmul.f32 %v5205_v23, %v7364_v35  ;;  %v5299_v15 = vmul.f32 %v5205_v23, %v7366_v62  ;;  %v7368_v29 = vld [vmem:[#allocation43_spill] sm:$0xff]  ;;  %v7370_v28 = vld [vmem:[#allocation45_spill] sm:$0xff] }
 0x3bb   :  { %7361 = vst [vmem:[#allocation62_spill] sm:$0xff] %v5287_v12  ;;  %7363 = vst [vmem:[#allocation98_spill] sm:$0xff] %v5291_v3  ;;  %v5303_v42 = vmul.f32 %v5205_v23, %v7368_v29  ;;  %v5307_v17 = vmul.f32 %v5205_v23, %v7370_v28  ;;  %v7372_v12 = vld [vmem:[#allocation47_spill] sm:$0xff]  ;;  %v7374_v3 = vld [vmem:[#allocation49_spill] sm:$0xff] }
 0x3bc   :  { %7365 = vst [vmem:[#allocation102_spill] sm:$0xff] %v5295_v44  ;;  %7367 = vst [vmem:[#allocation104_spill] sm:$0xff] %v5299_v15  ;;  %v5311_v58 = vmul.f32 %v5205_v23, %v7372_v12  ;;  %v5315_v35 = vmul.f32 %v5205_v23, %v7374_v3  ;;  %v7376_v44 = vld [vmem:[#allocation51_spill] sm:$0xff]  ;;  %v7378_v15 = vld [vmem:[#allocation53_spill] sm:$0xff] }
 0x3bd   :  { %7369 = vst [vmem:[#allocation107_spill] sm:$0xff] %v5303_v42  ;;  %7371 = vst [vmem:[#allocation34_spill] sm:$0xff] %v5307_v17  ;;  %v5319_v62 = vmul.f32 %v5205_v23, %v7376_v44  ;;  %v5323_v29 = vmul.f32 %v5205_v23, %v7378_v15  ;;  %v7380_v42 = vld [vmem:[#allocation55_spill] sm:$0xff]  ;;  %v7382_v17 = vld [vmem:[#allocation57_spill] sm:$0xff] }
 0x3be   :  { %7373 = vst [vmem:[#allocation36_spill] sm:$0xff] %v5311_v58  ;;  %7375 = vst [vmem:[#allocation38_spill] sm:$0xff] %v5315_v35  ;;  %v5327_v28 = vmul.f32 %v5205_v23, %v7380_v42  ;;  %v5331_v12 = vmul.f32 %v5205_v23, %v7382_v17  ;;  %v7384_v58 = vld [vmem:[#allocation59_spill] sm:$0xff]  ;;  %v7386_v35 = vld [vmem:[#allocation61_spill] sm:$0xff] }
 0x3bf   :  { %7377 = vst [vmem:[#allocation40_spill] sm:$0xff] %v5319_v62  ;;  %7379 = vst [vmem:[#allocation109_spill] sm:$0xff] %v5323_v29  ;;  %v5335_v3 = vmul.f32 %v5205_v23, %v7384_v58  ;;  %v5339_v44 = vmul.f32 %v5205_v23, %v7386_v35  ;;  %v7388_v62 = vld [vmem:[#allocation63_spill] sm:$0xff]  ;;  %v7390_v29 = vld [vmem:[#allocation64_spill] sm:$0xff] }
 0x3c0   :  { %7381 = vst [vmem:[#allocation2_spill] sm:$0xff] %v5327_v28  ;;  %7383 = vst [vmem:[#allocation3_spill] sm:$0xff] %v5331_v12  ;;  %v5343_v15 = vmul.f32 %v5205_v23, %v7388_v62  ;;  %v5347_v42 = vmul.f32 %v5205_v23, %v7390_v29  ;;  %v7392_v28 = vld [vmem:[#allocation65_spill] sm:$0xff]  ;;  %v7394_v12 = vld [vmem:[#allocation66_spill] sm:$0xff] }
 0x3c1   :  { %7385 = vst [vmem:[#allocation4_spill] sm:$0xff] %v5335_v3  ;;  %7387 = vst [vmem:[#allocation5_spill] sm:$0xff] %v5339_v44  ;;  %v5351_v17 = vmul.f32 %v5205_v23, %v7392_v28  ;;  %v5355_v58 = vmul.f32 %v5205_v23, %v7394_v12  ;;  %v7396_v3 = vld [vmem:[#allocation67_spill] sm:$0xff]  ;;  %v7398_v44 = vld [vmem:[#allocation68_spill] sm:$0xff] }
 0x3c2   :  { %7389 = vst [vmem:[#allocation6_spill] sm:$0xff] %v5343_v15  ;;  %7391 = vst [vmem:[#allocation7_spill] sm:$0xff] %v5347_v42  ;;  %v5359_v35 = vmul.f32 %v5205_v23, %v7396_v3  ;;  %v5363_v62 = vmul.f32 %v5205_v23, %v7398_v44  ;;  %v7400_v15 = vld [vmem:[#allocation69_spill] sm:$0xff]  ;;  %v7402_v42 = vld [vmem:[#allocation70_spill] sm:$0xff] }
 0x3c3   :  { %7393 = vst [vmem:[#allocation9_spill] sm:$0xff] %v5351_v17  ;;  %7395 = vst [vmem:[#allocation11_spill] sm:$0xff] %v5355_v58  ;;  %v5367_v29 = vmul.f32 %v5205_v23, %v7400_v15  ;;  %v5371_v28 = vmul.f32 %v5205_v23, %v7402_v42  ;;  %v7404_v17 = vld [vmem:[#allocation71_spill] sm:$0xff]  ;;  %v7406_v58 = vld [vmem:[#allocation72_spill] sm:$0xff] }
 0x3c4   :  { %7397 = vst [vmem:[#allocation13_spill] sm:$0xff] %v5359_v35  ;;  %7399 = vst [vmem:[#allocation15_spill] sm:$0xff] %v5363_v62  ;;  %v5375_v12 = vmul.f32 %v5205_v23, %v7404_v17  ;;  %v5379_v3 = vmul.f32 %v5205_v23, %v7406_v58  ;;  %v7408_v35 = vld [vmem:[#allocation73_spill] sm:$0xff]  ;;  %v7410_v62 = vld [vmem:[#allocation74_spill] sm:$0xff] }
 0x3c5   :  { %7401 = vst [vmem:[#allocation17_spill] sm:$0xff] %v5367_v29  ;;  %7403 = vst [vmem:[#allocation19_spill] sm:$0xff] %v5371_v28  ;;  %v5383_v44 = vmul.f32 %v5205_v23, %v7408_v35  ;;  %v5387_v15 = vmul.f32 %v5205_v23, %v7410_v62  ;;  %v7412_v29 = vld [vmem:[#allocation75_spill] sm:$0xff]  ;;  %v7414_v28 = vld [vmem:[#allocation76_spill] sm:$0xff] }
 0x3c6   :  { %7405 = vst [vmem:[#allocation21_spill] sm:$0xff] %v5375_v12  ;;  %7407 = vst [vmem:[#allocation23_spill] sm:$0xff] %v5379_v3  ;;  %v5391_v42 = vmul.f32 %v5205_v23, %v7412_v29  ;;  %v5395_v17 = vmul.f32 %v5205_v23, %v7414_v28  ;;  %v7416_v12 = vld [vmem:[#allocation78_spill] sm:$0xff]  ;;  %v7418_v3 = vld [vmem:[#allocation80_spill] sm:$0xff] }
 0x3c7   :  { %7409 = vst [vmem:[#allocation25_spill] sm:$0xff] %v5383_v44  ;;  %7411 = vst [vmem:[#allocation27_spill] sm:$0xff] %v5387_v15  ;;  %v5399_v58 = vmul.f32 %v5205_v23, %v7416_v12  ;;  %v5403_v35 = vmul.f32 %v5205_v23, %v7418_v3  ;;  %v7420_v44 = vld [vmem:[#allocation82_spill] sm:$0xff]  ;;  %v7422_v15 = vld [vmem:[#allocation84_spill] sm:$0xff] }
 0x3c8   :  { %7413 = vst [vmem:[#allocation29_spill] sm:$0xff] %v5391_v42  ;;  %7415 = vst [vmem:[#allocation31_spill] sm:$0xff] %v5395_v17  ;;  %v5407_v62 = vmul.f32 %v5205_v23, %v7420_v44  ;;  %v5411_v29 = vmul.f32 %v5205_v23, %v7422_v15  ;;  %v7424_v42 = vld [vmem:[#allocation86_spill] sm:$0xff]  ;;  %v7425_v17 = vld [vmem:[#allocation88_spill] sm:$0xff] }
 0x3c9   :  { %7417 = vst [vmem:[#allocation33_spill] sm:$0xff] %v5399_v58  ;;  %7419 = vst [vmem:[#allocation35_spill] sm:$0xff] %v5403_v35  ;;  %v5415_v28 = vmul.f32 %v5205_v23, %v7424_v42  ;;  %v5419_v12 = vmul.f32 %v5205_v23, %v7425_v17  ;;  %v7427_v58 = vld [vmem:[#allocation90_spill] sm:$0xff]  ;;  %v7428_v35 = vld [vmem:[#allocation92_spill] sm:$0xff]  ;;  %v5439_v17 = vmul.f32 %v5205_v23, %v7302_v20 }
 0x3ca   :  { %7421 = vst [vmem:[#allocation37_spill] sm:$0xff] %v5407_v62  ;;  %7423 = vst [vmem:[#allocation39_spill] sm:$0xff] %v5411_v29  ;;  %v5423_v3 = vmul.f32 %v5205_v23, %v7427_v58  ;;  %v5427_v44 = vmul.f32 %v5205_v23, %v7428_v35  ;;  %v7429_v62 = vld [vmem:[#allocation94_spill] sm:$0xff]  ;;  %v7430_v29 = vld [vmem:[#allocation96_spill] sm:$0xff]  ;;  %v5447_v35 = vmul.f32 %v5205_v23, %v7304_v8 }
 0x3cb   :  { %7426 = vst [vmem:[#allocation41_spill] sm:$0xff] %v5419_v12  ;;  %v5431_v15 = vmul.f32 %v5205_v23, %v7429_v62  ;;  %v5435_v42 = vmul.f32 %v5205_v23, %v7430_v29  ;;  %v7431_v12 = vld [vmem:[#allocation100_spill] sm:$0xff]  ;;  %v5451_v62 = vmul.f32 %v5205_v23, %v7305_v63  ;;  %v5455_v29 = vmul.f32 %v5205_v23, %v4850_v5 }
 0x3cc   :  { %v5443_v58 = vmul.f32 %v5205_v23, %v7431_v12  ;;  %v5459_v20 = vmul.f32 %v5205_v23, %v7306_v27  ;;  %v5463_v12 = vmul.f32 %v5205_v23, %v4862_v41  ;;  %v5467_v8 = vmul.f32 %v5205_v23, %v4471_v56 }
 0x3cd   :  { %v5471_v63 = vmul.f32 %v5205_v23, %v4478_v61  ;;  %v5475_v5 = vmul.f32 %v5205_v23, %v4491_v4  ;;  %v5479_v27 = vmul.f32 %v5205_v23, %v4498_v9  ;;  %v5483_v41 = vmul.f32 %v5205_v23, %v4511_v16 }
 0x3ce   :  { %7432 = vst [vmem:[#allocation43_spill] sm:$0xff] %v5463_v12  ;;  %7433 = vst [vmem:[#allocation45_spill] sm:$0xff] %v5467_v8  ;;  %v7438_v12 = vld [vmem:[#allocation8_spill] sm:$0xff]  ;;  %v7440_v8 = vld [vmem:[#allocation10_spill] sm:$0xff] }
 0x3cf   :  { %7434 = vst [vmem:[#allocation47_spill] sm:$0xff] %v5471_v63  ;;  %7435 = vst [vmem:[#allocation49_spill] sm:$0xff] %v5475_v5  ;;  %v5487_v56 = vmul.f32 %v5205_v23, %v7438_v12  ;;  %v5491_v61 = vmul.f32 %v5205_v23, %v7440_v8  ;;  %v7442_v63 = vld [vmem:[#allocation12_spill] sm:$0xff]  ;;  %v7444_v5 = vld [vmem:[#allocation14_spill] sm:$0xff] }
 0x3d0   :  { %7436 = vst [vmem:[#allocation51_spill] sm:$0xff] %v5479_v27  ;;  %7437 = vst [vmem:[#allocation53_spill] sm:$0xff] %v5483_v41  ;;  %v5495_v4 = vmul.f32 %v5205_v23, %v7442_v63  ;;  %v5499_v9 = vmul.f32 %v5205_v23, %v7444_v5  ;;  %v7446_v27 = vld [vmem:[#allocation16_spill] sm:$0xff]  ;;  %v7448_v41 = vld [vmem:[#allocation18_spill] sm:$0xff] }
 0x3d1   :  { %7439 = vst [vmem:[#allocation55_spill] sm:$0xff] %v5487_v56  ;;  %7441 = vst [vmem:[#allocation57_spill] sm:$0xff] %v5491_v61  ;;  %v5503_v16 = vmul.f32 %v5205_v23, %v7446_v27  ;;  %v5507_v12 = vmul.f32 %v5205_v23, %v7448_v41  ;;  %v7450_v56 = vld [vmem:[#allocation20_spill] sm:$0xff]  ;;  %v7452_v61 = vld [vmem:[#allocation22_spill] sm:$0xff] }
 0x3d2   :  { %7443 = vst [vmem:[#allocation59_spill] sm:$0xff] %v5495_v4  ;;  %7445 = vst [vmem:[#allocation61_spill] sm:$0xff] %v5499_v9  ;;  %v5511_v8 = vmul.f32 %v5205_v23, %v7450_v56  ;;  %v5515_v63 = vmul.f32 %v5205_v23, %v7452_v61  ;;  %v7453_v4 = vld [vmem:[#allocation24_spill] sm:$0xff]  ;;  %v7454_v9 = vld [vmem:[#allocation26_spill] sm:$0xff] }
 0x3d3   :  { %7447 = vst [vmem:[#allocation63_spill] sm:$0xff] %v5503_v16  ;;  %7449 = vst [vmem:[#allocation64_spill] sm:$0xff] %v5507_v12  ;;  %v5519_v5 = vmul.f32 %v5205_v23, %v7453_v4  ;;  %v5523_v27 = vmul.f32 %v5205_v23, %v7454_v9  ;;  %v7455_v16 = vld [vmem:[#allocation28_spill] sm:$0xff]  ;;  %v7456_v12 = vld [vmem:[#allocation30_spill] sm:$0xff]  ;;  %v5539_v4 = vmul.f32 %v5205_v23, %v7316_v50 }
 0x3d4   :  { %7451 = vst [vmem:[#allocation65_spill] sm:$0xff] %v5511_v8  ;;  %v5527_v41 = vmul.f32 %v5205_v23, %v7455_v16  ;;  %v5531_v56 = vmul.f32 %v5205_v23, %v7456_v12  ;;  %v7457_v8 = vld [vmem:[#allocation32_spill] sm:$0xff]  ;;  %v5543_v9 = vmul.f32 %v5205_v23, %v7317_v59  ;;  %v5547_v16 = vmul.f32 %v5205_v23, %v7318_v51 }
 0x3d5   :  { %v5535_v61 = vmul.f32 %v5205_v23, %v7457_v8  ;;  %v5551_v12 = vmul.f32 %v5205_v23, %v7319_v18  ;;  %v5555_v8 = vmul.f32 %v5205_v23, %v7234_v60  ;;  %v5559_v50 = vmul.f32 %v5205_v23, %v7235_v6 }
 0x3d6   :  { %v5563_v59 = vmul.f32 %v5205_v23, %v7236_v13  ;;  %v5567_v51 = vmul.f32 %v5205_v23, %v7237_v22  ;;  %v5571_v18 = vmul.f32 %v5205_v23, %v7238_v26  ;;  %v5575_v60 = vmul.f32 %v5205_v23, %v7239_v34 }
 0x3d7   :  { %v5579_v6 = vmul.f32 %v5205_v23, %v7240_v38  ;;  %v5583_v13 = vmul.f32 %v5205_v23, %v7241_v46  ;;  %v5587_v22 = vmul.f32 %v5205_v23, %v7242_v54  ;;  %v5591_v26 = vmul.f32 %v5205_v23, %v7243_v45 }
 0x3d8   :  { %v5595_v34 = vmul.f32 %v5205_v23, %v7244_v52  ;;  %v5599_v38 = vmul.f32 %v5205_v23, %v4684_v14  ;;  %v5603_v46 = vmul.f32 %v5205_v23, %v4690_v48  ;;  %v5607_v54 = vmul.f32 %v5205_v23, %v4696_v55 }
 0x3d9   :  { %v5611_v45 = vmul.f32 %v5205_v23, %v4702_v7  ;;  %v5615_v52 = vmul.f32 %v5205_v23, %v4708_v19  ;;  %v5619_v14 = vmul.f32 %v5205_v23, %v4714_v31  ;;  %v5623_v48 = vmul.f32 %v5205_v23, %v4720_v43 }
 0x3da   :  { %v5627_v55 = vmul.f32 %v5205_v23, %v4726_v57  ;;  %v5631_v7 = vmul.f32 %v5205_v23, %v4732_v11  ;;  %v5635_v19 = vmul.f32 %v5205_v23, %v4738_v25  ;;  %v5639_v31 = vmul.f32 %v5205_v23, %v4744_v37 }
 0x3db   :  { %v5643_v43 = vmul.f32 %v5205_v23, %v4750_v49  ;;  %v5647_v57 = vmul.f32 %v5205_v23, %v4756_v1 }
 0x3dc   :  { %7458 = vst [vmem:[#allocation66_spill] sm:$0xff] %v5627_v55  ;;  %7459 = vst [vmem:[#allocation67_spill] sm:$0xff] %v5631_v7  ;;  %v7464_v55 = vld [vmem:[#allocation77_spill] sm:$0xff]  ;;  %v7466_v7 = vld [vmem:[#allocation79_spill] sm:$0xff] }
 0x3dd   :  { %7460 = vst [vmem:[#allocation68_spill] sm:$0xff] %v5635_v19  ;;  %7461 = vst [vmem:[#allocation69_spill] sm:$0xff] %v5639_v31  ;;  %v5651_v11 = vmul.f32 %v5205_v23, %v7464_v55  ;;  %v5655_v25 = vmul.f32 %v5205_v23, %v7466_v7  ;;  %v7468_v19 = vld [vmem:[#allocation81_spill] sm:$0xff]  ;;  %v7470_v31 = vld [vmem:[#allocation83_spill] sm:$0xff] }
 0x3de   :  { %7462 = vst [vmem:[#allocation70_spill] sm:$0xff] %v5643_v43  ;;  %7463 = vst [vmem:[#allocation71_spill] sm:$0xff] %v5647_v57  ;;  %v5659_v37 = vmul.f32 %v5205_v23, %v7468_v19  ;;  %v5663_v49 = vmul.f32 %v5205_v23, %v7470_v31  ;;  %v7472_v43 = vld [vmem:[#allocation85_spill] sm:$0xff]  ;;  %v7474_v57 = vld [vmem:[#allocation87_spill] sm:$0xff] }
 0x3df   :  { %7465 = vst [vmem:[#allocation72_spill] sm:$0xff] %v5651_v11  ;;  %7467 = vst [vmem:[#allocation73_spill] sm:$0xff] %v5655_v25  ;;  %v5667_v1 = vmul.f32 %v5205_v23, %v7472_v43  ;;  %v5671_v55 = vmul.f32 %v5205_v23, %v7474_v57  ;;  %v7476_v11 = vld [vmem:[#allocation89_spill] sm:$0xff]  ;;  %v7478_v25 = vld [vmem:[#allocation91_spill] sm:$0xff] }
 0x3e0   :  { %7469 = vst [vmem:[#allocation74_spill] sm:$0xff] %v5659_v37  ;;  %7471 = vst [vmem:[#allocation75_spill] sm:$0xff] %v5663_v49  ;;  %v5675_v7 = vmul.f32 %v5205_v23, %v7476_v11  ;;  %v5679_v19 = vmul.f32 %v5205_v23, %v7478_v25  ;;  %v7480_v37 = vld [vmem:[#allocation93_spill] sm:$0xff]  ;;  %v7482_v49 = vld [vmem:[#allocation95_spill] sm:$0xff] }
 0x3e1   :  { %7473 = vst [vmem:[#allocation76_spill] sm:$0xff] %v5667_v1  ;;  %7475 = vst [vmem:[#allocation78_spill] sm:$0xff] %v5671_v55  ;;  %v5683_v31 = vmul.f32 %v5205_v23, %v7480_v37  ;;  %v5687_v43 = vmul.f32 %v5205_v23, %v7482_v49  ;;  %v7484_v1 = vld [vmem:[#allocation97_spill] sm:$0xff]  ;;  %v7486_v55 = vld [vmem:[#allocation99_spill] sm:$0xff]  ;;  %v7492_v49 = vsub.f32 %v5198_v47, %v5201_v21 }
 0x3e2   :  { %7477 = vst [vmem:[#allocation80_spill] sm:$0xff] %v5675_v7  ;;  %7479 = vst [vmem:[#allocation82_spill] sm:$0xff] %v5679_v19  ;;  %v5691_v57 = vmul.f32 %v5205_v23, %v7484_v1  ;;  %v5695_v11 = vmul.f32 %v5205_v23, %v7486_v55  ;;  %v7488_v7 = vld [vmem:[#allocation101_spill] sm:$0xff]  ;;  %v7490_v19 = vld [vmem:[#allocation103_spill] sm:$0xff] }
 0x3e3   :  { %7481 = vst [vmem:[#allocation84_spill] sm:$0xff] %v5683_v31  ;;  %7483 = vst [vmem:[#allocation86_spill] sm:$0xff] %v5687_v43  ;;  %v5699_v25 = vmul.f32 %v5205_v23, %v7488_v7  ;;  %v5703_v37 = vmul.f32 %v5205_v23, %v7490_v19  ;;  %v7491_v31 = vsub.s32 0, %v5189_v10  ;;  %v7493_v1 = vld [vmem:[#allocation105_spill] sm:$0xff]  ;;  %v7494_v55 = vld [vmem:[#allocation106_spill] sm:$0xff]  ;;  %v5726_v10 = vmul.f32 %v5205_v23, %v7330_v40 }
 0x3e4   :  { %7485 = vst [vmem:[#allocation88_spill] sm:$0xff] %v5691_v57  ;;  %7487 = vst [vmem:[#allocation90_spill] sm:$0xff] %v5695_v11  ;;  %v5714_v57 = vmul.f32 %v5205_v23, %v7493_v1  ;;  %v5718_v11 = vmul.f32 %v5205_v23, %v7494_v55  ;;  %v7495_v7 = vld [vmem:[#allocation108_spill] sm:$0xff]  ;;  %v7509_v1 = vld [vmem:[#allocation46_spill] sm:$0xff] }
 0x3e5   :  { %7489 = vst [vmem:[#allocation92_spill] sm:$0xff] %v5699_v25  ;;  %v5710_v43 = vrot.slane %v7492_v49, %v7491_v31  ;;  %v5722_v25 = vmul.f32 %v5205_v23, %v7495_v7  ;;  %v7507_v49 = vld [vmem:[#allocation44_spill] sm:$0xff]  ;;  %v7513_v7 = vld [vmem:[#allocation50_spill] sm:$0xff] }
 0x3e6   :  { %v7511_v55 = vld [vmem:[#allocation48_spill] sm:$0xff] }
 0x3e7   :  { %v5730_v47 = vadd.f32 %v5710_v43, %v5211_v33  ;;  %v5734_v21 = vadd.f32 %v5710_v43, %v5215_v32  ;;  %v5738_v19 = vadd.f32 %v5710_v43, %v5219_v39  ;;  %v5742_v31 = vadd.f32 %v5710_v43, %v5223_v30  ;;  %v7505_v30 = vld [vmem:[#allocation42_spill] sm:$0xff] }
 0x3e8   :  { %v5746_v40 = vadd.f32 %v5710_v43, %v5227_v53  ;;  %v5750_v23 = vadd.f32 %v5710_v43, %v5231_v2  ;;  %v5754_v33 = vadd.f32 %v5710_v43, %v5235_v0  ;;  %v5758_v32 = vadd.f32 %v5710_v43, %v5239_v36 }
 0x3e9   :  { %7496 = vst [vmem:[#allocation94_spill] sm:$0xff] %v5730_v47  ;;  %7497 = vst [vmem:[#allocation96_spill] sm:$0xff] %v5734_v21  ;;  %v5762_v39 = vadd.f32 %v5710_v43, %v5243_v24  ;;  %v5766_v53 = vadd.f32 %v5710_v43, %v7505_v30  ;;  %v5770_v2 = vadd.f32 %v5710_v43, %v7507_v49 }
 0x3ea   :  { %7498 = vst [vmem:[#allocation100_spill] sm:$0xff] %v5738_v19  ;;  %7499 = vst [vmem:[#allocation8_spill] sm:$0xff] %v5742_v31  ;;  %v5774_v0 = vadd.f32 %v5710_v43, %v7509_v1  ;;  %v5778_v36 = vadd.f32 %v5710_v43, %v7511_v55  ;;  %v5782_v24 = vadd.f32 %v5710_v43, %v7513_v7 }
 0x3eb   :  { %7500 = vst [vmem:[#allocation10_spill] sm:$0xff] %v5746_v40  ;;  %7501 = vst [vmem:[#allocation12_spill] sm:$0xff] %v5750_v23 }
 0x3ec   :  { %7502 = vst [vmem:[#allocation14_spill] sm:$0xff] %v5754_v33  ;;  %7503 = vst [vmem:[#allocation16_spill] sm:$0xff] %v5758_v32 }
 0x3ed   :  { %7504 = vst [vmem:[#allocation18_spill] sm:$0xff] %v5762_v39  ;;  %7506 = vst [vmem:[#allocation20_spill] sm:$0xff] %v5766_v53  ;;  %v7515_v39 = vld [vmem:[#allocation52_spill] sm:$0xff]  ;;  %v7517_v53 = vld [vmem:[#allocation54_spill] sm:$0xff] }
 0x3ee   :  { %7508 = vst [vmem:[#allocation22_spill] sm:$0xff] %v5770_v2  ;;  %7510 = vst [vmem:[#allocation24_spill] sm:$0xff] %v5774_v0  ;;  %v5786_v30 = vadd.f32 %v5710_v43, %v7515_v39  ;;  %v5790_v49 = vadd.f32 %v5710_v43, %v7517_v53  ;;  %v7519_v2 = vld [vmem:[#allocation56_spill] sm:$0xff]  ;;  %v7521_v0 = vld [vmem:[#allocation58_spill] sm:$0xff] }
 0x3ef   :  { %7512 = vst [vmem:[#allocation26_spill] sm:$0xff] %v5778_v36  ;;  %7514 = vst [vmem:[#allocation28_spill] sm:$0xff] %v5782_v24  ;;  %v5794_v1 = vadd.f32 %v5710_v43, %v7519_v2  ;;  %v5798_v55 = vadd.f32 %v5710_v43, %v7521_v0  ;;  %v7523_v36 = vld [vmem:[#allocation60_spill] sm:$0xff]  ;;  %v7525_v24 = vld [vmem:[#allocation62_spill] sm:$0xff] }
 0x3f0   :  { %7516 = vst [vmem:[#allocation30_spill] sm:$0xff] %v5786_v30  ;;  %7518 = vst [vmem:[#allocation32_spill] sm:$0xff] %v5790_v49  ;;  %v5802_v7 = vadd.f32 %v5710_v43, %v7523_v36  ;;  %v5806_v39 = vadd.f32 %v5710_v43, %v7525_v24  ;;  %v7527_v30 = vld [vmem:[#allocation98_spill] sm:$0xff] }
 0x3f1   :  { %7520 = vst [vmem:[#allocation77_spill] sm:$0xff] %v5794_v1  ;;  %7522 = vst [vmem:[#allocation79_spill] sm:$0xff] %v5798_v55  ;;  %v5810_v53 = vadd.f32 %v5710_v43, %v7527_v30  ;;  %v7529_v49 = vld [vmem:[#allocation102_spill] sm:$0xff]  ;;  %v7531_v1 = vld [vmem:[#allocation104_spill] sm:$0xff] }
 0x3f2   :  { %7524 = vst [vmem:[#allocation81_spill] sm:$0xff] %v5802_v7  ;;  %7526 = vst [vmem:[#allocation83_spill] sm:$0xff] %v5806_v39  ;;  %v5814_v2 = vadd.f32 %v5710_v43, %v7529_v49  ;;  %v5818_v0 = vadd.f32 %v5710_v43, %v7531_v1  ;;  %v7533_v55 = vld [vmem:[#allocation107_spill] sm:$0xff]  ;;  %v7535_v7 = vld [vmem:[#allocation34_spill] sm:$0xff] }
 0x3f3   :  { %7528 = vst [vmem:[#allocation85_spill] sm:$0xff] %v5810_v53  ;;  %v5822_v36 = vadd.f32 %v5710_v43, %v7533_v55  ;;  %v5826_v24 = vadd.f32 %v5710_v43, %v7535_v7  ;;  %v7537_v39 = vld [vmem:[#allocation36_spill] sm:$0xff]  ;;  %v7539_v53 = vld [vmem:[#allocation38_spill] sm:$0xff] }
 0x3f4   :  { %7530 = vst [vmem:[#allocation87_spill] sm:$0xff] %v5814_v2  ;;  %7532 = vst [vmem:[#allocation89_spill] sm:$0xff] %v5818_v0  ;;  %v5830_v30 = vadd.f32 %v5710_v43, %v7537_v39  ;;  %v5834_v49 = vadd.f32 %v5710_v43, %v7539_v53  ;;  %v7541_v2 = vld [vmem:[#allocation40_spill] sm:$0xff]  ;;  %v7543_v0 = vld [vmem:[#allocation109_spill] sm:$0xff] }
 0x3f5   :  { %7534 = vst [vmem:[#allocation91_spill] sm:$0xff] %v5822_v36  ;;  %7536 = vst [vmem:[#allocation93_spill] sm:$0xff] %v5826_v24  ;;  %v5838_v1 = vadd.f32 %v5710_v43, %v7541_v2  ;;  %v5842_v55 = vadd.f32 %v5710_v43, %v7543_v0  ;;  %v7545_v36 = vld [vmem:[#allocation2_spill] sm:$0xff]  ;;  %v7547_v24 = vld [vmem:[#allocation3_spill] sm:$0xff] }
 0x3f6   :  { %7538 = vst [vmem:[#allocation95_spill] sm:$0xff] %v5830_v30  ;;  %7540 = vst [vmem:[#allocation97_spill] sm:$0xff] %v5834_v49  ;;  %v5846_v7 = vadd.f32 %v5710_v43, %v7545_v36  ;;  %v5850_v39 = vadd.f32 %v5710_v43, %v7547_v24  ;;  %v7549_v30 = vld [vmem:[#allocation4_spill] sm:$0xff]  ;;  %v7551_v49 = vld [vmem:[#allocation5_spill] sm:$0xff] }
 0x3f7   :  { %7542 = vst [vmem:[#allocation99_spill] sm:$0xff] %v5838_v1  ;;  %7544 = vst [vmem:[#allocation101_spill] sm:$0xff] %v5842_v55  ;;  %v5854_v53 = vadd.f32 %v5710_v43, %v7549_v30  ;;  %v5858_v2 = vadd.f32 %v5710_v43, %v7551_v49  ;;  %v7553_v1 = vld [vmem:[#allocation6_spill] sm:$0xff]  ;;  %v7555_v55 = vld [vmem:[#allocation7_spill] sm:$0xff] }
 0x3f8   :  { %7546 = vst [vmem:[#allocation103_spill] sm:$0xff] %v5846_v7  ;;  %7548 = vst [vmem:[#allocation105_spill] sm:$0xff] %v5850_v39  ;;  %v5862_v0 = vadd.f32 %v5710_v43, %v7553_v1  ;;  %v5866_v36 = vadd.f32 %v5710_v43, %v7555_v55  ;;  %v7557_v7 = vld [vmem:[#allocation9_spill] sm:$0xff]  ;;  %v7559_v39 = vld [vmem:[#allocation11_spill] sm:$0xff] }
 0x3f9   :  { %7550 = vst [vmem:[#allocation106_spill] sm:$0xff] %v5854_v53  ;;  %7552 = vst [vmem:[#allocation108_spill] sm:$0xff] %v5858_v2  ;;  %v5870_v24 = vadd.f32 %v5710_v43, %v7557_v7  ;;  %v5874_v30 = vadd.f32 %v5710_v43, %v7559_v39  ;;  %v7561_v53 = vld [vmem:[#allocation13_spill] sm:$0xff]  ;;  %v7563_v2 = vld [vmem:[#allocation15_spill] sm:$0xff] }
 0x3fa   :  { %7554 = vst [vmem:[#allocation42_spill] sm:$0xff] %v5862_v0  ;;  %7556 = vst [vmem:[#allocation44_spill] sm:$0xff] %v5866_v36  ;;  %v5878_v49 = vadd.f32 %v5710_v43, %v7561_v53  ;;  %v5882_v1 = vadd.f32 %v5710_v43, %v7563_v2  ;;  %v7565_v0 = vld [vmem:[#allocation17_spill] sm:$0xff]  ;;  %v7567_v36 = vld [vmem:[#allocation19_spill] sm:$0xff] }
 0x3fb   :  { %7558 = vst [vmem:[#allocation46_spill] sm:$0xff] %v5870_v24  ;;  %7560 = vst [vmem:[#allocation48_spill] sm:$0xff] %v5874_v30  ;;  %v5886_v55 = vadd.f32 %v5710_v43, %v7565_v0  ;;  %v5890_v7 = vadd.f32 %v5710_v43, %v7567_v36  ;;  %v7569_v24 = vld [vmem:[#allocation21_spill] sm:$0xff]  ;;  %v7571_v30 = vld [vmem:[#allocation23_spill] sm:$0xff] }
 0x3fc   :  { %7562 = vst [vmem:[#allocation50_spill] sm:$0xff] %v5878_v49  ;;  %7564 = vst [vmem:[#allocation52_spill] sm:$0xff] %v5882_v1  ;;  %v5894_v39 = vadd.f32 %v5710_v43, %v7569_v24  ;;  %v5898_v53 = vadd.f32 %v5710_v43, %v7571_v30  ;;  %v7573_v49 = vld [vmem:[#allocation25_spill] sm:$0xff]  ;;  %v7575_v1 = vld [vmem:[#allocation27_spill] sm:$0xff] }
 0x3fd   :  { %7566 = vst [vmem:[#allocation54_spill] sm:$0xff] %v5886_v55  ;;  %7568 = vst [vmem:[#allocation56_spill] sm:$0xff] %v5890_v7  ;;  %v5902_v2 = vadd.f32 %v5710_v43, %v7573_v49  ;;  %v5906_v0 = vadd.f32 %v5710_v43, %v7575_v1  ;;  %v7577_v55 = vld [vmem:[#allocation29_spill] sm:$0xff]  ;;  %v7578_v7 = vld [vmem:[#allocation31_spill] sm:$0xff] }
 0x3fe   :  { %7570 = vst [vmem:[#allocation58_spill] sm:$0xff] %v5894_v39  ;;  %7572 = vst [vmem:[#allocation60_spill] sm:$0xff] %v5898_v53  ;;  %v5910_v36 = vadd.f32 %v5710_v43, %v7577_v55  ;;  %v5914_v24 = vadd.f32 %v5710_v43, %v7578_v7  ;;  %v7580_v39 = vld [vmem:[#allocation33_spill] sm:$0xff]  ;;  %v7582_v53 = vld [vmem:[#allocation35_spill] sm:$0xff]  ;;  %v5934_v7 = vadd.f32 %v5710_v43, %v5415_v28 }
 0x3ff   :  { %7574 = vst [vmem:[#allocation62_spill] sm:$0xff] %v5902_v2  ;;  %7576 = vst [vmem:[#allocation98_spill] sm:$0xff] %v5906_v0  ;;  %v5918_v30 = vadd.f32 %v5710_v43, %v7580_v39  ;;  %v5922_v49 = vadd.f32 %v5710_v43, %v7582_v53  ;;  %v7584_v2 = vld [vmem:[#allocation37_spill] sm:$0xff]  ;;  %v7586_v0 = vld [vmem:[#allocation39_spill] sm:$0xff]  ;;  %v5942_v53 = vadd.f32 %v5710_v43, %v5423_v3 }
 0x400   :  { %7579 = vst [vmem:[#allocation102_spill] sm:$0xff] %v5914_v24  ;;  %v5926_v1 = vadd.f32 %v5710_v43, %v7584_v2  ;;  %v5930_v55 = vadd.f32 %v5710_v43, %v7586_v0  ;;  %7588 = vst [vmem:[#allocation38_spill] sm:$0xff] %v5934_v7  ;;  %v7589_v24 = vld [vmem:[#allocation41_spill] sm:$0xff]  ;;  %v5946_v2 = vadd.f32 %v5710_v43, %v5427_v44 }
 0x401   :  { %7581 = vst [vmem:[#allocation104_spill] sm:$0xff] %v5918_v30  ;;  %7583 = vst [vmem:[#allocation107_spill] sm:$0xff] %v5922_v49  ;;  %v5938_v39 = vadd.f32 %v5710_v43, %v7589_v24  ;;  %v5950_v0 = vadd.f32 %v5710_v43, %v5431_v15  ;;  %v5954_v28 = vadd.f32 %v5710_v43, %v5435_v42  ;;  %v7707_v21 = vld [vmem:[#allocation44_spill] sm:$0xff] }
 0x402   :  { %7585 = vst [vmem:[#allocation34_spill] sm:$0xff] %v5926_v1  ;;  %7587 = vst [vmem:[#allocation36_spill] sm:$0xff] %v5930_v55  ;;  %v5958_v24 = vadd.f32 %v5710_v43, %v5439_v17  ;;  %v5962_v3 = vadd.f32 %v5710_v43, %v5443_v58  ;;  %v5966_v44 = vadd.f32 %v5710_v43, %v5447_v35  ;;  %v7709_v31 = vld [vmem:[#allocation48_spill] sm:$0xff] }
 0x403   :  { %7590 = vst [vmem:[#allocation40_spill] sm:$0xff] %v5938_v39  ;;  %7591 = vst [vmem:[#allocation109_spill] sm:$0xff] %v5942_v53  ;;  %v5970_v15 = vadd.f32 %v5710_v43, %v5451_v62  ;;  %v5974_v42 = vadd.f32 %v5710_v43, %v5455_v29  ;;  %v5978_v17 = vadd.f32 %v5710_v43, %v5459_v20  ;;  %v7710_v40 = vld [vmem:[#allocation50_spill] sm:$0xff]  ;;  %v7711_v23 = vld [vmem:[#allocation52_spill] sm:$0xff] }
 0x404   :  { %7592 = vst [vmem:[#allocation2_spill] sm:$0xff] %v5946_v2  ;;  %7593 = vst [vmem:[#allocation3_spill] sm:$0xff] %v5950_v0  ;;  %v7712_v33 = vld [vmem:[#allocation54_spill] sm:$0xff]  ;;  %v7713_v32 = vld [vmem:[#allocation56_spill] sm:$0xff] }
 0x405   :  { %7594 = vst [vmem:[#allocation4_spill] sm:$0xff] %v5954_v28  ;;  %7595 = vst [vmem:[#allocation5_spill] sm:$0xff] %v5958_v24  ;;  %v7601_v24 = vld [vmem:[#allocation43_spill] sm:$0xff] }
 0x406   :  { %7596 = vst [vmem:[#allocation6_spill] sm:$0xff] %v5962_v3  ;;  %7597 = vst [vmem:[#allocation7_spill] sm:$0xff] %v5966_v44  ;;  %v5982_v58 = vadd.f32 %v5710_v43, %v7601_v24  ;;  %v7603_v3 = vld [vmem:[#allocation45_spill] sm:$0xff]  ;;  %v7605_v44 = vld [vmem:[#allocation47_spill] sm:$0xff] }
 0x407   :  { %7598 = vst [vmem:[#allocation9_spill] sm:$0xff] %v5970_v15  ;;  %7599 = vst [vmem:[#allocation11_spill] sm:$0xff] %v5974_v42  ;;  %v5986_v35 = vadd.f32 %v5710_v43, %v7603_v3  ;;  %v5990_v62 = vadd.f32 %v5710_v43, %v7605_v44  ;;  %v7607_v15 = vld [vmem:[#allocation49_spill] sm:$0xff]  ;;  %v7609_v42 = vld [vmem:[#allocation51_spill] sm:$0xff] }
 0x408   :  { %7600 = vst [vmem:[#allocation13_spill] sm:$0xff] %v5978_v17  ;;  %7602 = vst [vmem:[#allocation15_spill] sm:$0xff] %v5982_v58  ;;  %v5994_v29 = vadd.f32 %v5710_v43, %v7607_v15  ;;  %v5998_v20 = vadd.f32 %v5710_v43, %v7609_v42  ;;  %v7611_v17 = vld [vmem:[#allocation53_spill] sm:$0xff]  ;;  %v7613_v58 = vld [vmem:[#allocation55_spill] sm:$0xff] }
 0x409   :  { %7604 = vst [vmem:[#allocation17_spill] sm:$0xff] %v5986_v35  ;;  %7606 = vst [vmem:[#allocation19_spill] sm:$0xff] %v5990_v62  ;;  %v6002_v24 = vadd.f32 %v5710_v43, %v7611_v17  ;;  %v6006_v3 = vadd.f32 %v5710_v43, %v7613_v58  ;;  %v7615_v35 = vld [vmem:[#allocation57_spill] sm:$0xff]  ;;  %v7616_v62 = vld [vmem:[#allocation59_spill] sm:$0xff] }
 0x40a   :  { %7608 = vst [vmem:[#allocation21_spill] sm:$0xff] %v5994_v29  ;;  %7610 = vst [vmem:[#allocation23_spill] sm:$0xff] %v5998_v20  ;;  %v6010_v44 = vadd.f32 %v5710_v43, %v7615_v35  ;;  %v6014_v15 = vadd.f32 %v5710_v43, %v7616_v62  ;;  %v7617_v29 = vld [vmem:[#allocation61_spill] sm:$0xff]  ;;  %v7618_v20 = vld [vmem:[#allocation63_spill] sm:$0xff]  ;;  %v6034_v62 = vadd.f32 %v5710_v43, %v5515_v63 }
 0x40b   :  { %7612 = vst [vmem:[#allocation25_spill] sm:$0xff] %v6002_v24  ;;  %7614 = vst [vmem:[#allocation27_spill] sm:$0xff] %v6006_v3  ;;  %v6018_v42 = vadd.f32 %v5710_v43, %v7617_v29  ;;  %v6022_v17 = vadd.f32 %v5710_v43, %v7618_v20  ;;  %v7619_v24 = vld [vmem:[#allocation64_spill] sm:$0xff]  ;;  %v7620_v3 = vld [vmem:[#allocation65_spill] sm:$0xff]  ;;  %v6038_v29 = vadd.f32 %v5710_v43, %v5519_v5 }
 0x40c   :  { %v6026_v58 = vadd.f32 %v5710_v43, %v7619_v24  ;;  %v6030_v35 = vadd.f32 %v5710_v43, %v7620_v3  ;;  %v6042_v20 = vadd.f32 %v5710_v43, %v5523_v27  ;;  %v6046_v24 = vadd.f32 %v5710_v43, %v5527_v41  ;;  %v7717_v47 = vld [vmem:[#allocation98_spill] sm:$0xff] }
 0x40d   :  { %v6050_v3 = vadd.f32 %v5710_v43, %v5531_v56  ;;  %v6054_v63 = vadd.f32 %v5710_v43, %v5535_v61  ;;  %v6058_v5 = vadd.f32 %v5710_v43, %v5539_v4  ;;  %v6062_v27 = vadd.f32 %v5710_v43, %v5543_v9  ;;  %v7721_v49 = vld [vmem:[#allocation7_spill] sm:$0xff] }
 0x40e   :  { %v6066_v41 = vadd.f32 %v5710_v43, %v5547_v16  ;;  %v6070_v56 = vadd.f32 %v5710_v43, %v5551_v12  ;;  %v6074_v61 = vadd.f32 %v5710_v43, %v5555_v8  ;;  %v6078_v4 = vadd.f32 %v5710_v43, %v5559_v50  ;;  %v7722_v1 = vld [vmem:[#allocation9_spill] sm:$0xff]  ;;  %v7723_v55 = vld [vmem:[#allocation11_spill] sm:$0xff] }
 0x40f   :  { %v6082_v9 = vadd.f32 %v5710_v43, %v5563_v59  ;;  %v6086_v16 = vadd.f32 %v5710_v43, %v5567_v51  ;;  %v6090_v12 = vadd.f32 %v5710_v43, %v5571_v18  ;;  %v6094_v8 = vadd.f32 %v5710_v43, %v5575_v60  ;;  %v7724_v7 = vld [vmem:[#allocation13_spill] sm:$0xff]  ;;  %v7725_v39 = vld [vmem:[#allocation15_spill] sm:$0xff] }
 0x410   :  { %7621 = vst [vmem:[#allocation29_spill] sm:$0xff] %v6078_v4  ;;  %v6098_v50 = vadd.f32 %v5710_v43, %v5579_v6  ;;  %v6102_v59 = vadd.f32 %v5710_v43, %v5583_v13  ;;  %v6106_v51 = vadd.f32 %v5710_v43, %v5587_v22  ;;  %v6110_v18 = vadd.f32 %v5710_v43, %v5591_v26  ;;  %v7726_v53 = vld [vmem:[#allocation17_spill] sm:$0xff]  ;;  %v7727_v2 = vld [vmem:[#allocation19_spill] sm:$0xff]  ;;  %v7776_v4 = vld [vmem:[#allocation20_spill] sm:$0xff] }
 0x411   :  { %7622 = vst [vmem:[#allocation31_spill] sm:$0xff] %v6082_v9  ;;  %7623 = vst [vmem:[#allocation33_spill] sm:$0xff] %v6086_v16  ;;  %v6114_v60 = vadd.f32 %v5710_v43, %v5595_v34  ;;  %v6118_v6 = vadd.f32 %v5710_v43, %v5599_v38  ;;  %v6122_v13 = vadd.f32 %v5710_v43, %v5603_v46  ;;  %v7728_v0 = vld [vmem:[#allocation21_spill] sm:$0xff]  ;;  %v7729_v28 = vld [vmem:[#allocation23_spill] sm:$0xff] }
 0x412   :  { %7624 = vst [vmem:[#allocation35_spill] sm:$0xff] %v6090_v12  ;;  %7625 = vst [vmem:[#allocation37_spill] sm:$0xff] %v6094_v8  ;;  %v6126_v22 = vadd.f32 %v5710_v43, %v5607_v54  ;;  %v6130_v26 = vadd.f32 %v5710_v43, %v5611_v45  ;;  %v6134_v34 = vadd.f32 %v5710_v43, %v5615_v52  ;;  %v7730_v19 = vld [vmem:[#allocation25_spill] sm:$0xff]  ;;  %v7731_v30 = vld [vmem:[#allocation27_spill] sm:$0xff] }
 0x413   :  { %7626 = vst [vmem:[#allocation39_spill] sm:$0xff] %v6098_v50  ;;  %7627 = vst [vmem:[#allocation41_spill] sm:$0xff] %v6102_v59  ;;  %v6138_v38 = vadd.f32 %v5710_v43, %v5619_v14  ;;  %v6142_v46 = vadd.f32 %v5710_v43, %v5623_v48  ;;  %v7766_v16 = vld [vmem:[#allocation10_spill] sm:$0xff]  ;;  %v7768_v12 = vld [vmem:[#allocation12_spill] sm:$0xff] }
 0x414   :  { %7628 = vst [vmem:[#allocation43_spill] sm:$0xff] %v6106_v51  ;;  %7629 = vst [vmem:[#allocation45_spill] sm:$0xff] %v6110_v18  ;;  %v7774_v51 = vld [vmem:[#allocation18_spill] sm:$0xff]  ;;  %v7788_v18 = vld [vmem:[#allocation32_spill] sm:$0xff] }
 0x415   :  { %7630 = vst [vmem:[#allocation47_spill] sm:$0xff] %v6114_v60  ;;  %7631 = vst [vmem:[#allocation49_spill] sm:$0xff] %v6118_v6  ;;  %v7780_v6 = vld [vmem:[#allocation24_spill] sm:$0xff] }
 0x416   :  { %7632 = vst [vmem:[#allocation51_spill] sm:$0xff] %v6122_v13  ;;  %7633 = vst [vmem:[#allocation53_spill] sm:$0xff] %v6126_v22  ;;  %v7638_v13 = vld [vmem:[#allocation66_spill] sm:$0xff]  ;;  %v7640_v22 = vld [vmem:[#allocation67_spill] sm:$0xff] }
 0x417   :  { %7634 = vst [vmem:[#allocation55_spill] sm:$0xff] %v6130_v26  ;;  %7635 = vst [vmem:[#allocation57_spill] sm:$0xff] %v6134_v34  ;;  %v6146_v54 = vadd.f32 %v5710_v43, %v7638_v13  ;;  %v6150_v45 = vadd.f32 %v5710_v43, %v7640_v22  ;;  %v7642_v26 = vld [vmem:[#allocation68_spill] sm:$0xff]  ;;  %v7644_v34 = vld [vmem:[#allocation69_spill] sm:$0xff] }
 0x418   :  { %7636 = vst [vmem:[#allocation59_spill] sm:$0xff] %v6138_v38  ;;  %7637 = vst [vmem:[#allocation61_spill] sm:$0xff] %v6142_v46  ;;  %v6154_v52 = vadd.f32 %v5710_v43, %v7642_v26  ;;  %v6158_v14 = vadd.f32 %v5710_v43, %v7644_v34  ;;  %v7646_v38 = vld [vmem:[#allocation70_spill] sm:$0xff]  ;;  %v7648_v46 = vld [vmem:[#allocation71_spill] sm:$0xff] }
 0x419   :  { %7639 = vst [vmem:[#allocation63_spill] sm:$0xff] %v6146_v54  ;;  %7641 = vst [vmem:[#allocation64_spill] sm:$0xff] %v6150_v45  ;;  %v6162_v48 = vadd.f32 %v5710_v43, %v7646_v38  ;;  %v6166_v13 = vadd.f32 %v5710_v43, %v7648_v46  ;;  %v7650_v54 = vld [vmem:[#allocation72_spill] sm:$0xff]  ;;  %v7652_v45 = vld [vmem:[#allocation73_spill] sm:$0xff] }
 0x41a   :  { %7643 = vst [vmem:[#allocation65_spill] sm:$0xff] %v6154_v52  ;;  %7645 = vst [vmem:[#allocation66_spill] sm:$0xff] %v6158_v14  ;;  %v6170_v22 = vadd.f32 %v5710_v43, %v7650_v54  ;;  %v6174_v26 = vadd.f32 %v5710_v43, %v7652_v45  ;;  %v7654_v52 = vld [vmem:[#allocation74_spill] sm:$0xff]  ;;  %v7656_v14 = vld [vmem:[#allocation75_spill] sm:$0xff] }
 0x41b   :  { %7647 = vst [vmem:[#allocation67_spill] sm:$0xff] %v6162_v48  ;;  %7649 = vst [vmem:[#allocation68_spill] sm:$0xff] %v6166_v13  ;;  %v6178_v34 = vadd.f32 %v5710_v43, %v7654_v52  ;;  %v6182_v38 = vadd.f32 %v5710_v43, %v7656_v14  ;;  %v7658_v48 = vld [vmem:[#allocation76_spill] sm:$0xff]  ;;  %v7660_v13 = vld [vmem:[#allocation78_spill] sm:$0xff] }
 0x41c   :  { %7651 = vst [vmem:[#allocation69_spill] sm:$0xff] %v6170_v22  ;;  %7653 = vst [vmem:[#allocation70_spill] sm:$0xff] %v6174_v26  ;;  %v6186_v46 = vadd.f32 %v5710_v43, %v7658_v48  ;;  %v6190_v54 = vadd.f32 %v5710_v43, %v7660_v13  ;;  %v7662_v22 = vld [vmem:[#allocation80_spill] sm:$0xff]  ;;  %v7664_v26 = vld [vmem:[#allocation82_spill] sm:$0xff] }
 0x41d   :  { %7655 = vst [vmem:[#allocation71_spill] sm:$0xff] %v6178_v34  ;;  %7657 = vst [vmem:[#allocation72_spill] sm:$0xff] %v6182_v38  ;;  %v6194_v45 = vadd.f32 %v5710_v43, %v7662_v22  ;;  %v6198_v52 = vadd.f32 %v5710_v43, %v7664_v26  ;;  %v7666_v34 = vld [vmem:[#allocation84_spill] sm:$0xff]  ;;  %v7668_v38 = vld [vmem:[#allocation86_spill] sm:$0xff] }
 0x41e   :  { %7659 = vst [vmem:[#allocation73_spill] sm:$0xff] %v6186_v46  ;;  %7661 = vst [vmem:[#allocation74_spill] sm:$0xff] %v6190_v54  ;;  %v6202_v14 = vadd.f32 %v5710_v43, %v7666_v34  ;;  %v6206_v48 = vadd.f32 %v5710_v43, %v7668_v38  ;;  %v7670_v46 = vld [vmem:[#allocation88_spill] sm:$0xff]  ;;  %v7672_v54 = vld [vmem:[#allocation90_spill] sm:$0xff]  ;;  %v6222_v34 = vadd.f32 %v5710_v43, %v5703_v37 }
 0x41f   :  { %7663 = vst [vmem:[#allocation75_spill] sm:$0xff] %v6194_v45  ;;  %7665 = vst [vmem:[#allocation76_spill] sm:$0xff] %v6198_v52  ;;  %v6210_v13 = vadd.f32 %v5710_v43, %v7670_v46  ;;  %v6214_v22 = vadd.f32 %v5710_v43, %v7672_v54  ;;  %v7674_v45 = vld [vmem:[#allocation92_spill] sm:$0xff]  ;;  %v6226_v38 = vadd.f32 %v5710_v43, %v5714_v57  ;;  %v7758_v52 = vld [vmem:[#allocation94_spill] sm:$0xff]  ;;  %v7767_v57 = vmax.f32 %v7766_v16, 0.0 }
 0x420   :  { %7667 = vst [vmem:[#allocation78_spill] sm:$0xff] %v6202_v14  ;;  %7669 = vst [vmem:[#allocation80_spill] sm:$0xff] %v6206_v48  ;;  %v6218_v26 = vadd.f32 %v5710_v43, %v7674_v45  ;;  %v6230_v46 = vadd.f32 %v5710_v43, %v5718_v11  ;;  %v6234_v54 = vadd.f32 %v5710_v43, %v5722_v25  ;;  %v7760_v14 = vld [vmem:[#allocation96_spill] sm:$0xff]  ;;  %v7770_v11 = vld [vmem:[#allocation14_spill] sm:$0xff] }
 0x421   :  { %7671 = vst [vmem:[#allocation82_spill] sm:$0xff] %v6210_v13  ;;  %7673 = vst [vmem:[#allocation84_spill] sm:$0xff] %v6214_v22  ;;  %v6238_v45 = vadd.f32 %v5710_v43, %v5726_v10  ;;  %v7715_v43 = vld [vmem:[#allocation60_spill] sm:$0xff]  ;;  %v7759_v22 = vmax.f32 %v7758_v52, 0.0  ;;  %v7761_v10 = vmax.f32 %v7760_v14, 0.0  ;;  %v7771_v50 = vmax.f32 %v7770_v11, 0.0 }
 0x422   :  { %7675 = vst [vmem:[#allocation86_spill] sm:$0xff] %v6218_v26  ;;  %7676 = vst [vmem:[#allocation88_spill] sm:$0xff] %v6222_v34  ;;  %v7762_v26 = vld [vmem:[#allocation100_spill] sm:$0xff]  ;;  %v7775_v52 = vmax.f32 %v7774_v51, 0.0  ;;  %v7777_v14 = vmax.f32 %v7776_v4, 0.0  ;;  %v7790_v4 = vld [vmem:[#allocation77_spill] sm:$0xff] }
 0x423   :  { %7677 = vst [vmem:[#allocation90_spill] sm:$0xff] %v6226_v38  ;;  %7678 = vst [vmem:[#allocation92_spill] sm:$0xff] %v6230_v46  ;;  %v3434_v48 = vpack.c.bf16 %v7761_v10, %v7759_v22  ;;  %v7763_v13 = vmax.f32 %v7762_v26, 0.0  ;;  %v7764_v37 = vld [vmem:[#allocation8_spill] sm:$0xff]  ;;  %v7769_v38 = vmax.f32 %v7768_v12, 0.0  ;;  %v7778_v10 = vld [vmem:[#allocation22_spill] sm:$0xff] }
 0x424   :  { %7679 = vst [vmem:[#allocation110_spill] sm:$0xff] %v6234_v54  ;;  %7680 = vst [vmem:[#allocation111_spill] sm:$0xff] %v6238_v45  ;;  %v7714_v54 = vld [vmem:[#allocation58_spill] sm:$0xff]  ;;  %v7765_v9 = vmax.f32 %v7764_v37, 0.0  ;;  %v7772_v46 = vld [vmem:[#allocation16_spill] sm:$0xff]  ;;  %v3454_v22 = vpack.c.bf16 %v7777_v14, %v7775_v52  ;;  %v7779_v26 = vmax.f32 %v7778_v10, 0.0 }
 0x425   :  { %v7716_v45 = vld [vmem:[#allocation62_spill] sm:$0xff]  ;;  %v3444_v8 = vpack.c.bf16 %v7769_v38, %v7767_v57  ;;  %v7773_v59 = vmax.f32 %v7772_v46, 0.0  ;;  %v7781_v37 = vmax.f32 %v7780_v6, 0.0  ;;  %v7784_v60 = vld [vmem:[#allocation28_spill] sm:$0xff]  ;;  %v7789_v46 = vmax.f32 %v7788_v18, 0.0  ;;  %3435 = vst [vmem:[%s6820_s4] sm:$0xff] %v3434_v48   ;;  %v7792_v51 = vld [vmem:[#allocation79_spill] sm:$0xff] }
 0x426   :  { %v3439_v34 = vpack.c.bf16 %v7765_v9, %v7763_v13  ;;  %v7782_v13 = vld [vmem:[#allocation26_spill] sm:$0xff]  ;;  %v7785_v12 = vmax.f32 %v7784_v60, 0.0  ;;  %v7793_v18 = vmax.f32 %v7792_v51, 0.0  ;;  %v7794_v6 = vld [vmem:[#allocation81_spill] sm:$0xff]  ;;  %v7796_v48 = vld [vmem:[#allocation83_spill] sm:$0xff]  ;;  %3754 = vst [vmem:[%s6820_s4 + $0x20] sm:$0xff] %v3454_v22  }
 0x427   :  { %v3449_v25 = vpack.c.bf16 %v7773_v59, %v7771_v50  ;;  %v3459_v9 = vpack.c.bf16 %v7781_v37, %v7779_v26  ;;  %v7783_v16 = vmax.f32 %v7782_v13, 0.0  ;;  %v7786_v57 = vld [vmem:[#allocation30_spill] sm:$0xff]  ;;  %3752 = vst [vmem:[%s6820_s4 + $0x10] sm:$0xff] %v3444_v8   ;;  %v7791_v59 = vmax.f32 %v7790_v4, 0.0  ;;  %v7798_v26 = vld [vmem:[#allocation85_spill] sm:$0xff]  ;;  %v7800_v37 = vld [vmem:[#allocation87_spill] sm:$0xff] }
 0x428   :  { %v7787_v11 = vmax.f32 %v7786_v57, 0.0  ;;  %3751 = vst [vmem:[%s6820_s4 + $0x8] sm:$0xff] %v3439_v34   ;;  %v7795_v52 = vmax.f32 %v7794_v6, 0.0  ;;  %v7797_v14 = vmax.f32 %v7796_v48, 0.0  ;;  %v7799_v34 = vmax.f32 %v7798_v26, 0.0  ;;  %v7802_v8 = vld [vmem:[#allocation89_spill] sm:$0xff] }
 0x429   :  { %v3464_v38 = vpack.c.bf16 %v7785_v12, %v7783_v16  ;;  %3753 = vst [vmem:[%s6820_s4 + $0x18] sm:$0xff] %v3449_v25   ;;  %v3474_v60 = vpack.c.bf16 %v7793_v18, %v7791_v59  ;;  %v7801_v13 = vmax.f32 %v7800_v37, 0.0  ;;  %v7803_v12 = vmax.f32 %v7802_v8, 0.0  ;;  %v7804_v57 = vld [vmem:[#allocation91_spill] sm:$0xff]  ;;  %3755 = vst [vmem:[%s6820_s4 + $0x28] sm:$0xff] %v3459_v9   ;;  %v7810_v6 = vld [vmem:[#allocation97_spill] sm:$0xff] }
 0x42a   :  { %v3469_v50 = vpack.c.bf16 %v7789_v46, %v7787_v11  ;;  %v3479_v10 = vpack.c.bf16 %v7797_v14, %v7795_v52  ;;  %v7805_v11 = vmax.f32 %v7804_v57, 0.0  ;;  %v7806_v46 = vld [vmem:[#allocation93_spill] sm:$0xff]  ;;  %v7808_v59 = vld [vmem:[#allocation95_spill] sm:$0xff]  ;;  %v7811_v52 = vmax.f32 %v7810_v6, 0.0 }
 0x42b   :  { %v3484_v16 = vpack.c.bf16 %v7801_v13, %v7799_v34  ;;  %3756 = vst [vmem:[%s6820_s4 + $0x30] sm:$0xff] %v3464_v38   ;;  %v7807_v4 = vmax.f32 %v7806_v46, 0.0  ;;  %v7809_v51 = vmax.f32 %v7808_v59, 0.0  ;;  %v7812_v22 = vld [vmem:[#allocation99_spill] sm:$0xff]  ;;  %v7814_v26 = vld [vmem:[#allocation101_spill] sm:$0xff]  ;;  %3758 = vst [vmem:[%s6820_s4 + $0x40] sm:$0xff] %v3474_v60  }
 0x42c   :  { %v3489_v25 = vpack.c.bf16 %v7805_v11, %v7803_v12  ;;  %3757 = vst [vmem:[%s6820_s4 + $0x38] sm:$0xff] %v3469_v50   ;;  %v7813_v48 = vmax.f32 %v7812_v22, 0.0  ;;  %v7815_v9 = vmax.f32 %v7814_v26, 0.0  ;;  %v7816_v34 = vld [vmem:[#allocation103_spill] sm:$0xff]  ;;  %v7818_v38 = vld [vmem:[#allocation105_spill] sm:$0xff]  ;;  %v7820_v12 = vld [vmem:[#allocation106_spill] sm:$0xff] }
 0x42d   :  { %v3494_v18 = vpack.c.bf16 %v7809_v51, %v7807_v4  ;;  %v7817_v37 = vmax.f32 %v7816_v34, 0.0  ;;  %v7819_v8 = vmax.f32 %v7818_v38, 0.0  ;;  %v7821_v57 = vmax.f32 %v7820_v12, 0.0  ;;  %3759 = vst [vmem:[%s6820_s4 + $0x48] sm:$0xff] %v3479_v10   ;;  %3760 = vst [vmem:[%s6820_s4 + $0x50] sm:$0xff] %v3484_v16   ;;  %v7822_v11 = vld [vmem:[#allocation108_spill] sm:$0xff] }
 0x42e   :  { %v3499_v14 = vpack.c.bf16 %v7813_v48, %v7811_v52  ;;  %3761 = vst [vmem:[%s6820_s4 + $0x58] sm:$0xff] %v3489_v25   ;;  %v7823_v46 = vmax.f32 %v7822_v11, 0.0  ;;  %v7824_v4 = vld [vmem:[#allocation42_spill] sm:$0xff]  ;;  %v7826_v6 = vmax.f32 %v7707_v21, 0.0  ;;  %v7829_v10 = vmax.f32 %v7709_v31, 0.0 }
 0x42f   :  { %v3504_v13 = vpack.c.bf16 %v7817_v37, %v7815_v9  ;;  %v3509_v50 = vpack.c.bf16 %v7821_v57, %v7819_v8  ;;  %v7825_v59 = vmax.f32 %v7824_v4, 0.0  ;;  %v7827_v60 = vld [vmem:[#allocation46_spill] sm:$0xff]  ;;  %v7830_v48 = vmax.f32 %v7710_v40, 0.0  ;;  %3762 = vst [vmem:[%s6820_s4 + $0x60] sm:$0xff] %v3494_v18   ;;  %v7841_v8 = vld [vmem:[#allocation104_spill] sm:$0xff] }
 0x430   :  { %v7828_v52 = vmax.f32 %v7827_v60, 0.0  ;;  %v7831_v16 = vmax.f32 %v7711_v23, 0.0  ;;  %v7832_v9 = vmax.f32 %v7712_v33, 0.0  ;;  %3763 = vst [vmem:[%s6820_s4 + $0x68] sm:$0xff] %v3499_v14   ;;  %v7833_v21 = vmax.f32 %v7713_v32, 0.0  ;;  %v7849_v11 = vld [vmem:[#allocation38_spill] sm:$0xff] }
 0x431   :  { %v3514_v51 = vpack.c.bf16 %v7825_v59, %v7823_v46  ;;  %v3524_v26 = vpack.c.bf16 %v7830_v48, %v7829_v10  ;;  %3764 = vst [vmem:[%s6820_s4 + $0x70] sm:$0xff] %v3504_v13   ;;  %3765 = vst [vmem:[%s6820_s4 + $0x78] sm:$0xff] %v3509_v50   ;;  %v7834_v31 = vmax.f32 %v7714_v54, 0.0  ;;  %v7835_v23 = vmax.f32 %v7715_v43, 0.0  ;;  %v7839_v13 = vld [vmem:[#allocation102_spill] sm:$0xff]  ;;  %v7847_v43 = vld [vmem:[#allocation36_spill] sm:$0xff] }
 0x432   :  { %v3519_v22 = vpack.c.bf16 %v7828_v52, %v7826_v6  ;;  %v3529_v25 = vpack.c.bf16 %v7832_v9, %v7831_v16  ;;  %v7836_v33 = vmax.f32 %v7716_v45, 0.0  ;;  %v7837_v14 = vmax.f32 %v7717_v47, 0.0  ;;  %v7843_v47 = vld [vmem:[#allocation107_spill] sm:$0xff]  ;;  %v7851_v59 = vld [vmem:[#allocation40_spill] sm:$0xff]  ;;  %v7853_v6 = vld [vmem:[#allocation109_spill] sm:$0xff] }
 0x433   :  { %v3534_v40 = vpack.c.bf16 %v7834_v31, %v7833_v21  ;;  %v7838_v34 = vmax.f32 %v5910_v36, 0.0  ;;  %v7840_v38 = vmax.f32 %v7839_v13, 0.0  ;;  %v7842_v12 = vmax.f32 %v7841_v8, 0.0  ;;  %3766 = vst [vmem:[%s6820_s4 + $0x80] sm:$0xff] %v3514_v51   ;;  %3768 = vst [vmem:[%s6820_s4 + $0x90] sm:$0xff] %v3524_v26   ;;  %v7845_v36 = vld [vmem:[#allocation34_spill] sm:$0xff] }
 0x434   :  { %v3539_v18 = vpack.c.bf16 %v7836_v33, %v7835_v23  ;;  %3767 = vst [vmem:[%s6820_s4 + $0x88] sm:$0xff] %v3519_v22   ;;  %3769 = vst [vmem:[%s6820_s4 + $0x98] sm:$0xff] %v3529_v25   ;;  %v7844_v32 = vmax.f32 %v7843_v47, 0.0  ;;  %v7846_v54 = vmax.f32 %v7845_v36, 0.0  ;;  %v7848_v50 = vmax.f32 %v7847_v43, 0.0  ;;  %v7855_v22 = vld [vmem:[#allocation2_spill] sm:$0xff] }
 0x435   :  { %v3544_v37 = vpack.c.bf16 %v7838_v34, %v7837_v14  ;;  %v3549_v57 = vpack.c.bf16 %v7842_v12, %v7840_v38  ;;  %v7850_v46 = vmax.f32 %v7849_v11, 0.0  ;;  %v7852_v51 = vmax.f32 %v7851_v59, 0.0  ;;  %v7857_v48 = vld [vmem:[#allocation3_spill] sm:$0xff]  ;;  %3770 = vst [vmem:[%s6820_s4 + $0xa0] sm:$0xff] %v3534_v40   ;;  %v7859_v9 = vld [vmem:[#allocation4_spill] sm:$0xff]  ;;  %v7861_v21 = vld [vmem:[#allocation5_spill] sm:$0xff] }
 0x436   :  { %v3554_v45 = vpack.c.bf16 %v7846_v54, %v7844_v32  ;;  %v7854_v60 = vmax.f32 %v7853_v6, 0.0  ;;  %v7856_v10 = vmax.f32 %v7855_v22, 0.0  ;;  %v7858_v26 = vmax.f32 %v7857_v48, 0.0  ;;  %3771 = vst [vmem:[%s6820_s4 + $0xa8] sm:$0xff] %v3539_v18   ;;  %v7863_v33 = vld [vmem:[#allocation6_spill] sm:$0xff]  ;;  %v7893_v6 = vld [vmem:[#allocation29_spill] sm:$0xff] }
 0x437   :  { %v3559_v4 = vpack.c.bf16 %v7850_v46, %v7848_v50  ;;  %3772 = vst [vmem:[%s6820_s4 + $0xb0] sm:$0xff] %v3544_v37   ;;  %3773 = vst [vmem:[%s6820_s4 + $0xb8] sm:$0xff] %v3549_v57   ;;  %v7860_v25 = vmax.f32 %v7859_v9, 0.0  ;;  %v7862_v31 = vmax.f32 %v7861_v21, 0.0  ;;  %v7864_v14 = vmax.f32 %v7863_v33, 0.0  ;;  %v7901_v22 = vld [vmem:[#allocation37_spill] sm:$0xff] }
 0x438   :  { %v3564_v52 = vpack.c.bf16 %v7854_v60, %v7852_v51  ;;  %v3569_v16 = vpack.c.bf16 %v7858_v26, %v7856_v10  ;;  %v7865_v40 = vmax.f32 %v7721_v49, 0.0  ;;  %v7866_v18 = vmax.f32 %v7722_v1, 0.0  ;;  %3774 = vst [vmem:[%s6820_s4 + $0xc0] sm:$0xff] %v3554_v45   ;;  %v7903_v26 = vld [vmem:[#allocation39_spill] sm:$0xff]  ;;  %v7905_v9 = vld [vmem:[#allocation41_spill] sm:$0xff] }
 0x439   :  { %v3574_v23 = vpack.c.bf16 %v7862_v31, %v7860_v25  ;;  %v7867_v13 = vmax.f32 %v7723_v55, 0.0  ;;  %v7868_v37 = vmax.f32 %v7724_v7, 0.0  ;;  %v7869_v8 = vmax.f32 %v7725_v39, 0.0  ;;  %3775 = vst [vmem:[%s6820_s4 + $0xc8] sm:$0xff] %v3559_v4   ;;  %v7907_v31 = vld [vmem:[#allocation43_spill] sm:$0xff]  ;;  %v7909_v33 = vld [vmem:[#allocation45_spill] sm:$0xff] }
 0x43a   :  { %v3579_v34 = vpack.c.bf16 %v7865_v40, %v7864_v14  ;;  %3776 = vst [vmem:[%s6820_s4 + $0xd0] sm:$0xff] %v3564_v52   ;;  %3777 = vst [vmem:[%s6820_s4 + $0xd8] sm:$0xff] %v3569_v16   ;;  %v7870_v49 = vmax.f32 %v7726_v53, 0.0  ;;  %v7871_v1 = vmax.f32 %v7727_v2, 0.0  ;;  %v7872_v7 = vmax.f32 %v7728_v0, 0.0 }
 0x43b   :  { %v3584_v38 = vpack.c.bf16 %v7867_v13, %v7866_v18  ;;  %v3589_v12 = vpack.c.bf16 %v7869_v8, %v7868_v37  ;;  %v7873_v39 = vmax.f32 %v7729_v28, 0.0  ;;  %v7874_v47 = vmax.f32 %v7730_v19, 0.0  ;;  %3778 = vst [vmem:[%s6820_s4 + $0xe0] sm:$0xff] %v3574_v23   ;;  %v7913_v13 = vld [vmem:[#allocation49_spill] sm:$0xff]  ;;  %v7915_v8 = vld [vmem:[#allocation51_spill] sm:$0xff] }
 0x43c   :  { %v3594_v55 = vpack.c.bf16 %v7871_v1, %v7870_v49  ;;  %v7875_v32 = vmax.f32 %v7731_v30, 0.0  ;;  %v7876_v54 = vmax.f32 %v6010_v44, 0.0  ;;  %v7877_v45 = vmax.f32 %v6014_v15, 0.0  ;;  %3779 = vst [vmem:[%s6820_s4 + $0xe8] sm:$0xff] %v3579_v34   ;;  %v7911_v34 = vld [vmem:[#allocation47_spill] sm:$0xff]  ;;  %v7917_v49 = vld [vmem:[#allocation53_spill] sm:$0xff] }
 0x43d   :  { %v3599_v57 = vpack.c.bf16 %v7873_v39, %v7872_v7  ;;  %3780 = vst [vmem:[%s6820_s4 + $0xf0] sm:$0xff] %v3584_v38   ;;  %3781 = vst [vmem:[%s6820_s4 + $0xf8] sm:$0xff] %v3589_v12   ;;  %v7878_v19 = vmax.f32 %v6018_v42, 0.0  ;;  %v7879_v30 = vmax.f32 %v6022_v17, 0.0  ;;  %v7880_v2 = vmax.f32 %v6026_v58, 0.0  ;;  %v7919_v7 = vld [vmem:[#allocation55_spill] sm:$0xff] }
 0x43e   :  { %v3604_v36 = vpack.c.bf16 %v7875_v32, %v7874_v47  ;;  %v3609_v43 = vpack.c.bf16 %v7877_v45, %v7876_v54  ;;  %v7881_v0 = vmax.f32 %v6030_v35, 0.0  ;;  %v7882_v44 = vmax.f32 %v6034_v62, 0.0  ;;  %3782 = vst [vmem:[%s6820_s4 + $0x100] sm:$0xff] %v3594_v55   ;;  %v7925_v45 = vld [vmem:[#allocation61_spill] sm:$0xff] }
 0x43f   :  { %v3614_v53 = vpack.c.bf16 %v7879_v30, %v7878_v19  ;;  %v7883_v15 = vmax.f32 %v6038_v29, 0.0  ;;  %v7884_v11 = vmax.f32 %v6042_v20, 0.0  ;;  %v7885_v46 = vmax.f32 %v6046_v24, 0.0  ;;  %3783 = vst [vmem:[%s6820_s4 + $0x108] sm:$0xff] %v3599_v57   ;;  %v7921_v57 = vld [vmem:[#allocation57_spill] sm:$0xff]  ;;  %v7927_v30 = vld [vmem:[#allocation63_spill] sm:$0xff] }
 0x440   :  { %v3619_v28 = vpack.c.bf16 %v7881_v0, %v7880_v2  ;;  %3784 = vst [vmem:[%s6820_s4 + $0x110] sm:$0xff] %v3604_v36   ;;  %3785 = vst [vmem:[%s6820_s4 + $0x118] sm:$0xff] %v3609_v43   ;;  %v7886_v42 = vmax.f32 %v6050_v3, 0.0  ;;  %v7887_v17 = vmax.f32 %v6054_v63, 0.0  ;;  %v7888_v35 = vmax.f32 %v6058_v5, 0.0  ;;  %v7895_v3 = vld [vmem:[#allocation31_spill] sm:$0xff] }
 0x441   :  { %v3624_v50 = vpack.c.bf16 %v7883_v15, %v7882_v44  ;;  %v3629_v4 = vpack.c.bf16 %v7885_v46, %v7884_v11  ;;  %v7889_v62 = vmax.f32 %v6062_v27, 0.0  ;;  %v7890_v20 = vmax.f32 %v6066_v41, 0.0  ;;  %3786 = vst [vmem:[%s6820_s4 + $0x120] sm:$0xff] %v3614_v53   ;;  %v7897_v5 = vld [vmem:[#allocation33_spill] sm:$0xff]  ;;  %v7923_v36 = vld [vmem:[#allocation59_spill] sm:$0xff]  ;;  %v7929_v2 = vld [vmem:[#allocation64_spill] sm:$0xff] }
 0x442   :  { %v3634_v58 = vpack.c.bf16 %v7887_v17, %v7886_v42  ;;  %v7891_v24 = vmax.f32 %v6070_v56, 0.0  ;;  %v7892_v51 = vmax.f32 %v6074_v61, 0.0  ;;  %v7894_v60 = vmax.f32 %v7893_v6, 0.0  ;;  %3787 = vst [vmem:[%s6820_s4 + $0x128] sm:$0xff] %v3619_v28   ;;  %v7899_v56 = vld [vmem:[#allocation35_spill] sm:$0xff]  ;;  %v7931_v44 = vld [vmem:[#allocation65_spill] sm:$0xff] }
 0x443   :  { %v3639_v29 = vpack.c.bf16 %v7889_v62, %v7888_v35  ;;  %3788 = vst [vmem:[%s6820_s4 + $0x130] sm:$0xff] %v3624_v50   ;;  %3789 = vst [vmem:[%s6820_s4 + $0x138] sm:$0xff] %v3629_v4   ;;  %v7896_v63 = vmax.f32 %v7895_v3, 0.0  ;;  %v7898_v27 = vmax.f32 %v7897_v5, 0.0  ;;  %v7900_v61 = vmax.f32 %v7899_v56, 0.0  ;;  %v7933_v50 = vld [vmem:[#allocation66_spill] sm:$0xff] }
 0x444   :  { %v3644_v59 = vpack.c.bf16 %v7891_v24, %v7890_v20  ;;  %v3649_v52 = vpack.c.bf16 %v7894_v60, %v7892_v51  ;;  %v7902_v10 = vmax.f32 %v7901_v22, 0.0  ;;  %v7904_v16 = vmax.f32 %v7903_v26, 0.0  ;;  %3790 = vst [vmem:[%s6820_s4 + $0x140] sm:$0xff] %v3634_v58   ;;  %v7935_v4 = vld [vmem:[#allocation67_spill] sm:$0xff]  ;;  %v7937_v17 = vld [vmem:[#allocation68_spill] sm:$0xff]  ;;  %v7939_v62 = vld [vmem:[#allocation69_spill] sm:$0xff] }
 0x445   :  { %v3654_v41 = vpack.c.bf16 %v7898_v27, %v7896_v63  ;;  %v7906_v25 = vmax.f32 %v7905_v9, 0.0  ;;  %v7908_v23 = vmax.f32 %v7907_v31, 0.0  ;;  %v7910_v14 = vmax.f32 %v7909_v33, 0.0  ;;  %3791 = vst [vmem:[%s6820_s4 + $0x148] sm:$0xff] %v3639_v29   ;;  %v7941_v20 = vld [vmem:[#allocation70_spill] sm:$0xff]  ;;  %v7943_v51 = vld [vmem:[#allocation71_spill] sm:$0xff] }
 0x446   :  { %v3659_v48 = vpack.c.bf16 %v7902_v10, %v7900_v61  ;;  %3792 = vst [vmem:[%s6820_s4 + $0x150] sm:$0xff] %v3644_v59   ;;  %3793 = vst [vmem:[%s6820_s4 + $0x158] sm:$0xff] %v3649_v52   ;;  %v7912_v18 = vmax.f32 %v7911_v34, 0.0  ;;  %v7914_v38 = vmax.f32 %v7913_v13, 0.0  ;;  %v7916_v12 = vmax.f32 %v7915_v8, 0.0  ;;  %v7945_v60 = vld [vmem:[#allocation72_spill] sm:$0xff] }
 0x447   :  { %v3664_v21 = vpack.c.bf16 %v7906_v25, %v7904_v16  ;;  %v3669_v40 = vpack.c.bf16 %v7910_v14, %v7908_v23  ;;  %v7918_v1 = vmax.f32 %v7917_v49, 0.0  ;;  %v7920_v39 = vmax.f32 %v7919_v7, 0.0  ;;  %3794 = vst [vmem:[%s6820_s4 + $0x160] sm:$0xff] %v3654_v41   ;;  %v7947_v63 = vld [vmem:[#allocation73_spill] sm:$0xff]  ;;  %v7949_v27 = vld [vmem:[#allocation74_spill] sm:$0xff]  ;;  %v7951_v61 = vld [vmem:[#allocation75_spill] sm:$0xff] }
 0x448   :  { %v3674_v37 = vpack.c.bf16 %v7914_v38, %v7912_v18  ;;  %v7922_v47 = vmax.f32 %v7921_v57, 0.0  ;;  %v7924_v54 = vmax.f32 %v7923_v36, 0.0  ;;  %v7926_v43 = vmax.f32 %v7925_v45, 0.0  ;;  %3795 = vst [vmem:[%s6820_s4 + $0x168] sm:$0xff] %v3659_v48   ;;  %v7953_v10 = vld [vmem:[#allocation76_spill] sm:$0xff]  ;;  %v7955_v16 = vld [vmem:[#allocation78_spill] sm:$0xff] }
 0x449   :  { %v3679_v55 = vpack.c.bf16 %v7918_v1, %v7916_v12  ;;  %3796 = vst [vmem:[%s6820_s4 + $0x170] sm:$0xff] %v3664_v21   ;;  %3797 = vst [vmem:[%s6820_s4 + $0x178] sm:$0xff] %v3669_v40   ;;  %v7928_v53 = vmax.f32 %v7927_v30, 0.0  ;;  %v7930_v0 = vmax.f32 %v7929_v2, 0.0  ;;  %v7932_v15 = vmax.f32 %v7931_v44, 0.0  ;;  %v7957_v25 = vld [vmem:[#allocation80_spill] sm:$0xff] }
 0x44a   :  { %v3684_v32 = vpack.c.bf16 %v7922_v47, %v7920_v39  ;;  %v3689_v19 = vpack.c.bf16 %v7926_v43, %v7924_v54  ;;  %v7934_v11 = vmax.f32 %v7933_v50, 0.0  ;;  %v7936_v42 = vmax.f32 %v7935_v4, 0.0  ;;  %3798 = vst [vmem:[%s6820_s4 + $0x180] sm:$0xff] %v3674_v37   ;;  %v7959_v23 = vld [vmem:[#allocation82_spill] sm:$0xff]  ;;  %v7961_v14 = vld [vmem:[#allocation84_spill] sm:$0xff]  ;;  %v7973_v47 = vld [vmem:[#allocation111_spill] sm:$0xff] }
 0x44b   :  { %v3694_v28 = vpack.c.bf16 %v7930_v0, %v7928_v53  ;;  %v7938_v58 = vmax.f32 %v7937_v17, 0.0  ;;  %v7940_v29 = vmax.f32 %v7939_v62, 0.0  ;;  %v7942_v24 = vmax.f32 %v7941_v20, 0.0  ;;  %3799 = vst [vmem:[%s6820_s4 + $0x188] sm:$0xff] %v3679_v55   ;;  %v7963_v18 = vld [vmem:[#allocation86_spill] sm:$0xff]  ;;  %v7965_v38 = vld [vmem:[#allocation88_spill] sm:$0xff] }
 0x44c   :  { %v3699_v46 = vpack.c.bf16 %v7934_v11, %v7932_v15  ;;  %3800 = vst [vmem:[%s6820_s4 + $0x190] sm:$0xff] %v3684_v32   ;;  %3801 = vst [vmem:[%s6820_s4 + $0x198] sm:$0xff] %v3689_v19   ;;  %v7944_v6 = vmax.f32 %v7943_v51, 0.0  ;;  %v7946_v52 = vmax.f32 %v7945_v60, 0.0  ;;  %v7948_v5 = vmax.f32 %v7947_v63, 0.0  ;;  %v7967_v12 = vld [vmem:[#allocation90_spill] sm:$0xff] }
 0x44d   :  { %v3704_v35 = vpack.c.bf16 %v7938_v58, %v7936_v42  ;;  %v3709_v59 = vpack.c.bf16 %v7942_v24, %v7940_v29  ;;  %v7950_v41 = vmax.f32 %v7949_v27, 0.0  ;;  %v7952_v22 = vmax.f32 %v7951_v61, 0.0  ;;  %3802 = vst [vmem:[%s6820_s4 + $0x1a0] sm:$0xff] %v3694_v28   ;;  %v7969_v1 = vld [vmem:[#allocation92_spill] sm:$0xff]  ;;  %v7971_v39 = vld [vmem:[#allocation110_spill] sm:$0xff] }
 0x44e   :  { %v3714_v3 = vpack.c.bf16 %v7946_v52, %v7944_v6  ;;  %v7954_v48 = vmax.f32 %v7953_v10, 0.0  ;;  %v7956_v9 = vmax.f32 %v7955_v16, 0.0  ;;  %v7958_v21 = vmax.f32 %v7957_v25, 0.0  ;;  %3803 = vst [vmem:[%s6820_s4 + $0x1a8] sm:$0xff] %v3699_v46  }
 0x44f   :  { %v3719_v56 = vpack.c.bf16 %v7950_v41, %v7948_v5  ;;  %3804 = vst [vmem:[%s6820_s4 + $0x1b0] sm:$0xff] %v3704_v35   ;;  %3805 = vst [vmem:[%s6820_s4 + $0x1b8] sm:$0xff] %v3709_v59   ;;  %v7960_v33 = vmax.f32 %v7959_v23, 0.0  ;;  %v7962_v40 = vmax.f32 %v7961_v14, 0.0  ;;  %v7964_v13 = vmax.f32 %v7963_v18, 0.0 }
 0x450   :  { %v3724_v26 = vpack.c.bf16 %v7954_v48, %v7952_v22  ;;  %v3729_v31 = vpack.c.bf16 %v7958_v21, %v7956_v9  ;;  %v7966_v37 = vmax.f32 %v7965_v38, 0.0  ;;  %v7968_v49 = vmax.f32 %v7967_v12, 0.0  ;;  %3806 = vst [vmem:[%s6820_s4 + $0x1c0] sm:$0xff] %v3714_v3  }
 0x451   :  { %v3734_v34 = vpack.c.bf16 %v7962_v40, %v7960_v33  ;;  %v7970_v55 = vmax.f32 %v7969_v1, 0.0  ;;  %v7972_v57 = vmax.f32 %v7971_v39, 0.0  ;;  %v7974_v32 = vmax.f32 %v7973_v47, 0.0  ;;  %3807 = vst [vmem:[%s6820_s4 + $0x1c8] sm:$0xff] %v3719_v56  }
 0x452   :  { %v3739_v8 = vpack.c.bf16 %v7966_v37, %v7964_v13  ;;  %3808 = vst [vmem:[%s6820_s4 + $0x1d0] sm:$0xff] %v3724_v26   ;;  %3809 = vst [vmem:[%s6820_s4 + $0x1d8] sm:$0xff] %v3729_v31  }
 0x453   :  { %v3744_v7 = vpack.c.bf16 %v7970_v55, %v7968_v49  ;;  %v3749_v36 = vpack.c.bf16 %v7974_v32, %v7972_v57  ;;  %3810 = vst [vmem:[%s6820_s4 + $0x1e0] sm:$0xff] %v3734_v34  }
 0x454   :  { %3811 = vst [vmem:[%s6820_s4 + $0x1e8] sm:$0xff] %v3739_v8  }
 0x455   :  { %3812 = vst [vmem:[%s6820_s4 + $0x1f0] sm:$0xff] %v3744_v7   ;;  %3813 = vst [vmem:[%s6820_s4 + $0x1f8] sm:$0xff] %v3749_v36  }

// kernel: osnet_forward.3
= control target key start
LH: loop header
LB: loop body
LE: loop exit
PB: predicated region body
PF: predicated region fallthrough
CT: control target
= control target key end

     0   :  { %vm723_vm0 = vcmask 1046528   ;;  %s6616_s0 = inlined_call_operand.vmem [shape: bf16[4,2,17,9,128], index: 0, kind: input, shape index: {}]   ;;  %s6617_s1 = inlined_call_operand.vmem [shape: bf16[6,128,128], index: 1, kind: input, shape index: {}]   ;;  %s6618_s2 = inlined_call_operand.vmem [shape: f32[6,1,128], index: 2, kind: input, shape index: {}]   ;;  %s6619_s3 = inlined_call_operand.vmem [shape: f32[6,1,128], index: 3, kind: input, shape index: {}]   ;;  %s6620_s4 = inlined_call_operand.vmem [shape: bf16[64,256], index: 4, kind: input, shape index: {}]   ;;  %s6621_s5 = inlined_call_operand.vmem [shape: bf16[16,64], index: 5, kind: input, shape index: {}]   ;;  %s6622_s6 = inlined_call_operand.vmem [shape: bf16[2,16], index: 6, kind: input, shape index: {}]   ;;  %s6623_s7 = inlined_call_operand.vmem [shape: bf16[128,128], index: 7, kind: input, shape index: {}]   ;;  %s6624_s8 = inlined_call_operand.vmem [shape: f32[1,128], index: 8, kind: input, shape index: {}]   ;;  %s6625_s9 = inlined_call_operand.vmem [shape: f32[1,128], index: 9, kind: input, shape index: {}]   ;;  %s6626_s10 = inlined_call_operand.vmem [shape: f32[1,128], index: 10, kind: input, shape index: {}]   ;;  %s6627_s11 = inlined_call_operand.vmem [shape: bf16[128,128], index: 11, kind: input, shape index: {}]   ;;  %s6628_s12 = inlined_call_operand.vmem [shape: f32[1,128], index: 12, kind: input, shape index: {}]   ;;  %s6629_s13 = inlined_call_operand.hbm [shape: f32[2,128], index: 13, kind: output, shape index: {}]  }
   0x1   :  { %v4579_v0 = vld [vmem:[%s6617_s1 + $0x38] sm:$0xff]   ;;  %v4580_v1 = vld [vmem:[%s6617_s1 + $0x30] sm:$0xff]   ;;  %v4581_v2 = vld [vmem:[%s6617_s1 + $0x28] sm:$0xff]  }
   0x2   :  { %4334 = vmatprep.subr.bf16.mxu0 %v4579_v0  ;;  %v4582_v3 = vld [vmem:[%s6617_s1 + $0x20] sm:$0xff]   ;;  %v3788_v5 = vld [vmem:[%s6616_s0 + $0x110] ss:$8 sps:$4 sm:$0xff]   ;;  %v176_v11 = vld [vmem:[%s6616_s0 + $0xc] sm:$0x1] }
   0x3   :  { %4335 = vmatpush3.bf16.msra.mxu0 %v4579_v0  ;;  %v46_v4 = vld [vmem:[%s6616_s0] ss:$8 sps:$4 sm:$0xff]   ;;  %v175_v6 = vld [vmem:[%s6616_s0 + $0x4] sm:$0x1]  ;;  %v143_v9 = vunpack.c.l.bf16 %v3788_v5  ;;  %v144_v10 = vunpack.c.h.bf16 %v3788_v5  ;;  %v4795_v13 = vld [vmem:[%s6616_s0 + $0x330] ss:$8 sps:$4 sm:$0xff]   ;;  %v208_v15 = vunpack.c.l.bf16 %v176_v11 }
   0x4   :  { %4336 = vmatprep.subr.bf16.mxu0 %v4580_v1  ;;  %v78_v7 = vunpack.c.l.bf16 %v46_v4  ;;  %v79_v8 = vunpack.c.h.bf16 %v46_v4  ;;  %v3820_v12 = vld [vmem:[%s6616_s0 + $0x220] ss:$8 sps:$4 sm:$0xff]   ;;  %v207_v14 = vunpack.c.l.bf16 %v175_v6  ;;  %v3884_v16 = vld [vmem:[%s6616_s0 + $0x224] sm:$0x1]  ;;  %v3885_v17 = vld [vmem:[%s6616_s0 + $0x22c] sm:$0x1]  ;;  %v337_v26 = vunpack.c.l.bf16 %v4795_v13 }
   0x5   :  { %v4806_v18 = vld [vmem:[%s6616_s0 + $0x8] ss:$8 sps:$4 sm:$0xff]   ;;  %v272_v19 = vunpack.c.l.bf16 %v3820_v12  ;;  %v273_v20 = vunpack.c.h.bf16 %v3820_v12  ;;  %v401_v21 = vunpack.c.l.bf16 %v3884_v16  ;;  %v402_v22 = vunpack.c.l.bf16 %v3885_v17  ;;  %v3980_v23 = vld [vmem:[%s6616_s0 + $0xc] sm:$0x1]  ;;  %v3981_v24 = vld [vmem:[%s6616_s0 + $0x14] sm:$0x1] }
   0x6   :  { %v4583_v25 = vld [vmem:[%s6617_s1 + $0x18] sm:$0xff]   ;;  %v338_v27 = vunpack.c.h.bf16 %v4795_v13  ;;  %v466_v28 = vunpack.c.l.bf16 %v4806_v18  ;;  %v467_v29 = vunpack.c.h.bf16 %v4806_v18  ;;  %v595_v30 = vunpack.c.l.bf16 %v3980_v23  ;;  %v4584_v43 = vld [vmem:[%s6617_s1 + $0x10] sm:$0xff]   ;;  %v3790_v53 = vld [vmem:[%s6616_s0 + $0x120] ss:$8 sps:$4 sm:$0xff]  }
   0x7   :  { %4337 = vmatpush3.bf16.msra.mxu0 %v4580_v1  ;;  %v596_v31 = vunpack.c.l.bf16 %v3981_v24  ;;  %v627_v32 = vmax.f32 %v78_v7, %v143_v9  ;;  %v628_v33 = vmax.f32 %v79_v8, %v144_v10  ;;  %v4824_v34 = vld [vmem:[%s6616_s0 + $0x118] ss:$8 sps:$4 sm:$0xff]   ;;  %v724_v35 = vrot.slane %v78_v7, 1  ;;  %v177_v58 = vld [vmem:[%s6616_s0 + $0x14] sm:$0x1] }
   0x8   :  { %4338 = vmatprep.subr.bf16.mxu0 %v4581_v2  ;;  %v725_v36 = vrot.slane %v207_v14, 1  ;;  %v727_v37 = vrot.slane %v79_v8, 1  ;;  %v728_v38 = vrot.slane %v208_v15, 1  ;;  %v1012_v39 = vrot.slane %v272_v19, 1  ;;  %v48_v48 = vld [vmem:[%s6616_s0 + $0x10] ss:$8 sps:$4 sm:$0xff]  }
   0x9   :  { %v1013_v40 = vrot.slane %v401_v21, 1  ;;  %v1015_v41 = vrot.slane %v273_v20, 1  ;;  %v1016_v42 = vrot.slane %v402_v22, 1  ;;  %v1300_v46 = vrot.slane %v466_v28, 1  ;;  %v178_v59 = vld [vmem:[%s6616_s0 + $0x1c] sm:$0x1] }
   0xa   :  { %v726_v44 = vsel %vm723_vm0, %v724_v35, %v725_v36  ;;  %v729_v45 = vsel %vm723_vm0, %v727_v37, %v728_v38  ;;  %v1301_v47 = vrot.slane %v595_v30, 1  ;;  %v531_v49 = vunpack.c.l.bf16 %v4824_v34  ;;  %v4857_v0 = vld [vmem:[%s6616_s0 + $0x230] ss:$8 sps:$4 sm:$0xff]   ;;  %v4862_v1 = vld [vmem:[%s6616_s0 + $0x340] ss:$8 sps:$4 sm:$0xff]  }
   0xb   :  { %4339 = vmatpush3.bf16.msra.mxu0 %v4581_v2  ;;  %v532_v50 = vunpack.c.h.bf16 %v4824_v34  ;;  %v852_v51 = vmax.f32 %v627_v32, %v726_v44  ;;  %v853_v52 = vmax.f32 %v628_v33, %v729_v45  ;;  %v1014_v54 = vsel %vm723_vm0, %v1012_v39, %v1013_v40  ;;  %v4585_v2 = vld [vmem:[%s6617_s1 + $0x8] sm:$0xff]   ;;  %v3886_v7 = vld [vmem:[%s6616_s0 + $0x234] sm:$0x1]  ;;  %v3887_v8 = vld [vmem:[%s6616_s0 + $0x23c] sm:$0x1] }
   0xc   :  { %4340 = vmatprep.subr.bf16.mxu0 %v4582_v3  ;;  %v1017_v55 = vsel %vm723_vm0, %v1015_v41, %v1016_v42  ;;  %v1303_v56 = vrot.slane %v467_v29, 1  ;;  %v1304_v57 = vrot.slane %v596_v31, 1  ;;  %v4852_v62 = vsel %vm723_vm0, %v1300_v46, %v1301_v47  ;;  %v4877_v13 = vld [vmem:[%s6616_s0 + $0x18] ss:$8 sps:$4 sm:$0xff]   ;;  %v3982_v14 = vld [vmem:[%s6616_s0 + $0x1c] sm:$0x1] }
   0xd   :  { %v884_v60 = vmax.f32 %v852_v51, %v272_v19  ;;  %v885_v61 = vmax.f32 %v853_v52, %v273_v20  ;;  %v80_v63 = vunpack.c.l.bf16 %v48_v48  ;;  %v81_v4 = vunpack.c.h.bf16 %v48_v48  ;;  %v3983_v15 = vld [vmem:[%s6616_s0 + $0x24] sm:$0x1]  ;;  %v3950_v42 = vld [vmem:[%s6616_s0 + $0x128] ss:$8 sps:$4 sm:$0xff]  }
   0xe   :  { %v145_v5 = vunpack.c.l.bf16 %v3790_v53  ;;  %v146_v6 = vunpack.c.h.bf16 %v3790_v53  ;;  %v209_v11 = vunpack.c.l.bf16 %v177_v58  ;;  %v210_v12 = vunpack.c.l.bf16 %v178_v59  ;;  %v50_v53 = vld [vmem:[%s6616_s0 + $0x20] ss:$8 sps:$4 sm:$0xff]   ;;  %v3792_v58 = vld [vmem:[%s6616_s0 + $0x130] ss:$8 sps:$4 sm:$0xff]  }
   0xf   :  { %4341 = vmatpush3.bf16.msra.mxu0 %v4582_v3  ;;  %v1305_v3 = vsel %vm723_vm0, %v1303_v56, %v1304_v57  ;;  %v916_v9 = vmax.f32 %v884_v60, %v337_v26  ;;  %v917_v10 = vmax.f32 %v885_v61, %v338_v27  ;;  %v274_v16 = vunpack.c.l.bf16 %v4857_v0 }
  0x10   :  { %4342 = vmatprep.subr.bf16.mxu0 %v4583_v25  ;;  %v275_v17 = vunpack.c.h.bf16 %v4857_v0  ;;  %v339_v19 = vunpack.c.l.bf16 %v4862_v1  ;;  %v340_v20 = vunpack.c.h.bf16 %v4862_v1  ;;  %v403_v23 = vunpack.c.l.bf16 %v3886_v7  ;;  %v180_v0 = vld [vmem:[%s6616_s0 + $0x2c] sm:$0x1]  ;;  %v3888_v7 = vld [vmem:[%s6616_s0 + $0x244] sm:$0x1] }
  0x11   :  { %v1140_v21 = vmax.f32 %v916_v9, %v1014_v54  ;;  %v1141_v22 = vmax.f32 %v917_v10, %v1017_v55  ;;  %v404_v24 = vunpack.c.l.bf16 %v3887_v8  ;;  %v468_v26 = vunpack.c.l.bf16 %v4877_v13 }
  0x12   :  { %v469_v27 = vunpack.c.h.bf16 %v4877_v13  ;;  %v597_v30 = vunpack.c.l.bf16 %v3982_v14  ;;  %v598_v31 = vunpack.c.l.bf16 %v3983_v15  ;;  %v629_v34 = vmax.f32 %v80_v63, %v145_v5  ;;  %v3824_v5 = vld [vmem:[%s6616_s0 + $0x240] ss:$8 sps:$4 sm:$0xff]  }
  0x13   :  { %4343 = vmatpush3.bf16.msra.mxu0 %v4583_v25  ;;  %v4586_v25 = vld [vmem:[%s6617_s1] sm:$0xff]   ;;  %v1172_v32 = vmax.f32 %v1140_v21, %v466_v28  ;;  %v1173_v33 = vmax.f32 %v1141_v22, %v467_v29  ;;  %v630_v35 = vmax.f32 %v81_v4, %v146_v6  ;;  %v730_v36 = vrot.slane %v80_v63, 1  ;;  %v4929_v6 = vld [vmem:[%s6616_s0 + $0x350] ss:$8 sps:$4 sm:$0xff]   ;;  %v3985_v21 = vld [vmem:[%s6616_s0 + $0x34] sm:$0x1] }
  0x14   :  { %4344 = vmatprep.subr.bf16.mxu0 %v4584_v43  ;;  %v731_v37 = vrot.slane %v209_v11, 1  ;;  %v733_v38 = vrot.slane %v81_v4, 1  ;;  %v734_v39 = vrot.slane %v210_v12, 1  ;;  %v1019_v44 = vrot.slane %v403_v23, 1  ;;  %v179_v63 = vld [vmem:[%s6616_s0 + $0x24] sm:$0x1] }
  0x15   :  { %v1204_v40 = vmax.f32 %v1172_v32, %v531_v49  ;;  %v1205_v41 = vmax.f32 %v1173_v33, %v532_v50  ;;  %v1021_v29 = vrot.slane %v275_v17, 1  ;;  %v1022_v45 = vrot.slane %v404_v24, 1  ;;  %v3889_v12 = vld [vmem:[%s6616_s0 + $0x24c] sm:$0x1]  ;;  %v4941_v14 = vld [vmem:[%s6616_s0 + $0x28] ss:$8 sps:$4 sm:$0xff]  }
  0x16   :  { %v732_v28 = vsel %vm723_vm0, %v730_v36, %v731_v37  ;;  %v735_v18 = vsel %vm723_vm0, %v733_v38, %v734_v39  ;;  %v533_v49 = vunpack.c.l.bf16 %v3950_v42  ;;  %v1306_v50 = vrot.slane %v468_v26, 1  ;;  %v3952_v13 = vld [vmem:[%s6616_s0 + $0x138] ss:$8 sps:$4 sm:$0xff]  }
  0x17   :  { %4345 = vmatpush3.bf16.msra.mxu0 %v4584_v43  ;;  %v1018_v43 = vrot.slane %v274_v16, 1  ;;  %v1428_v46 = vmax.f32 %v1204_v40, %v4852_v62  ;;  %v1429_v47 = vmax.f32 %v1205_v41, %v1305_v3  ;;  %v854_v48 = vmax.f32 %v629_v34, %v732_v28 }
  0x18   :  { %4346 = vmatprep.subr.bf16.mxu0 %v4585_v2  ;;  %v855_v51 = vmax.f32 %v630_v35, %v735_v18  ;;  %v1307_v52 = vrot.slane %v597_v30, 1  ;;  %v1309_v57 = vrot.slane %v469_v27, 1  ;;  %v534_v59 = vunpack.c.h.bf16 %v3950_v42 }
  0x19   :  { %v1540_v54 = vpack.c.bf16 %v1429_v47, %v1428_v46  ;;  %v886_v55 = vmax.f32 %v854_v48, %v274_v16  ;;  %v1020_v60 = vsel %vm723_vm0, %v1018_v43, %v1019_v44  ;;  %v1023_v61 = vsel %vm723_vm0, %v1021_v29, %v1022_v45 }
  0x1a   :  { %v887_v56 = vmax.f32 %v855_v51, %v275_v17  ;;  %v1310_v62 = vrot.slane %v598_v31, 1  ;;  %v1308_v3 = vsel %vm723_vm0, %v1306_v50, %v1307_v52  ;;  %v82_v4 = vunpack.c.l.bf16 %v50_v53 }
  0x1b   :  { %4347 = vmatpush3.bf16.msra.mxu0 %v4585_v2  ;;  %4350 = vmatprep.mubr.bf16.mxu0 %v1540_v54  ;;  %v918_v1 = vmax.f32 %v886_v55, %v339_v19  ;;  %v83_v9 = vunpack.c.h.bf16 %v50_v53  ;;  %v147_v10 = vunpack.c.l.bf16 %v3792_v58  ;;  %v148_v11 = vunpack.c.h.bf16 %v3792_v58  ;;  %v52_v53 = vld [vmem:[%s6616_s0 + $0x30] ss:$8 sps:$4 sm:$0xff]   ;;  %v3794_v58 = vld [vmem:[%s6616_s0 + $0x140] ss:$8 sps:$4 sm:$0xff]  }
  0x1c   :  { %4348 = vmatprep.subr.bf16.mxu0 %v4586_v25  ;;  %v919_v2 = vmax.f32 %v887_v56, %v340_v20  ;;  %v1311_v8 = vsel %vm723_vm0, %v1309_v57, %v1310_v62  ;;  %v211_v17 = vunpack.c.l.bf16 %v179_v63  ;;  %v212_v19 = vunpack.c.l.bf16 %v180_v0  ;;  %v3984_v20 = vld [vmem:[%s6616_s0 + $0x2c] sm:$0x1]  ;;  %v181_v63 = vld [vmem:[%s6616_s0 + $0x34] sm:$0x1]  ;;  %v182_v0 = vld [vmem:[%s6616_s0 + $0x3c] sm:$0x1] }
  0x1d   :  { %v1142_v15 = vmax.f32 %v918_v1, %v1020_v60  ;;  %v276_v22 = vunpack.c.l.bf16 %v3824_v5  ;;  %v277_v23 = vunpack.c.h.bf16 %v3824_v5  ;;  %v341_v24 = vunpack.c.l.bf16 %v4929_v6  ;;  %v3826_v1 = vld [vmem:[%s6616_s0 + $0x250] ss:$8 sps:$4 sm:$0xff]  }
  0x1e   :  { %v1143_v16 = vmax.f32 %v919_v2, %v1023_v61  ;;  %v406_v32 = vunpack.c.l.bf16 %v3889_v12  ;;  %v470_v33 = vunpack.c.l.bf16 %v4941_v14  ;;  %v471_v34 = vunpack.c.h.bf16 %v4941_v14  ;;  %v3891_v12 = vld [vmem:[%s6616_s0 + $0x25c] sm:$0x1]  ;;  %v3954_v14 = vld [vmem:[%s6616_s0 + $0x148] ss:$8 sps:$4 sm:$0xff]  }
  0x1f   :  { %4349 = vmatpush3.bf16.msra.mxu0 %v4586_v25  ;;  %v405_v25 = vunpack.c.l.bf16 %v3888_v7  ;;  %v1174_v30 = vmax.f32 %v1142_v15, %v468_v26  ;;  %v599_v35 = vunpack.c.l.bf16 %v3984_v20  ;;  %v600_v36 = vunpack.c.l.bf16 %v3985_v21  ;;  %v4999_v15 = vld [vmem:[%s6616_s0 + $0x38] ss:$8 sps:$4 sm:$0xff]   ;;  %v3986_v21 = vld [vmem:[%s6616_s0 + $0x3c] sm:$0x1] }
  0x20   :  { %v1175_v31 = vmax.f32 %v1143_v16, %v469_v27  ;;  %v631_v37 = vmax.f32 %v82_v4, %v147_v10  ;;  %v632_v40 = vmax.f32 %v83_v9, %v148_v11  ;;  %v736_v41 = vrot.slane %v82_v4, 1  ;;  %v3890_v11 = vld [vmem:[%s6616_s0 + $0x254] sm:$0x1] }
  0x21   :  { %v1206_v38 = vmax.f32 %v1174_v30, %v533_v49  ;;  %v737_v42 = vrot.slane %v211_v17, 1  ;;  %v739_v43 = vrot.slane %v83_v9, 1  ;;  %v740_v44 = vrot.slane %v212_v19, 1 }
  0x22   :  { %v1207_v39 = vmax.f32 %v1175_v31, %v534_v59  ;;  %v1024_v28 = vrot.slane %v276_v22, 1  ;;  %v1025_v27 = vrot.slane %v405_v25, 1  ;;  %v1027_v29 = vrot.slane %v277_v23, 1 }
  0x23   :  { %v1430_v26 = vmax.f32 %v1206_v38, %v1308_v3  ;;  %v738_v45 = vsel %vm723_vm0, %v736_v41, %v737_v42  ;;  %v741_v46 = vsel %vm723_vm0, %v739_v43, %v740_v44  ;;  %v1028_v47 = vrot.slane %v406_v32, 1 }
  0x24   :  { %v1431_v18 = vmax.f32 %v1207_v39, %v1311_v8  ;;  %v1312_v48 = vrot.slane %v470_v33, 1  ;;  %v342_v49 = vunpack.c.h.bf16 %v4929_v6  ;;  %v856_v50 = vmax.f32 %v631_v37, %v738_v45  ;;  %v4987_v6 = vld [vmem:[%s6616_s0 + $0x360] ss:$8 sps:$4 sm:$0xff]  }
  0x25   :  { %v857_v52 = vmax.f32 %v632_v40, %v741_v46  ;;  %v535_v54 = vunpack.c.l.bf16 %v3952_v13  ;;  %v1313_v55 = vrot.slane %v599_v35, 1  ;;  %v1315_v56 = vrot.slane %v471_v34, 1 }
  0x26   :  { %v1541_v51 = vpack.c.bf16 %v1431_v18, %v1430_v26  ;;  %v1316_v57 = vrot.slane %v600_v36, 1  ;;  %v536_v59 = vunpack.c.h.bf16 %v3952_v13  ;;  %v888_v60 = vmax.f32 %v856_v50, %v276_v22  ;;  %v3987_v22 = vld [vmem:[%s6616_s0 + $0x44] sm:$0x1] }
  0x27   :  { %v889_v61 = vmax.f32 %v857_v52, %v277_v23  ;;  %v1026_v62 = vsel %vm723_vm0, %v1024_v28, %v1025_v27  ;;  %v1029_v2 = vsel %vm723_vm0, %v1027_v29, %v1028_v47  ;;  %v1314_v3 = vsel %vm723_vm0, %v1312_v48, %v1313_v55 }
  0x28   :  { %4351 = vmatmul.mubr.bf16.vlgmr.msra.gmra.mxu0 %v1541_v51  ;;  %v84_v4 = vunpack.c.l.bf16 %v52_v53  ;;  %v85_v5 = vunpack.c.h.bf16 %v52_v53  ;;  %v920_v7 = vmax.f32 %v888_v60, %v341_v24  ;;  %v1317_v9 = vsel %vm723_vm0, %v1315_v56, %v1316_v57  ;;  %v54_v53 = vld [vmem:[%s6616_s0 + $0x40] ss:$8 sps:$4 sm:$0xff]  }
  0x29   :  { %v921_v8 = vmax.f32 %v889_v61, %v342_v49  ;;  %v149_v10 = vunpack.c.l.bf16 %v3794_v58  ;;  %v150_v16 = vunpack.c.h.bf16 %v3794_v58  ;;  %v213_v17 = vunpack.c.l.bf16 %v181_v63  ;;  %v3796_v58 = vld [vmem:[%s6616_s0 + $0x150] ss:$8 sps:$4 sm:$0xff]   ;;  %v183_v63 = vld [vmem:[%s6616_s0 + $0x44] sm:$0x1] }
  0x2a   :  { %v214_v19 = vunpack.c.l.bf16 %v182_v0  ;;  %v278_v20 = vunpack.c.l.bf16 %v3826_v1  ;;  %v1144_v23 = vmax.f32 %v920_v7, %v1026_v62  ;;  %v279_v25 = vunpack.c.h.bf16 %v3826_v1 }
  0x2b   :  { %v1145_v24 = vmax.f32 %v921_v8, %v1029_v2  ;;  %v343_v30 = vunpack.c.l.bf16 %v4987_v6  ;;  %v407_v31 = vunpack.c.l.bf16 %v3890_v11  ;;  %v408_v32 = vunpack.c.l.bf16 %v3891_v12  ;;  %v3892_v11 = vld [vmem:[%s6616_s0 + $0x264] sm:$0x1]  ;;  %v3893_v12 = vld [vmem:[%s6616_s0 + $0x26c] sm:$0x1] }
  0x2c   :  { %v472_v35 = vunpack.c.l.bf16 %v4999_v15  ;;  %v473_v36 = vunpack.c.h.bf16 %v4999_v15  ;;  %v1176_v37 = vmax.f32 %v1144_v23, %v470_v33  ;;  %v601_v39 = vunpack.c.l.bf16 %v3986_v21  ;;  %v5057_v21 = vld [vmem:[%s6616_s0 + $0x48] ss:$8 sps:$4 sm:$0xff]  }
  0x2d   :  { %v1177_v38 = vmax.f32 %v1145_v24, %v471_v34  ;;  %v602_v40 = vunpack.c.l.bf16 %v3987_v22  ;;  %v633_v41 = vmax.f32 %v84_v4, %v149_v10  ;;  %v634_v42 = vmax.f32 %v85_v5, %v150_v16  ;;  %v5045_v10 = vld [vmem:[%s6616_s0 + $0x370] ss:$8 sps:$4 sm:$0xff]   ;;  %v3988_v22 = vld [vmem:[%s6616_s0 + $0x4c] sm:$0x1] }
  0x2e   :  { %v742_v43 = vrot.slane %v84_v4, 1  ;;  %v743_v44 = vrot.slane %v213_v17, 1  ;;  %v1208_v28 = vmax.f32 %v1176_v37, %v535_v54  ;;  %v745_v18 = vrot.slane %v85_v5, 1  ;;  %v184_v4 = vld [vmem:[%s6616_s0 + $0x4c] sm:$0x1] }
  0x2f   :  { %v1209_v26 = vmax.f32 %v1177_v38, %v536_v59  ;;  %v746_v13 = vrot.slane %v214_v19, 1  ;;  %v1030_v29 = vrot.slane %v278_v20, 1  ;;  %v1031_v45 = vrot.slane %v407_v31, 1  ;;  %v3828_v5 = vld [vmem:[%s6616_s0 + $0x260] ss:$8 sps:$4 sm:$0xff]  }
  0x30   :  { %v744_v27 = vsel %vm723_vm0, %v742_v43, %v743_v44  ;;  %v1033_v46 = vrot.slane %v279_v25, 1  ;;  %v1432_v47 = vmax.f32 %v1208_v28, %v1314_v3  ;;  %v344_v51 = vunpack.c.h.bf16 %v4987_v6  ;;  %v3989_v31 = vld [vmem:[%s6616_s0 + $0x54] sm:$0x1] }
  0x31   :  { %v1433_v33 = vmax.f32 %v1209_v26, %v1317_v9  ;;  %v747_v34 = vsel %vm723_vm0, %v745_v18, %v746_v13  ;;  %v858_v48 = vmax.f32 %v633_v41, %v744_v27  ;;  %v1034_v50 = vrot.slane %v408_v32, 1 }
  0x32   :  { %v859_v49 = vmax.f32 %v634_v42, %v747_v34  ;;  %v1318_v52 = vrot.slane %v472_v35, 1  ;;  %v1319_v56 = vrot.slane %v601_v39, 1  ;;  %v1321_v57 = vrot.slane %v473_v36, 1 }
  0x33   :  { %v1542_v54 = vpack.c.bf16 %v1433_v33, %v1432_v47  ;;  %v890_v55 = vmax.f32 %v858_v48, %v278_v20  ;;  %v537_v59 = vunpack.c.l.bf16 %v3954_v14  ;;  %v1032_v61 = vsel %vm723_vm0, %v1030_v29, %v1031_v45 }
  0x34   :  { %v891_v60 = vmax.f32 %v859_v49, %v279_v25  ;;  %v1322_v62 = vrot.slane %v602_v40, 1  ;;  %v538_v0 = vunpack.c.h.bf16 %v3954_v14  ;;  %v1035_v2 = vsel %vm723_vm0, %v1033_v46, %v1034_v50  ;;  %v5075_v46 = vld [vmem:[%s6616_s0 + $0x158] ss:$8 sps:$4 sm:$0xff]  }
  0x35   :  { %4354 = vmatprep.mubr.bf16.mxu0 %v1542_v54  ;;  %v922_v1 = vmax.f32 %v890_v55, %v343_v30  ;;  %v86_v3 = vunpack.c.l.bf16 %v54_v53  ;;  %v1320_v7 = vsel %vm723_vm0, %v1318_v52, %v1319_v56  ;;  %v87_v8 = vunpack.c.h.bf16 %v54_v53  ;;  %v56_v53 = vld [vmem:[%s6616_s0 + $0x50] ss:$8 sps:$4 sm:$0xff]  }
  0x36   :  { %v923_v6 = vmax.f32 %v891_v60, %v344_v51  ;;  %v151_v9 = vunpack.c.l.bf16 %v3796_v58  ;;  %v1323_v17 = vsel %vm723_vm0, %v1321_v57, %v1322_v62  ;;  %v152_v19 = vunpack.c.h.bf16 %v3796_v58  ;;  %v3798_v58 = vld [vmem:[%s6616_s0 + $0x160] ss:$8 sps:$4 sm:$0xff]  }
  0x37   :  { %v1146_v16 = vmax.f32 %v922_v1, %v1032_v61  ;;  %v215_v20 = vunpack.c.l.bf16 %v183_v63  ;;  %v216_v24 = vunpack.c.l.bf16 %v184_v4  ;;  %v280_v25 = vunpack.c.l.bf16 %v3828_v5  ;;  %v185_v63 = vld [vmem:[%s6616_s0 + $0x54] sm:$0x1]  ;;  %v186_v4 = vld [vmem:[%s6616_s0 + $0x5c] sm:$0x1] }
  0x38   :  { %v1147_v23 = vmax.f32 %v923_v6, %v1035_v2  ;;  %v281_v30 = vunpack.c.h.bf16 %v3828_v5  ;;  %v345_v37 = vunpack.c.l.bf16 %v5045_v10  ;;  %v409_v38 = vunpack.c.l.bf16 %v3892_v11  ;;  %v5103_v5 = vld [vmem:[%s6616_s0 + $0x270] ss:$8 sps:$4 sm:$0xff]   ;;  %v3894_v11 = vld [vmem:[%s6616_s0 + $0x274] sm:$0x1] }
  0x39   :  { %v1178_v32 = vmax.f32 %v1146_v16, %v472_v35  ;;  %v410_v39 = vunpack.c.l.bf16 %v3893_v12  ;;  %v474_v41 = vunpack.c.l.bf16 %v5057_v21  ;;  %v475_v42 = vunpack.c.h.bf16 %v5057_v21  ;;  %v3895_v12 = vld [vmem:[%s6616_s0 + $0x27c] sm:$0x1] }
  0x3a   :  { %v1179_v40 = vmax.f32 %v1147_v23, %v473_v36  ;;  %v603_v43 = vunpack.c.l.bf16 %v3988_v22  ;;  %v604_v28 = vunpack.c.l.bf16 %v3989_v31  ;;  %v635_v26 = vmax.f32 %v86_v3, %v151_v9  ;;  %v5121_v22 = vld [vmem:[%s6616_s0 + $0x58] ss:$8 sps:$4 sm:$0xff]   ;;  %v3990_v23 = vld [vmem:[%s6616_s0 + $0x5c] sm:$0x1] }
  0x3b   :  { %v1210_v44 = vmax.f32 %v1178_v32, %v537_v59  ;;  %v636_v18 = vmax.f32 %v87_v8, %v152_v19  ;;  %v748_v27 = vrot.slane %v86_v3, 1  ;;  %v749_v29 = vrot.slane %v215_v20, 1  ;;  %v3991_v32 = vld [vmem:[%s6616_s0 + $0x64] sm:$0x1] }
  0x3c   :  { %v1211_v13 = vmax.f32 %v1179_v40, %v538_v0  ;;  %v751_v35 = vrot.slane %v87_v8, 1  ;;  %v752_v15 = vrot.slane %v216_v24, 1  ;;  %v1036_v36 = vrot.slane %v280_v25, 1 }
  0x3d   :  { %v1434_v45 = vmax.f32 %v1210_v44, %v1320_v7  ;;  %v1037_v47 = vrot.slane %v409_v38, 1  ;;  %v750_v14 = vsel %vm723_vm0, %v748_v27, %v749_v29  ;;  %v1039_v34 = vrot.slane %v281_v30, 1 }
  0x3e   :  { %v1435_v33 = vmax.f32 %v1211_v13, %v1323_v17  ;;  %v1040_v48 = vrot.slane %v410_v39, 1  ;;  %v346_v51 = vunpack.c.h.bf16 %v5045_v10  ;;  %v753_v49 = vsel %vm723_vm0, %v751_v35, %v752_v15  ;;  %v5109_v10 = vld [vmem:[%s6616_s0 + $0x380] ss:$8 sps:$4 sm:$0xff]  }
  0x3f   :  { %v860_v50 = vmax.f32 %v635_v26, %v750_v14  ;;  %v1324_v52 = vrot.slane %v474_v41, 1  ;;  %v539_v55 = vunpack.c.l.bf16 %v5075_v46  ;;  %v861_v56 = vmax.f32 %v636_v18, %v753_v49 }
  0x40   :  { %v1543_v54 = vpack.c.bf16 %v1435_v33, %v1434_v45  ;;  %v1325_v57 = vrot.slane %v603_v43, 1  ;;  %v540_v59 = vunpack.c.h.bf16 %v5075_v46  ;;  %v1327_v61 = vrot.slane %v475_v42, 1 }
  0x41   :  { %v892_v60 = vmax.f32 %v860_v50, %v280_v25  ;;  %v1328_v62 = vrot.slane %v604_v28, 1  ;;  %v893_v0 = vmax.f32 %v861_v56, %v281_v30  ;;  %v1038_v1 = vsel %vm723_vm0, %v1036_v36, %v1037_v47 }
  0x42   :  { %4355 = vmatmul.mubr.bf16.gmra.mxu0 %v1543_v54  ;;  %v1041_v2 = vsel %vm723_vm0, %v1039_v34, %v1040_v48  ;;  %v88_v3 = vunpack.c.l.bf16 %v56_v53  ;;  %v1326_v7 = vsel %vm723_vm0, %v1324_v52, %v1325_v57  ;;  %v89_v8 = vunpack.c.h.bf16 %v56_v53  ;;  %v58_v53 = vld [vmem:[%s6616_s0 + $0x60] ss:$8 sps:$4 sm:$0xff]   ;;  %v3800_v54 = vld [vmem:[%s6616_s0 + $0x170] ss:$8 sps:$4 sm:$0xff]  }
  0x43   :  { %v924_v6 = vmax.f32 %v892_v60, %v345_v37  ;;  %v153_v9 = vunpack.c.l.bf16 %v3798_v58  ;;  %v925_v16 = vmax.f32 %v893_v0, %v346_v51  ;;  %v1329_v17 = vsel %vm723_vm0, %v1327_v61, %v1328_v62  ;;  %v188_v60 = vld [vmem:[%s6616_s0 + $0x6c] sm:$0x1]  ;;  %v5164_v61 = vld [vmem:[%s6616_s0 + $0x280] ss:$8 sps:$4 sm:$0xff]  }
  0x44   :  { %v154_v19 = vunpack.c.h.bf16 %v3798_v58  ;;  %v217_v20 = vunpack.c.l.bf16 %v185_v63  ;;  %v218_v25 = vunpack.c.l.bf16 %v186_v4  ;;  %v282_v30 = vunpack.c.l.bf16 %v5103_v5 }
  0x45   :  { %v1148_v24 = vmax.f32 %v924_v6, %v1038_v1  ;;  %v283_v31 = vunpack.c.h.bf16 %v5103_v5  ;;  %v1149_v37 = vmax.f32 %v925_v16, %v1041_v2  ;;  %v347_v38 = vunpack.c.l.bf16 %v5109_v10  ;;  %v5171_v2 = vld [vmem:[%s6616_s0 + $0x390] ss:$8 sps:$4 sm:$0xff]  }
  0x46   :  { %v411_v39 = vunpack.c.l.bf16 %v3894_v11  ;;  %v412_v40 = vunpack.c.l.bf16 %v3895_v12  ;;  %v476_v44 = vunpack.c.l.bf16 %v5121_v22  ;;  %v477_v28 = vunpack.c.h.bf16 %v5121_v22 }
  0x47   :  { %v1180_v43 = vmax.f32 %v1148_v24, %v474_v41  ;;  %v605_v26 = vunpack.c.l.bf16 %v3990_v23  ;;  %v1181_v18 = vmax.f32 %v1149_v37, %v475_v42  ;;  %v606_v13 = vunpack.c.l.bf16 %v3991_v32  ;;  %v5141_v41 = vld [vmem:[%s6616_s0 + $0x168] ss:$8 sps:$4 sm:$0xff]   ;;  %v3993_v37 = vld [vmem:[%s6616_s0 + $0x74] sm:$0x1] }
  0x48   :  { %v637_v27 = vmax.f32 %v88_v3, %v153_v9  ;;  %v638_v29 = vmax.f32 %v89_v8, %v154_v19  ;;  %v754_v45 = vrot.slane %v88_v3, 1  ;;  %v755_v46 = vrot.slane %v217_v20, 1  ;;  %v3896_v3 = vld [vmem:[%s6616_s0 + $0x284] sm:$0x1]  ;;  %v5185_v9 = vld [vmem:[%s6616_s0 + $0x68] ss:$8 sps:$4 sm:$0xff]  }
  0x49   :  { %v1212_v35 = vmax.f32 %v1180_v43, %v539_v55  ;;  %v757_v15 = vrot.slane %v89_v8, 1  ;;  %v1213_v36 = vmax.f32 %v1181_v18, %v540_v59  ;;  %v758_v47 = vrot.slane %v218_v25, 1  ;;  %v187_v59 = vld [vmem:[%s6616_s0 + $0x64] sm:$0x1]  ;;  %v3897_v8 = vld [vmem:[%s6616_s0 + $0x28c] sm:$0x1] }
  0x4a   :  { %v1042_v33 = vrot.slane %v282_v30, 1  ;;  %v1043_v14 = vrot.slane %v411_v39, 1  ;;  %v756_v21 = vsel %vm723_vm0, %v754_v45, %v755_v46  ;;  %v1045_v42 = vrot.slane %v283_v31, 1 }
  0x4b   :  { %v1436_v34 = vmax.f32 %v1212_v35, %v1326_v7  ;;  %v1046_v48 = vrot.slane %v412_v40, 1  ;;  %v1437_v51 = vmax.f32 %v1213_v36, %v1329_v17  ;;  %v348_v49 = vunpack.c.h.bf16 %v5109_v10  ;;  %v3992_v17 = vld [vmem:[%s6616_s0 + $0x6c] sm:$0x1]  ;;  %v5207_v36 = vld [vmem:[%s6616_s0 + $0x178] ss:$8 sps:$4 sm:$0xff]  }
  0x4c   :  { %v759_v50 = vsel %vm723_vm0, %v757_v15, %v758_v47  ;;  %v862_v52 = vmax.f32 %v637_v27, %v756_v21  ;;  %v541_v55 = vunpack.c.l.bf16 %v5141_v41  ;;  %v1330_v57 = vrot.slane %v476_v44, 1 }
  0x4d   :  { %v863_v56 = vmax.f32 %v638_v29, %v759_v50  ;;  %v1331_v58 = vrot.slane %v605_v26, 1  ;;  %v1544_v62 = vpack.c.bf16 %v1437_v51, %v1436_v34  ;;  %v1333_v0 = vrot.slane %v477_v28, 1  ;;  %v60_v51 = vld [vmem:[%s6616_s0 + $0x70] ss:$8 sps:$4 sm:$0xff]  }
  0x4e   :  { %v894_v63 = vmax.f32 %v862_v52, %v282_v30  ;;  %v1334_v1 = vrot.slane %v606_v13, 1  ;;  %v542_v4 = vunpack.c.h.bf16 %v5141_v41  ;;  %v1044_v6 = vsel %vm723_vm0, %v1042_v33, %v1043_v14 }
  0x4f   :  { %v895_v5 = vmax.f32 %v863_v56, %v283_v31  ;;  %v1047_v7 = vsel %vm723_vm0, %v1045_v42, %v1046_v48  ;;  %4358 = vmatprep.mubr.bf16.mxu0 %v1544_v62  ;;  %v1332_v11 = vsel %vm723_vm0, %v1330_v57, %v1331_v58  ;;  %v90_v12 = vunpack.c.l.bf16 %v58_v53 }
  0x50   :  { %v926_v10 = vmax.f32 %v894_v63, %v347_v38  ;;  %v91_v16 = vunpack.c.h.bf16 %v58_v53  ;;  %v1335_v20 = vsel %vm723_vm0, %v1333_v0, %v1334_v1  ;;  %v155_v23 = vunpack.c.l.bf16 %v3800_v54  ;;  %v5232_v1 = vld [vmem:[%s6616_s0 + $0x290] ss:$8 sps:$4 sm:$0xff]  }
  0x51   :  { %v927_v19 = vmax.f32 %v895_v5, %v348_v49  ;;  %v156_v24 = vunpack.c.h.bf16 %v3800_v54  ;;  %v219_v30 = vunpack.c.l.bf16 %v187_v59  ;;  %v220_v31 = vunpack.c.l.bf16 %v188_v60  ;;  %v3802_v54 = vld [vmem:[%s6616_s0 + $0x180] ss:$8 sps:$4 sm:$0xff]   ;;  %v189_v59 = vld [vmem:[%s6616_s0 + $0x74] sm:$0x1]  ;;  %v190_v60 = vld [vmem:[%s6616_s0 + $0x7c] sm:$0x1] }
  0x52   :  { %v1150_v25 = vmax.f32 %v926_v10, %v1044_v6  ;;  %v284_v32 = vunpack.c.l.bf16 %v5164_v61  ;;  %v285_v39 = vunpack.c.h.bf16 %v5164_v61  ;;  %v349_v40 = vunpack.c.l.bf16 %v5171_v2  ;;  %v5250_v10 = vld [vmem:[%s6616_s0 + $0x78] ss:$8 sps:$4 sm:$0xff]  }
  0x53   :  { %v1151_v38 = vmax.f32 %v927_v19, %v1047_v7  ;;  %v413_v43 = vunpack.c.l.bf16 %v3896_v3  ;;  %v414_v18 = vunpack.c.l.bf16 %v3897_v8  ;;  %v478_v13 = vunpack.c.l.bf16 %v5185_v9  ;;  %v3898_v7 = vld [vmem:[%s6616_s0 + $0x294] sm:$0x1]  ;;  %v3899_v8 = vld [vmem:[%s6616_s0 + $0x29c] sm:$0x1] }
  0x54   :  { %v1182_v26 = vmax.f32 %v1150_v25, %v476_v44  ;;  %v479_v27 = vunpack.c.h.bf16 %v5185_v9  ;;  %v607_v35 = vunpack.c.l.bf16 %v3992_v17  ;;  %v608_v45 = vunpack.c.l.bf16 %v3993_v37  ;;  %v3994_v19 = vld [vmem:[%s6616_s0 + $0x7c] sm:$0x1] }
  0x55   :  { %v1183_v29 = vmax.f32 %v1151_v38, %v477_v28  ;;  %v639_v46 = vmax.f32 %v90_v12, %v155_v23  ;;  %v640_v41 = vmax.f32 %v91_v16, %v156_v24  ;;  %v760_v47 = vrot.slane %v90_v12, 1 }
  0x56   :  { %v1214_v15 = vmax.f32 %v1182_v26, %v541_v55  ;;  %v761_v44 = vrot.slane %v219_v30, 1  ;;  %v763_v14 = vrot.slane %v91_v16, 1  ;;  %v764_v34 = vrot.slane %v220_v31, 1 }
  0x57   :  { %v1215_v33 = vmax.f32 %v1183_v29, %v542_v4  ;;  %v1048_v21 = vrot.slane %v284_v32, 1  ;;  %v1049_v28 = vrot.slane %v413_v43, 1  ;;  %v1051_v48 = vrot.slane %v285_v39, 1 }
  0x58   :  { %v1438_v42 = vmax.f32 %v1214_v15, %v1332_v11  ;;  %v762_v22 = vsel %vm723_vm0, %v760_v47, %v761_v44  ;;  %v765_v50 = vsel %vm723_vm0, %v763_v14, %v764_v34  ;;  %v1052_v53 = vrot.slane %v414_v18, 1  ;;  %v5273_v44 = vld [vmem:[%s6616_s0 + $0x188] ss:$8 sps:$4 sm:$0xff]  }
  0x59   :  { %v1439_v49 = vmax.f32 %v1215_v33, %v1335_v20  ;;  %v864_v52 = vmax.f32 %v639_v46, %v762_v22  ;;  %v350_v55 = vunpack.c.h.bf16 %v5171_v2  ;;  %v865_v56 = vmax.f32 %v640_v41, %v765_v50  ;;  %v5237_v2 = vld [vmem:[%s6616_s0 + $0x3a0] ss:$8 sps:$4 sm:$0xff]   ;;  %v3995_v20 = vld [vmem:[%s6616_s0 + $0x84] sm:$0x1] }
  0x5a   :  { %v1336_v57 = vrot.slane %v478_v13, 1  ;;  %v1337_v58 = vrot.slane %v607_v35, 1  ;;  %v543_v62 = vunpack.c.l.bf16 %v5207_v36  ;;  %v1339_v0 = vrot.slane %v479_v27, 1 }
  0x5b   :  { %v1545_v61 = vpack.c.bf16 %v1439_v49, %v1438_v42  ;;  %v896_v63 = vmax.f32 %v864_v52, %v284_v32  ;;  %v544_v3 = vunpack.c.h.bf16 %v5207_v36  ;;  %v897_v4 = vmax.f32 %v865_v56, %v285_v39 }
  0x5c   :  { %v1050_v5 = vsel %vm723_vm0, %v1048_v21, %v1049_v28  ;;  %v1340_v6 = vrot.slane %v608_v45, 1  ;;  %v1053_v12 = vsel %vm723_vm0, %v1051_v48, %v1052_v53  ;;  %v1338_v16 = vsel %vm723_vm0, %v1336_v57, %v1337_v58 }
  0x5d   :  { %4359 = vmatmul.mubr.bf16.gmra.mxu0 %v1545_v61  ;;  %v928_v11 = vmax.f32 %v896_v63, %v349_v40  ;;  %v92_v17 = vunpack.c.l.bf16 %v60_v51  ;;  %v929_v23 = vmax.f32 %v897_v4, %v350_v55  ;;  %v93_v24 = vunpack.c.h.bf16 %v60_v51  ;;  %v62_v51 = vld [vmem:[%s6616_s0 + $0x88] ss:$8 sps:$4 sm:$0xff]  }
  0x5e   :  { %v157_v25 = vunpack.c.l.bf16 %v3802_v54  ;;  %v158_v30 = vunpack.c.h.bf16 %v3802_v54  ;;  %v1341_v32 = vsel %vm723_vm0, %v1339_v0, %v1340_v6  ;;  %v221_v37 = vunpack.c.l.bf16 %v189_v59  ;;  %v3804_v54 = vld [vmem:[%s6616_s0 + $0x198] ss:$8 sps:$4 sm:$0xff]   ;;  %v191_v59 = vld [vmem:[%s6616_s0 + $0x8c] sm:$0x1] }
  0x5f   :  { %v1152_v31 = vmax.f32 %v928_v11, %v1050_v5  ;;  %v222_v38 = vunpack.c.l.bf16 %v190_v60  ;;  %v1153_v39 = vmax.f32 %v929_v23, %v1053_v12  ;;  %v286_v40 = vunpack.c.l.bf16 %v5232_v1  ;;  %v192_v60 = vld [vmem:[%s6616_s0 + $0x94] sm:$0x1]  ;;  %v5304_v6 = vld [vmem:[%s6616_s0 + $0x3b8] ss:$8 sps:$4 sm:$0xff]  }
  0x60   :  { %v287_v43 = vunpack.c.h.bf16 %v5232_v1  ;;  %v351_v26 = vunpack.c.l.bf16 %v5237_v2  ;;  %v415_v29 = vunpack.c.l.bf16 %v3898_v7  ;;  %v416_v35 = vunpack.c.l.bf16 %v3899_v8  ;;  %v5298_v1 = vld [vmem:[%s6616_s0 + $0x2a8] ss:$8 sps:$4 sm:$0xff]   ;;  %v3900_v7 = vld [vmem:[%s6616_s0 + $0x2ac] sm:$0x1]  ;;  %v3901_v8 = vld [vmem:[%s6616_s0 + $0x2b4] sm:$0x1] }
  0x61   :  { %v1184_v18 = vmax.f32 %v1152_v31, %v478_v13  ;;  %v480_v45 = vunpack.c.l.bf16 %v5250_v10  ;;  %v1185_v46 = vmax.f32 %v1153_v39, %v479_v27  ;;  %v481_v15 = vunpack.c.h.bf16 %v5250_v10  ;;  %v5315_v11 = vld [vmem:[%s6616_s0 + $0x90] ss:$8 sps:$4 sm:$0xff]   ;;  %v3997_v31 = vld [vmem:[%s6616_s0 + $0x9c] sm:$0x1] }
  0x62   :  { %v609_v36 = vunpack.c.l.bf16 %v3994_v19  ;;  %v610_v41 = vunpack.c.l.bf16 %v3995_v20  ;;  %v641_v33 = vmax.f32 %v92_v17, %v157_v25  ;;  %v642_v14 = vmax.f32 %v93_v24, %v158_v30  ;;  %v3996_v20 = vld [vmem:[%s6616_s0 + $0x94] sm:$0x1] }
  0x63   :  { %v1216_v47 = vmax.f32 %v1184_v18, %v543_v62  ;;  %v766_v13 = vrot.slane %v92_v17, 1  ;;  %v1217_v34 = vmax.f32 %v1185_v46, %v544_v3  ;;  %v767_v21 = vrot.slane %v221_v37, 1 }
  0x64   :  { %v769_v42 = vrot.slane %v93_v24, 1  ;;  %v770_v22 = vrot.slane %v222_v38, 1  ;;  %v1054_v9 = vrot.slane %v286_v40, 1  ;;  %v1055_v27 = vrot.slane %v415_v29, 1 }
  0x65   :  { %v1440_v28 = vmax.f32 %v1216_v47, %v1338_v16  ;;  %v1057_v48 = vrot.slane %v287_v43, 1  ;;  %v1441_v49 = vmax.f32 %v1217_v34, %v1341_v32  ;;  %v768_v50 = vsel %vm723_vm0, %v766_v13, %v767_v21 }
  0x66   :  { %v771_v52 = vsel %vm723_vm0, %v769_v42, %v770_v22  ;;  %v1058_v53 = vrot.slane %v416_v35, 1  ;;  %v352_v55 = vunpack.c.h.bf16 %v5237_v2  ;;  %v866_v56 = vmax.f32 %v641_v33, %v768_v50 }
  0x67   :  { %v867_v57 = vmax.f32 %v642_v14, %v771_v52  ;;  %v1342_v58 = vrot.slane %v480_v45, 1  ;;  %v1546_v61 = vpack.c.bf16 %v1441_v49, %v1440_v28  ;;  %v545_v62 = vunpack.c.l.bf16 %v5273_v44  ;;  %v5339_v14 = vld [vmem:[%s6616_s0 + $0x1a0] ss:$8 sps:$4 sm:$0xff]  }
  0x68   :  { %v1343_v63 = vrot.slane %v609_v36, 1  ;;  %v1345_v0 = vrot.slane %v481_v15, 1  ;;  %v546_v2 = vunpack.c.h.bf16 %v5273_v44  ;;  %v898_v3 = vmax.f32 %v866_v56, %v286_v40 }
  0x69   :  { %v899_v4 = vmax.f32 %v867_v57, %v287_v43  ;;  %v1346_v5 = vrot.slane %v610_v41, 1  ;;  %4362 = vmatprep.mubr.bf16.mxu0 %v1546_v61  ;;  %v1056_v12 = vsel %vm723_vm0, %v1054_v9, %v1055_v27  ;;  %v1059_v16 = vsel %vm723_vm0, %v1057_v48, %v1058_v53 }
  0x6a   :  { %v1344_v17 = vsel %vm723_vm0, %v1342_v58, %v1343_v63  ;;  %v94_v19 = vunpack.c.l.bf16 %v62_v51  ;;  %v930_v23 = vmax.f32 %v898_v3, %v351_v26  ;;  %v95_v25 = vunpack.c.h.bf16 %v62_v51  ;;  %v64_v51 = vld [vmem:[%s6616_s0 + $0x98] ss:$8 sps:$4 sm:$0xff]  }
  0x6b   :  { %v931_v24 = vmax.f32 %v899_v4, %v352_v55  ;;  %v159_v30 = vunpack.c.l.bf16 %v3804_v54  ;;  %v1347_v32 = vsel %vm723_vm0, %v1345_v0, %v1346_v5  ;;  %v160_v37 = vunpack.c.h.bf16 %v3804_v54  ;;  %v3806_v54 = vld [vmem:[%s6616_s0 + $0x1a8] ss:$8 sps:$4 sm:$0xff]   ;;  %v194_v0 = vld [vmem:[%s6616_s0 + $0xa4] sm:$0x1] }
  0x6c   :  { %v223_v38 = vunpack.c.l.bf16 %v191_v59  ;;  %v224_v39 = vunpack.c.l.bf16 %v192_v60  ;;  %v1154_v40 = vmax.f32 %v930_v23, %v1056_v12  ;;  %v288_v18 = vunpack.c.l.bf16 %v5298_v1  ;;  %v193_v59 = vld [vmem:[%s6616_s0 + $0x9c] sm:$0x1]  ;;  %v3998_v23 = vld [vmem:[%s6616_s0 + $0xa4] sm:$0x1] }
  0x6d   :  { %v1155_v43 = vmax.f32 %v931_v24, %v1059_v16  ;;  %v289_v29 = vunpack.c.h.bf16 %v5298_v1  ;;  %v353_v26 = vunpack.c.l.bf16 %v5304_v6  ;;  %v417_v35 = vunpack.c.l.bf16 %v3900_v7  ;;  %v5362_v1 = vld [vmem:[%s6616_s0 + $0x2b8] ss:$8 sps:$4 sm:$0xff]   ;;  %v3902_v7 = vld [vmem:[%s6616_s0 + $0x2bc] sm:$0x1] }
  0x6e   :  { %v418_v46 = vunpack.c.l.bf16 %v3901_v8  ;;  %v482_v36 = vunpack.c.l.bf16 %v5315_v11  ;;  %v1186_v41 = vmax.f32 %v1154_v40, %v480_v45  ;;  %v483_v44 = vunpack.c.h.bf16 %v5315_v11  ;;  %v3903_v8 = vld [vmem:[%s6616_s0 + $0x2c4] sm:$0x1] }
  0x6f   :  { %v1187_v47 = vmax.f32 %v1155_v43, %v481_v15  ;;  %v611_v33 = vunpack.c.l.bf16 %v3996_v20  ;;  %v612_v13 = vunpack.c.l.bf16 %v3997_v31  ;;  %v643_v34 = vmax.f32 %v94_v19, %v159_v30  ;;  %v5383_v20 = vld [vmem:[%s6616_s0 + $0xa0] ss:$8 sps:$4 sm:$0xff]  }
  0x70   :  { %v644_v21 = vmax.f32 %v95_v25, %v160_v37  ;;  %v772_v42 = vrot.slane %v94_v19, 1  ;;  %v1218_v22 = vmax.f32 %v1186_v41, %v545_v62  ;;  %v773_v9 = vrot.slane %v223_v38, 1 }
  0x71   :  { %v1219_v28 = vmax.f32 %v1187_v47, %v546_v2  ;;  %v775_v27 = vrot.slane %v95_v25, 1  ;;  %v776_v45 = vrot.slane %v224_v39, 1  ;;  %v1060_v48 = vrot.slane %v288_v18, 1 }
  0x72   :  { %v1061_v10 = vrot.slane %v417_v35, 1  ;;  %v1063_v15 = vrot.slane %v289_v29, 1  ;;  %v1442_v49 = vmax.f32 %v1218_v22, %v1344_v17  ;;  %v774_v52 = vsel %vm723_vm0, %v772_v42, %v773_v9  ;;  %v5405_v42 = vld [vmem:[%s6616_s0 + $0x1b0] ss:$8 sps:$4 sm:$0xff]  }
  0x73   :  { %v1443_v50 = vmax.f32 %v1219_v28, %v1347_v32  ;;  %v1064_v53 = vrot.slane %v418_v46, 1  ;;  %v354_v55 = vunpack.c.h.bf16 %v5304_v6  ;;  %v777_v56 = vsel %vm723_vm0, %v775_v27, %v776_v45  ;;  %v5370_v6 = vld [vmem:[%s6616_s0 + $0x3c8] ss:$8 sps:$4 sm:$0xff]   ;;  %v3999_v32 = vld [vmem:[%s6616_s0 + $0xac] sm:$0x1] }
  0x74   :  { %v868_v57 = vmax.f32 %v643_v34, %v774_v52  ;;  %v1348_v58 = vrot.slane %v482_v36, 1  ;;  %v547_v61 = vunpack.c.l.bf16 %v5339_v14  ;;  %v869_v62 = vmax.f32 %v644_v21, %v777_v56 }
  0x75   :  { %v1547_v60 = vpack.c.bf16 %v1443_v50, %v1442_v49  ;;  %v1349_v63 = vrot.slane %v611_v33, 1  ;;  %v548_v2 = vunpack.c.h.bf16 %v5339_v14  ;;  %v1351_v4 = vrot.slane %v483_v44, 1 }
  0x76   :  { %v900_v3 = vmax.f32 %v868_v57, %v288_v18  ;;  %v1352_v5 = vrot.slane %v612_v13, 1  ;;  %v901_v12 = vmax.f32 %v869_v62, %v289_v29  ;;  %v1062_v16 = vsel %vm723_vm0, %v1060_v48, %v1061_v10 }
  0x77   :  { %4363 = vmatmul.mubr.bf16.gmra.mxu0 %v1547_v60  ;;  %v1065_v17 = vsel %vm723_vm0, %v1063_v15, %v1064_v53  ;;  %v96_v19 = vunpack.c.l.bf16 %v64_v51  ;;  %v1350_v25 = vsel %vm723_vm0, %v1348_v58, %v1349_v63  ;;  %v97_v30 = vunpack.c.h.bf16 %v64_v51 }
  0x78   :  { %v932_v24 = vmax.f32 %v900_v3, %v353_v26  ;;  %v161_v31 = vunpack.c.l.bf16 %v3806_v54  ;;  %v933_v37 = vmax.f32 %v901_v12, %v354_v55  ;;  %v1353_v38 = vsel %vm723_vm0, %v1351_v4, %v1352_v5 }
  0x79   :  { %v162_v39 = vunpack.c.h.bf16 %v3806_v54  ;;  %v225_v40 = vunpack.c.l.bf16 %v193_v59  ;;  %v226_v18 = vunpack.c.l.bf16 %v194_v0  ;;  %v290_v29 = vunpack.c.l.bf16 %v5362_v1 }
  0x7a   :  { %v1156_v43 = vmax.f32 %v932_v24, %v1062_v16  ;;  %v291_v35 = vunpack.c.h.bf16 %v5362_v1  ;;  %v1157_v26 = vmax.f32 %v933_v37, %v1065_v17  ;;  %v355_v46 = vunpack.c.l.bf16 %v5370_v6 }
  0x7b   :  { %v419_v41 = vunpack.c.l.bf16 %v3902_v7  ;;  %v420_v47 = vunpack.c.l.bf16 %v3903_v8  ;;  %v484_v14 = vunpack.c.l.bf16 %v5383_v20  ;;  %v485_v13 = vunpack.c.h.bf16 %v5383_v20 }
  0x7c   :  { %v1188_v33 = vmax.f32 %v1156_v43, %v482_v36  ;;  %v613_v34 = vunpack.c.l.bf16 %v3998_v23  ;;  %v1189_v21 = vmax.f32 %v1157_v26, %v483_v44  ;;  %v614_v22 = vunpack.c.l.bf16 %v3999_v32 }
  0x7d   :  { %v645_v28 = vmax.f32 %v96_v19, %v161_v31  ;;  %v646_v9 = vmax.f32 %v97_v30, %v162_v39  ;;  %v778_v45 = vrot.slane %v96_v19, 1  ;;  %v779_v48 = vrot.slane %v225_v40, 1 }
  0x7e   :  { %v1220_v27 = vmax.f32 %v1188_v33, %v547_v61  ;;  %v781_v36 = vrot.slane %v97_v30, 1  ;;  %v1221_v10 = vmax.f32 %v1189_v21, %v548_v2  ;;  %v782_v15 = vrot.slane %v226_v18, 1 }
  0x7f   :  { %v1066_v51 = vrot.slane %v290_v29, 1  ;;  %v1067_v49 = vrot.slane %v419_v41, 1 }
  0x80   :  { %18 = vsyncpa [#allocation4], 0  ;;  %v1444_v50 = vmax.f32 %v1220_v27, %v1350_v25  ;;  %v780_v11 = vsel %vm723_vm0, %v778_v45, %v779_v48  ;;  %v1069_v44 = vrot.slane %v291_v35, 1  ;;  %v1070_v52 = vrot.slane %v420_v47, 1  ;;  %v66_v61 = vld [vmem:[%s6616_s0 + $0xa8] ss:$8 sps:$4 sm:$0xff]  }
  0x81   :  { %v1445_v53 = vmax.f32 %v1221_v10, %v1353_v38  ;;  %v356_v54 = vunpack.c.h.bf16 %v5370_v6  ;;  %v783_v55 = vsel %vm723_vm0, %v781_v36, %v782_v15  ;;  %v870_v56 = vmax.f32 %v645_v28, %v780_v11  ;;  %v3808_v2 = vld [vmem:[%s6616_s0 + $0x1b8] ss:$8 sps:$4 sm:$0xff]   ;;  %v195_v7 = vld [vmem:[%s6616_s0 + $0xac] sm:$0x1]  ;;  %v196_v8 = vld [vmem:[%s6616_s0 + $0xb4] sm:$0x1] }
  0x82   :  { %v549_v57 = vunpack.c.l.bf16 %v5405_v42  ;;  %v871_v58 = vmax.f32 %v646_v9, %v783_v55  ;;  %v1354_v59 = vrot.slane %v484_v14, 1  ;;  %v1355_v60 = vrot.slane %v613_v34, 1  ;;  %v3840_v12 = vld [vmem:[%s6616_s0 + $0x2c8] ss:$8 sps:$4 sm:$0xff]   ;;  %v5437_v24 = vld [vmem:[%s6616_s0 + $0x3d8] ss:$8 sps:$4 sm:$0xff]  }
  0x83   :  { %v1548_v62 = vpack.c.bf16 %v1445_v53, %v1444_v50  ;;  %v902_v63 = vmax.f32 %v870_v56, %v290_v29  ;;  %v1357_v0 = vrot.slane %v485_v13, 1  ;;  %v1358_v1 = vrot.slane %v614_v22, 1  ;;  %v3904_v25 = vld [vmem:[%s6616_s0 + $0x2cc] sm:$0x1]  ;;  %v3905_v38 = vld [vmem:[%s6616_s0 + $0x2d4] sm:$0x1] }
  0x84   :  { %v550_v3 = vunpack.c.h.bf16 %v5405_v42  ;;  %v903_v4 = vmax.f32 %v871_v58, %v291_v35  ;;  %v1068_v5 = vsel %vm723_vm0, %v1066_v51, %v1067_v49  ;;  %v1071_v6 = vsel %vm723_vm0, %v1069_v44, %v1070_v52  ;;  %v5449_v39 = vld [vmem:[%s6616_s0 + $0xb0] ss:$8 sps:$4 sm:$0xff]   ;;  %v4000_v35 = vld [vmem:[%s6616_s0 + $0xb4] sm:$0x1]  ;;  %v4001_v26 = vld [vmem:[%s6616_s0 + $0xbc] sm:$0x1] }
  0x85   :  { %4366 = vmatprep.mubr.bf16.mxu0 %v1548_v62  ;;  %v934_v16 = vmax.f32 %v902_v63, %v355_v46  ;;  %v1356_v17 = vsel %vm723_vm0, %v1354_v59, %v1355_v60  ;;  %v98_v19 = vunpack.c.l.bf16 %v66_v61  ;;  %v99_v23 = vunpack.c.h.bf16 %v66_v61  ;;  %v3968_v44 = vld [vmem:[%s6616_s0 + $0x1c0] ss:$8 sps:$4 sm:$0xff]  }
  0x86   :  { %v935_v30 = vmax.f32 %v903_v4, %v356_v54  ;;  %v1359_v31 = vsel %vm723_vm0, %v1357_v0, %v1358_v1  ;;  %v163_v32 = vunpack.c.l.bf16 %v3808_v2  ;;  %v164_v37 = vunpack.c.h.bf16 %v3808_v2  ;;  %v68_v61 = vld [vmem:[%s6616_s0 + $0xb8] ss:$8 sps:$4 sm:$0xff]   ;;  %v3810_v2 = vld [vmem:[%s6616_s0 + $0x1c8] ss:$8 sps:$4 sm:$0xff]  }
  0x87   :  { %v1158_v40 = vmax.f32 %v934_v16, %v1068_v5  ;;  %v227_v43 = vunpack.c.l.bf16 %v195_v7  ;;  %v228_v18 = vunpack.c.l.bf16 %v196_v8  ;;  %v292_v29 = vunpack.c.l.bf16 %v3840_v12  ;;  %v197_v7 = vld [vmem:[%s6616_s0 + $0xbc] sm:$0x1]  ;;  %v198_v8 = vld [vmem:[%s6616_s0 + $0xc4] sm:$0x1] }
  0x88   :  { %v1159_v46 = vmax.f32 %v935_v30, %v1071_v6  ;;  %v293_v41 = vunpack.c.h.bf16 %v3840_v12  ;;  %v357_v47 = vunpack.c.l.bf16 %v5437_v24  ;;  %v421_v33 = vunpack.c.l.bf16 %v3904_v25 }
  0x89   :  { %v1190_v34 = vmax.f32 %v1158_v40, %v484_v14  ;;  %v422_v21 = vunpack.c.l.bf16 %v3905_v38  ;;  %v486_v42 = vunpack.c.l.bf16 %v5449_v39  ;;  %v487_v22 = vunpack.c.h.bf16 %v5449_v39  ;;  %v3907_v38 = vld [vmem:[%s6616_s0 + $0x2e4] sm:$0x1]  ;;  %v5506_v40 = vld [vmem:[%s6616_s0 + $0xc0] ss:$8 sps:$4 sm:$0xff]   ;;  %v3970_v39 = vld [vmem:[%s6616_s0 + $0x1d0] ss:$8 sps:$4 sm:$0xff]  }
  0x8a   :  { %v1191_v28 = vmax.f32 %v1159_v46, %v485_v13  ;;  %v615_v9 = vunpack.c.l.bf16 %v4000_v35  ;;  %v616_v27 = vunpack.c.l.bf16 %v4001_v26  ;;  %v647_v45 = vmax.f32 %v98_v19, %v163_v32  ;;  %v4002_v26 = vld [vmem:[%s6616_s0 + $0xc4] sm:$0x1]  ;;  %v4003_v46 = vld [vmem:[%s6616_s0 + $0xcc] sm:$0x1] }
  0x8b   :  { %v1222_v48 = vmax.f32 %v1190_v34, %v549_v57  ;;  %v648_v36 = vmax.f32 %v99_v23, %v164_v37  ;;  %v784_v10 = vrot.slane %v98_v19, 1  ;;  %v785_v15 = vrot.slane %v227_v43, 1  ;;  %v3906_v37 = vld [vmem:[%s6616_s0 + $0x2dc] sm:$0x1] }
  0x8c   :  { %v1223_v51 = vmax.f32 %v1191_v28, %v550_v3  ;;  %v787_v49 = vrot.slane %v99_v23, 1  ;;  %v788_v50 = vrot.slane %v228_v18, 1  ;;  %v1072_v11 = vrot.slane %v292_v29, 1  ;;  %v3842_v23 = vld [vmem:[%s6616_s0 + $0x2d8] ss:$8 sps:$4 sm:$0xff]  }
  0x8d   :  { %v1446_v14 = vmax.f32 %v1222_v48, %v1356_v17  ;;  %v786_v52 = vsel %vm723_vm0, %v784_v10, %v785_v15  ;;  %v1073_v20 = vrot.slane %v421_v33, 1  ;;  %v1075_v13 = vrot.slane %v293_v41, 1 }
  0x8e   :  { %v1447_v53 = vmax.f32 %v1223_v51, %v1359_v31  ;;  %v789_v54 = vsel %vm723_vm0, %v787_v49, %v788_v50  ;;  %v872_v55 = vmax.f32 %v647_v45, %v786_v52  ;;  %v1076_v56 = vrot.slane %v422_v21, 1 }
  0x8f   :  { %v358_v57 = vunpack.c.h.bf16 %v5437_v24  ;;  %v873_v58 = vmax.f32 %v648_v36, %v789_v54  ;;  %v1360_v59 = vrot.slane %v486_v42, 1  ;;  %v1361_v60 = vrot.slane %v615_v9, 1  ;;  %v5495_v24 = vld [vmem:[%s6616_s0 + $0x3e8] ss:$8 sps:$4 sm:$0xff]  }
  0x90   :  { %v1549_v62 = vpack.c.bf16 %v1447_v53, %v1446_v14  ;;  %v551_v63 = vunpack.c.l.bf16 %v3968_v44  ;;  %v904_v0 = vmax.f32 %v872_v55, %v292_v29  ;;  %v1363_v1 = vrot.slane %v487_v22, 1 }
  0x91   :  { %v552_v3 = vunpack.c.h.bf16 %v3968_v44  ;;  %v905_v4 = vmax.f32 %v873_v58, %v293_v41  ;;  %v1074_v5 = vsel %vm723_vm0, %v1072_v11, %v1073_v20  ;;  %v1364_v6 = vrot.slane %v616_v27, 1 }
  0x92   :  { %4367 = vmatmul.mubr.bf16.gmra.mxu0 %v1549_v62  ;;  %v936_v12 = vmax.f32 %v904_v0, %v357_v47  ;;  %v1077_v16 = vsel %vm723_vm0, %v1075_v13, %v1076_v56  ;;  %v1362_v17 = vsel %vm723_vm0, %v1360_v59, %v1361_v60  ;;  %v100_v19 = vunpack.c.l.bf16 %v68_v61 }
  0x93   :  { %v937_v25 = vmax.f32 %v905_v4, %v358_v57  ;;  %v101_v30 = vunpack.c.h.bf16 %v68_v61  ;;  %v165_v31 = vunpack.c.l.bf16 %v3810_v2  ;;  %v166_v32 = vunpack.c.h.bf16 %v3810_v2  ;;  %v70_v61 = vld [vmem:[%s6616_s0 + $0xc8] ss:$8 sps:$4 sm:$0xff]  }
  0x94   :  { %v1160_v43 = vmax.f32 %v936_v12, %v1074_v5  ;;  %v1365_v18 = vsel %vm723_vm0, %v1363_v1, %v1364_v6  ;;  %v229_v29 = vunpack.c.l.bf16 %v197_v7  ;;  %v230_v35 = vunpack.c.l.bf16 %v198_v8  ;;  %v3812_v5 = vld [vmem:[%s6616_s0 + $0x1d8] ss:$8 sps:$4 sm:$0xff]   ;;  %v199_v6 = vld [vmem:[%s6616_s0 + $0xcc] sm:$0x1] }
  0x95   :  { %v1161_v41 = vmax.f32 %v937_v25, %v1077_v16  ;;  %v294_v47 = vunpack.c.l.bf16 %v3842_v23  ;;  %v295_v33 = vunpack.c.h.bf16 %v3842_v23  ;;  %v359_v34 = vunpack.c.l.bf16 %v5495_v24 }
  0x96   :  { %v1192_v21 = vmax.f32 %v1160_v43, %v486_v42  ;;  %v423_v28 = vunpack.c.l.bf16 %v3906_v37  ;;  %v424_v9 = vunpack.c.l.bf16 %v3907_v38  ;;  %v488_v27 = vunpack.c.l.bf16 %v5506_v40  ;;  %v5559_v37 = vld [vmem:[%s6616_s0 + $0xd0] ss:$8 sps:$4 sm:$0xff]  }
  0x97   :  { %v1193_v45 = vmax.f32 %v1161_v41, %v487_v22  ;;  %v489_v48 = vunpack.c.h.bf16 %v5506_v40  ;;  %v617_v36 = vunpack.c.l.bf16 %v4002_v26  ;;  %v618_v10 = vunpack.c.l.bf16 %v4003_v46 }
  0x98   :  { %v1224_v15 = vmax.f32 %v1192_v21, %v551_v63  ;;  %v649_v51 = vmax.f32 %v100_v19, %v165_v31  ;;  %v650_v49 = vmax.f32 %v101_v30, %v166_v32  ;;  %v790_v50 = vrot.slane %v100_v19, 1  ;;  %v3844_v19 = vld [vmem:[%s6616_s0 + $0x2e8] ss:$8 sps:$4 sm:$0xff]   ;;  %v3908_v31 = vld [vmem:[%s6616_s0 + $0x2ec] sm:$0x1] }
  0x99   :  { %v1225_v11 = vmax.f32 %v1193_v45, %v552_v3  ;;  %v791_v14 = vrot.slane %v229_v29, 1  ;;  %v793_v44 = vrot.slane %v101_v30, 1  ;;  %v794_v52 = vrot.slane %v230_v35, 1  ;;  %v3909_v32 = vld [vmem:[%s6616_s0 + $0x2f4] sm:$0x1] }
  0x9a   :  { %v1448_v42 = vmax.f32 %v1224_v15, %v1362_v17  ;;  %v1078_v20 = vrot.slane %v294_v47, 1  ;;  %v1079_v13 = vrot.slane %v423_v28, 1  ;;  %v1081_v53 = vrot.slane %v295_v33, 1  ;;  %v200_v17 = vld [vmem:[%s6616_s0 + $0xd4] sm:$0x1] }
  0x9b   :  { %v1449_v54 = vmax.f32 %v1225_v11, %v1365_v18  ;;  %v792_v22 = vsel %vm723_vm0, %v790_v50, %v791_v14  ;;  %v795_v55 = vsel %vm723_vm0, %v793_v44, %v794_v52  ;;  %v1082_v56 = vrot.slane %v424_v9, 1  ;;  %v4004_v35 = vld [vmem:[%s6616_s0 + $0xd4] sm:$0x1]  ;;  %v3876_v52 = vld [vmem:[%s6616_s0 + $0x3f8] ss:$8 sps:$4 sm:$0xff]  }
  0x9c   :  { %v360_v57 = vunpack.c.h.bf16 %v5495_v24  ;;  %v874_v58 = vmax.f32 %v649_v51, %v792_v22  ;;  %v875_v59 = vmax.f32 %v650_v49, %v795_v55  ;;  %v1366_v60 = vrot.slane %v488_v27, 1 }
  0x9d   :  { %v1550_v62 = vpack.c.bf16 %v1449_v54, %v1448_v42  ;;  %v1367_v63 = vrot.slane %v617_v36, 1  ;;  %v1369_v0 = vrot.slane %v489_v48, 1  ;;  %v553_v1 = vunpack.c.l.bf16 %v3970_v39 }
  0x9e   :  { %v906_v2 = vmax.f32 %v874_v58, %v294_v47  ;;  %v907_v3 = vmax.f32 %v875_v59, %v295_v33  ;;  %v1370_v4 = vrot.slane %v618_v10, 1  ;;  %v554_v7 = vunpack.c.h.bf16 %v3970_v39  ;;  %v4005_v33 = vld [vmem:[%s6616_s0 + $0xdc] sm:$0x1]  ;;  %v3972_v39 = vld [vmem:[%s6616_s0 + $0x1e0] ss:$8 sps:$4 sm:$0xff]  }
  0x9f   :  { %4370 = vmatprep.mubr.bf16.mxu0 %v1550_v62  ;;  %v1080_v8 = vsel %vm723_vm0, %v1078_v20, %v1079_v13  ;;  %v1083_v12 = vsel %vm723_vm0, %v1081_v53, %v1082_v56  ;;  %v102_v16 = vunpack.c.l.bf16 %v70_v61  ;;  %v1368_v25 = vsel %vm723_vm0, %v1366_v60, %v1367_v63 }
  0xa0   :  { %v938_v23 = vmax.f32 %v906_v2, %v359_v34  ;;  %v939_v24 = vmax.f32 %v907_v3, %v360_v57  ;;  %v103_v30 = vunpack.c.h.bf16 %v70_v61  ;;  %v1371_v38 = vsel %vm723_vm0, %v1369_v0, %v1370_v4  ;;  %v72_v0 = vld [vmem:[%s6616_s0 + $0xd8] ss:$8 sps:$4 sm:$0xff]  }
  0xa1   :  { %v167_v43 = vunpack.c.l.bf16 %v3812_v5  ;;  %v168_v18 = vunpack.c.h.bf16 %v3812_v5  ;;  %v231_v29 = vunpack.c.l.bf16 %v199_v6  ;;  %v232_v41 = vunpack.c.l.bf16 %v200_v17  ;;  %v3814_v5 = vld [vmem:[%s6616_s0 + $0x1e8] ss:$8 sps:$4 sm:$0xff]   ;;  %v202_v17 = vld [vmem:[%s6616_s0 + $0xe4] sm:$0x1] }
  0xa2   :  { %v1162_v26 = vmax.f32 %v938_v23, %v1080_v8  ;;  %v1163_v46 = vmax.f32 %v939_v24, %v1083_v12  ;;  %v296_v47 = vunpack.c.l.bf16 %v3844_v19  ;;  %v297_v34 = vunpack.c.h.bf16 %v3844_v19  ;;  %v3846_v19 = vld [vmem:[%s6616_s0 + $0x2f8] ss:$8 sps:$4 sm:$0xff]  }
  0xa3   :  { %v425_v21 = vunpack.c.l.bf16 %v3908_v31  ;;  %v426_v28 = vunpack.c.l.bf16 %v3909_v32  ;;  %v490_v9 = vunpack.c.l.bf16 %v5559_v37  ;;  %v491_v10 = vunpack.c.h.bf16 %v5559_v37  ;;  %v5607_v31 = vld [vmem:[%s6616_s0 + $0x408] ss:$8 sps:$4 sm:$0xff]   ;;  %v3910_v32 = vld [vmem:[%s6616_s0 + $0x2fc] sm:$0x1] }
  0xa4   :  { %v1194_v45 = vmax.f32 %v1162_v26, %v488_v27  ;;  %v1195_v36 = vmax.f32 %v1163_v46, %v489_v48  ;;  %v619_v15 = vunpack.c.l.bf16 %v4004_v35  ;;  %v620_v51 = vunpack.c.l.bf16 %v4005_v33  ;;  %v3911_v35 = vld [vmem:[%s6616_s0 + $0x304] sm:$0x1]  ;;  %v5619_v26 = vld [vmem:[%s6616_s0 + $0xe0] ss:$8 sps:$4 sm:$0xff]   ;;  %v3974_v37 = vld [vmem:[%s6616_s0 + $0x1f0] ss:$8 sps:$4 sm:$0xff]  }
  0xa5   :  { %v651_v49 = vmax.f32 %v102_v16, %v167_v43  ;;  %v652_v50 = vmax.f32 %v103_v30, %v168_v18  ;;  %v796_v11 = vrot.slane %v102_v16, 1  ;;  %v797_v42 = vrot.slane %v231_v29, 1  ;;  %v201_v16 = vld [vmem:[%s6616_s0 + $0xdc] sm:$0x1] }
  0xa6   :  { %v1226_v14 = vmax.f32 %v1194_v45, %v553_v1  ;;  %v1227_v44 = vmax.f32 %v1195_v36, %v554_v7  ;;  %v799_v20 = vrot.slane %v103_v30, 1  ;;  %v800_v13 = vrot.slane %v232_v41, 1 }
  0xa7   :  { %v1084_v27 = vrot.slane %v296_v47, 1  ;;  %v1085_v53 = vrot.slane %v425_v21, 1  ;;  %v1087_v40 = vrot.slane %v297_v34, 1  ;;  %v798_v22 = vsel %vm723_vm0, %v796_v11, %v797_v42  ;;  %v4007_v11 = vld [vmem:[%s6616_s0 + $0xec] sm:$0x1] }
  0xa8   :  { %v1450_v48 = vmax.f32 %v1226_v14, %v1368_v25  ;;  %v1451_v54 = vmax.f32 %v1227_v44, %v1371_v38  ;;  %v1088_v55 = vrot.slane %v426_v28, 1  ;;  %v361_v56 = vunpack.c.l.bf16 %v3876_v52 }
  0xa9   :  { %v801_v57 = vsel %vm723_vm0, %v799_v20, %v800_v13  ;;  %v876_v58 = vmax.f32 %v651_v49, %v798_v22  ;;  %v1372_v59 = vrot.slane %v490_v9, 1  ;;  %v362_v61 = vunpack.c.h.bf16 %v3876_v52 }
  0xaa   :  { %v1551_v60 = vpack.c.bf16 %v1451_v54, %v1450_v48  ;;  %v877_v62 = vmax.f32 %v652_v50, %v801_v57  ;;  %v1373_v63 = vrot.slane %v619_v15, 1  ;;  %v555_v1 = vunpack.c.l.bf16 %v3972_v39 }
  0xab   :  { %v908_v2 = vmax.f32 %v876_v58, %v296_v47  ;;  %v1375_v3 = vrot.slane %v491_v10, 1  ;;  %v1376_v4 = vrot.slane %v620_v51, 1  ;;  %v556_v6 = vunpack.c.h.bf16 %v3972_v39 }
  0xac   :  { %4371 = vmatmul.mubr.bf16.gmra.mxu0 %v1551_v60  ;;  %v909_v7 = vmax.f32 %v877_v62, %v297_v34  ;;  %v1086_v8 = vsel %vm723_vm0, %v1084_v27, %v1085_v53  ;;  %v1089_v12 = vsel %vm723_vm0, %v1087_v40, %v1088_v55  ;;  %v1374_v24 = vsel %vm723_vm0, %v1372_v59, %v1373_v63  ;;  %v4006_v34 = vld [vmem:[%s6616_s0 + $0xe4] sm:$0x1] }
  0xad   :  { %v940_v23 = vmax.f32 %v908_v2, %v361_v56  ;;  %v104_v25 = vunpack.c.l.bf16 %v72_v0  ;;  %v105_v30 = vunpack.c.h.bf16 %v72_v0  ;;  %v1377_v43 = vsel %vm723_vm0, %v1375_v3, %v1376_v4  ;;  %v74_v4 = vld [vmem:[%s6616_s0 + $0xe8] ss:$8 sps:$4 sm:$0xff]  }
  0xae   :  { %v941_v38 = vmax.f32 %v909_v7, %v362_v61  ;;  %v169_v18 = vunpack.c.l.bf16 %v3814_v5  ;;  %v170_v29 = vunpack.c.h.bf16 %v3814_v5  ;;  %v233_v41 = vunpack.c.l.bf16 %v201_v16  ;;  %v3816_v5 = vld [vmem:[%s6616_s0 + $0x1f8] ss:$8 sps:$4 sm:$0xff]  }
  0xaf   :  { %v1164_v46 = vmax.f32 %v940_v23, %v1086_v8  ;;  %v234_v47 = vunpack.c.l.bf16 %v202_v17  ;;  %v298_v33 = vunpack.c.l.bf16 %v3846_v19  ;;  %v299_v28 = vunpack.c.h.bf16 %v3846_v19 }
  0xb0   :  { %v1165_v21 = vmax.f32 %v941_v38, %v1089_v12  ;;  %v363_v45 = vunpack.c.l.bf16 %v5607_v31  ;;  %v427_v36 = vunpack.c.l.bf16 %v3910_v32  ;;  %v428_v51 = vunpack.c.l.bf16 %v3911_v35  ;;  %v203_v12 = vld [vmem:[%s6616_s0 + $0xec] sm:$0x1] }
  0xb1   :  { %v1196_v15 = vmax.f32 %v1164_v46, %v490_v9  ;;  %v492_v49 = vunpack.c.l.bf16 %v5619_v26  ;;  %v493_v50 = vunpack.c.h.bf16 %v5619_v26  ;;  %v621_v44 = vunpack.c.l.bf16 %v4006_v34  ;;  %v4008_v34 = vld [vmem:[%s6616_s0 + $0xf4] sm:$0x1] }
  0xb2   :  { %v1197_v14 = vmax.f32 %v1165_v21, %v491_v10  ;;  %v653_v52 = vmax.f32 %v104_v25, %v169_v18  ;;  %v654_v42 = vmax.f32 %v105_v30, %v170_v29  ;;  %v802_v13 = vrot.slane %v104_v25, 1  ;;  %v3848_v25 = vld [vmem:[%s6616_s0 + $0x308] ss:$8 sps:$4 sm:$0xff]   ;;  %v3912_v18 = vld [vmem:[%s6616_s0 + $0x30c] sm:$0x1] }
  0xb3   :  { %v1228_v20 = vmax.f32 %v1196_v15, %v555_v1  ;;  %v803_v27 = vrot.slane %v233_v41, 1  ;;  %v805_v53 = vrot.slane %v105_v30, 1  ;;  %v622_v40 = vunpack.c.l.bf16 %v4007_v11  ;;  %v3913_v29 = vld [vmem:[%s6616_s0 + $0x314] sm:$0x1] }
  0xb4   :  { %v1229_v9 = vmax.f32 %v1197_v14, %v556_v6  ;;  %v806_v48 = vrot.slane %v234_v47, 1  ;;  %v1090_v54 = vrot.slane %v298_v33, 1  ;;  %v1091_v55 = vrot.slane %v427_v36, 1 }
  0xb5   :  { %v1452_v39 = vmax.f32 %v1228_v20, %v1374_v24  ;;  %v804_v22 = vsel %vm723_vm0, %v802_v13, %v803_v27  ;;  %v1093_v56 = vrot.slane %v299_v28, 1  ;;  %v1094_v59 = vrot.slane %v428_v51, 1  ;;  %v204_v24 = vld [vmem:[%s6616_s0 + $0xf4] sm:$0x1] }
  0xb6   :  { %v1453_v57 = vmax.f32 %v1229_v9, %v1377_v43  ;;  %v807_v10 = vsel %vm723_vm0, %v805_v53, %v806_v48  ;;  %v878_v58 = vmax.f32 %v653_v52, %v804_v22  ;;  %v364_v60 = vunpack.c.h.bf16 %v5607_v31  ;;  %v3880_v43 = vld [vmem:[%s6616_s0 + $0x418] ss:$8 sps:$4 sm:$0xff]   ;;  %v4009_v48 = vld [vmem:[%s6616_s0 + $0xfc] sm:$0x1] }
  0xb7   :  { %v879_v61 = vmax.f32 %v654_v42, %v807_v10  ;;  %v1378_v62 = vrot.slane %v492_v49, 1  ;;  %v1379_v63 = vrot.slane %v621_v44, 1  ;;  %v1381_v2 = vrot.slane %v493_v50, 1 }
  0xb8   :  { %v1552_v0 = vpack.c.bf16 %v1453_v57, %v1452_v39  ;;  %v910_v1 = vmax.f32 %v878_v58, %v298_v33  ;;  %v1382_v3 = vrot.slane %v622_v40, 1  ;;  %v557_v6 = vunpack.c.l.bf16 %v3974_v37  ;;  %v5673_v33 = vld [vmem:[%s6616_s0 + $0xf0] ss:$8 sps:$4 sm:$0xff]  }
  0xb9   :  { %v911_v7 = vmax.f32 %v879_v61, %v299_v28  ;;  %v1092_v8 = vsel %vm723_vm0, %v1090_v54, %v1091_v55  ;;  %v558_v16 = vunpack.c.h.bf16 %v3974_v37  ;;  %v1095_v19 = vsel %vm723_vm0, %v1093_v56, %v1094_v59 }
  0xba   :  { %4374 = vmatprep.mubr.bf16.mxu0 %v1552_v0  ;;  %v942_v17 = vmax.f32 %v910_v1, %v363_v45  ;;  %v1380_v23 = vsel %vm723_vm0, %v1378_v62, %v1379_v63  ;;  %v106_v31 = vunpack.c.l.bf16 %v74_v4  ;;  %v107_v32 = vunpack.c.h.bf16 %v74_v4  ;;  %v76_v1 = vld [vmem:[%s6616_s0 + $0xf8] ss:$8 sps:$4 sm:$0xff]  }
  0xbb   :  { %v943_v30 = vmax.f32 %v911_v7, %v364_v60  ;;  %v171_v38 = vunpack.c.l.bf16 %v3816_v5  ;;  %v1383_v46 = vsel %vm723_vm0, %v1381_v2, %v1382_v3  ;;  %v172_v41 = vunpack.c.h.bf16 %v3816_v5  ;;  %v3976_v60 = vld [vmem:[%s6616_s0 + $0x200] ss:$8 sps:$4 sm:$0xff]  }
  0xbc   :  { %v1166_v35 = vmax.f32 %v942_v17, %v1092_v8  ;;  %v235_v47 = vunpack.c.l.bf16 %v203_v12  ;;  %v236_v28 = vunpack.c.l.bf16 %v204_v24  ;;  %v300_v45 = vunpack.c.l.bf16 %v3848_v25  ;;  %v205_v17 = vld [vmem:[%s6616_s0 + $0xfc] sm:$0x1] }
  0xbd   :  { %v1167_v21 = vmax.f32 %v943_v30, %v1095_v19  ;;  %v301_v36 = vunpack.c.h.bf16 %v3848_v25  ;;  %v365_v51 = vunpack.c.l.bf16 %v3880_v43  ;;  %v429_v11 = vunpack.c.l.bf16 %v3912_v18  ;;  %v206_v19 = vld [vmem:[%s6616_s0 + $0x104] sm:$0x1] }
  0xbe   :  { %v1198_v15 = vmax.f32 %v1166_v35, %v492_v49  ;;  %v430_v14 = vunpack.c.l.bf16 %v3913_v29  ;;  %v494_v52 = vunpack.c.l.bf16 %v5673_v33  ;;  %v623_v42 = vunpack.c.l.bf16 %v4008_v34  ;;  %v3882_v35 = vld [vmem:[%s6616_s0 + $0x428] ss:$8 sps:$4 sm:$0xff]  }
  0xbf   :  { %v1199_v44 = vmax.f32 %v1167_v21, %v493_v50  ;;  %v655_v20 = vmax.f32 %v106_v31, %v171_v38  ;;  %v656_v27 = vmax.f32 %v107_v32, %v172_v41  ;;  %v808_v53 = vrot.slane %v106_v31, 1  ;;  %v3850_v31 = vld [vmem:[%s6616_s0 + $0x318] ss:$8 sps:$4 sm:$0xff]  }
  0xc0   :  { %v1230_v13 = vmax.f32 %v1198_v15, %v557_v6  ;;  %v809_v9 = vrot.slane %v235_v47, 1  ;;  %v811_v49 = vrot.slane %v107_v32, 1  ;;  %v812_v54 = vrot.slane %v236_v28, 1  ;;  %v3818_v6 = vld [vmem:[%s6616_s0 + $0x208] ss:$8 sps:$4 sm:$0xff]  }
  0xc1   :  { %v1231_v40 = vmax.f32 %v1199_v44, %v558_v16  ;;  %v1096_v39 = vrot.slane %v300_v45, 1  ;;  %v1097_v50 = vrot.slane %v429_v11, 1  ;;  %v1099_v55 = vrot.slane %v301_v36, 1  ;;  %v3914_v32 = vld [vmem:[%s6616_s0 + $0x31c] sm:$0x1] }
  0xc2   :  { %v1454_v22 = vmax.f32 %v1230_v13, %v1380_v23  ;;  %v810_v26 = vsel %vm723_vm0, %v808_v53, %v809_v9  ;;  %v813_v57 = vsel %vm723_vm0, %v811_v49, %v812_v54  ;;  %v1100_v10 = vrot.slane %v430_v14, 1  ;;  %v4011_v54 = vld [vmem:[%s6616_s0 + $0x10c] sm:$0x1] }
  0xc3   :  { %v1455_v56 = vmax.f32 %v1231_v40, %v1383_v46  ;;  %v880_v37 = vmax.f32 %v655_v20, %v810_v26  ;;  %v366_v58 = vunpack.c.h.bf16 %v3880_v43  ;;  %v495_v59 = vunpack.c.h.bf16 %v5673_v33  ;;  %v3915_v46 = vld [vmem:[%s6616_s0 + $0x324] sm:$0x1] }
  0xc4   :  { %v624_v61 = vunpack.c.l.bf16 %v4009_v48  ;;  %v881_v62 = vmax.f32 %v656_v27, %v813_v57  ;;  %v1098_v3 = vsel %vm723_vm0, %v1096_v39, %v1097_v50  ;;  %v1384_v4 = vrot.slane %v494_v52, 1 }
  0xc5   :  { %v1553_v63 = vpack.c.bf16 %v1455_v56, %v1454_v22  ;;  %v912_v0 = vmax.f32 %v880_v37, %v300_v45  ;;  %v1385_v5 = vrot.slane %v623_v42, 1  ;;  %v559_v7 = vunpack.c.l.bf16 %v3976_v60  ;;  %v3946_v42 = vld [vmem:[%s6616_s0 + $0x100] ss:$8 sps:$4 sm:$0xff]  }
  0xc6   :  { %v913_v2 = vmax.f32 %v881_v62, %v301_v36  ;;  %v560_v8 = vunpack.c.h.bf16 %v3976_v60  ;;  %v1101_v16 = vsel %vm723_vm0, %v1099_v55, %v1100_v10  ;;  %v1387_v24 = vrot.slane %v495_v59, 1 }
  0xc7   :  { %4375 = vmatmul.mubr.bf16.gmra.mxu0 %v1553_v63  ;;  %v944_v12 = vmax.f32 %v912_v0, %v365_v51  ;;  %v1388_v25 = vrot.slane %v624_v61, 1  ;;  %v108_v30 = vunpack.c.l.bf16 %v76_v1  ;;  %v109_v43 = vunpack.c.h.bf16 %v76_v1 }
  0xc8   :  { %v945_v23 = vmax.f32 %v913_v2, %v366_v58  ;;  %v173_v18 = vunpack.c.l.bf16 %v3818_v6  ;;  %v174_v29 = vunpack.c.h.bf16 %v3818_v6  ;;  %v1386_v47 = vsel %vm723_vm0, %v1384_v4, %v1385_v5  ;;  %v3978_v2 = vld [vmem:[%s6616_s0 + $0x210] ss:$8 sps:$4 sm:$0xff]  }
  0xc9   :  { %v1168_v38 = vmax.f32 %v944_v12, %v1098_v3  ;;  %v237_v33 = vunpack.c.l.bf16 %v205_v17  ;;  %v238_v34 = vunpack.c.l.bf16 %v206_v19  ;;  %v302_v28 = vunpack.c.l.bf16 %v3850_v31 }
  0xca   :  { %v1169_v41 = vmax.f32 %v945_v23, %v1101_v16  ;;  %v303_v45 = vunpack.c.h.bf16 %v3850_v31  ;;  %v431_v36 = vunpack.c.l.bf16 %v3914_v32  ;;  %v1389_v51 = vsel %vm723_vm0, %v1387_v24, %v1388_v25 }
  0xcb   :  { %v1200_v21 = vmax.f32 %v1168_v38, %v494_v52  ;;  %v367_v11 = vunpack.c.l.bf16 %v3882_v35  ;;  %v432_v14 = vunpack.c.l.bf16 %v3915_v46  ;;  %v657_v20 = vmax.f32 %v108_v30, %v173_v18  ;;  %v4010_v52 = vld [vmem:[%s6616_s0 + $0x104] sm:$0x1] }
  0xcc   :  { %v1201_v15 = vmax.f32 %v1169_v41, %v495_v59  ;;  %v658_v13 = vmax.f32 %v109_v43, %v174_v29  ;;  %v814_v27 = vrot.slane %v108_v30, 1  ;;  %v815_v9 = vrot.slane %v237_v33, 1 }
  0xcd   :  { %v1232_v44 = vmax.f32 %v1200_v21, %v559_v7  ;;  %v817_v40 = vrot.slane %v109_v43, 1  ;;  %v818_v48 = vrot.slane %v238_v34, 1  ;;  %v1102_v39 = vrot.slane %v302_v28, 1 }
  0xce   :  { %v1233_v53 = vmax.f32 %v1201_v15, %v560_v8  ;;  %v1103_v22 = vrot.slane %v431_v36, 1  ;;  %v1105_v26 = vrot.slane %v303_v45, 1  ;;  %v816_v55 = vsel %vm723_vm0, %v814_v27, %v815_v9 }
  0xcf   :  { %v1456_v49 = vmax.f32 %v1232_v44, %v1386_v47  ;;  %v819_v56 = vsel %vm723_vm0, %v817_v40, %v818_v48  ;;  %v1106_v57 = vrot.slane %v432_v14, 1  ;;  %v368_v37 = vunpack.c.h.bf16 %v3882_v35 }
  0xd0   :  { %v1457_v50 = vmax.f32 %v1233_v53, %v1389_v51  ;;  %v496_v10 = vunpack.c.l.bf16 %v3946_v42  ;;  %v882_v58 = vmax.f32 %v657_v20, %v816_v55  ;;  %v883_v59 = vmax.f32 %v658_v13, %v819_v56 }
  0xd1   :  { %v497_v61 = vunpack.c.h.bf16 %v3946_v42  ;;  %v625_v62 = vunpack.c.l.bf16 %v4010_v52  ;;  %v626_v63 = vunpack.c.l.bf16 %v4011_v54  ;;  %v1104_v3 = vsel %vm723_vm0, %v1102_v39, %v1103_v22 }
  0xd2   :  { %v1554_v60 = vpack.c.bf16 %v1457_v50, %v1456_v49  ;;  %v914_v0 = vmax.f32 %v882_v58, %v302_v28  ;;  %v915_v1 = vmax.f32 %v883_v59, %v303_v45  ;;  %v1107_v4 = vsel %vm723_vm0, %v1105_v26, %v1106_v57 }
  0xd3   :  { %v1390_v7 = vrot.slane %v496_v10, 1  ;;  %v1391_v8 = vrot.slane %v625_v62, 1  ;;  %v1393_v12 = vrot.slane %v497_v61, 1  ;;  %v1394_v16 = vrot.slane %v626_v63, 1 }
  0xd4   :  { %4378 = vmatprep.mubr.bf16.mxu0 %v1554_v60  ;;  %v946_v5 = vmax.f32 %v914_v0, %v367_v11  ;;  %v947_v6 = vmax.f32 %v915_v1, %v368_v37  ;;  %v561_v17 = vunpack.c.l.bf16 %v3978_v2  ;;  %v562_v19 = vunpack.c.h.bf16 %v3978_v2 }
  0xd5   :  { %v1392_v31 = vsel %vm723_vm0, %v1390_v7, %v1391_v8  ;;  %v1395_v32 = vsel %vm723_vm0, %v1393_v12, %v1394_v16  ;;  %vm4693_vm1 = vmmov 0   ;;  %vm3107_vm2 = vcmask 523264  }
  0xd6   :  { %v1170_v23 = vmax.f32 %v946_v5, %v1104_v3  ;;  %v1171_v24 = vmax.f32 %v947_v6, %v1107_v4  ;;  %vm3463_vm3 = vcmask 130048   ;;  %vm3621_vm4 = vcmask 1041408  }
  0xd8   :  { %v1202_v25 = vmax.f32 %v1170_v23, %v496_v10  ;;  %v1203_v30 = vmax.f32 %v1171_v24, %v497_v61 }
  0xda   :  { %v1234_v38 = vmax.f32 %v1202_v25, %v561_v17  ;;  %v1235_v43 = vmax.f32 %v1203_v30, %v562_v19  ;;  %v4587_v25 = vld [vmem:[%s6617_s1 + $0x78] sm:$0xff]  }
  0xdb   :  { %4382 = vmatprep.subr.bf16.mxu1 %v4587_v25 }
  0xdc   :  { %v1458_v18 = vmax.f32 %v1234_v38, %v1392_v31  ;;  %v1459_v29 = vmax.f32 %v1235_v43, %v1395_v32  ;;  %4383 = vmatpush3.bf16.msra.mxu1 %v4587_v25  ;;  %v4588_v38 = vld [vmem:[%s6617_s1 + $0x70] sm:$0xff]  }
  0xdd   :  { %4384 = vmatprep.subr.bf16.mxu1 %v4588_v38 }
  0xde   :  { %v1555_v35 = vpack.c.bf16 %v1459_v29, %v1458_v18 }
  0xe0   :  { %4379 = vmatmul.mubr.bf16.gmra.mxu0 %v1555_v35  ;;  %4385 = vmatpush3.bf16.msra.mxu1 %v4588_v38  ;;  %v4589_v35 = vld [vmem:[%s6617_s1 + $0x68] sm:$0xff]  }
  0xe1   :  { %4386 = vmatprep.subr.bf16.mxu1 %v4589_v35 }
  0xe4   :  { %4387 = vmatpush3.bf16.msra.mxu1 %v4589_v35 }
  0xe8   :  { %v5736_v46 = vpop.f32.mrf.mxu0 }
  0xea   :  { %v5738_v41 = vpop.f32.mrf.mxu0 }
  0xec   :  { %v5740_v47 = vpop.f32.mrf.mxu0 }
  0xee   :  { %v5742_v33 = vpop.f32.mrf.mxu0 }
  0xef   :  { %v1767_v34 = vadd.f32 %v5742_v33, %v5738_v41 }
  0xf1   :  { %v1768_v28 = vadd.f32 %v5736_v46, %v1767_v34 }
  0xf3   :  { %v1769_v36 = vadd.f32 %v5740_v47, %v1768_v28 }
 0x102   :  { %v5746_v21 = vpop.f32.mrf.mxu0 }
 0x104   :  { %v5749_v45 = vpop.f32.mrf.mxu0 }
 0x105   :  { %v1770_v51 = vadd.f32 %v1769_v36, %v5749_v45  ;;  %v4590_v36 = vld [vmem:[%s6617_s1 + $0x60] sm:$0xff]  }
 0x106   :  { %v5752_v15 = vpop.f32.mrf.mxu0  ;;  %4388 = vmatprep.subr.bf16.mxu1 %v4590_v36 }
 0x107   :  { %4389 = vmatpush3.bf16.msra.mxu1 %v4590_v36 }
 0x108   :  { %v5755_v11 = vpop.f32.mrf.mxu0 }
 0x109   :  { %v1771_v14 = vadd.f32 %v1770_v51, %v5755_v11 }
 0x10b   :  { %v1772_v42 = vadd.f32 %v5746_v21, %v1771_v14 }
 0x10d   :  { %v1773_v13 = vadd.f32 %v5752_v15, %v1772_v42  ;;  %v4591_v42 = vld [vmem:[%s6617_s1 + $0x58] sm:$0xff]  }
 0x10e   :  { %4390 = vmatprep.subr.bf16.mxu1 %v4591_v42 }
 0x10f   :  { %4391 = vmatpush3.bf16.msra.mxu1 %v4591_v42 }
 0x11d   :  { %v5758_v44 = vpop.f32.mrf.mxu0 }
 0x11f   :  { %v5761_v20 = vpop.f32.mrf.mxu0 }
 0x120   :  { %v1774_v53 = vadd.f32 %v1773_v13, %v5761_v20 }
 0x121   :  { %v5764_v27 = vpop.f32.mrf.mxu0 }
 0x123   :  { %v5767_v52 = vpop.f32.mrf.mxu0 }
 0x124   :  { %v1775_v9 = vadd.f32 %v1774_v53, %v5767_v52 }
 0x126   :  { %v1776_v48 = vadd.f32 %v5758_v44, %v1775_v9  ;;  %v4592_v9 = vld [vmem:[%s6617_s1 + $0x50] sm:$0xff]  }
 0x127   :  { %4392 = vmatprep.subr.bf16.mxu1 %v4592_v9 }
 0x128   :  { %v1777_v54 = vadd.f32 %v5764_v27, %v1776_v48  ;;  %4393 = vmatpush3.bf16.msra.mxu1 %v4592_v9 }
 0x137   :  { %v5770_v40 = vpop.f32.mrf.mxu0 }
 0x139   :  { %v5773_v49 = vpop.f32.mrf.mxu0 }
 0x13a   :  { %v1778_v22 = vadd.f32 %v1777_v54, %v5773_v49  ;;  %v4593_v54 = vld [vmem:[%s6617_s1 + $0x48] sm:$0xff]  }
 0x13b   :  { %v5776_v39 = vpop.f32.mrf.mxu0  ;;  %4394 = vmatprep.subr.bf16.mxu1 %v4593_v54 }
 0x13c   :  { %4395 = vmatpush3.bf16.msra.mxu1 %v4593_v54 }
 0x13d   :  { %v5779_v26 = vpop.f32.mrf.mxu0 }
 0x13e   :  { %v1779_v50 = vadd.f32 %v1778_v22, %v5779_v26  ;;  %v4594_v22 = vld [vmem:[%s6617_s1 + $0x40] sm:$0xff]  }
 0x13f   :  { %4396 = vmatprep.subr.bf16.mxu1 %v4594_v22 }
 0x140   :  { %v1780_v56 = vadd.f32 %v5770_v40, %v1779_v50  ;;  %4397 = vmatpush3.bf16.msra.mxu1 %v4594_v22 }
 0x142   :  { %v1781_v37 = vadd.f32 %v5776_v39, %v1780_v56 }
 0x152   :  { %v5782_v55 = vpop.f32.mrf.mxu0 }
 0x154   :  { %v5785_v57 = vpop.f32.mrf.mxu0 }
 0x155   :  { %v1782_v58 = vadd.f32 %v1781_v37, %v5785_v57 }
 0x156   :  { %v5788_v10 = vpop.f32.mrf.mxu0 }
 0x158   :  { %v5791_v59 = vpop.f32.mrf.mxu0 }
 0x159   :  { %v1783_v60 = vadd.f32 %v1782_v58, %v5791_v59 }
 0x15b   :  { %v1784_v62 = vadd.f32 %v5782_v55, %v1783_v60 }
 0x15d   :  { %v1785_v0 = vadd.f32 %v5788_v10, %v1784_v62 }
 0x16c   :  { %v5794_v61 = vpop.f32.mrf.mxu0 }
 0x16e   :  { %v5797_v63 = vpop.f32.mrf.mxu0 }
 0x16f   :  { %v1786_v2 = vadd.f32 %v1785_v0, %v5797_v63 }
 0x170   :  { %v5800_v1 = vpop.f32.mrf.mxu0 }
 0x172   :  { %v5803_v3 = vpop.f32.mrf.mxu0 }
 0x173   :  { %v1787_v4 = vadd.f32 %v1786_v2, %v5803_v3 }
 0x175   :  { %v1788_v6 = vadd.f32 %v5794_v61, %v1787_v4 }
 0x177   :  { %v1789_v8 = vadd.f32 %v5800_v1, %v1788_v6 }
 0x187   :  { %v5806_v5 = vpop.f32.mrf.mxu0 }
 0x189   :  { %v5809_v7 = vpop.f32.mrf.mxu0 }
 0x18a   :  { %v1790_v16 = vadd.f32 %v1789_v8, %v5809_v7 }
 0x18b   :  { %v5812_v12 = vpop.f32.mrf.mxu0 }
 0x18d   :  { %v5815_v17 = vpop.f32.mrf.mxu0 }
 0x18e   :  { %v1791_v19 = vadd.f32 %v1790_v16, %v5815_v17 }
 0x190   :  { %v1792_v23 = vadd.f32 %v5806_v5, %v1791_v19 }
 0x192   :  { %v1793_v24 = vadd.f32 %v5812_v12, %v1792_v23 }
 0x1a0   :  { %v5823_v30 = vpop.f32.mrf.mxu0 }
 0x1a2   :  { %v5825_v31 = vpop.f32.mrf.mxu0 }
 0x1a3   :  { %v1794_v32 = vadd.f32 %v1793_v24, %v5825_v31 }
 0x1a4   :  { %v5831_v43 = vpop.f32.mrf.mxu0 }
 0x1a6   :  { %v5833_v18 = vpop.f32.mrf.mxu0 }
 0x1a7   :  { %v1795_v29 = vadd.f32 %v1794_v32, %v5833_v18 }
 0x1a9   :  { %v1796_v34 = vadd.f32 %v5823_v30, %v1795_v29 }
 0x1ab   :  { %v1797_v28 = vadd.f32 %v5831_v43, %v1796_v34 }
 0x1ad   :  { %v1798_v51 = vrot.slane %v1797_v28, 4 }
 0x1af   :  { %v1799_v14 = vadd.f32 %v1798_v51, %v1797_v28 }
 0x1b1   :  { %v1800_v13 = vrot.slane %v1799_v14, 2 }
 0x1b3   :  { %v1801_v53 = vadd.f32 %v1800_v13, %v1799_v14 }
 0x1b5   :  { %v1802_v48 = vrot.slane %v1801_v53, 1 }
 0x1b7   :  { %v1803_v50 = vadd.f32 %v1802_v48, %v1801_v53 }
 0x1b9   :  { %v5856_v56 = vmul.f32 0.00390625, %v1803_v50 }
 0x1bb   :  { %v1806_v37 = vsub.f32 %v5738_v41, %v5856_v56  ;;  %v1807_v58 = vsub.f32 %v5742_v33, %v5856_v56  ;;  %v1808_v60 = vsub.f32 %v5736_v46, %v5856_v56  ;;  %v1809_v2 = vsub.f32 %v5740_v47, %v5856_v56 }
 0x1bc   :  { %v1810_v4 = vsub.f32 %v5749_v45, %v5856_v56  ;;  %v1811_v16 = vsub.f32 %v5755_v11, %v5856_v56  ;;  %v1812_v24 = vsub.f32 %v5746_v21, %v5856_v56  ;;  %v1813_v38 = vsub.f32 %v5752_v15, %v5856_v56 }
 0x1bd   :  { %v1838_v62 = vmul.f32 %v1806_v37, %v1806_v37  ;;  %v1839_v0 = vmul.f32 %v1807_v58, %v1807_v58  ;;  %v1840_v6 = vmul.f32 %v1808_v60, %v1808_v60  ;;  %v1841_v19 = vmul.f32 %v1809_v2, %v1809_v2 }
 0x1be   :  { %v1842_v25 = vmul.f32 %v1810_v4, %v1810_v4  ;;  %v1843_v29 = vmul.f32 %v1811_v16, %v1811_v16  ;;  %v1814_v34 = vsub.f32 %v5761_v20, %v5856_v56  ;;  %v1844_v28 = vmul.f32 %v1812_v24, %v1812_v24 }
 0x1bf   :  { %v1870_v8 = vadd.f32 %v1839_v0, %v1838_v62  ;;  %v1815_v51 = vsub.f32 %v5767_v52, %v5856_v56  ;;  %v1845_v14 = vmul.f32 %v1813_v38, %v1813_v38  ;;  %v1816_v13 = vsub.f32 %v5758_v44, %v5856_v56 }
 0x1c0   :  { %v1846_v53 = vmul.f32 %v1814_v34, %v1814_v34  ;;  %v1817_v48 = vsub.f32 %v5764_v27, %v5856_v56  ;;  %v1818_v50 = vsub.f32 %v5773_v49, %v5856_v56  ;;  %v1819_v60 = vsub.f32 %v5779_v26, %v5856_v56 }
 0x1c1   :  { %v1871_v23 = vadd.f32 %v1870_v8, %v1840_v6  ;;  %v1847_v54 = vmul.f32 %v1815_v51, %v1815_v51  ;;  %v1848_v37 = vmul.f32 %v1816_v13, %v1816_v13  ;;  %v1820_v2 = vsub.f32 %v5770_v40, %v5856_v56 }
 0x1c2   :  { %v1849_v62 = vmul.f32 %v1817_v48, %v1817_v48  ;;  %v1850_v4 = vmul.f32 %v1818_v50, %v1818_v50  ;;  %v1821_v8 = vsub.f32 %v5776_v39, %v5856_v56  ;;  %v1851_v16 = vmul.f32 %v1819_v60, %v1819_v60 }
 0x1c3   :  { %v1872_v32 = vadd.f32 %v1871_v23, %v1841_v19  ;;  %v1822_v23 = vsub.f32 %v5785_v57, %v5856_v56  ;;  %v1852_v24 = vmul.f32 %v1820_v2, %v1820_v2 }
 0x1c4   :  { %v1853_v38 = vmul.f32 %v1821_v8, %v1821_v8 }
 0x1c5   :  { %v1873_v35 = vadd.f32 %v1872_v32, %v1842_v25  ;;  %v1823_v32 = vsub.f32 %v5791_v59, %v5856_v56  ;;  %v1854_v34 = vmul.f32 %v1822_v23, %v1822_v23 }
 0x1c7   :  { %v1874_v36 = vadd.f32 %v1873_v35, %v1843_v29  ;;  %v1824_v35 = vsub.f32 %v5782_v55, %v5856_v56  ;;  %v1855_v51 = vmul.f32 %v1823_v32, %v1823_v32 }
 0x1c9   :  { %v1875_v42 = vadd.f32 %v1874_v36, %v1844_v28  ;;  %v1825_v36 = vsub.f32 %v5788_v10, %v5856_v56  ;;  %v1856_v13 = vmul.f32 %v1824_v35, %v1824_v35 }
 0x1cb   :  { %v1876_v9 = vadd.f32 %v1875_v42, %v1845_v14  ;;  %v1826_v42 = vsub.f32 %v5797_v63, %v5856_v56  ;;  %v1857_v48 = vmul.f32 %v1825_v36, %v1825_v36 }
 0x1cd   :  { %v1877_v22 = vadd.f32 %v1876_v9, %v1846_v53  ;;  %v1827_v9 = vsub.f32 %v5803_v3, %v5856_v56  ;;  %v1858_v50 = vmul.f32 %v1826_v42, %v1826_v42 }
 0x1cf   :  { %v1878_v58 = vadd.f32 %v1877_v22, %v1847_v54  ;;  %v1828_v22 = vsub.f32 %v5794_v61, %v5856_v56  ;;  %v1859_v60 = vmul.f32 %v1827_v9, %v1827_v9 }
 0x1d1   :  { %v1879_v0 = vadd.f32 %v1878_v58, %v1848_v37  ;;  %v1829_v58 = vsub.f32 %v5800_v1, %v5856_v56  ;;  %v1860_v2 = vmul.f32 %v1828_v22, %v1828_v22 }
 0x1d3   :  { %v1880_v6 = vadd.f32 %v1879_v0, %v1849_v62  ;;  %v1830_v0 = vsub.f32 %v5809_v7, %v5856_v56  ;;  %v1861_v8 = vmul.f32 %v1829_v58, %v1829_v58 }
 0x1d5   :  { %v1881_v19 = vadd.f32 %v1880_v6, %v1850_v4  ;;  %v1831_v6 = vsub.f32 %v5815_v17, %v5856_v56  ;;  %v1862_v23 = vmul.f32 %v1830_v0, %v1830_v0 }
 0x1d7   :  { %v1882_v25 = vadd.f32 %v1881_v19, %v1851_v16  ;;  %v1832_v19 = vsub.f32 %v5806_v5, %v5856_v56  ;;  %v1863_v32 = vmul.f32 %v1831_v6, %v1831_v6 }
 0x1d9   :  { %v1883_v29 = vadd.f32 %v1882_v25, %v1852_v24  ;;  %v1833_v25 = vsub.f32 %v5812_v12, %v5856_v56  ;;  %v1864_v35 = vmul.f32 %v1832_v19, %v1832_v19  ;;  %v1765_v19 = vld [vmem:[%s6618_s2] sm:$0x1] }
 0x1db   :  { %v1884_v28 = vadd.f32 %v1883_v29, %v1853_v38  ;;  %v1834_v29 = vsub.f32 %v5825_v31, %v5856_v56  ;;  %v1865_v36 = vmul.f32 %v1833_v25, %v1833_v25 }
 0x1dd   :  { %v1885_v14 = vadd.f32 %v1884_v28, %v1854_v34  ;;  %v1835_v28 = vsub.f32 %v5833_v18, %v5856_v56  ;;  %v1866_v42 = vmul.f32 %v1834_v29, %v1834_v29  ;;  %v1766_v29 = vld [vmem:[%s6619_s3] sm:$0x1] }
 0x1df   :  { %v1886_v53 = vadd.f32 %v1885_v14, %v1855_v51  ;;  %v1836_v14 = vsub.f32 %v5823_v30, %v5856_v56  ;;  %v1867_v9 = vmul.f32 %v1835_v28, %v1835_v28 }
 0x1e1   :  { %v1887_v54 = vadd.f32 %v1886_v53, %v1856_v13  ;;  %v1837_v53 = vsub.f32 %v5831_v43, %v5856_v56 }
 0x1e3   :  { %v1888_v37 = vadd.f32 %v1887_v54, %v1857_v48  ;;  %v1868_v54 = vmul.f32 %v1836_v14, %v1836_v14 }
 0x1e5   :  { %v1889_v62 = vadd.f32 %v1888_v37, %v1858_v50  ;;  %v1869_v50 = vmul.f32 %v1837_v53, %v1837_v53 }
 0x1e7   :  { %v1890_v4 = vadd.f32 %v1889_v62, %v1859_v60 }
 0x1e9   :  { %v1891_v16 = vadd.f32 %v1890_v4, %v1860_v2 }
 0x1eb   :  { %v1892_v24 = vadd.f32 %v1891_v16, %v1861_v8 }
 0x1ed   :  { %v1893_v38 = vadd.f32 %v1892_v24, %v1862_v23  ;;  %v1914_v23 = vlaneseq }
 0x1ef   :  { %v1894_v34 = vadd.f32 %v1893_v38, %v1863_v32  ;;  %v1915_v32 = vshrl.u32 %v1914_v23, 7 }
 0x1f1   :  { %v1895_v51 = vadd.f32 %v1894_v34, %v1864_v35  ;;  %v5929_v35 = vsub.s32 0, %v1915_v32 }
 0x1f3   :  { %v1896_v13 = vadd.f32 %v1895_v51, %v1865_v36 }
 0x1f5   :  { %v1897_v48 = vadd.f32 %v1896_v13, %v1866_v42 }
 0x1f7   :  { %v1898_v22 = vadd.f32 %v1897_v48, %v1867_v9 }
 0x1f9   :  { %v1899_v37 = vadd.f32 %v1898_v22, %v1868_v54 }
 0x1fb   :  { %v1900_v58 = vadd.f32 %v1899_v37, %v1869_v50 }
 0x1fd   :  { %v1901_v60 = vrot.slane %v1900_v58, 4 }
 0x1ff   :  { %v1902_v62 = vadd.f32 %v1901_v60, %v1900_v58 }
 0x201   :  { %v1903_v0 = vrot.slane %v1902_v62, 2 }
 0x203   :  { %v1904_v2 = vadd.f32 %v1903_v0, %v1902_v62 }
 0x205   :  { %v1905_v4 = vrot.slane %v1904_v2, 1 }
 0x207   :  { %v1906_v6 = vadd.f32 %v1905_v4, %v1904_v2 }
 0x209   :  { %v1907_v8 = vmul.f32 0.00390625, %v1906_v6 }
 0x20b   :  { %v1908_v16 = vadd.f32 1e-05, %v1907_v8 }
 0x20d   :  { %4656 = vrsqrt.f32 %v1908_v16 }
 0x21a   :  { %v4657_v24 = vpop.eup %4656 }
 0x21b   :  { %v1910_v25 = vmul.f32 %v4657_v24, %v1765_v19 }
 0x21d   :  { %v1911_v38 = vmul.f32 %v1910_v25, %v5856_v56  ;;  %v5932_v28 = vrot.slane %v1910_v25, %v5929_v35 }
 0x21f   :  { %v1912_v34 = vsub.f32 %v1766_v29, %v1911_v38  ;;  %v1921_v51 = vmul.f32 %v5736_v46, %v5932_v28  ;;  %v1922_v14 = vmul.f32 %v5740_v47, %v5932_v28  ;;  %v1923_v56 = vmul.f32 %v5932_v28, %v5749_v45 }
 0x220   :  { %v1924_v42 = vmul.f32 %v5932_v28, %v5755_v11  ;;  %v1919_v9 = vmul.f32 %v5932_v28, %v5738_v41  ;;  %v1920_v48 = vmul.f32 %v5932_v28, %v5742_v33  ;;  %v1925_v41 = vmul.f32 %v5746_v21, %v5932_v28 }
 0x221   :  { %v5935_v36 = vrot.slane %v1912_v34, %v5929_v35  ;;  %v1926_v33 = vmul.f32 %v5752_v15, %v5932_v28  ;;  %v1927_v0 = vmul.f32 %v5932_v28, %v5761_v20  ;;  %v1928_v2 = vmul.f32 %v5932_v28, %v5767_v52 }
 0x222   :  { %v1929_v52 = vmul.f32 %v5758_v44, %v5932_v28  ;;  %v1930_v25 = vmul.f32 %v5764_v27, %v5932_v28  ;;  %v1931_v32 = vmul.f32 %v5932_v28, %v5773_v49  ;;  %v1932_v38 = vmul.f32 %v5932_v28, %v5779_v26 }
 0x223   :  { %v1959_v13 = vadd.f32 %v5935_v36, %v1921_v51  ;;  %v1960_v53 = vadd.f32 %v5935_v36, %v1922_v14  ;;  %v1961_v46 = vadd.f32 %v5935_v36, %v1923_v56  ;;  %v1962_v47 = vadd.f32 %v5935_v36, %v1924_v42 }
 0x224   :  { %v1957_v54 = vadd.f32 %v5935_v36, %v1919_v9  ;;  %v1958_v45 = vadd.f32 %v5935_v36, %v1920_v48  ;;  %v1963_v6 = vadd.f32 %v5935_v36, %v1925_v41  ;;  %v1964_v8 = vadd.f32 %v5935_v36, %v1926_v33 }
 0x225   :  { %v1991_v22 = vmax.f32 %v1959_v13, 0.0  ;;  %v1992_v11 = vmax.f32 %v1960_v53, 0.0  ;;  %v1993_v58 = vmax.f32 %v1961_v46, 0.0  ;;  %v1994_v60 = vmax.f32 %v1962_v47, 0.0 }
 0x226   :  { %v1989_v50 = vmax.f32 %v1957_v54, 0.0  ;;  %v1990_v37 = vmax.f32 %v1958_v45, 0.0  ;;  %v1965_v16 = vadd.f32 %v5935_v36, %v1927_v0  ;;  %v1966_v19 = vadd.f32 %v5935_v36, %v1928_v2 }
 0x227   :  { %v2039_v62 = vpack.c.bf16 %v1992_v11, %v1991_v22  ;;  %v2040_v21 = vpack.c.bf16 %v1994_v60, %v1993_v58  ;;  %v1995_v15 = vmax.f32 %v1963_v6, 0.0  ;;  %v1996_v23 = vmax.f32 %v1964_v8, 0.0 }
 0x228   :  { %v2038_v4 = vpack.c.bf16 %v1990_v37, %v1989_v50  ;;  %v1997_v24 = vmax.f32 %v1965_v16, 0.0  ;;  %v1998_v20 = vmax.f32 %v1966_v19, 0.0  ;;  %v1967_v29 = vadd.f32 %v5935_v36, %v1929_v52 }
 0x229   :  { %v1968_v34 = vadd.f32 %v5935_v36, %v1930_v25  ;;  %v2041_v51 = vpack.c.bf16 %v1996_v23, %v1995_v15  ;;  %v1969_v14 = vadd.f32 %v5935_v36, %v1931_v32  ;;  %v1970_v56 = vadd.f32 %v5935_v36, %v1932_v38 }
 0x22a   :  { %4398 = vmatprep.mubr.bf16.mxu1 %v2038_v4  ;;  %v2042_v42 = vpack.c.bf16 %v1998_v20, %v1997_v24  ;;  %v1999_v44 = vmax.f32 %v1967_v29, 0.0  ;;  %v1933_v49 = vmul.f32 %v5770_v40, %v5932_v28  ;;  %v1934_v26 = vmul.f32 %v5776_v39, %v5932_v28 }
 0x22b   :  { %4399 = vmatmul.mubr.bf16.vlgmr.msra.gmra.mxu1 %v2039_v62  ;;  %v2000_v27 = vmax.f32 %v1968_v34, 0.0  ;;  %v2001_v13 = vmax.f32 %v1969_v14, 0.0  ;;  %v2002_v53 = vmax.f32 %v1970_v56, 0.0  ;;  %v1935_v9 = vmul.f32 %v5932_v28, %v5785_v57 }
 0x22c   :  { %4402 = vmatprep.mubr.bf16.mxu1 %v2040_v21  ;;  %v1936_v48 = vmul.f32 %v5932_v28, %v5791_v59  ;;  %v1971_v46 = vadd.f32 %v5935_v36, %v1933_v49  ;;  %v1972_v47 = vadd.f32 %v5935_v36, %v1934_v26  ;;  %v1937_v57 = vmul.f32 %v5782_v55, %v5932_v28 }
 0x22d   :  { %v2043_v54 = vpack.c.bf16 %v2000_v27, %v1999_v44  ;;  %v1973_v45 = vadd.f32 %v5935_v36, %v1935_v9  ;;  %v2044_v11 = vpack.c.bf16 %v2002_v53, %v2001_v13  ;;  %v1938_v59 = vmul.f32 %v5788_v10, %v5932_v28 }
 0x22e   :  { %v1974_v22 = vadd.f32 %v5935_v36, %v1936_v48  ;;  %v2003_v40 = vmax.f32 %v1971_v46, 0.0  ;;  %v2004_v39 = vmax.f32 %v1972_v47, 0.0  ;;  %v1939_v58 = vmul.f32 %v5932_v28, %v5797_v63 }
 0x22f   :  { %v2005_v50 = vmax.f32 %v1973_v45, 0.0  ;;  %v1940_v60 = vmul.f32 %v5932_v28, %v5803_v3  ;;  %v1975_v41 = vadd.f32 %v5935_v36, %v1937_v57  ;;  %v1976_v33 = vadd.f32 %v5935_v36, %v1938_v59 }
 0x230   :  { %v2006_v37 = vmax.f32 %v1974_v22, 0.0  ;;  %v2045_v62 = vpack.c.bf16 %v2004_v39, %v2003_v40  ;;  %v1977_v0 = vadd.f32 %v5935_v36, %v1939_v58  ;;  %v1941_v63 = vmul.f32 %v5794_v61, %v5932_v28 }
 0x231   :  { %v1978_v2 = vadd.f32 %v5935_v36, %v1940_v60  ;;  %v2007_v55 = vmax.f32 %v1975_v41, 0.0  ;;  %v2008_v10 = vmax.f32 %v1976_v33, 0.0  ;;  %v1942_v3 = vmul.f32 %v5800_v1, %v5932_v28 }
 0x232   :  { %v2046_v4 = vpack.c.bf16 %v2006_v37, %v2005_v50  ;;  %v2009_v6 = vmax.f32 %v1977_v0, 0.0  ;;  %v1943_v16 = vmul.f32 %v5932_v28, %v5809_v7  ;;  %v1944_v19 = vmul.f32 %v5932_v28, %v5815_v17 }
 0x233   :  { %4403 = vmatmul.mubr.bf16.gmra.mxu1 %v2041_v51  ;;  %v2010_v8 = vmax.f32 %v1978_v2, 0.0  ;;  %v1979_v21 = vadd.f32 %v5935_v36, %v1941_v63  ;;  %v1980_v15 = vadd.f32 %v5935_v36, %v1942_v3  ;;  %v2047_v23 = vpack.c.bf16 %v2008_v10, %v2007_v55 }
 0x234   :  { %4406 = vmatprep.mubr.bf16.mxu1 %v2042_v42  ;;  %v1981_v24 = vadd.f32 %v5935_v36, %v1943_v16  ;;  %v1982_v20 = vadd.f32 %v5935_v36, %v1944_v19  ;;  %v1945_v7 = vmul.f32 %v5806_v5, %v5932_v28  ;;  %v1946_v17 = vmul.f32 %v5812_v12, %v5932_v28 }
 0x235   :  { %v2048_v52 = vpack.c.bf16 %v2010_v8, %v2009_v6  ;;  %v2011_v61 = vmax.f32 %v1979_v21, 0.0  ;;  %v2012_v1 = vmax.f32 %v1980_v15, 0.0  ;;  %v1948_v38 = vmul.f32 %v5932_v28, %v5833_v18 }
 0x236   :  { %v2013_v25 = vmax.f32 %v1981_v24, 0.0  ;;  %v2014_v32 = vmax.f32 %v1982_v20, 0.0  ;;  %v1947_v29 = vmul.f32 %v5932_v28, %v5825_v31  ;;  %v1983_v34 = vadd.f32 %v5935_v36, %v1945_v7 }
 0x237   :  { %v1984_v51 = vadd.f32 %v5935_v36, %v1946_v17  ;;  %v2049_v14 = vpack.c.bf16 %v2012_v1, %v2011_v61  ;;  %v1986_v56 = vadd.f32 %v5935_v36, %v1948_v38  ;;  %v1949_v18 = vmul.f32 %v5823_v30, %v5932_v28 }
 0x238   :  { %v1985_v42 = vadd.f32 %v5935_v36, %v1947_v29  ;;  %v2050_v44 = vpack.c.bf16 %v2014_v32, %v2013_v25  ;;  %v2015_v5 = vmax.f32 %v1983_v34, 0.0  ;;  %v1950_v31 = vmul.f32 %v5831_v43, %v5932_v28 }
 0x239   :  { %v2016_v12 = vmax.f32 %v1984_v51, 0.0  ;;  %v2018_v13 = vmax.f32 %v1986_v56, 0.0  ;;  %v1987_v53 = vadd.f32 %v5935_v36, %v1949_v18 }
 0x23a   :  { %v2017_v27 = vmax.f32 %v1985_v42, 0.0  ;;  %v1988_v49 = vadd.f32 %v5935_v36, %v1950_v31 }
 0x23b   :  { %4407 = vmatmul.mubr.bf16.gmra.mxu1 %v2043_v54  ;;  %v2051_v26 = vpack.c.bf16 %v2016_v12, %v2015_v5  ;;  %v2019_v48 = vmax.f32 %v1987_v53, 0.0 }
 0x23c   :  { %4410 = vmatprep.mubr.bf16.mxu1 %v2044_v11  ;;  %v2052_v9 = vpack.c.bf16 %v2018_v13, %v2017_v27  ;;  %v2020_v46 = vmax.f32 %v1988_v49, 0.0 }
 0x23e   :  { %v2053_v47 = vpack.c.bf16 %v2020_v46, %v2019_v48 }
 0x243   :  { %4411 = vmatmul.mubr.bf16.gmra.mxu1 %v2045_v62 }
 0x244   :  { %4414 = vmatprep.mubr.bf16.mxu1 %v2046_v4 }
 0x24b   :  { %4415 = vmatmul.mubr.bf16.gmra.mxu1 %v2047_v23 }
 0x24c   :  { %4418 = vmatprep.mubr.bf16.mxu1 %v2048_v52 }
 0x253   :  { %4419 = vmatmul.mubr.bf16.gmra.mxu1 %v2049_v14 }
 0x254   :  { %4422 = vmatprep.mubr.bf16.mxu1 %v2050_v44 }
 0x25b   :  { %4423 = vmatmul.mubr.bf16.gmra.mxu1 %v2051_v26 }
 0x25c   :  { %4426 = vmatprep.mubr.bf16.mxu1 %v2052_v9 }
 0x263   :  { %4427 = vmatmul.mubr.bf16.gmra.mxu1 %v2053_v47 }
 0x2eb   :  { %v6033_v54 = vpop.f32.mrf.mxu1 }
 0x2ed   :  { %v6035_v45 = vpop.f32.mrf.mxu1 }
 0x2ef   :  { %v6037_v30 = vpop.f32.mrf.mxu1 }
 0x2f1   :  { %v6039_v22 = vpop.f32.mrf.mxu1 }
 0x2f2   :  { %v2267_v43 = vadd.f32 %v6039_v22, %v6035_v45 }
 0x2f3   :  { %v6043_v28 = vpop.f32.mrf.mxu1 }
 0x2f4   :  { %v2268_v36 = vadd.f32 %v6033_v54, %v2267_v43 }
 0x2f5   :  { %v6046_v11 = vpop.f32.mrf.mxu1 }
 0x2f6   :  { %v2269_v40 = vadd.f32 %v6037_v30, %v2268_v36 }
 0x2f7   :  { %v6049_v39 = vpop.f32.mrf.mxu1 }
 0x2f8   :  { %v2270_v50 = vadd.f32 %v2269_v40, %v6046_v11 }
 0x2f9   :  { %v6052_v37 = vpop.f32.mrf.mxu1 }
 0x2fa   :  { %v2271_v57 = vadd.f32 %v2270_v50, %v6052_v37 }
 0x2fb   :  { %v6055_v59 = vpop.f32.mrf.mxu1 }
 0x2fc   :  { %v2272_v58 = vadd.f32 %v6043_v28, %v2271_v57 }
 0x2fd   :  { %v6058_v60 = vpop.f32.mrf.mxu1 }
 0x2fe   :  { %v2273_v41 = vadd.f32 %v6049_v39, %v2272_v58 }
 0x2ff   :  { %v6061_v33 = vpop.f32.mrf.mxu1 }
 0x300   :  { %v2274_v62 = vadd.f32 %v2273_v41, %v6058_v60 }
 0x301   :  { %v6064_v0 = vpop.f32.mrf.mxu1 }
 0x302   :  { %v2275_v2 = vadd.f32 %v2274_v62, %v6064_v0 }
 0x303   :  { %v6067_v4 = vpop.f32.mrf.mxu1 }
 0x304   :  { %v2276_v55 = vadd.f32 %v6055_v59, %v2275_v2 }
 0x305   :  { %v6070_v10 = vpop.f32.mrf.mxu1 }
 0x306   :  { %v2277_v6 = vadd.f32 %v6061_v33, %v2276_v55 }
 0x307   :  { %v6073_v8 = vpop.f32.mrf.mxu1 }
 0x308   :  { %v2278_v63 = vadd.f32 %v2277_v6, %v6070_v10 }
 0x309   :  { %v6076_v3 = vpop.f32.mrf.mxu1 }
 0x30a   :  { %v2279_v16 = vadd.f32 %v2278_v63, %v6076_v3 }
 0x30b   :  { %v6079_v19 = vpop.f32.mrf.mxu1 }
 0x30c   :  { %v2280_v21 = vadd.f32 %v6067_v4, %v2279_v16 }
 0x30d   :  { %v6082_v15 = vpop.f32.mrf.mxu1 }
 0x30e   :  { %v2281_v23 = vadd.f32 %v6073_v8, %v2280_v21 }
 0x30f   :  { %v6085_v24 = vpop.f32.mrf.mxu1 }
 0x310   :  { %v2282_v20 = vadd.f32 %v2281_v23, %v6082_v15 }
 0x311   :  { %v6088_v52 = vpop.f32.mrf.mxu1 }
 0x312   :  { %v2283_v61 = vadd.f32 %v2282_v20, %v6088_v52 }
 0x313   :  { %v6091_v1 = vpop.f32.mrf.mxu1 }
 0x314   :  { %v2284_v25 = vadd.f32 %v6079_v19, %v2283_v61 }
 0x315   :  { %v6094_v32 = vpop.f32.mrf.mxu1 }
 0x316   :  { %v2285_v7 = vadd.f32 %v6085_v24, %v2284_v25 }
 0x317   :  { %v6097_v17 = vpop.f32.mrf.mxu1 }
 0x318   :  { %v2286_v38 = vadd.f32 %v2285_v7, %v6094_v32 }
 0x319   :  { %v6100_v29 = vpop.f32.mrf.mxu1 }
 0x31a   :  { %v2287_v34 = vadd.f32 %v2286_v38, %v6100_v29 }
 0x31b   :  { %v6103_v51 = vpop.f32.mrf.mxu1 }
 0x31c   :  { %v2288_v14 = vadd.f32 %v6091_v1, %v2287_v34 }
 0x31d   :  { %v6106_v56 = vpop.f32.mrf.mxu1 }
 0x31e   :  { %v2289_v42 = vadd.f32 %v6097_v17, %v2288_v14 }
 0x31f   :  { %v6109_v44 = vpop.f32.mrf.mxu1 }
 0x320   :  { %v2290_v5 = vadd.f32 %v2289_v42, %v6106_v56 }
 0x321   :  { %v6112_v12 = vpop.f32.mrf.mxu1 }
 0x322   :  { %v2291_v27 = vadd.f32 %v2290_v5, %v6112_v12 }
 0x323   :  { %v6115_v13 = vpop.f32.mrf.mxu1 }
 0x324   :  { %v2292_v18 = vadd.f32 %v6103_v51, %v2291_v27 }
 0x325   :  { %v6118_v31 = vpop.f32.mrf.mxu1 }
 0x326   :  { %v2293_v53 = vadd.f32 %v6109_v44, %v2292_v18 }
 0x327   :  { %v6121_v49 = vpop.f32.mrf.mxu1 }
 0x328   :  { %v2294_v26 = vadd.f32 %v2293_v53, %v6118_v31 }
 0x329   :  { %v6124_v9 = vpop.f32.mrf.mxu1 }
 0x32a   :  { %v2295_v48 = vadd.f32 %v2294_v26, %v6124_v9 }
 0x32c   :  { %v2296_v46 = vadd.f32 %v6115_v13, %v2295_v48 }
 0x32e   :  { %v2297_v47 = vadd.f32 %v6121_v49, %v2296_v46 }
 0x330   :  { %v2298_v43 = vrot.slane %v2297_v47, 4 }
 0x332   :  { %v2299_v36 = vadd.f32 %v2298_v43, %v2297_v47 }
 0x334   :  { %v2300_v40 = vrot.slane %v2299_v36, 2 }
 0x336   :  { %v2301_v50 = vadd.f32 %v2300_v40, %v2299_v36 }
 0x338   :  { %v2302_v57 = vrot.slane %v2301_v50, 1 }
 0x33a   :  { %v2303_v58 = vadd.f32 %v2302_v57, %v2301_v50 }
 0x33c   :  { %v6129_v41 = vmul.f32 0.00390625, %v2303_v58 }
 0x33e   :  { %v2305_v62 = vsub.f32 %v6035_v45, %v6129_v41  ;;  %v2306_v2 = vsub.f32 %v6039_v22, %v6129_v41  ;;  %v2307_v55 = vsub.f32 %v6033_v54, %v6129_v41  ;;  %v2308_v16 = vsub.f32 %v6037_v30, %v6129_v41 }
 0x33f   :  { %v2309_v21 = vsub.f32 %v6046_v11, %v6129_v41  ;;  %v2310_v61 = vsub.f32 %v6052_v37, %v6129_v41  ;;  %v2311_v38 = vsub.f32 %v6043_v28, %v6129_v41  ;;  %v2312_v42 = vsub.f32 %v6049_v39, %v6129_v41 }
 0x340   :  { %v2337_v6 = vmul.f32 %v2305_v62, %v2305_v62  ;;  %v2338_v63 = vmul.f32 %v2306_v2, %v2306_v2  ;;  %v2339_v23 = vmul.f32 %v2307_v55, %v2307_v55  ;;  %v2340_v25 = vmul.f32 %v2308_v16, %v2308_v16 }
 0x341   :  { %v2341_v34 = vmul.f32 %v2309_v21, %v2309_v21  ;;  %v2342_v5 = vmul.f32 %v2310_v61, %v2310_v61  ;;  %v2313_v18 = vsub.f32 %v6058_v60, %v6129_v41  ;;  %v2343_v53 = vmul.f32 %v2311_v38, %v2311_v38  ;;  %v4597_v61 = vld [vmem:[%s6620_s4 + $0x4] ss:$8 sps:$4 sm:$0xff]  }
 0x342   :  { %v2369_v20 = vadd.f32 %v2338_v63, %v2337_v6  ;;  %v2314_v48 = vsub.f32 %v6064_v0, %v6129_v41  ;;  %v2344_v46 = vmul.f32 %v2312_v42, %v2312_v42  ;;  %v2315_v43 = vsub.f32 %v6055_v59, %v6129_v41  ;;  %2616 = vmatprep.mubr.bf16.mxu0 %v4597_v61 }
 0x343   :  { %v2345_v36 = vmul.f32 %v2313_v18, %v2313_v18  ;;  %v2316_v50 = vsub.f32 %v6061_v33, %v6129_v41  ;;  %v2317_v62 = vsub.f32 %v6070_v10, %v6129_v41  ;;  %v2318_v6 = vsub.f32 %v6076_v3, %v6129_v41 }
 0x344   :  { %v2370_v7 = vadd.f32 %v2369_v20, %v2339_v23  ;;  %v2346_v57 = vmul.f32 %v2314_v48, %v2314_v48  ;;  %v2347_v2 = vmul.f32 %v2315_v43, %v2315_v43  ;;  %v2319_v21 = vsub.f32 %v6067_v4, %v6129_v41 }
 0x345   :  { %v2348_v63 = vmul.f32 %v2316_v50, %v2316_v50  ;;  %v2349_v23 = vmul.f32 %v2317_v62, %v2317_v62 }
 0x346   :  { %v2371_v14 = vadd.f32 %v2370_v7, %v2340_v25  ;;  %v2320_v25 = vsub.f32 %v6073_v8, %v6129_v41  ;;  %v2350_v7 = vmul.f32 %v2318_v6, %v2318_v6 }
 0x348   :  { %v2372_v27 = vadd.f32 %v2371_v14, %v2341_v34  ;;  %v2321_v34 = vsub.f32 %v6082_v15, %v6129_v41  ;;  %v2351_v14 = vmul.f32 %v2319_v21, %v2319_v21 }
 0x34a   :  { %v2373_v26 = vadd.f32 %v2372_v27, %v2342_v5  ;;  %v2322_v5 = vsub.f32 %v6088_v52, %v6129_v41  ;;  %v2352_v27 = vmul.f32 %v2320_v25, %v2320_v25  ;;  %v2330_v25 = vsub.f32 %v6112_v12, %v6129_v41 }
 0x34c   :  { %v2374_v47 = vadd.f32 %v2373_v26, %v2343_v53  ;;  %v2323_v53 = vsub.f32 %v6079_v19, %v6129_v41  ;;  %v2353_v26 = vmul.f32 %v2321_v34, %v2321_v34  ;;  %v2331_v34 = vsub.f32 %v6103_v51, %v6129_v41 }
 0x34e   :  { %v2375_v40 = vadd.f32 %v2374_v47, %v2344_v46  ;;  %v2324_v46 = vsub.f32 %v6085_v24, %v6129_v41  ;;  %v2354_v47 = vmul.f32 %v2322_v5, %v2322_v5  ;;  %v2332_v5 = vsub.f32 %v6109_v44, %v6129_v41 }
 0x350   :  { %v2376_v58 = vadd.f32 %v2375_v40, %v2345_v36  ;;  %v2325_v36 = vsub.f32 %v6094_v32, %v6129_v41  ;;  %v2355_v40 = vmul.f32 %v2323_v53, %v2323_v53  ;;  %v2333_v53 = vsub.f32 %v6118_v31, %v6129_v41 }
 0x352   :  { %v2377_v55 = vadd.f32 %v2376_v58, %v2346_v57  ;;  %v2326_v57 = vsub.f32 %v6100_v29, %v6129_v41  ;;  %v2356_v58 = vmul.f32 %v2324_v46, %v2324_v46  ;;  %v4607_v46 = vld [vmem:[%s6617_s1 + $0xb8] sm:$0xff]  }
 0x353   :  { %4430 = vmatprep.subr.bf16.mxu1 %v4607_v46 }
 0x354   :  { %v2378_v16 = vadd.f32 %v2377_v55, %v2347_v2  ;;  %v2327_v2 = vsub.f32 %v6091_v1, %v6129_v41  ;;  %v2357_v55 = vmul.f32 %v2325_v36, %v2325_v36  ;;  %v2364_v36 = vmul.f32 %v2332_v5, %v2332_v5  ;;  %4431 = vmatpush3.bf16.msra.mxu1 %v4607_v46 }
 0x356   :  { %v2379_v20 = vadd.f32 %v2378_v16, %v2348_v63  ;;  %v2328_v63 = vsub.f32 %v6097_v17, %v6129_v41  ;;  %v2358_v16 = vmul.f32 %v2326_v57, %v2326_v57  ;;  %v2365_v57 = vmul.f32 %v2333_v53, %v2333_v53 }
 0x358   :  { %v2380_v38 = vadd.f32 %v2379_v20, %v2349_v23  ;;  %v2329_v23 = vsub.f32 %v6106_v56, %v6129_v41  ;;  %v2359_v20 = vmul.f32 %v2327_v2, %v2327_v2 }
 0x35a   :  { %v2381_v42 = vadd.f32 %v2380_v38, %v2350_v7  ;;  %v2360_v7 = vmul.f32 %v2328_v63, %v2328_v63 }
 0x35c   :  { %v2382_v18 = vadd.f32 %v2381_v42, %v2351_v14  ;;  %v2361_v14 = vmul.f32 %v2329_v23, %v2329_v23 }
 0x35e   :  { %v2383_v48 = vadd.f32 %v2382_v18, %v2352_v27  ;;  %v2362_v27 = vmul.f32 %v2330_v25, %v2330_v25 }
 0x360   :  { %v2384_v43 = vadd.f32 %v2383_v48, %v2353_v26  ;;  %v2363_v26 = vmul.f32 %v2331_v34, %v2331_v34 }
 0x362   :  { %v2385_v50 = vadd.f32 %v2384_v43, %v2354_v47  ;;  %v4608_v47 = vld [vmem:[%s6617_s1 + $0xb0] sm:$0xff]   ;;  %v2334_v43 = vsub.f32 %v6124_v9, %v6129_v41 }
 0x363   :  { %4432 = vmatprep.subr.bf16.mxu1 %v4608_v47 }
 0x364   :  { %v2386_v62 = vadd.f32 %v2385_v50, %v2355_v40  ;;  %v2335_v50 = vsub.f32 %v6115_v13, %v6129_v41  ;;  %v2366_v2 = vmul.f32 %v2334_v43, %v2334_v43  ;;  %4433 = vmatpush3.bf16.msra.mxu1 %v4608_v47 }
 0x366   :  { %v2387_v6 = vadd.f32 %v2386_v62, %v2356_v58  ;;  %v2336_v62 = vsub.f32 %v6121_v49, %v6129_v41 }
 0x368   :  { %v2388_v21 = vadd.f32 %v2387_v6, %v2357_v55  ;;  %v2367_v6 = vmul.f32 %v2335_v50, %v2335_v50 }
 0x36a   :  { %v2389_v61 = vadd.f32 %v2388_v21, %v2358_v16  ;;  %v2368_v16 = vmul.f32 %v2336_v62, %v2336_v62 }
 0x36c   :  { %v2390_v38 = vadd.f32 %v2389_v61, %v2359_v20 }
 0x36e   :  { %v2391_v42 = vadd.f32 %v2390_v38, %v2360_v7 }
 0x370   :  { %v2392_v18 = vadd.f32 %v2391_v42, %v2361_v14 }
 0x372   :  { %v2393_v48 = vadd.f32 %v2392_v18, %v2362_v27  ;;  %v4044_v27 = vld [vmem:[%s6618_s2 + $0x1] sm:$0x1] }
 0x374   :  { %v2394_v40 = vadd.f32 %v2393_v48, %v2363_v26  ;;  %v4045_v26 = vld [vmem:[%s6619_s3 + $0x1] sm:$0x1] }
 0x376   :  { %v2395_v58 = vadd.f32 %v2394_v40, %v2364_v36 }
 0x378   :  { %v2396_v55 = vadd.f32 %v2395_v58, %v2365_v57 }
 0x37a   :  { %v2397_v63 = vadd.f32 %v2396_v55, %v2366_v2 }
 0x37c   :  { %v2398_v21 = vadd.f32 %v2397_v63, %v2367_v6 }
 0x37e   :  { %v2399_v23 = vadd.f32 %v2398_v21, %v2368_v16 }
 0x380   :  { %v2400_v20 = vrot.slane %v2399_v23, 4 }
 0x382   :  { %v2401_v61 = vadd.f32 %v2400_v20, %v2399_v23 }
 0x384   :  { %v2402_v25 = vrot.slane %v2401_v61, 2 }
 0x386   :  { %v2403_v7 = vadd.f32 %v2402_v25, %v2401_v61 }
 0x388   :  { %v2404_v38 = vrot.slane %v2403_v7, 1 }
 0x38a   :  { %v2405_v34 = vadd.f32 %v2404_v38, %v2403_v7 }
 0x38c   :  { %v2406_v14 = vmul.f32 0.00390625, %v2405_v34 }
 0x38e   :  { %v2407_v42 = vadd.f32 1e-05, %v2406_v14 }
 0x390   :  { %4658 = vrsqrt.f32 %v2407_v42 }
 0x39d   :  { %v4659_v5 = vpop.eup %4658 }
 0x39e   :  { %v2409_v18 = vmul.f32 %v4659_v5, %v4044_v27 }
 0x3a0   :  { %v2410_v53 = vmul.f32 %v2409_v18, %v6129_v41  ;;  %v6212_v46 = vrot.slane %v2409_v18, %v5929_v35 }
 0x3a2   :  { %v2411_v48 = vsub.f32 %v4045_v26, %v2410_v53  ;;  %v2447_v43 = vmul.f32 %v6212_v46, %v6124_v9  ;;  %v2432_v36 = vmul.f32 %v6067_v4, %v6212_v46  ;;  %v2433_v41 = vmul.f32 %v6073_v8, %v6212_v46 }
 0x3a3   :  { %v2448_v40 = vmul.f32 %v6115_v13, %v6212_v46  ;;  %v2449_v50 = vmul.f32 %v6121_v49, %v6212_v46  ;;  %v2430_v58 = vmul.f32 %v6212_v46, %v6070_v10  ;;  %v2446_v9 = vmul.f32 %v6212_v46, %v6118_v31 }
 0x3a4   :  { %v6215_v47 = vrot.slane %v2411_v48, %v5929_v35  ;;  %v2431_v13 = vmul.f32 %v6212_v46, %v6076_v3  ;;  %v2444_v49 = vmul.f32 %v6103_v51, %v6212_v46  ;;  %v2445_v10 = vmul.f32 %v6109_v44, %v6212_v46 }
 0x3a5   :  { %v2426_v31 = vmul.f32 %v6212_v46, %v6058_v60  ;;  %v2427_v6 = vmul.f32 %v6212_v46, %v6064_v0  ;;  %v2428_v63 = vmul.f32 %v6055_v59, %v6212_v46  ;;  %v2429_v60 = vmul.f32 %v6061_v33, %v6212_v46 }
 0x3a6   :  { %v2485_v57 = vadd.f32 %v6215_v47, %v2447_v43  ;;  %v2470_v62 = vadd.f32 %v6215_v47, %v2432_v36  ;;  %v2471_v4 = vadd.f32 %v6215_v47, %v2433_v41  ;;  %v2486_v8 = vadd.f32 %v6215_v47, %v2448_v40 }
 0x3a7   :  { %v2487_v2 = vadd.f32 %v6215_v47, %v2449_v50  ;;  %v2484_v55 = vadd.f32 %v6215_v47, %v2446_v9  ;;  %v2468_v16 = vadd.f32 %v6215_v47, %v2430_v58  ;;  %v2469_v3 = vadd.f32 %v6215_v47, %v2431_v13 }
 0x3a8   :  { %v2482_v51 = vadd.f32 %v6215_v47, %v2444_v49  ;;  %v2483_v21 = vadd.f32 %v6215_v47, %v2445_v10  ;;  %v2502_v44 = vmax.f32 %v2470_v62, 0.0  ;;  %v2503_v23 = vmax.f32 %v2471_v4, 0.0 }
 0x3a9   :  { %v2518_v20 = vmax.f32 %v2486_v8, 0.0  ;;  %v2519_v61 = vmax.f32 %v2487_v2, 0.0  ;;  %v2442_v0 = vmul.f32 %v6212_v46, %v6106_v56  ;;  %v2516_v25 = vmax.f32 %v2484_v55, 0.0 }
 0x3aa   :  { %v2517_v59 = vmax.f32 %v2485_v57, 0.0  ;;  %v2443_v7 = vmul.f32 %v6212_v46, %v6112_v12  ;;  %v2466_v38 = vadd.f32 %v6215_v47, %v2428_v63  ;;  %v2535_v14 = vpack.c.bf16 %v2503_v23, %v2502_v44 }
 0x3ab   :  { %v2543_v34 = vpack.c.bf16 %v2519_v61, %v2518_v20  ;;  %v2467_v42 = vadd.f32 %v6215_v47, %v2429_v60  ;;  %v2480_v5 = vadd.f32 %v6215_v47, %v2442_v0  ;;  %v2500_v27 = vmax.f32 %v2468_v16, 0.0 }
 0x3ac   :  { %v2501_v18 = vmax.f32 %v2469_v3, 0.0  ;;  %v2481_v33 = vadd.f32 %v6215_v47, %v2443_v7  ;;  %v2542_v53 = vpack.c.bf16 %v2517_v59, %v2516_v25  ;;  %v2514_v56 = vmax.f32 %v2482_v51, 0.0 }
 0x3ad   :  { %4227 = vmatprep.subr.bf16.mxu0 %v2543_v34  ;;  %v2515_v26 = vmax.f32 %v2483_v21, 0.0  ;;  %v2424_v48 = vmul.f32 %v6043_v28, %v6212_v46  ;;  %v2440_v12 = vmul.f32 %v6091_v1, %v6212_v46  ;;  %v2425_v43 = vmul.f32 %v6049_v39, %v6212_v46 }
 0x3ae   :  { %4228 = vmatpush3.bf16.msra.mxu0 %v2535_v14  ;;  %v2441_v36 = vmul.f32 %v6097_v17, %v6212_v46  ;;  %v2464_v41 = vadd.f32 %v6215_v47, %v2426_v31  ;;  %v2465_v40 = vadd.f32 %v6215_v47, %v2427_v6  ;;  %v2498_v57 = vmax.f32 %v2466_v38, 0.0 }
 0x3af   :  { %4229 = vmatprep.subr.bf16.mxu0 %v2542_v53  ;;  %v2478_v50 = vadd.f32 %v6215_v47, %v2440_v12  ;;  %v2499_v58 = vmax.f32 %v2467_v42, 0.0  ;;  %v2534_v28 = vpack.c.bf16 %v2501_v18, %v2500_v27  ;;  %v2541_v1 = vpack.c.bf16 %v2515_v26, %v2514_v56 }
 0x3b0   :  { %v2479_v9 = vadd.f32 %v6215_v47, %v2441_v36  ;;  %v2512_v62 = vmax.f32 %v2480_v5, 0.0  ;;  %v2513_v4 = vmax.f32 %v2481_v33, 0.0  ;;  %v2422_v39 = vmul.f32 %v6212_v46, %v6046_v11 }
 0x3b1   :  { %v2438_v17 = vmul.f32 %v6212_v46, %v6094_v32  ;;  %v2423_v8 = vmul.f32 %v6212_v46, %v6052_v37  ;;  %v2439_v2 = vmul.f32 %v6212_v46, %v6100_v29  ;;  %v2462_v13 = vadd.f32 %v6215_v47, %v2424_v48 }
 0x3b2   :  { %4230 = vmatpush3.bf16.msra.mxu0 %v2534_v28  ;;  %v2463_v49 = vadd.f32 %v6215_v47, %v2425_v43  ;;  %v2496_v55 = vmax.f32 %v2464_v41, 0.0  ;;  %v2497_v31 = vmax.f32 %v2465_v40, 0.0  ;;  %v2533_v11 = vpack.c.bf16 %v2499_v58, %v2498_v57  ;;  %v4600_v58 = vld [vmem:[%s6620_s4 + $0x10] ss:$8 sps:$4 sm:$0xff]   ;;  %v4601_v28 = vld [vmem:[%s6620_s4 + $0x24] ss:$8 sps:$4 sm:$0xff]  }
 0x3b3   :  { %4231 = vmatprep.subr.bf16.mxu0 %v2541_v1  ;;  %v2476_v10 = vadd.f32 %v6215_v47, %v2438_v17  ;;  %v2477_v6 = vadd.f32 %v6215_v47, %v2439_v2  ;;  %v2540_v32 = vpack.c.bf16 %v2513_v4, %v2512_v62  ;;  %v2510_v63 = vmax.f32 %v2478_v50, 0.0  ;;  %v4604_v1 = vld [vmem:[%s6620_s4 + $0x34] ss:$8 sps:$4 sm:$0xff]   ;;  %v4606_v62 = vld [vmem:[%s6620_s4 + $0x30] ss:$8 sps:$4 sm:$0xff]   ;;  %v4609_v4 = vld [vmem:[%s6617_s1 + $0xa8] sm:$0xff]  }
 0x3b4   :  { %v2511_v16 = vmax.f32 %v2479_v9, 0.0  ;;  %v2420_v37 = vmul.f32 %v6033_v54, %v6212_v46  ;;  %v2436_v29 = vmul.f32 %v6079_v19, %v6212_v46  ;;  %v2421_v3 = vmul.f32 %v6037_v30, %v6212_v46  ;;  %v4603_v9 = vld [vmem:[%s6620_s4 + $0x20] ss:$8 sps:$4 sm:$0xff]   ;;  %4434 = vmatprep.subr.bf16.mxu1 %v4609_v4  ;;  %v4611_v17 = vld [vmem:[%s6617_s1 + $0x98] sm:$0xff]  }
 0x3b5   :  { %v2437_v51 = vmul.f32 %v6085_v24, %v6212_v46  ;;  %v2460_v21 = vadd.f32 %v6215_v47, %v2422_v39  ;;  %v2461_v44 = vadd.f32 %v6215_v47, %v2423_v8  ;;  %v2494_v20 = vmax.f32 %v2462_v13, 0.0  ;;  %4435 = vmatpush3.bf16.msra.mxu1 %v4609_v4  ;;  %v4610_v39 = vld [vmem:[%s6617_s1 + $0xa0] sm:$0xff]   ;;  %v4612_v8 = vld [vmem:[%s6617_s1 + $0x90] sm:$0xff]   ;;  %v4613_v2 = vld [vmem:[%s6617_s1 + $0x88] sm:$0xff]  }
 0x3b6   :  { %4232 = vmatpush3.bf16.msra.mxu0 %v2533_v11  ;;  %v2474_v23 = vadd.f32 %v6215_v47, %v2436_v29  ;;  %v2495_v61 = vmax.f32 %v2463_v49, 0.0  ;;  %v2532_v54 = vpack.c.bf16 %v2497_v31, %v2496_v55  ;;  %v2539_v19 = vpack.c.bf16 %v2511_v16, %v2510_v63  ;;  %4436 = vmatprep.subr.bf16.mxu1 %v4610_v39  ;;  %v4614_v13 = vld [vmem:[%s6617_s1 + $0x80] sm:$0xff]  }
 0x3b7   :  { %4233 = vmatprep.subr.bf16.mxu0 %v2540_v32  ;;  %v2475_v60 = vadd.f32 %v6215_v47, %v2437_v51  ;;  %v2508_v0 = vmax.f32 %v2476_v10, 0.0  ;;  %v2509_v25 = vmax.f32 %v2477_v6, 0.0  ;;  %v2434_v30 = vmul.f32 %v6212_v46, %v6082_v15 }
 0x3b8   :  { %v2418_v24 = vmul.f32 %v6212_v46, %v6035_v45  ;;  %v2435_v59 = vmul.f32 %v6212_v46, %v6088_v52  ;;  %v2458_v7 = vadd.f32 %v6215_v47, %v2420_v37  ;;  %v2459_v38 = vadd.f32 %v6215_v47, %v2421_v3 }
 0x3b9   :  { %v2472_v34 = vadd.f32 %v6215_v47, %v2434_v30  ;;  %v2492_v14 = vmax.f32 %v2460_v21, 0.0  ;;  %v2493_v42 = vmax.f32 %v2461_v44, 0.0  ;;  %v2531_v5 = vpack.c.bf16 %v2495_v61, %v2494_v20  ;;  %4437 = vmatpush3.bf16.msra.mxu1 %v4610_v39 }
 0x3ba   :  { %4234 = vmatpush3.bf16.msra.mxu0 %v2532_v54  ;;  %v2473_v27 = vadd.f32 %v6215_v47, %v2435_v59  ;;  %v2538_v15 = vpack.c.bf16 %v2509_v25, %v2508_v0  ;;  %v2506_v18 = vmax.f32 %v2474_v23, 0.0  ;;  %v2507_v33 = vmax.f32 %v2475_v60, 0.0  ;;  %4438 = vmatprep.subr.bf16.mxu1 %v4611_v17 }
 0x3bb   :  { %4235 = vmatprep.subr.bf16.mxu0 %v2539_v19  ;;  %v2419_v45 = vmul.f32 %v6212_v46, %v6039_v22  ;;  %v2456_v52 = vadd.f32 %v6215_v47, %v2418_v24  ;;  %v2490_v56 = vmax.f32 %v2458_v7, 0.0  ;;  %v2491_v26 = vmax.f32 %v2459_v38, 0.0  ;;  %v4595_v46 = vld [vmem:[%s6620_s4] ss:$8 sps:$4 sm:$0xff]  }
 0x3bc   :  { %v2530_v48 = vpack.c.bf16 %v2493_v42, %v2492_v14  ;;  %v2537_v12 = vpack.c.bf16 %v2507_v33, %v2506_v18  ;;  %v2504_v43 = vmax.f32 %v2472_v34, 0.0  ;;  %v2505_v36 = vmax.f32 %v2473_v27, 0.0  ;;  %v4615_v34 = vld [vmem:[%s6617_s1 + $0xf8] sm:$0xff]   ;;  %v4616_v14 = vld [vmem:[%s6617_s1 + $0xf0] sm:$0xff]   ;;  %v4617_v42 = vld [vmem:[%s6617_s1 + $0xe8] sm:$0xff]  }
 0x3bd   :  { %v2457_v53 = vadd.f32 %v6215_v47, %v2419_v45  ;;  %v2488_v41 = vmax.f32 %v2456_v52, 0.0  ;;  %v2529_v50 = vpack.c.bf16 %v2491_v26, %v2490_v56  ;;  %v4598_v47 = vld [vmem:[%s6620_s4 + $0x14] ss:$8 sps:$4 sm:$0xff]   ;;  %4439 = vmatpush3.bf16.msra.mxu1 %v4611_v17  ;;  %v4621_v18 = vld [vmem:[%s6617_s1 + $0xc8] sm:$0xff]   ;;  %v4622_v33 = vld [vmem:[%s6617_s1 + $0xc0] sm:$0xff]  }
 0x3be   :  { %4236 = vmatpush3.bf16.msra.mxu0 %v2531_v5  ;;  %v2536_v57 = vpack.c.bf16 %v2505_v36, %v2504_v43  ;;  %4440 = vmatprep.subr.bf16.mxu1 %v4612_v8  ;;  %v4618_v5 = vld [vmem:[%s6617_s1 + $0xe0] sm:$0xff]   ;;  %v4619_v27 = vld [vmem:[%s6617_s1 + $0xd8] sm:$0xff]  }
 0x3bf   :  { %4237 = vmatprep.subr.bf16.mxu0 %v2538_v15  ;;  %v2489_v40 = vmax.f32 %v2457_v53, 0.0  ;;  %v4620_v15 = vld [vmem:[%s6617_s1 + $0xd0] sm:$0xff]  }
 0x3c1   :  { %v2528_v22 = vpack.c.bf16 %v2489_v40, %v2488_v41  ;;  %4441 = vmatpush3.bf16.msra.mxu1 %v4612_v8 }
 0x3c2   :  { %4238 = vmatpush3.bf16.msra.mxu0 %v2530_v48  ;;  %4442 = vmatprep.subr.bf16.mxu1 %v4613_v2 }
 0x3c3   :  { %4239 = vmatprep.subr.bf16.mxu0 %v2537_v12 }
 0x3c5   :  { %4443 = vmatpush3.bf16.msra.mxu1 %v4613_v2 }
 0x3c6   :  { %4240 = vmatpush3.bf16.msra.mxu0 %v2529_v50  ;;  %4444 = vmatprep.subr.bf16.mxu1 %v4614_v13 }
 0x3c7   :  { %4241 = vmatprep.subr.bf16.mxu0 %v2536_v57 }
 0x3c9   :  { %4445 = vmatpush3.bf16.msra.mxu1 %v4614_v13 }
 0x3ca   :  { %4242 = vmatpush3.bf16.msra.mxu0 %v2528_v22 }
 0x3cb   :  { %4454 = vmatprep.subr.bf16.mxu0 %v4615_v34 }
 0x3cd   :  { %2617 = vmatmul.mubr.bf16.vlgmr.msra.gmra.mxu0 %v4595_v46 }
 0x3ce   :  { %2624 = vmatprep.mubr.bf16.mxu0 %v4598_v47  ;;  %4455 = vmatpush3.bf16.msra.mxu0 %v4615_v34 }
 0x3cf   :  { %4456 = vmatprep.subr.bf16.mxu0 %v4616_v14 }
 0x3d2   :  { %4457 = vmatpush3.bf16.msra.mxu0 %v4616_v14  ;;  %v4079_v14 = vld [vmem:[%s6619_s3 + $0x2] sm:$0x1] }
 0x3d3   :  { %4458 = vmatprep.subr.bf16.mxu0 %v4617_v42 }
 0x3d5   :  { %2625 = vmatmul.mubr.bf16.gmra.mxu0 %v4600_v58 }
 0x3d6   :  { %2632 = vmatprep.mubr.bf16.mxu0 %v4601_v28  ;;  %4459 = vmatpush3.bf16.msra.mxu0 %v4617_v42 }
 0x3d7   :  { %4460 = vmatprep.subr.bf16.mxu0 %v4618_v5 }
 0x3da   :  { %4461 = vmatpush3.bf16.msra.mxu0 %v4618_v5 }
 0x3db   :  { %4462 = vmatprep.subr.bf16.mxu0 %v4619_v27 }
 0x3dd   :  { %2633 = vmatmul.mubr.bf16.gmra.mxu0 %v4603_v9 }
 0x3de   :  { %2640 = vmatprep.mubr.bf16.mxu0 %v4604_v1  ;;  %4463 = vmatpush3.bf16.msra.mxu0 %v4619_v27 }
 0x3df   :  { %4464 = vmatprep.subr.bf16.mxu0 %v4620_v15 }
 0x3e2   :  { %4465 = vmatpush3.bf16.msra.mxu0 %v4620_v15 }
 0x3e3   :  { %4466 = vmatprep.subr.bf16.mxu0 %v4621_v18 }
 0x3e5   :  { %2641 = vmatmul.mubr.bf16.gmra.mxu0 %v4606_v62 }
 0x3e6   :  { %4467 = vmatpush3.bf16.msra.mxu0 %v4621_v18 }
 0x3e7   :  { %4468 = vmatprep.subr.bf16.mxu0 %v4622_v33 }
 0x3ea   :  { %4469 = vmatpush3.bf16.msra.mxu0 %v4622_v33 }
 0x48d   :  { %v4243_v49 = vpop.f32.mrf.mxu0 }
 0x48f   :  { %v4244_v10 = vpop.f32.mrf.mxu0 }
 0x490   :  { %v4245_v11 = vadd.f32 %v4244_v10, %v4243_v49 }
 0x491   :  { %v4246_v55 = vpop.f32.mrf.mxu0 }
 0x493   :  { %v4247_v31 = vpop.f32.mrf.mxu0 }
 0x494   :  { %v4248_v6 = vadd.f32 %v4247_v31, %v4246_v55 }
 0x495   :  { %v4249_v32 = vpop.f32.mrf.mxu0 }
 0x496   :  { %v2666_v63 = vpack.c.bf16 %v4248_v6, %v4245_v11 }
 0x497   :  { %v4250_v16 = vpop.f32.mrf.mxu0 }
 0x498   :  { %4446 = vmatprep.mubr.bf16.mxu1 %v2666_v63  ;;  %v4251_v3 = vadd.f32 %v4250_v16, %v4249_v32 }
 0x499   :  { %v4252_v37 = vpop.f32.mrf.mxu0 }
 0x49b   :  { %v4253_v29 = vpop.f32.mrf.mxu0 }
 0x49c   :  { %v4254_v51 = vadd.f32 %v4253_v29, %v4252_v37 }
 0x49d   :  { %v4255_v21 = vpop.f32.mrf.mxu0 }
 0x49e   :  { %v2667_v44 = vpack.c.bf16 %v4254_v51, %v4251_v3 }
 0x49f   :  { %v4256_v23 = vpop.f32.mrf.mxu0 }
 0x4a0   :  { %4447 = vmatmul.mubr.bf16.vlgmr.msra.gmra.mxu1 %v2667_v44  ;;  %v4257_v54 = vadd.f32 %v4256_v23, %v4255_v21 }
 0x4a1   :  { %v4258_v20 = vpop.f32.mrf.mxu0 }
 0x4a3   :  { %v4259_v61 = vpop.f32.mrf.mxu0 }
 0x4a4   :  { %v4260_v60 = vadd.f32 %v4259_v61, %v4258_v20 }
 0x4a5   :  { %v4261_v19 = vpop.f32.mrf.mxu0 }
 0x4a6   :  { %v2668_v0 = vpack.c.bf16 %v4260_v60, %v4257_v54 }
 0x4a7   :  { %v4262_v25 = vpop.f32.mrf.mxu0 }
 0x4a8   :  { %4450 = vmatprep.mubr.bf16.mxu1 %v2668_v0  ;;  %v4263_v59 = vadd.f32 %v4262_v25, %v4261_v19 }
 0x4a9   :  { %v4264_v30 = vpop.f32.mrf.mxu0 }
 0x4ab   :  { %v4265_v24 = vpop.f32.mrf.mxu0 }
 0x4ac   :  { %v4266_v7 = vadd.f32 %v4265_v24, %v4264_v30 }
 0x4ae   :  { %v2669_v38 = vpack.c.bf16 %v4266_v7, %v4263_v59  ;;  %v4078_v7 = vld [vmem:[%s6618_s2 + $0x2] sm:$0x1] }
 0x4b0   :  { %4451 = vmatmul.mubr.bf16.gmra.mxu1 %v2669_v38 }
 0x560   :  { %v6376_v45 = vpop.f32.mrf.mxu1 }
 0x562   :  { %v2752_v52 = vpop.f32.mrf.mxu1 }
 0x564   :  { %v6378_v53 = vpop.f32.mrf.mxu1 }
 0x566   :  { %v2755_v56 = vpop.f32.mrf.mxu1 }
 0x567   :  { %v2787_v26 = vadd.f32 %v2755_v56, %v2752_v52 }
 0x569   :  { %v2788_v48 = vadd.f32 %v6376_v45, %v2787_v26 }
 0x56b   :  { %v2789_v36 = vadd.f32 %v6378_v53, %v2788_v48 }
 0x570   :  { %v6381_v12 = vpop.f32.mrf.mxu1 }
 0x572   :  { %v2768_v43 = vpop.f32.mrf.mxu1 }
 0x573   :  { %v2790_v40 = vadd.f32 %v2789_v36, %v2768_v43 }
 0x574   :  { %v6384_v41 = vpop.f32.mrf.mxu1 }
 0x576   :  { %v2771_v50 = vpop.f32.mrf.mxu1 }
 0x577   :  { %v2791_v57 = vadd.f32 %v2790_v40, %v2771_v50 }
 0x579   :  { %v2792_v22 = vadd.f32 %v6381_v12, %v2791_v57 }
 0x57b   :  { %v2793_v46 = vadd.f32 %v6384_v41, %v2792_v22 }
 0x57d   :  { %v2794_v47 = vrot.slane %v2793_v46, 4 }
 0x57f   :  { %v2795_v58 = vadd.f32 %v2794_v47, %v2793_v46 }
 0x581   :  { %v2796_v28 = vrot.slane %v2795_v58, 2 }
 0x583   :  { %v2797_v9 = vadd.f32 %v2796_v28, %v2795_v58 }
 0x585   :  { %v2798_v1 = vrot.slane %v2797_v9, 1 }
 0x587   :  { %v2799_v62 = vadd.f32 %v2798_v1, %v2797_v9 }
 0x589   :  { %v2801_v4 = vmul.f32 0.015625, %v2799_v62 }
 0x58b   :  { %v2802_v39 = vsub.f32 %v2752_v52, %v2801_v4  ;;  %v2803_v17 = vsub.f32 %v2755_v56, %v2801_v4  ;;  %v2804_v8 = vsub.f32 %v6376_v45, %v2801_v4  ;;  %v2805_v2 = vsub.f32 %v6378_v53, %v2801_v4 }
 0x58c   :  { %v2806_v10 = vsub.f32 %v2768_v43, %v2801_v4  ;;  %v2807_v11 = vsub.f32 %v2771_v50, %v2801_v4  ;;  %v2808_v63 = vsub.f32 %v6381_v12, %v2801_v4  ;;  %v2809_v29 = vsub.f32 %v6384_v41, %v2801_v4 }
 0x58d   :  { %v2810_v13 = vmul.f32 %v2802_v39, %v2802_v39  ;;  %v2811_v49 = vmul.f32 %v2803_v17, %v2803_v17  ;;  %v2812_v55 = vmul.f32 %v2804_v8, %v2804_v8  ;;  %v2813_v6 = vmul.f32 %v2805_v2, %v2805_v2 }
 0x58e   :  { %v2814_v16 = vmul.f32 %v2806_v10, %v2806_v10  ;;  %v2815_v3 = vmul.f32 %v2807_v11, %v2807_v11  ;;  %v2816_v21 = vmul.f32 %v2808_v63, %v2808_v63  ;;  %v2817_v23 = vmul.f32 %v2809_v29, %v2809_v29 }
 0x58f   :  { %v2818_v31 = vadd.f32 %v2811_v49, %v2810_v13  ;;  %v4692_v10 = vmov 0.0  }
 0x590   :  { %4478 = vmatprep.subr.bf16.mxu1 %v4692_v10  ;;  %4510 = vmatprep.subr.bf16.mxu0 %v4692_v10 }
 0x591   :  { %v2819_v32 = vadd.f32 %v2818_v31, %v2812_v55  ;;  %4486 = vmatprep.mubr.msk.bf16.mxu1 %vm4693_vm1, %v4692_v10 }
 0x593   :  { %v2820_v37 = vadd.f32 %v2819_v32, %v2813_v6 }
 0x595   :  { %v2821_v51 = vadd.f32 %v2820_v37, %v2814_v16 }
 0x597   :  { %v2822_v44 = vadd.f32 %v2821_v51, %v2815_v3 }
 0x599   :  { %v2823_v20 = vadd.f32 %v2822_v44, %v2816_v21 }
 0x59b   :  { %v2824_v61 = vadd.f32 %v2823_v20, %v2817_v23 }
 0x59d   :  { %v2825_v54 = vrot.slane %v2824_v61, 4 }
 0x59f   :  { %v2826_v60 = vadd.f32 %v2825_v54, %v2824_v61 }
 0x5a1   :  { %v2827_v19 = vrot.slane %v2826_v60, 2 }
 0x5a3   :  { %v2828_v0 = vadd.f32 %v2827_v19, %v2826_v60 }
 0x5a5   :  { %v2829_v25 = vrot.slane %v2828_v0, 1 }
 0x5a7   :  { %v2830_v30 = vadd.f32 %v2829_v25, %v2828_v0 }
 0x5a9   :  { %v2831_v24 = vmul.f32 0.015625, %v2830_v30 }
 0x5ab   :  { %v2832_v59 = vadd.f32 1e-05, %v2831_v24 }
 0x5ad   :  { %4660 = vrsqrt.f32 %v2832_v59 }
 0x5ba   :  { %v4661_v38 = vpop.eup %4660 }
 0x5bb   :  { %v2834_v34 = vmul.f32 %v4661_v38, %v4078_v7 }
 0x5bd   :  { %v2835_v42 = vmul.f32 %v2834_v34, %v2801_v4  ;;  %v2841_v5 = vrot.slane %v2834_v34, %v5929_v35 }
 0x5bf   :  { %v2836_v27 = vsub.f32 %v4079_v14, %v2835_v42  ;;  %v2848_v15 = vmul.f32 %v2841_v5, %v2771_v50  ;;  %v2843_v33 = vmul.f32 %v2841_v5, %v2752_v52  ;;  %v2844_v26 = vmul.f32 %v2841_v5, %v2755_v56 }
 0x5c0   :  { %v2845_v48 = vmul.f32 %v6376_v45, %v2841_v5  ;;  %v2846_v36 = vmul.f32 %v6378_v53, %v2841_v5  ;;  %v2847_v40 = vmul.f32 %v2841_v5, %v2768_v43  ;;  %v2849_v52 = vmul.f32 %v6381_v12, %v2841_v5 }
 0x5c1   :  { %v2855_v18 = vrot.slane %v2836_v27, %v5929_v35  ;;  %v2850_v56 = vmul.f32 %v6384_v41, %v2841_v5 }
 0x5c3   :  { %v2862_v57 = vadd.f32 %v2855_v18, %v2848_v15  ;;  %v2857_v22 = vadd.f32 %v2855_v18, %v2843_v33  ;;  %v2858_v46 = vadd.f32 %v2855_v18, %v2844_v26  ;;  %v2859_v47 = vadd.f32 %v2855_v18, %v2845_v48 }
 0x5c4   :  { %v2860_v58 = vadd.f32 %v2855_v18, %v2846_v36  ;;  %v2861_v28 = vadd.f32 %v2855_v18, %v2847_v40  ;;  %v2863_v53 = vadd.f32 %v2855_v18, %v2849_v52  ;;  %v2864_v43 = vadd.f32 %v2855_v18, %v2850_v56  ;;  %v4104_v56 = vld [vmem:[%s6618_s2 + $0x3] sm:$0x1] }
 0x5c5   :  { %v2865_v9 = vmax.f32 %v2857_v22, 0.0  ;;  %v2866_v1 = vmax.f32 %v2858_v46, 0.0  ;;  %v2867_v62 = vmax.f32 %v2859_v47, 0.0  ;;  %v2870_v4 = vmax.f32 %v2862_v57, 0.0 }
 0x5c6   :  { %v2868_v50 = vmax.f32 %v2860_v58, 0.0  ;;  %v2869_v39 = vmax.f32 %v2861_v28, 0.0  ;;  %v2871_v2 = vmax.f32 %v2863_v53, 0.0  ;;  %v2872_v13 = vmax.f32 %v2864_v43, 0.0  ;;  %v4105_v53 = vld [vmem:[%s6619_s3 + $0x3] sm:$0x1] }
 0x5c7   :  { %v2890_v45 = vpack.c.bf16 %v2866_v1, %v2865_v9 }
 0x5c8   :  { %v2891_v17 = vpack.c.bf16 %v2868_v50, %v2867_v62  ;;  %v2892_v8 = vpack.c.bf16 %v2870_v4, %v2869_v39  ;;  %v2893_v49 = vpack.c.bf16 %v2872_v13, %v2871_v2 }
 0x5c9   :  { %4470 = vmatprep.mubr.bf16.mxu0 %v2890_v45 }
 0x5ca   :  { %4471 = vmatmul.mubr.bf16.vlgmr.msra.gmra.mxu0 %v2891_v17 }
 0x5cb   :  { %4474 = vmatprep.mubr.bf16.mxu0 %v2892_v8 }
 0x5d2   :  { %4475 = vmatmul.mubr.bf16.gmra.mxu0 %v2893_v49 }
 0x5d3   :  { %4526 = vmatprep.mubr.msk.bf16.mxu0 %vm4693_vm1, %v4692_v10 }
 0x68a   :  { %v6410_v12 = vpop.f32.mrf.mxu0 }
 0x68c   :  { %v6412_v41 = vpop.f32.mrf.mxu0 }
 0x68e   :  { %v6414_v55 = vpop.f32.mrf.mxu0 }
 0x690   :  { %v6416_v31 = vpop.f32.mrf.mxu0 }
 0x691   :  { %v3011_v11 = vadd.f32 %v6416_v31, %v6412_v41 }
 0x692   :  { %v4476_v6 = vpop.f32.mrf.mxu0 }
 0x693   :  { %v3012_v32 = vadd.f32 %v6410_v12, %v3011_v11 }
 0x694   :  { %v2992_v63 = vpop.f32.mrf.mxu0 }
 0x695   :  { %v3013_v16 = vadd.f32 %v6414_v55, %v3012_v32 }
 0x696   :  { %v4477_v37 = vpop.f32.mrf.mxu0 }
 0x697   :  { %v3014_v29 = vadd.f32 %v3013_v16, %v2992_v63 }
 0x698   :  { %v2995_v3 = vpop.f32.mrf.mxu0 }
 0x699   :  { %v3015_v51 = vadd.f32 %v3014_v29, %v2995_v3 }
 0x69b   :  { %v3016_v21 = vadd.f32 %v4476_v6, %v3015_v51 }
 0x69d   :  { %v3017_v44 = vadd.f32 %v4477_v37, %v3016_v21 }
 0x69f   :  { %v3018_v23 = vrot.slane %v3017_v44, 4 }
 0x6a1   :  { %v3019_v20 = vadd.f32 %v3018_v23, %v3017_v44 }
 0x6a3   :  { %v3020_v61 = vrot.slane %v3019_v20, 2 }
 0x6a5   :  { %v3021_v54 = vadd.f32 %v3020_v61, %v3019_v20 }
 0x6a7   :  { %v3022_v60 = vrot.slane %v3021_v54, 1 }
 0x6a9   :  { %v3023_v19 = vadd.f32 %v3022_v60, %v3021_v54 }
 0x6ab   :  { %v3024_v0 = vmul.f32 0.015625, %v3023_v19 }
 0x6ad   :  { %v3025_v25 = vsub.f32 %v6412_v41, %v3024_v0  ;;  %v3026_v30 = vsub.f32 %v6416_v31, %v3024_v0  ;;  %v3027_v24 = vsub.f32 %v6410_v12, %v3024_v0  ;;  %v3028_v59 = vsub.f32 %v6414_v55, %v3024_v0 }
 0x6ae   :  { %v3029_v34 = vsub.f32 %v2992_v63, %v3024_v0  ;;  %v3030_v5 = vsub.f32 %v2995_v3, %v3024_v0  ;;  %v3031_v18 = vsub.f32 %v4476_v6, %v3024_v0  ;;  %v3032_v48 = vsub.f32 %v4477_v37, %v3024_v0 }
 0x6af   :  { %v3033_v7 = vmul.f32 %v3025_v25, %v3025_v25  ;;  %v3034_v38 = vmul.f32 %v3026_v30, %v3026_v30  ;;  %v3035_v14 = vmul.f32 %v3027_v24, %v3027_v24  ;;  %v3036_v27 = vmul.f32 %v3028_v59, %v3028_v59 }
 0x6b0   :  { %v3037_v33 = vmul.f32 %v3029_v34, %v3029_v34  ;;  %v3038_v36 = vmul.f32 %v3030_v5, %v3030_v5  ;;  %v3039_v57 = vmul.f32 %v3031_v18, %v3031_v18  ;;  %v3040_v46 = vmul.f32 %v3032_v48, %v3032_v48  ;;  %v4624_v34 = vld [vmem:[%s6617_s1 + $0x138] sm:$0xff]   ;;  %v4627_v5 = vld [vmem:[%s6617_s1 + $0x120] sm:$0xff]   ;;  %v4630_v18 = vld [vmem:[%s6617_s1 + $0x108] sm:$0xff]  }
 0x6b1   :  { %v3041_v42 = vadd.f32 %v3034_v38, %v3033_v7 }
 0x6b3   :  { %v3042_v15 = vadd.f32 %v3041_v42, %v3035_v14  ;;  %v4625_v14 = vld [vmem:[%s6617_s1 + $0x130] sm:$0xff]   ;;  %v4626_v42 = vld [vmem:[%s6617_s1 + $0x128] sm:$0xff]  }
 0x6b5   :  { %v3043_v26 = vadd.f32 %v3042_v15, %v3036_v27  ;;  %v4628_v27 = vld [vmem:[%s6617_s1 + $0x118] sm:$0xff]   ;;  %v4629_v15 = vld [vmem:[%s6617_s1 + $0x110] sm:$0xff]  }
 0x6b7   :  { %v3044_v40 = vadd.f32 %v3043_v26, %v3037_v33  ;;  %v4631_v33 = vld [vmem:[%s6617_s1 + $0x100] sm:$0xff]  }
 0x6b9   :  { %v3045_v22 = vadd.f32 %v3044_v40, %v3038_v36 }
 0x6bb   :  { %v3046_v47 = vadd.f32 %v3045_v22, %v3039_v57  ;;  %v4632_v22 = vld [vmem:[%s6617_s1 + $0x178] sm:$0xff]  }
 0x6bc   :  { %4511 = vmatpush3.bf16.msra.mxu0 %v4632_v22 }
 0x6bd   :  { %v3047_v58 = vadd.f32 %v3046_v47, %v3040_v46  ;;  %4512 = vmatprep.subr.bf16.mxu0 %v4692_v10  ;;  %v4633_v46 = vld [vmem:[%s6617_s1 + $0x170] sm:$0xff]   ;;  %v4634_v47 = vld [vmem:[%s6617_s1 + $0x168] sm:$0xff]  }
 0x6bf   :  { %v3048_v28 = vrot.slane %v3047_v58, 4 }
 0x6c0   :  { %4513 = vmatpush3.bf16.msra.mxu0 %v4633_v46 }
 0x6c1   :  { %v3049_v9 = vadd.f32 %v3048_v28, %v3047_v58  ;;  %4514 = vmatprep.subr.bf16.mxu0 %v4692_v10  ;;  %v4635_v58 = vld [vmem:[%s6617_s1 + $0x160] sm:$0xff]   ;;  %v4636_v28 = vld [vmem:[%s6617_s1 + $0x158] sm:$0xff]  }
 0x6c3   :  { %v3050_v1 = vrot.slane %v3049_v9, 2 }
 0x6c4   :  { %4515 = vmatpush3.bf16.msra.mxu0 %v4634_v47 }
 0x6c5   :  { %v3051_v62 = vadd.f32 %v3050_v1, %v3049_v9  ;;  %4516 = vmatprep.subr.bf16.mxu0 %v4692_v10  ;;  %v4637_v9 = vld [vmem:[%s6617_s1 + $0x150] sm:$0xff]   ;;  %v4638_v1 = vld [vmem:[%s6617_s1 + $0x148] sm:$0xff]  }
 0x6c7   :  { %v3052_v4 = vrot.slane %v3051_v62, 1 }
 0x6c8   :  { %4517 = vmatpush3.bf16.msra.mxu0 %v4635_v58 }
 0x6c9   :  { %v3053_v50 = vadd.f32 %v3052_v4, %v3051_v62  ;;  %4518 = vmatprep.subr.bf16.mxu0 %v4692_v10  ;;  %v4639_v62 = vld [vmem:[%s6617_s1 + $0x140] sm:$0xff]  }
 0x6cb   :  { %v3054_v39 = vmul.f32 0.015625, %v3053_v50 }
 0x6cc   :  { %4519 = vmatpush3.bf16.msra.mxu0 %v4636_v28 }
 0x6cd   :  { %v3055_v52 = vadd.f32 1e-05, %v3054_v39  ;;  %4520 = vmatprep.subr.bf16.mxu0 %v4692_v10 }
 0x6cf   :  { %4662 = vrsqrt.f32 %v3055_v52 }
 0x6d0   :  { %4521 = vmatpush3.bf16.msra.mxu0 %v4637_v9 }
 0x6d1   :  { %4522 = vmatprep.subr.bf16.mxu0 %v4692_v10 }
 0x6d4   :  { %4523 = vmatpush3.bf16.msra.mxu0 %v4638_v1 }
 0x6d5   :  { %4524 = vmatprep.subr.bf16.mxu0 %v4692_v10 }
 0x6d8   :  { %4525 = vmatpush3.bf16.msra.mxu0 %v4639_v62 }
 0x6d9   :  { %4556 = vmatprep.subr.bf16.mxu0 %v4692_v10 }
 0x6dc   :  { %v4663_v45 = vpop.eup %4662 }
 0x6dd   :  { %v3057_v17 = vmul.f32 %v4663_v45, %v4104_v56 }
 0x6df   :  { %v3058_v43 = vmul.f32 %v3057_v17, %v3024_v0  ;;  %v3064_v8 = vrot.slane %v3057_v17, %v5929_v35 }
 0x6e1   :  { %v3059_v2 = vsub.f32 %v4105_v53, %v3058_v43  ;;  %v3071_v13 = vmul.f32 %v3064_v8, %v2995_v3  ;;  %v3072_v11 = vmul.f32 %v4476_v6, %v3064_v8  ;;  %v3073_v32 = vmul.f32 %v4477_v37, %v3064_v8 }
 0x6e2   :  { %v3070_v16 = vmul.f32 %v3064_v8, %v2992_v63  ;;  %v3068_v23 = vmul.f32 %v6410_v12, %v3064_v8  ;;  %v3069_v54 = vmul.f32 %v6414_v55, %v3064_v8  ;;  %v3066_v30 = vmul.f32 %v3064_v8, %v6412_v41 }
 0x6e3   :  { %v3078_v49 = vrot.slane %v3059_v2, %v5929_v35  ;;  %v3067_v6 = vmul.f32 %v3064_v8, %v6416_v31  ;;  %v4623_v31 = vld [vmem:[%s6621_s5] sm:$0xff]  }
 0x6e5   :  { %v3085_v29 = vadd.f32 %v3078_v49, %v3071_v13  ;;  %v3086_v51 = vadd.f32 %v3078_v49, %v3072_v11  ;;  %v3087_v21 = vadd.f32 %v3078_v49, %v3073_v32  ;;  %v3084_v44 = vadd.f32 %v3078_v49, %v3070_v16 }
 0x6e6   :  { %v3082_v60 = vadd.f32 %v3078_v49, %v3068_v23  ;;  %v3083_v3 = vadd.f32 %v3078_v49, %v3069_v54  ;;  %v3080_v63 = vadd.f32 %v3078_v49, %v3066_v30  ;;  %v3081_v59 = vadd.f32 %v3078_v49, %v3067_v6 }
 0x6e7   :  { %v3094_v20 = vmax.f32 %v3086_v51, 0.0  ;;  %v3095_v61 = vmax.f32 %v3087_v21, 0.0  ;;  %v3093_v19 = vmax.f32 %v3085_v29, 0.0  ;;  %v3092_v25 = vmax.f32 %v3084_v44, 0.0 }
 0x6e8   :  { %v3090_v24 = vmax.f32 %v3082_v60, 0.0  ;;  %v3091_v12 = vmax.f32 %v3083_v3, 0.0  ;;  %v3088_v7 = vmax.f32 %v3080_v63, 0.0  ;;  %v3089_v38 = vmax.f32 %v3081_v59, 0.0  ;;  %v4133_v3 = vld [vmem:[%s6619_s3 + $0x4] sm:$0x1] }
 0x6e9   :  { %v3101_v0 = vpack.c.bf16 %v3095_v61, %v3094_v20  ;;  %v3100_v37 = vpack.c.bf16 %v3093_v19, %v3092_v25  ;;  %v4132_v19 = vld [vmem:[%s6618_s2 + $0x4] sm:$0x1] }
 0x6ea   :  { %v3099_v55 = vpack.c.bf16 %v3091_v12, %v3090_v24  ;;  %v3098_v41 = vpack.c.bf16 %v3089_v38, %v3088_v7 }
 0x6eb   :  { %4479 = vmatpush3.bf16.msra.mxu1 %v3101_v0 }
 0x6ec   :  { %4480 = vmatprep.subr.bf16.mxu1 %v4692_v10 }
 0x6ef   :  { %4481 = vmatpush3.bf16.msra.mxu1 %v3100_v37 }
 0x6f0   :  { %4482 = vmatprep.subr.bf16.mxu1 %v4692_v10 }
 0x6f3   :  { %4483 = vmatpush3.bf16.msra.mxu1 %v3099_v55 }
 0x6f4   :  { %4484 = vmatprep.subr.bf16.mxu1 %v4692_v10 }
 0x6f7   :  { %4485 = vmatpush3.bf16.msra.mxu1 %v3098_v41 }
 0x6f8   :  { %4490 = vmatprep.subr.bf16.mxu1 %v4692_v10 }
 0x6fa   :  { %4487 = vmatmul.mubr.msk.bf16.vlgmr.msra.gmra.mxu1 %vm3107_vm2, %v4623_v31 }
 0x6fb   :  { %4491 = vmatpush3.bf16.msra.mxu1 %v4624_v34  ;;  %4506 = vmatprep.mubr.msk.bf16.mxu1 %vm4693_vm1, %v4692_v10 }
 0x6fc   :  { %4492 = vmatprep.subr.bf16.mxu1 %v4692_v10 }
 0x6ff   :  { %4493 = vmatpush3.bf16.msra.mxu1 %v4625_v14 }
 0x700   :  { %4494 = vmatprep.subr.bf16.mxu1 %v4692_v10 }
 0x703   :  { %4495 = vmatpush3.bf16.msra.mxu1 %v4626_v42 }
 0x704   :  { %4496 = vmatprep.subr.bf16.mxu1 %v4692_v10 }
 0x707   :  { %4497 = vmatpush3.bf16.msra.mxu1 %v4627_v5 }
 0x708   :  { %4498 = vmatprep.subr.bf16.mxu1 %v4692_v10 }
 0x70b   :  { %4499 = vmatpush3.bf16.msra.mxu1 %v4628_v27 }
 0x70c   :  { %4500 = vmatprep.subr.bf16.mxu1 %v4692_v10 }
 0x70f   :  { %4501 = vmatpush3.bf16.msra.mxu1 %v4629_v15 }
 0x710   :  { %4502 = vmatprep.subr.bf16.mxu1 %v4692_v10 }
 0x713   :  { %4503 = vmatpush3.bf16.msra.mxu1 %v4630_v18 }
 0x714   :  { %4504 = vmatprep.subr.bf16.mxu1 %v4692_v10 }
 0x717   :  { %4505 = vmatpush3.bf16.msra.mxu1 %v4631_v33 }
 0x718   :  { %4530 = vmatprep.subr.bf16.mxu1 %v4692_v10 }
 0x7ba   :  { %v3145_v26 = vpop.f32.mrf.mxu1 }
 0x7bc   :  { %v4488_v48 = vpop.f32.mrf.mxu1 }
 0x7be   :  { %v3148_v36 = vpop.f32.mrf.mxu1 }
 0x7bf   :  { %v3169_v40 = vpack.c.bf16 %v3148_v36, %v3145_v26 }
 0x7c0   :  { %v4489_v57 = vpop.f32.mrf.mxu1 }
 0x7c1   :  { %4507 = vmatmul.mubr.bf16.vlgmr.msra.gmra.mxu1 %v3169_v40 }
 0x7c2   :  { %4532 = vmatprep.mubr.msk.bf16.mxu1 %vm4693_vm1, %v4692_v10 }
 0x881   :  { %v3252_v4 = vpop.f32.mrf.mxu1 }
 0x883   :  { %v4508_v50 = vpop.f32.mrf.mxu1 }
 0x885   :  { %v3255_v39 = vpop.f32.mrf.mxu1 }
 0x886   :  { %v3263_v52 = vadd.f32 %v3255_v39, %v3252_v4 }
 0x887   :  { %v4509_v56 = vpop.f32.mrf.mxu1 }
 0x888   :  { %v3264_v45 = vrot.slane %v3263_v52, 4 }
 0x88a   :  { %v3265_v17 = vadd.f32 %v3264_v45, %v3263_v52  ;;  %v4158_v52 = vld [vmem:[%s6618_s2 + $0x5] sm:$0x1] }
 0x88c   :  { %v3266_v53 = vrot.slane %v3265_v17, 2 }
 0x88e   :  { %v3267_v43 = vadd.f32 %v3266_v53, %v3265_v17  ;;  %v4159_v17 = vld [vmem:[%s6619_s3 + $0x5] sm:$0x1] }
 0x890   :  { %v3268_v8 = vrot.slane %v3267_v43, 1 }
 0x892   :  { %v3269_v2 = vadd.f32 %v3268_v8, %v3267_v43 }
 0x894   :  { %v3271_v13 = vmul.f32 0.0625, %v3269_v2 }
 0x896   :  { %v3272_v49 = vsub.f32 %v3252_v4, %v3271_v13  ;;  %v3273_v11 = vsub.f32 %v3255_v39, %v3271_v13 }
 0x898   :  { %v3274_v32 = vmul.f32 %v3272_v49, %v3272_v49  ;;  %v3275_v16 = vmul.f32 %v3273_v11, %v3273_v11 }
 0x89a   :  { %v3276_v29 = vadd.f32 %v3275_v16, %v3274_v32 }
 0x89c   :  { %v3277_v51 = vrot.slane %v3276_v29, 4 }
 0x89e   :  { %v3278_v21 = vadd.f32 %v3277_v51, %v3276_v29 }
 0x8a0   :  { %v3279_v44 = vrot.slane %v3278_v21, 2 }
 0x8a2   :  { %v3280_v23 = vadd.f32 %v3279_v44, %v3278_v21  ;;  %v3461_v21 = vld [vmem:[%s6622_s6] sm:$0x1]  ;;  %v4640_v44 = vld [vmem:[%s6623_s7 + $0x38] sm:$0xff]  }
 0x8a4   :  { %v3281_v20 = vrot.slane %v3280_v23, 1 }
 0x8a6   :  { %v3282_v61 = vadd.f32 %v3281_v20, %v3280_v23  ;;  %v4641_v23 = vld [vmem:[%s6623_s7 + $0x30] sm:$0xff]   ;;  %v4642_v20 = vld [vmem:[%s6623_s7 + $0x28] sm:$0xff]  }
 0x8a8   :  { %v3283_v54 = vmul.f32 0.0625, %v3282_v61  ;;  %v4643_v61 = vld [vmem:[%s6623_s7 + $0x20] sm:$0xff]  }
 0x8aa   :  { %v3284_v60 = vadd.f32 1e-05, %v3283_v54  ;;  %v4644_v54 = vld [vmem:[%s6623_s7 + $0x18] sm:$0xff]  }
 0x8ac   :  { %4664 = vrsqrt.f32 %v3284_v60  ;;  %v4645_v60 = vld [vmem:[%s6623_s7 + $0x10] sm:$0xff]  }
 0x8b9   :  { %v4665_v0 = vpop.eup %4664 }
 0x8ba   :  { %v3286_v25 = vmul.f32 %v4665_v0, %v4132_v19  ;;  %v4646_v19 = vld [vmem:[%s6623_s7 + $0x8] sm:$0xff]   ;;  %v4647_v0 = vld [vmem:[%s6623_s7] sm:$0xff]  }
 0x8bc   :  { %v3287_v30 = vmul.f32 %v3286_v25, %v3271_v13  ;;  %v3293_v6 = vrot.slane %v3286_v25, %v5929_v35 }
 0x8be   :  { %v3288_v63 = vsub.f32 %v4133_v3, %v3287_v30  ;;  %v3295_v37 = vmul.f32 %v3293_v6, %v3252_v4  ;;  %v3296_v24 = vmul.f32 %v3293_v6, %v3255_v39 }
 0x8c0   :  { %v3301_v12 = vrot.slane %v3288_v63, %v5929_v35 }
 0x8c2   :  { %v3303_v59 = vadd.f32 %v3301_v12, %v3295_v37  ;;  %v3304_v55 = vadd.f32 %v3301_v12, %v3296_v24  ;;  %v4648_v37 = vld [vmem:[%s6627_s11 + $0x38] sm:$0xff]   ;;  %v4649_v24 = vld [vmem:[%s6627_s11 + $0x30] sm:$0xff]   ;;  %v4650_v12 = vld [vmem:[%s6627_s11 + $0x28] sm:$0xff]  }
 0x8c4   :  { %v3305_v7 = vmax.f32 %v3303_v59, 0.0  ;;  %v3306_v38 = vmax.f32 %v3304_v55, 0.0  ;;  %v4651_v59 = vld [vmem:[%s6627_s11 + $0x20] sm:$0xff]   ;;  %v4652_v55 = vld [vmem:[%s6627_s11 + $0x18] sm:$0xff]  }
 0x8c6   :  { %v3324_v41 = vpack.c.bf16 %v3306_v38, %v3305_v7  ;;  %v4653_v7 = vld [vmem:[%s6627_s11 + $0x10] sm:$0xff]   ;;  %v4654_v38 = vld [vmem:[%s6627_s11 + $0x8] sm:$0xff]  }
 0x8c8   :  { %4527 = vmatmul.mubr.bf16.vlgmr.msra.gmra.mxu0 %v3324_v41  ;;  %v4655_v41 = vld [vmem:[%s6627_s11] sm:$0xff]  }
 0x8c9   :  { %4572 = vmatprep.mubr.msk.bf16.mxu0 %vm4693_vm1, %v4692_v10  ;;  %4557 = vmatpush3.bf16.msra.mxu0 %v4648_v37 }
 0x8ca   :  { %4558 = vmatprep.subr.bf16.mxu0 %v4692_v10 }
 0x8cd   :  { %4559 = vmatpush3.bf16.msra.mxu0 %v4649_v24 }
 0x8ce   :  { %4560 = vmatprep.subr.bf16.mxu0 %v4692_v10 }
 0x8d1   :  { %4561 = vmatpush3.bf16.msra.mxu0 %v4650_v12 }
 0x8d2   :  { %4562 = vmatprep.subr.bf16.mxu0 %v4692_v10 }
 0x8d5   :  { %4563 = vmatpush3.bf16.msra.mxu0 %v4651_v59 }
 0x8d6   :  { %4564 = vmatprep.subr.bf16.mxu0 %v4692_v10 }
 0x8d9   :  { %4565 = vmatpush3.bf16.msra.mxu0 %v4652_v55 }
 0x8da   :  { %4566 = vmatprep.subr.bf16.mxu0 %v4692_v10 }
 0x8dd   :  { %4567 = vmatpush3.bf16.msra.mxu0 %v4653_v7 }
 0x8de   :  { %4568 = vmatprep.subr.bf16.mxu0 %v4692_v10 }
 0x8e1   :  { %4569 = vmatpush3.bf16.msra.mxu0 %v4654_v38 }
 0x8e2   :  { %4570 = vmatprep.subr.bf16.mxu0 %v4692_v10 }
 0x8e5   :  { %4571 = vmatpush3.bf16.msra.mxu0 %v4655_v41 }
 0x988   :  { %v3407_v31 = vpop.f32.mrf.mxu0 }
 0x98a   :  { %v4528_v34 = vpop.f32.mrf.mxu0 }
 0x98c   :  { %v3410_v14 = vpop.f32.mrf.mxu0 }
 0x98d   :  { %v3418_v42 = vadd.f32 %v3410_v14, %v3407_v31 }
 0x98e   :  { %v4529_v5 = vpop.f32.mrf.mxu0 }
 0x98f   :  { %v3419_v27 = vrot.slane %v3418_v42, 4 }
 0x991   :  { %v3420_v15 = vadd.f32 %v3419_v27, %v3418_v42 }
 0x993   :  { %v3421_v18 = vrot.slane %v3420_v15, 2 }
 0x995   :  { %v3422_v33 = vadd.f32 %v3421_v18, %v3420_v15 }
 0x997   :  { %v3423_v26 = vrot.slane %v3422_v33, 1 }
 0x999   :  { %v3424_v48 = vadd.f32 %v3423_v26, %v3422_v33 }
 0x99b   :  { %v3425_v36 = vmul.f32 0.0625, %v3424_v48 }
 0x99d   :  { %v3426_v40 = vsub.f32 %v3407_v31, %v3425_v36  ;;  %v3427_v57 = vsub.f32 %v3410_v14, %v3425_v36 }
 0x99f   :  { %v3428_v22 = vmul.f32 %v3426_v40, %v3426_v40  ;;  %v3429_v46 = vmul.f32 %v3427_v57, %v3427_v57 }
 0x9a1   :  { %v3430_v47 = vadd.f32 %v3429_v46, %v3428_v22 }
 0x9a3   :  { %v3431_v58 = vrot.slane %v3430_v47, 4 }
 0x9a5   :  { %v3432_v28 = vadd.f32 %v3431_v58, %v3430_v47 }
 0x9a7   :  { %v3433_v9 = vrot.slane %v3432_v28, 2 }
 0x9a9   :  { %v3434_v1 = vadd.f32 %v3433_v9, %v3432_v28 }
 0x9ab   :  { %v3435_v62 = vrot.slane %v3434_v1, 1 }
 0x9ad   :  { %v3436_v4 = vadd.f32 %v3435_v62, %v3434_v1 }
 0x9af   :  { %v3437_v50 = vmul.f32 0.0625, %v3436_v4 }
 0x9b1   :  { %v3438_v39 = vadd.f32 1e-05, %v3437_v50 }
 0x9b3   :  { %4666 = vrsqrt.f32 %v3438_v39  ;;  %v3619_v39 = vld [vmem:[%s6625_s9] sm:$0x1]  ;;  %s4694_s9 = smov [#allocation3]  }
 0x9b4   :  { %s3780_s16 = sshll.u32 %s4694_s9, 4  ;;  %s3781_s16 = int_to_ptr.vmem [resolvable:$true] %s3780_s16 }
 0x9b5   :  { %p4675_p1 = scmp.lt.s32.totalorder %s3781_s16, %s3781_s16 }
 0x9c0   :  { %v4667_v56 = vpop.eup %4666 }
 0x9c1   :  { %v3440_v45 = vmul.f32 %v4667_v56, %v4158_v52 }
 0x9c3   :  { %v3441_v53 = vmul.f32 %v3440_v45, %v3425_v36  ;;  %v3447_v43 = vrot.slane %v3440_v45, %v5929_v35  ;;  %v3620_v45 = vld [vmem:[%s6626_s10] sm:$0x1]  ;;  %s4670_s10 = scalar_lea.vmem %s3781_s16, 32 }
 0x9c4   :  { %p4671_p0 = scmp.ne.s32.totalorder %s3781_s16, %s4670_s10  ;;  %p4676_p2 = scmp.lt.s32.totalorder %s4670_s10, %s4670_s10 }
 0x9c5   :  { %v3442_v8 = vsub.f32 %v4159_v17, %v3441_v53  ;;  %v3449_v2 = vmul.f32 %v3447_v43, %v3407_v31  ;;  %v3450_v13 = vmul.f32 %v3447_v43, %v3410_v14  ;;  %v4161_v31 = vld [vmem:[%s6624_s8] ss:$0 sm:$0xff] }
 0x9c6   :  { %p4677_p3 = por %p4676_p2, %p4675_p1 }
 0x9c7   :  { %v3455_v49 = vrot.slane %v3442_v8, %v5929_v35 }
 0x9c8   :  { %p4678_p4 = pnand %p4677_p3, %p4671_p0 }
 0x9c9   :  { %v3457_v11 = vadd.f32 %v3455_v49, %v3449_v2  ;;  %v3458_v32 = vadd.f32 %v3455_v49, %v3450_v13 }
 0x9cb   :  { %v3460_v16 = vmax.f32 %v3458_v32, 0.0  ;;  %v3459_v29 = vmax.f32 %v3457_v11, 0.0  ;;  %v4170_v32 = vld [vmem:[%s6628_s12] ss:$0 sm:$0xff] }
 0x9cd   :  { %v3462_v51 = vpack.c.bf16 %v3460_v16, %v3459_v29 }
 0x9cf   :  { %4531 = vmatpush3.bf16.msra.mxu1 %v3462_v51 }
 0x9d0   :  { %4536 = vmatprep.subr.bf16.mxu1 %v4692_v10 }
 0x9d2   :  { %4533 = vmatmul.mubr.msk.bf16.vlgmr.msra.gmra.mxu1 %vm3463_vm3, %v3461_v21 }
 0x9d3   :  { %4537 = vmatpush3.bf16.msra.mxu1 %v4640_v44  ;;  %4552 = vmatprep.mubr.msk.bf16.mxu1 %vm4693_vm1, %v4692_v10 }
 0x9d4   :  { %4538 = vmatprep.subr.bf16.mxu1 %v4692_v10 }
 0x9d7   :  { %4539 = vmatpush3.bf16.msra.mxu1 %v4641_v23 }
 0x9d8   :  { %4540 = vmatprep.subr.bf16.mxu1 %v4692_v10 }
 0x9db   :  { %4541 = vmatpush3.bf16.msra.mxu1 %v4642_v20 }
 0x9dc   :  { %4542 = vmatprep.subr.bf16.mxu1 %v4692_v10 }
 0x9df   :  { %4543 = vmatpush3.bf16.msra.mxu1 %v4643_v61 }
 0x9e0   :  { %4544 = vmatprep.subr.bf16.mxu1 %v4692_v10 }
 0x9e3   :  { %4545 = vmatpush3.bf16.msra.mxu1 %v4644_v54 }
 0x9e4   :  { %4546 = vmatprep.subr.bf16.mxu1 %v4692_v10 }
 0x9e7   :  { %4547 = vmatpush3.bf16.msra.mxu1 %v4645_v60 }
 0x9e8   :  { %4548 = vmatprep.subr.bf16.mxu1 %v4692_v10 }
 0x9eb   :  { %4549 = vmatpush3.bf16.msra.mxu1 %v4646_v19 }
 0x9ec   :  { %4550 = vmatprep.subr.bf16.mxu1 %v4692_v10 }
 0x9ef   :  { %4551 = vmatpush3.bf16.msra.mxu1 %v4647_v0 }
 0xa92   :  { %v3501_v25 = vpop.f32.mrf.mxu1 }
 0xa93   :  { %v3523_v3 = vpack.c.bf16 %v3501_v25, %v3501_v25 }
 0xa94   :  { %v4534_v30 = vpop.f32.mrf.mxu1 }
 0xa95   :  { %4553 = vmatmul.mubr.bf16.vlgmr.msra.gmra.mxu1 %v3523_v3 }
 0xa96   :  { %v3504_v6 = vpop.f32.mrf.mxu1 }
 0xa98   :  { %v4535_v63 = vpop.f32.mrf.mxu1 }
 0xb55   :  { %v3613_v34 = vpop.f32.mrf.mxu1 }
 0xb56   :  { %v3614_v14 = vadd.f32 %v4161_v31, %v3613_v34 }
 0xb57   :  { %v4554_v42 = vpop.f32.mrf.mxu1 }
 0xb58   :  { %v3622_v5 = vsel %vm3621_vm4, %v3614_v14, 0.0 }
 0xb59   :  { %v3623_v27 = vrot.slane %v3622_v5, 4  ;;  %v3616_v15 = vpop.f32.mrf.mxu1 }
 0xb5b   :  { %v3624_v18 = vadd.f32 %v3623_v27, %v3622_v5  ;;  %v4555_v33 = vpop.f32.mrf.mxu1 }
 0xb5d   :  { %v3625_v26 = vrot.slane %v3624_v18, 2 }
 0xb5f   :  { %v3626_v48 = vadd.f32 %v3625_v26, %v3624_v18 }
 0xb61   :  { %v3627_v36 = vrot.slane %v3626_v48, 1 }
 0xb63   :  { %v3628_v40 = vadd.f32 %v3627_v36, %v3626_v48 }
 0xb65   :  { %v3630_v57 = vmul.f32 0.5, %v3628_v40 }
 0xb67   :  { %v3631_v10 = vsub.f32 %v3614_v14, %v3630_v57 }
 0xb69   :  { %v3632_v22 = vmul.f32 %v3631_v10, %v3631_v10 }
 0xb6b   :  { %v3633_v46 = vsel %vm3621_vm4, %v3632_v22, 0.0 }
 0xb6c   :  { %v3634_v47 = vrot.slane %v3633_v46, 4 }
 0xb6e   :  { %v3635_v58 = vadd.f32 %v3634_v47, %v3633_v46 }
 0xb70   :  { %v3636_v28 = vrot.slane %v3635_v58, 2 }
 0xb72   :  { %v3637_v9 = vadd.f32 %v3636_v28, %v3635_v58 }
 0xb74   :  { %v3638_v1 = vrot.slane %v3637_v9, 1 }
 0xb76   :  { %v3639_v62 = vadd.f32 %v3638_v1, %v3637_v9 }
 0xb78   :  { %v3640_v4 = vmul.f32 0.5, %v3639_v62 }
 0xb7a   :  { %v3641_v50 = vadd.f32 1e-05, %v3640_v4 }
 0xb7c   :  { %4668 = vrsqrt.f32 %v3641_v50 }
 0xb89   :  { %v4669_v52 = vpop.eup %4668 }
 0xb8a   :  { %v3643_v56 = vmul.f32 %v4669_v52, %v3619_v39 }
 0xb8c   :  { %v3644_v17 = vmul.f32 %v3643_v56, %v3630_v57  ;;  %v3650_v53 = vrot.slane %v3643_v56, %v5929_v35 }
 0xb8e   :  { %v3645_v43 = vsub.f32 %v3620_v45, %v3644_v17  ;;  %v3652_v8 = vmul.f32 %v3650_v53, %v3614_v14 }
 0xb90   :  { %v3657_v2 = vrot.slane %v3645_v43, %v5929_v35 }
 0xb92   :  { %v3659_v13 = vadd.f32 %v3657_v2, %v3652_v8 }
 0xb94   :  { %v3660_v49 = vmax.f32 %v3659_v13, 0.0 }
 0xb96   :  { %v3677_v11 = vpack.c.bf16 %v3660_v49, %v3660_v49 }
 0xb98   :  { %4573 = vmatmul.mubr.bf16.vlgmr.msra.gmra.mxu0 %v3677_v11 }
 0xc58   :  { %v3767_v16 = vpop.f32.mrf.mxu0 }
 0xc59   :  { %v3768_v29 = vadd.f32 %v4170_v32, %v3767_v16 }
 0xc5a   :  { %v4574_v51 = vpop.f32.mrf.mxu0 }
 0xc5b   :  { %3773 = vst [vmem:[#allocation3] sm:$0x3] %v3768_v29 }
 0xc5c   :  { %v3770_v21 = vpop.f32.mrf.mxu0 }
 0xc5d   :  { %4681 = shalt.err (!%p4678_p4)
}
 0xc5e   :  { %3783 = dma.vmem_to_hbm [thread:$0]  %s3781_s16, 32, %s6629_s13, [#allocation4]   ;;  %v4575_v35 = vpop.f32.mrf.mxu0 }
 0xc5f   :  { %4690 = dma.done.wait [#allocation4], 32  }
 0xc60   :  { %4691 = vsyncadd [#allocation4], 4294967264 }
 0xc61   :  { %3787 = vsyncpa [#allocation4], 1 }

</bundles_post_ra>
